<compile_context>
chip_gen: v5e
topology: v5e:2x2
jax: 0.10.0
libtpu: 0.0.40
codegen_flags: <defaults>
</compile_context>

<pallas_src>
import random

import jax
import jax.numpy as jnp
from jax import lax
from jax.experimental import pallas as pl
from jax.experimental.pallas import tpu as pltpu

# ---------------- config (mirrors Seq2Seq.__init__) ----------------
EMBED = 16                # config.embed_size
HIDDEN = 32               # config.hidden_size (per encoder direction)
DEC_HIDDEN = 2 * HIDDEN   # decoder hidden = 2H (bidirectional hand-off)
CELL = "GRU"              # config.cell
DROPOUT_P = 0.0           # identity
IN_VOCAB = 20
OUT_VOCAB = 24
SOS_IDX, EOS_IDX, PAD_IDX = 1, 2, 0

# padded kernel layout constants
HPAD = 128                # padded concat-hidden width (2H=64 -> 128 lanes)
G3 = 3 * HPAD             # [r | z | n] gate blocks, each HPAD lanes wide
VPAD = 128                # padded vocab width (one-hot inputs / logits output)
NEG = -1e30               # pad-logit bias so argmax never picks a pad lane


# =====================================================================
# Fused forward kernel
# =====================================================================
def _seq2seq_kernel(src_ref, tgt_ref, tf_ref,
                    enc_tab_ref, dec_tab_ref,
                    wih_e_ref, whh_e_ref, bih_e_ref, bhh_e_ref,
                    wih_d_ref, whh_d_ref, bih_d_ref, bhh_d_ref,
                    wfc_ref, bfc_ref,
                    logits_ref,
                    gi_scr):
    T, BP, _ = src_ref.shape
    steps = logits_ref.shape[0]

    lane_v3 = lax.broadcasted_iota(jnp.int32, (1, 1, VPAD), 2)
    lane_v2 = lax.broadcasted_iota(jnp.int32, (1, VPAD), 1)
    lane_g = lax.broadcasted_iota(jnp.int32, (1, G3), 1)
    # within each 128-lane gate block: lanes [0,H) = fwd dir, [H,2H) = bwd dir
    fwd_mask = (lane_g % HPAD) < HIDDEN

    # ----------------- encoder: bidirectional GRU, both directions fused -----------------
    # Hoist the input-side matmul out of the recurrence and fuse it with the
    # embedding gather:  gi_all[t] = one_hot(src[t]) @ (E_table @ W_ih) + b_ih
    src_oh = (src_ref[...] == lane_v3).astype(jnp.float32)          # (T, BP, VPAD)
    emb_w = jnp.dot(enc_tab_ref[...], wih_e_ref[...],
                    preferred_element_type=jnp.float32)              # (VPAD, G3)
    gi_all = jnp.dot(src_oh.reshape(T * BP, VPAD), emb_w,
                     preferred_element_type=jnp.float32) + bih_e_ref[...]
    gi_scr[...] = gi_all.reshape(T, BP, G3)

    whh_e = whh_e_ref[...]                                           # hoisted weight reads
    bhh_e = bhh_e_ref[...]

    def enc_body(s, h):
        # forward direction consumes step s, backward direction consumes step T-1-s
        gi = jnp.where(fwd_mask, gi_scr[s], gi_scr[T - 1 - s])       # (BP, G3)
        gh = jnp.dot(h, whh_e, preferred_element_type=jnp.float32) + bhh_e
        r = jax.nn.sigmoid(gi[:, :HPAD] + gh[:, :HPAD])
        z = jax.nn.sigmoid(gi[:, HPAD:2 * HPAD] + gh[:, HPAD:2 * HPAD])
        n = jnp.tanh(gi[:, 2 * HPAD:] + r * gh[:, 2 * HPAD:])
        return (1.0 - z) * n + z * h

    h_enc = lax.fori_loop(0, T, enc_body,
                          jnp.zeros((BP, HPAD), jnp.float32), unroll=True)
    # h_enc lanes [0,H) = fwd final hidden (h_n[-2]); [H,2H) = bwd final hidden
    # (h_n[-1]); lanes [2H,128) stay exactly 0  ->  cat(h[-2], h[-1]) padded.

    # ----------------- decoder: GRU(hidden 2H) + fc head + token feed loop ----------------
    dec_emb_w = jnp.dot(dec_tab_ref[...], wih_d_ref[...],
                        preferred_element_type=jnp.float32)           # (VPAD, G3)
    whh_d = whh_d_ref[...]
    bih_d = bih_d_ref[...]
    bhh_d = bhh_d_ref[...]
    wfc = wfc_ref[...]
    bfc = bfc_ref[...]

    def dec_body(t, carry):
        h, tok = carry                                                # (BP,HPAD) f32, (BP,1) i32
        oh = (tok == lane_v2).astype(jnp.float32)                     # (BP, VPAD) one-hot
        gi = jnp.dot(oh, dec_emb_w, preferred_element_type=jnp.float32) + bih_d
        gh = jnp.dot(h, whh_d, preferred_element_type=jnp.float32) + bhh_d
        r = jax.nn.sigmoid(gi[:, :HPAD] + gh[:, :HPAD])
        z = jax.nn.sigmoid(gi[:, HPAD:2 * HPAD] + gh[:, HPAD:2 * HPAD])
        n = jnp.tanh(gi[:, 2 * HPAD:] + r * gh[:, 2 * HPAD:])
        h_new = (1.0 - z) * n + z * h
        logits = jnp.dot(h_new, wfc, preferred_element_type=jnp.float32) + bfc
        logits_ref[t] = logits                                        # (BP, VPAD) lane-dense store
        # greedy top-1 (first index among ties, matching argmax)
        maxv = jnp.max(logits, axis=1, keepdims=True)
        top1 = jnp.min(jnp.where(logits == maxv, lane_v2, VPAD),
                       axis=1, keepdims=True).astype(jnp.int32)       # (BP, 1)
        tok_next = jnp.where(tf_ref[t] > 0, tgt_ref[t + 1], top1)
        return (h_new, tok_next)

    lax.fori_loop(0, steps, dec_body, (h_enc, tgt_ref[0]), unroll=True)


# =====================================================================
# Parameter init (PyTorch layout, gate order r,z,n) and kernel packing
# =====================================================================
def init_params(key):
    ks = jax.random.split(key, 16)
    kH = 1.0 / float(HIDDEN) ** 0.5
    k2H = 1.0 / float(DEC_HIDDEN) ** 0.5
    u = lambda k, shp, s: jax.random.uniform(k, shp, jnp.float32, -s, s)
    p = {}
    p["enc_embedding"] = jax.random.normal(ks[0], (IN_VOCAB, EMBED), jnp.float32)
    p["dec_embedding"] = jax.random.normal(ks[1], (OUT_VOCAB, EMBED), jnp.float32)
    # encoder: bidirectional 1-layer GRU (PyTorch shapes)
    p["enc_w_ih_f"] = u(ks[2], (3 * HIDDEN, EMBED), kH)
    p["enc_w_hh_f"] = u(ks[3], (3 * HIDDEN, HIDDEN), kH)
    p["enc_b_ih_f"] = u(ks[4], (3 * HIDDEN,), kH)
    p["enc_b_hh_f"] = u(ks[5], (3 * HIDDEN,), kH)
    p["enc_w_ih_b"] = u(ks[6], (3 * HIDDEN, EMBED), kH)
    p["enc_w_hh_b"] = u(ks[7], (3 * HIDDEN, HIDDEN), kH)
    p["enc_b_ih_b"] = u(ks[8], (3 * HIDDEN,), kH)
    p["enc_b_hh_b"] = u(ks[9], (3 * HIDDEN,), kH)
    # decoder: 1-layer GRU, hidden 2H, input EMBED
    p["dec_w_ih"] = u(ks[10], (3 * DEC_HIDDEN, EMBED), k2H)
    p["dec_w_hh"] = u(ks[11], (3 * DEC_HIDDEN, DEC_HIDDEN), k2H)
    p["dec_b_ih"] = u(ks[12], (3 * DEC_HIDDEN,), k2H)
    p["dec_b_hh"] = u(ks[13], (3 * DEC_HIDDEN,), k2H)
    # fc: Linear(2H -> OUT_VOCAB)
    p["fc_w"] = u(ks[14], (OUT_VOCAB, DEC_HIDDEN), k2H)
    p["fc_b"] = u(ks[15], (OUT_VOCAB,), k2H)
    return p


def pack_params(p):
    """Rearrange PyTorch-layout weights into the padded, lane-aligned kernel layout."""
    H, E, DH = HIDDEN, EMBED, DEC_HIDDEN
    gate = lambda w, g, sz: w[g * sz:(g + 1) * sz]

    # encoder: gate block g occupies lanes [g*HPAD, g*HPAD+128);
    # within it: [0,H) = forward direction, [H,2H) = backward, rest zero.
    w_ih_e = jnp.zeros((E, G3), jnp.float32)
    w_hh_e = jnp.zeros((HPAD, G3), jnp.float32)
    b_ih_e = jnp.zeros((1, G3), jnp.float32)
    b_hh_e = jnp.zeros((1, G3), jnp.float32)
    for g in range(3):
        c = g * HPAD
        w_ih_e = w_ih_e.at[:, c:c + H].set(gate(p["enc_w_ih_f"], g, H).T)
        w_ih_e = w_ih_e.at[:, c + H:c + 2 * H].set(gate(p["enc_w_ih_b"], g, H).T)
        w_hh_e = w_hh_e.at[:H, c:c + H].set(gate(p["enc_w_hh_f"], g, H).T)
        w_hh_e = w_hh_e.at[H:2 * H, c + H:c + 2 * H].set(gate(p["enc_w_hh_b"], g, H).T)
        b_ih_e = b_ih_e.at[0, c:c + H].set(gate(p["enc_b_ih_f"], g, H))
        b_ih_e = b_ih_e.at[0, c + H:c + 2 * H].set(gate(p["enc_b_ih_b"], g, H))
        b_hh_e = b_hh_e.at[0, c:c + H].set(gate(p["enc_b_hh_f"], g, H))
        b_hh_e = b_hh_e.at[0, c + H:c + 2 * H].set(gate(p["enc_b_hh_b"], g, H))

    # decoder: gate block g lanes [0,2H) valid, rest zero
    w_ih_d = jnp.zeros((E, G3), jnp.float32)
    w_hh_d = jnp.zeros((HPAD, G3), jnp.float32)
    b_ih_d = jnp.zeros((1, G3), jnp.float32)
    b_hh_d = jnp.zeros((1, G3), jnp.float32)
    for g in range(3):
        c = g * HPAD
        w_ih_d = w_ih_d.at[:, c:c + DH].set(gate(p["dec_w_ih"], g, DH).T)
        w_hh_d = w_hh_d.at[:DH, c:c + DH].set(gate(p["dec_w_hh"], g, DH).T)
        b_ih_d = b_ih_d.at[0, c:c + DH].set(gate(p["dec_b_ih"], g, DH))
        b_hh_d = b_hh_d.at[0, c:c + DH].set(gate(p["dec_b_hh"], g, DH))

    w_fc = jnp.zeros((HPAD, VPAD), jnp.float32).at[:DH, :OUT_VOCAB].set(p["fc_w"].T)
    b_fc = jnp.full((1, VPAD), NEG, jnp.float32).at[0, :OUT_VOCAB].set(p["fc_b"])

    enc_tab = jnp.zeros((VPAD, E), jnp.float32).at[:IN_VOCAB].set(p["enc_embedding"])
    dec_tab = jnp.zeros((VPAD, E), jnp.float32).at[:OUT_VOCAB].set(p["dec_embedding"])

    return dict(enc_tab=enc_tab, dec_tab=dec_tab,
                w_ih_e=w_ih_e, w_hh_e=w_hh_e, b_ih_e=b_ih_e, b_hh_e=b_hh_e,
                w_ih_d=w_ih_d, w_hh_d=w_hh_d, b_ih_d=b_ih_d, b_hh_d=b_hh_d,
                w_fc=w_fc, b_fc=b_fc)


# =====================================================================
# Jitted wrapper (padding + single fused pallas_call + un-padding)
# =====================================================================
@jax.jit
def _forward_fused(packed, src, tgt, tf_flags):
    B, T = src.shape
    tgt_len = tgt.shape[1]
    steps = tgt_len - 1
    BP = ((B + 7) // 8) * 8                                # pad batch to 8 sublanes

    src_p = jnp.zeros((BP, T), jnp.int32).at[:B].set(src.astype(jnp.int32))
    tgt_p = jnp.zeros((BP, tgt_len), jnp.int32).at[:B].set(tgt.astype(jnp.int32))
    src_tm = jnp.transpose(src_p, (1, 0))[:, :, None]      # (T, BP, 1) time-major
    tgt_tm = jnp.transpose(tgt_p, (1, 0))[:, :, None]      # (tgt_len, BP, 1)

    vmem = pl.BlockSpec(memory_space=pltpu.MemorySpace.VMEM)
    smem = pl.BlockSpec(memory_space=pltpu.MemorySpace.SMEM)

    logits_pad = pl.pallas_call(
        _seq2seq_kernel,
        out_shape=jax.ShapeDtypeStruct((steps, BP, VPAD), jnp.float32),
        in_specs=[vmem, vmem, smem] + [vmem] * 12,
        out_specs=vmem,
        scratch_shapes=[pltpu.VMEM((T, BP, G3), jnp.float32)],
    )(src_tm, tgt_tm, tf_flags,
      packed["enc_tab"], packed["dec_tab"],
      packed["w_ih_e"], packed["w_hh_e"], packed["b_ih_e"], packed["b_hh_e"],
      packed["w_ih_d"], packed["w_hh_d"], packed["b_ih_d"], packed["b_hh_d"],
      packed["w_fc"], packed["b_fc"])

    # (steps, BP, VPAD) -> (B, steps, OUT_VOCAB)  == torch.cat(outputs, dim=1)
    return jnp.transpose(logits_pad[:, :B, :OUT_VOCAB], (1, 0, 2))


def seq2seq_forward(packed, src, tgt, teacher_forcing_ratio=0.5, tf_flags=None):
    steps = tgt.shape[1] - 1
    if tf_flags is None:
        # host-side coin flips, exactly like PyTorch's random.random() per step,
        # but pre-drawn so the whole step loop runs inside one fused kernel.
        tf_flags = jnp.asarray(
            [1 if random.random() < teacher_forcing_ratio else 0 for _ in range(steps)],
            dtype=jnp.int32)
    return _forward_fused(packed, src, tgt, tf_flags)


# =====================================================================
# Pure-JAX reference (PyTorch semantics) for in-script validation
# =====================================================================
def _gru_cell_ref(x, h, w_ih, w_hh, b_ih, b_hh):
    gi = x @ w_ih.T + b_ih
    gh = h @ w_hh.T + b_hh
    hs = h.shape[1]
    r = jax.nn.sigmoid(gi[:, :hs] + gh[:, :hs])
    z = jax.nn.sigmoid(gi[:, hs:2 * hs] + gh[:, hs:2 * hs])
    n = jnp.tanh(gi[:, 2 * hs:] + r * gh[:, 2 * hs:])
    return (1.0 - z) * n + z * h


def seq2seq_reference(p, src, tgt, tf_flags):
    B, T = src.shape
    emb = p["enc_embedding"][src]
    hf = jnp.zeros((B, HIDDEN), jnp.float32)
    hb = jnp.zeros((B, HIDDEN), jnp.float32)
    for t in range(T):
        hf = _gru_cell_ref(emb[:, t], hf, p["enc_w_ih_f"], p["enc_w_hh_f"],
                           p["enc_b_ih_f"], p["enc_b_hh_f"])
        hb = _gru_cell_ref(emb[:, T - 1 - t], hb, p["enc_w_ih_b"], p["enc_w_hh_b"],
                           p["enc_b_ih_b"], p["enc_b_hh_b"])
    h = jnp.concatenate([hf, hb], axis=1)
    tok = tgt[:, 0]
    outs = []
    for t in range(1, tgt.shape[1]):
        x = p["dec_embedding"][tok]
        h = _gru_cell_ref(x, h, p["dec_w_ih"], p["dec_w_hh"], p["dec_b_ih"], p["dec_b_hh"])
        logits = h @ p["fc_w"].T + p["fc_b"]
        outs.append(logits)
        top1 = jnp.argmax(logits, axis=1).astype(jnp.int32)
        tok = jnp.where(tf_flags[t - 1] > 0, tgt[:, t], top1)
    return jnp.stack(outs, axis=1)


# =====================================================================
if __name__ == "__main__":
    random.seed(0)  # deterministic teacher-forcing coin flips
    key = jax.random.PRNGKey(0)
    pkey, skey, tkey = jax.random.split(key, 3)
    params = init_params(pkey)
    packed = pack_params(params)

    B, SRC_LEN, TGT_LEN = 4, 10, 8
    src = jax.random.randint(skey, (B, SRC_LEN), 0, IN_VOCAB, dtype=jnp.int32)
    tgt = jax.random.randint(tkey, (B, TGT_LEN), 0, OUT_VOCAB, dtype=jnp.int32)
    tgt = tgt.at[:, 0].set(SOS_IDX)

    steps = TGT_LEN - 1
    tf_flags = jnp.asarray([1 if random.random() < 0.5 else 0 for _ in range(steps)],
                           dtype=jnp.int32)

    out = seq2seq_forward(packed, src, tgt, teacher_forcing_ratio=0.5, tf_flags=tf_flags)
    out = jax.block_until_ready(out)
    assert out.shape == (B, TGT_LEN - 1, OUT_VOCAB), out.shape
    assert out.dtype == jnp.float32
    assert bool(jnp.all(jnp.isfinite(out)))

    ref = seq2seq_reference(params, src, tgt, tf_flags)
    max_err = float(jnp.max(jnp.abs(out - ref)))
    assert max_err < 1e-3, f"mismatch vs reference: {max_err}"

    print("KERNEL_OK")
</pallas_src>

<mosaic_0001>
module attributes {stable_mosaic.version = 11 : i64} {
  func.func @_seq2seq_kernel(%arg0: memref<10x8x1xi32, #tpu.memory_space<vmem>>, %arg1: memref<8x8x1xi32, #tpu.memory_space<vmem>>, %arg2: memref<7xi32, #tpu.memory_space<smem>>, %arg3: memref<128x16xf32, #tpu.memory_space<vmem>>, %arg4: memref<128x16xf32, #tpu.memory_space<vmem>>, %arg5: memref<16x384xf32, #tpu.memory_space<vmem>>, %arg6: memref<128x384xf32, #tpu.memory_space<vmem>>, %arg7: memref<1x384xf32, #tpu.memory_space<vmem>>, %arg8: memref<1x384xf32, #tpu.memory_space<vmem>>, %arg9: memref<16x384xf32, #tpu.memory_space<vmem>>, %arg10: memref<128x384xf32, #tpu.memory_space<vmem>>, %arg11: memref<1x384xf32, #tpu.memory_space<vmem>>, %arg12: memref<1x384xf32, #tpu.memory_space<vmem>>, %arg13: memref<128x128xf32, #tpu.memory_space<vmem>>, %arg14: memref<1x128xf32, #tpu.memory_space<vmem>>, %arg15: memref<7x8x128xf32, #tpu.memory_space<vmem>>, %arg16: memref<10x8x384xf32, #tpu.memory_space<vmem>>) attributes {dimension_semantics = [], scalar_prefetch = 0 : i64, scratch_operands = 1 : i64, tpu.core_type = #tpu.core_type<tc>} {
    %0 = tpu.iota {dimensions = array<i32: 2>} : vector<1x1x128xi32>
    %1 = tpu.iota {dimensions = array<i32: 1>} : vector<1x128xi32>
    %2 = tpu.iota {dimensions = array<i32: 1>} : vector<1x384xi32>
    %c128_i32 = arith.constant 128 : i32
    %c0_i32 = arith.constant 0 : i32
    %3 = arith.cmpi eq, %c128_i32, %c0_i32 : i32
    %c1_i32 = arith.constant 1 : i32
    %4 = arith.select %3, %c1_i32, %c128_i32 : i32
    %5 = vector.broadcast %4 : i32 to vector<1x384xi32>
    %6 = arith.remsi %2, %5 : vector<1x384xi32>
    %c0_i32_0 = arith.constant 0 : i32
    %7 = vector.broadcast %c0_i32_0 : i32 to vector<1x384xi32>
    %8 = arith.cmpi ne, %6, %7 : vector<1x384xi32>
    %c0_i32_1 = arith.constant 0 : i32
    %9 = vector.broadcast %c0_i32_1 : i32 to vector<1x384xi32>
    %10 = arith.cmpi slt, %6, %9 : vector<1x384xi32>
    %c0_i32_2 = arith.constant 0 : i32
    %11 = arith.cmpi slt, %4, %c0_i32_2 : i32
    %12 = vector.broadcast %11 : i1 to vector<1x384xi1>
    %13 = vector.broadcast %12 : vector<1x384xi1> to vector<1x384xi1>
    %14 = arith.xori %10, %13 : vector<1x384xi1>
    %15 = arith.andi %14, %8 : vector<1x384xi1>
    %16 = vector.broadcast %4 : i32 to vector<1x384xi32>
    %17 = arith.addi %6, %16 : vector<1x384xi32>
    %18 = arith.select %15, %17, %6 : vector<1x384xi1>, vector<1x384xi32>
    %c32_i32 = arith.constant 32 : i32
    %19 = vector.broadcast %c32_i32 : i32 to vector<1x384xi32>
    %20 = arith.cmpi slt, %18, %19 : vector<1x384xi32>
    %c0 = arith.constant 0 : index
    %c0_3 = arith.constant 0 : index
    %c0_4 = arith.constant 0 : index
    %21 = vector.load %arg0[%c0, %c0_3, %c0_4] : memref<10x8x1xi32, #tpu.memory_space<vmem>>, vector<10x8x1xi32>
    %22 = vector.broadcast %21 : vector<10x8x1xi32> to vector<10x8x128xi32>
    %23 = vector.broadcast %0 : vector<1x1x128xi32> to vector<10x8x128xi32>
    %24 = arith.cmpi eq, %22, %23 : vector<10x8x128xi32>
    %25 = arith.extui %24 : vector<10x8x128xi1> to vector<10x8x128xi32>
    %26 = arith.sitofp %25 : vector<10x8x128xi32> to vector<10x8x128xf32>
    %c0_5 = arith.constant 0 : index
    %c0_6 = arith.constant 0 : index
    %27 = vector.load %arg3[%c0_5, %c0_6] : memref<128x16xf32, #tpu.memory_space<vmem>>, vector<128x16xf32>
    %c0_7 = arith.constant 0 : index
    %c0_8 = arith.constant 0 : index
    %28 = vector.load %arg5[%c0_7, %c0_8] : memref<16x384xf32, #tpu.memory_space<vmem>>, vector<16x384xf32>
    %cst = arith.constant dense<0.000000e+00> : vector<128x384xf32>
    %29 = tpu.matmul %27, %28, %cst {dimension_numbers = #tpu.dot_dimension_numbers<[1], [0], [0], [1], [0, 0, 1, 1], [], []>} : vector<128x16xf32>, vector<16x384xf32>, vector<128x384xf32> -> vector<128x384xf32>
    %30 = vector.shape_cast %26 : vector<10x8x128xf32> to vector<80x128xf32>
    %cst_9 = arith.constant dense<0.000000e+00> : vector<80x384xf32>
    %31 = tpu.matmul %30, %29, %cst_9 {dimension_numbers = #tpu.dot_dimension_numbers<[1], [0], [0], [1], [0, 0, 1, 1], [], []>} : vector<80x128xf32>, vector<128x384xf32>, vector<80x384xf32> -> vector<80x384xf32>
    %c0_10 = arith.constant 0 : index
    %c0_11 = arith.constant 0 : index
    %32 = vector.load %arg7[%c0_10, %c0_11] : memref<1x384xf32, #tpu.memory_space<vmem>>, vector<1x384xf32>
    %33 = vector.broadcast %32 : vector<1x384xf32> to vector<80x384xf32>
    %34 = arith.addf %31, %33 : vector<80x384xf32>
    %35 = vector.shape_cast %34 : vector<80x384xf32> to vector<10x8x384xf32>
    %c0_12 = arith.constant 0 : index
    %c0_13 = arith.constant 0 : index
    %c0_14 = arith.constant 0 : index
    %36 = vector.load %arg16[%c0_12, %c0_13, %c0_14] : memref<10x8x384xf32, #tpu.memory_space<vmem>>, vector<10x8x384xf32>
    tpu.vector_store %arg16[%c0_12, %c0_13, %c0_14], %35 {strides = array<i32>} : memref<10x8x384xf32, #tpu.memory_space<vmem>>, vector<10x8x384xf32>,
    %c0_15 = arith.constant 0 : index
    %c0_16 = arith.constant 0 : index
    %37 = vector.load %arg6[%c0_15, %c0_16] : memref<128x384xf32, #tpu.memory_space<vmem>>, vector<128x384xf32>
    %c0_17 = arith.constant 0 : index
    %c0_18 = arith.constant 0 : index
    %38 = vector.load %arg8[%c0_17, %c0_18] : memref<1x384xf32, #tpu.memory_space<vmem>>, vector<1x384xf32>
    %cst_19 = arith.constant 0.000000e+00 : f32
    %39 = vector.broadcast %cst_19 : f32 to vector<8x128xf32>
    %c0_i32_20 = arith.constant 0 : i32
    %40 = arith.index_cast %c0_i32_20 : i32 to index
    %c0_21 = arith.constant 0 : index
    %c0_22 = arith.constant 0 : index
    %41 = vector.load %arg16[%40, %c0_21, %c0_22] : memref<10x8x384xf32, #tpu.memory_space<vmem>>, vector<1x8x384xf32>
    %42 = vector.shape_cast %41 : vector<1x8x384xf32> to vector<8x384xf32>
    %c9_i32 = arith.constant 9 : i32
    %43 = arith.subi %c9_i32, %c0_i32_20 : i32
    %44 = arith.index_cast %43 : i32 to index
    %c0_23 = arith.constant 0 : index
    %c0_24 = arith.constant 0 : index
    %45 = vector.load %arg16[%44, %c0_23, %c0_24] : memref<10x8x384xf32, #tpu.memory_space<vmem>>, vector<1x8x384xf32>
    %46 = vector.shape_cast %45 : vector<1x8x384xf32> to vector<8x384xf32>
    %47 = vector.shape_cast %20 : vector<1x384xi1> to vector<1x384xi1>
    %48 = vector.broadcast %47 : vector<1x384xi1> to vector<8x384xi1>
    %49 = arith.select %48, %42, %46 : vector<8x384xi1>, vector<8x384xf32>
    %cst_25 = arith.constant dense<0.000000e+00> : vector<8x384xf32>
    %50 = tpu.matmul %39, %37, %cst_25 {dimension_numbers = #tpu.dot_dimension_numbers<[1], [0], [0], [1], [0, 0, 1, 1], [], []>} : vector<8x128xf32>, vector<128x384xf32>, vector<8x384xf32> -> vector<8x384xf32>
    %51 = vector.broadcast %38 : vector<1x384xf32> to vector<8x384xf32>
    %52 = arith.addf %50, %51 : vector<8x384xf32>
    %53 = vector.extract_strided_slice %49 {offsets = [0, 0], sizes = [8, 128], strides = [1, 1]} : vector<8x384xf32> to vector<8x128xf32>
    %54 = vector.extract_strided_slice %52 {offsets = [0, 0], sizes = [8, 128], strides = [1, 1]} : vector<8x384xf32> to vector<8x128xf32>
    %55 = arith.addf %53, %54 : vector<8x128xf32>
    %56 = arith.negf %55 : vector<8x128xf32>
    %57 = math.exp %56 : vector<8x128xf32>
    %cst_26 = arith.constant 1.000000e+00 : f32
    %58 = vector.broadcast %cst_26 : f32 to vector<8x128xf32>
    %59 = arith.addf %58, %57 : vector<8x128xf32>
    %60 = arith.divf %58, %59 : vector<8x128xf32>
    %61 = vector.extract_strided_slice %49 {offsets = [0, 128], sizes = [8, 128], strides = [1, 1]} : vector<8x384xf32> to vector<8x128xf32>
    %62 = vector.extract_strided_slice %52 {offsets = [0, 128], sizes = [8, 128], strides = [1, 1]} : vector<8x384xf32> to vector<8x128xf32>
    %63 = arith.addf %61, %62 : vector<8x128xf32>
    %64 = arith.negf %63 : vector<8x128xf32>
    %65 = math.exp %64 : vector<8x128xf32>
    %cst_27 = arith.constant 1.000000e+00 : f32
    %66 = vector.broadcast %cst_27 : f32 to vector<8x128xf32>
    %67 = arith.addf %66, %65 : vector<8x128xf32>
    %68 = arith.divf %66, %67 : vector<8x128xf32>
    %69 = vector.extract_strided_slice %49 {offsets = [0, 256], sizes = [8, 128], strides = [1, 1]} : vector<8x384xf32> to vector<8x128xf32>
    %70 = vector.extract_strided_slice %52 {offsets = [0, 256], sizes = [8, 128], strides = [1, 1]} : vector<8x384xf32> to vector<8x128xf32>
    %71 = arith.mulf %60, %70 : vector<8x128xf32>
    %72 = arith.addf %69, %71 : vector<8x128xf32>
    %73 = math.tanh %72 : vector<8x128xf32>
    %cst_28 = arith.constant 1.000000e+00 : f32
    %74 = vector.broadcast %cst_28 : f32 to vector<8x128xf32>
    %75 = arith.subf %74, %68 : vector<8x128xf32>
    %76 = arith.mulf %75, %73 : vector<8x128xf32>
    %77 = arith.mulf %68, %39 : vector<8x128xf32>
    %78 = arith.addf %76, %77 : vector<8x128xf32>
    %c1_i32_29 = arith.constant 1 : i32
    %79 = arith.index_cast %c1_i32_29 : i32 to index
    %c0_30 = arith.constant 0 : index
    %c0_31 = arith.constant 0 : index
    %80 = vector.load %arg16[%79, %c0_30, %c0_31] : memref<10x8x384xf32, #tpu.memory_space<vmem>>, vector<1x8x384xf32>
    %81 = vector.shape_cast %80 : vector<1x8x384xf32> to vector<8x384xf32>
    %c9_i32_32 = arith.constant 9 : i32
    %82 = arith.subi %c9_i32_32, %c1_i32_29 : i32
    %83 = arith.index_cast %82 : i32 to index
    %c0_33 = arith.constant 0 : index
    %c0_34 = arith.constant 0 : index
    %84 = vector.load %arg16[%83, %c0_33, %c0_34] : memref<10x8x384xf32, #tpu.memory_space<vmem>>, vector<1x8x384xf32>
    %85 = vector.shape_cast %84 : vector<1x8x384xf32> to vector<8x384xf32>
    %86 = vector.shape_cast %20 : vector<1x384xi1> to vector<1x384xi1>
    %87 = vector.broadcast %86 : vector<1x384xi1> to vector<8x384xi1>
    %88 = arith.select %87, %81, %85 : vector<8x384xi1>, vector<8x384xf32>
    %cst_35 = arith.constant dense<0.000000e+00> : vector<8x384xf32>
    %89 = tpu.matmul %78, %37, %cst_35 {dimension_numbers = #tpu.dot_dimension_numbers<[1], [0], [0], [1], [0, 0, 1, 1], [], []>} : vector<8x128xf32>, vector<128x384xf32>, vector<8x384xf32> -> vector<8x384xf32>
    %90 = vector.broadcast %38 : vector<1x384xf32> to vector<8x384xf32>
    %91 = arith.addf %89, %90 : vector<8x384xf32>
    %92 = vector.extract_strided_slice %88 {offsets = [0, 0], sizes = [8, 128], strides = [1, 1]} : vector<8x384xf32> to vector<8x128xf32>
    %93 = vector.extract_strided_slice %91 {offsets = [0, 0], sizes = [8, 128], strides = [1, 1]} : vector<8x384xf32> to vector<8x128xf32>
    %94 = arith.addf %92, %93 : vector<8x128xf32>
    %95 = arith.negf %94 : vector<8x128xf32>
    %96 = math.exp %95 : vector<8x128xf32>
    %cst_36 = arith.constant 1.000000e+00 : f32
    %97 = vector.broadcast %cst_36 : f32 to vector<8x128xf32>
    %98 = arith.addf %97, %96 : vector<8x128xf32>
    %99 = arith.divf %97, %98 : vector<8x128xf32>
    %100 = vector.extract_strided_slice %88 {offsets = [0, 128], sizes = [8, 128], strides = [1, 1]} : vector<8x384xf32> to vector<8x128xf32>
    %101 = vector.extract_strided_slice %91 {offsets = [0, 128], sizes = [8, 128], strides = [1, 1]} : vector<8x384xf32> to vector<8x128xf32>
    %102 = arith.addf %100, %101 : vector<8x128xf32>
    %103 = arith.negf %102 : vector<8x128xf32>
    %104 = math.exp %103 : vector<8x128xf32>
    %cst_37 = arith.constant 1.000000e+00 : f32
    %105 = vector.broadcast %cst_37 : f32 to vector<8x128xf32>
    %106 = arith.addf %105, %104 : vector<8x128xf32>
    %107 = arith.divf %105, %106 : vector<8x128xf32>
    %108 = vector.extract_strided_slice %88 {offsets = [0, 256], sizes = [8, 128], strides = [1, 1]} : vector<8x384xf32> to vector<8x128xf32>
    %109 = vector.extract_strided_slice %91 {offsets = [0, 256], sizes = [8, 128], strides = [1, 1]} : vector<8x384xf32> to vector<8x128xf32>
    %110 = arith.mulf %99, %109 : vector<8x128xf32>
    %111 = arith.addf %108, %110 : vector<8x128xf32>
    %112 = math.tanh %111 : vector<8x128xf32>
    %cst_38 = arith.constant 1.000000e+00 : f32
    %113 = vector.broadcast %cst_38 : f32 to vector<8x128xf32>
    %114 = arith.subf %113, %107 : vector<8x128xf32>
    %115 = arith.mulf %114, %112 : vector<8x128xf32>
    %116 = arith.mulf %107, %78 : vector<8x128xf32>
    %117 = arith.addf %115, %116 : vector<8x128xf32>
    %c2_i32 = arith.constant 2 : i32
    %118 = arith.index_cast %c2_i32 : i32 to index
    %c0_39 = arith.constant 0 : index
    %c0_40 = arith.constant 0 : index
    %119 = vector.load %arg16[%118, %c0_39, %c0_40] : memref<10x8x384xf32, #tpu.memory_space<vmem>>, vector<1x8x384xf32>
    %120 = vector.shape_cast %119 : vector<1x8x384xf32> to vector<8x384xf32>
    %c9_i32_41 = arith.constant 9 : i32
    %121 = arith.subi %c9_i32_41, %c2_i32 : i32
    %122 = arith.index_cast %121 : i32 to index
    %c0_42 = arith.constant 0 : index
    %c0_43 = arith.constant 0 : index
    %123 = vector.load %arg16[%122, %c0_42, %c0_43] : memref<10x8x384xf32, #tpu.memory_space<vmem>>, vector<1x8x384xf32>
    %124 = vector.shape_cast %123 : vector<1x8x384xf32> to vector<8x384xf32>
    %125 = vector.shape_cast %20 : vector<1x384xi1> to vector<1x384xi1>
    %126 = vector.broadcast %125 : vector<1x384xi1> to vector<8x384xi1>
    %127 = arith.select %126, %120, %124 : vector<8x384xi1>, vector<8x384xf32>
    %cst_44 = arith.constant dense<0.000000e+00> : vector<8x384xf32>
    %128 = tpu.matmul %117, %37, %cst_44 {dimension_numbers = #tpu.dot_dimension_numbers<[1], [0], [0], [1], [0, 0, 1, 1], [], []>} : vector<8x128xf32>, vector<128x384xf32>, vector<8x384xf32> -> vector<8x384xf32>
    %129 = vector.broadcast %38 : vector<1x384xf32> to vector<8x384xf32>
    %130 = arith.addf %128, %129 : vector<8x384xf32>
    %131 = vector.extract_strided_slice %127 {offsets = [0, 0], sizes = [8, 128], strides = [1, 1]} : vector<8x384xf32> to vector<8x128xf32>
    %132 = vector.extract_strided_slice %130 {offsets = [0, 0], sizes = [8, 128], strides = [1, 1]} : vector<8x384xf32> to vector<8x128xf32>
    %133 = arith.addf %131, %132 : vector<8x128xf32>
    %134 = arith.negf %133 : vector<8x128xf32>
    %135 = math.exp %134 : vector<8x128xf32>
    %cst_45 = arith.constant 1.000000e+00 : f32
    %136 = vector.broadcast %cst_45 : f32 to vector<8x128xf32>
    %137 = arith.addf %136, %135 : vector<8x128xf32>
    %138 = arith.divf %136, %137 : vector<8x128xf32>
    %139 = vector.extract_strided_slice %127 {offsets = [0, 128], sizes = [8, 128], strides = [1, 1]} : vector<8x384xf32> to vector<8x128xf32>
    %140 = vector.extract_strided_slice %130 {offsets = [0, 128], sizes = [8, 128], strides = [1, 1]} : vector<8x384xf32> to vector<8x128xf32>
    %141 = arith.addf %139, %140 : vector<8x128xf32>
    %142 = arith.negf %141 : vector<8x128xf32>
    %143 = math.exp %142 : vector<8x128xf32>
    %cst_46 = arith.constant 1.000000e+00 : f32
    %144 = vector.broadcast %cst_46 : f32 to vector<8x128xf32>
    %145 = arith.addf %144, %143 : vector<8x128xf32>
    %146 = arith.divf %144, %145 : vector<8x128xf32>
    %147 = vector.extract_strided_slice %127 {offsets = [0, 256], sizes = [8, 128], strides = [1, 1]} : vector<8x384xf32> to vector<8x128xf32>
    %148 = vector.extract_strided_slice %130 {offsets = [0, 256], sizes = [8, 128], strides = [1, 1]} : vector<8x384xf32> to vector<8x128xf32>
    %149 = arith.mulf %138, %148 : vector<8x128xf32>
    %150 = arith.addf %147, %149 : vector<8x128xf32>
    %151 = math.tanh %150 : vector<8x128xf32>
    %cst_47 = arith.constant 1.000000e+00 : f32
    %152 = vector.broadcast %cst_47 : f32 to vector<8x128xf32>
    %153 = arith.subf %152, %146 : vector<8x128xf32>
    %154 = arith.mulf %153, %151 : vector<8x128xf32>
    %155 = arith.mulf %146, %117 : vector<8x128xf32>
    %156 = arith.addf %154, %155 : vector<8x128xf32>
    %c3_i32 = arith.constant 3 : i32
    %157 = arith.index_cast %c3_i32 : i32 to index
    %c0_48 = arith.constant 0 : index
    %c0_49 = arith.constant 0 : index
    %158 = vector.load %arg16[%157, %c0_48, %c0_49] : memref<10x8x384xf32, #tpu.memory_space<vmem>>, vector<1x8x384xf32>
    %159 = vector.shape_cast %158 : vector<1x8x384xf32> to vector<8x384xf32>
    %c9_i32_50 = arith.constant 9 : i32
    %160 = arith.subi %c9_i32_50, %c3_i32 : i32
    %161 = arith.index_cast %160 : i32 to index
    %c0_51 = arith.constant 0 : index
    %c0_52 = arith.constant 0 : index
    %162 = vector.load %arg16[%161, %c0_51, %c0_52] : memref<10x8x384xf32, #tpu.memory_space<vmem>>, vector<1x8x384xf32>
    %163 = vector.shape_cast %162 : vector<1x8x384xf32> to vector<8x384xf32>
    %164 = vector.shape_cast %20 : vector<1x384xi1> to vector<1x384xi1>
    %165 = vector.broadcast %164 : vector<1x384xi1> to vector<8x384xi1>
    %166 = arith.select %165, %159, %163 : vector<8x384xi1>, vector<8x384xf32>
    %cst_53 = arith.constant dense<0.000000e+00> : vector<8x384xf32>
    %167 = tpu.matmul %156, %37, %cst_53 {dimension_numbers = #tpu.dot_dimension_numbers<[1], [0], [0], [1], [0, 0, 1, 1], [], []>} : vector<8x128xf32>, vector<128x384xf32>, vector<8x384xf32> -> vector<8x384xf32>
    %168 = vector.broadcast %38 : vector<1x384xf32> to vector<8x384xf32>
    %169 = arith.addf %167, %168 : vector<8x384xf32>
    %170 = vector.extract_strided_slice %166 {offsets = [0, 0], sizes = [8, 128], strides = [1, 1]} : vector<8x384xf32> to vector<8x128xf32>
    %171 = vector.extract_strided_slice %169 {offsets = [0, 0], sizes = [8, 128], strides = [1, 1]} : vector<8x384xf32> to vector<8x128xf32>
    %172 = arith.addf %170, %171 : vector<8x128xf32>
    %173 = arith.negf %172 : vector<8x128xf32>
    %174 = math.exp %173 : vector<8x128xf32>
    %cst_54 = arith.constant 1.000000e+00 : f32
    %175 = vector.broadcast %cst_54 : f32 to vector<8x128xf32>
    %176 = arith.addf %175, %174 : vector<8x128xf32>
    %177 = arith.divf %175, %176 : vector<8x128xf32>
    %178 = vector.extract_strided_slice %166 {offsets = [0, 128], sizes = [8, 128], strides = [1, 1]} : vector<8x384xf32> to vector<8x128xf32>
    %179 = vector.extract_strided_slice %169 {offsets = [0, 128], sizes = [8, 128], strides = [1, 1]} : vector<8x384xf32> to vector<8x128xf32>
    %180 = arith.addf %178, %179 : vector<8x128xf32>
    %181 = arith.negf %180 : vector<8x128xf32>
    %182 = math.exp %181 : vector<8x128xf32>
    %cst_55 = arith.constant 1.000000e+00 : f32
    %183 = vector.broadcast %cst_55 : f32 to vector<8x128xf32>
    %184 = arith.addf %183, %182 : vector<8x128xf32>
    %185 = arith.divf %183, %184 : vector<8x128xf32>
    %186 = vector.extract_strided_slice %166 {offsets = [0, 256], sizes = [8, 128], strides = [1, 1]} : vector<8x384xf32> to vector<8x128xf32>
    %187 = vector.extract_strided_slice %169 {offsets = [0, 256], sizes = [8, 128], strides = [1, 1]} : vector<8x384xf32> to vector<8x128xf32>
    %188 = arith.mulf %177, %187 : vector<8x128xf32>
    %189 = arith.addf %186, %188 : vector<8x128xf32>
    %190 = math.tanh %189 : vector<8x128xf32>
    %cst_56 = arith.constant 1.000000e+00 : f32
    %191 = vector.broadcast %cst_56 : f32 to vector<8x128xf32>
    %192 = arith.subf %191, %185 : vector<8x128xf32>
    %193 = arith.mulf %192, %190 : vector<8x128xf32>
    %194 = arith.mulf %185, %156 : vector<8x128xf32>
    %195 = arith.addf %193, %194 : vector<8x128xf32>
    %c4_i32 = arith.constant 4 : i32
    %196 = arith.index_cast %c4_i32 : i32 to index
    %c0_57 = arith.constant 0 : index
    %c0_58 = arith.constant 0 : index
    %197 = vector.load %arg16[%196, %c0_57, %c0_58] : memref<10x8x384xf32, #tpu.memory_space<vmem>>, vector<1x8x384xf32>
    %198 = vector.shape_cast %197 : vector<1x8x384xf32> to vector<8x384xf32>
    %c9_i32_59 = arith.constant 9 : i32
    %199 = arith.subi %c9_i32_59, %c4_i32 : i32
    %200 = arith.index_cast %199 : i32 to index
    %c0_60 = arith.constant 0 : index
    %c0_61 = arith.constant 0 : index
    %201 = vector.load %arg16[%200, %c0_60, %c0_61] : memref<10x8x384xf32, #tpu.memory_space<vmem>>, vector<1x8x384xf32>
    %202 = vector.shape_cast %201 : vector<1x8x384xf32> to vector<8x384xf32>
    %203 = vector.shape_cast %20 : vector<1x384xi1> to vector<1x384xi1>
    %204 = vector.broadcast %203 : vector<1x384xi1> to vector<8x384xi1>
    %205 = arith.select %204, %198, %202 : vector<8x384xi1>, vector<8x384xf32>
    %cst_62 = arith.constant dense<0.000000e+00> : vector<8x384xf32>
    %206 = tpu.matmul %195, %37, %cst_62 {dimension_numbers = #tpu.dot_dimension_numbers<[1], [0], [0], [1], [0, 0, 1, 1], [], []>} : vector<8x128xf32>, vector<128x384xf32>, vector<8x384xf32> -> vector<8x384xf32>
    %207 = vector.broadcast %38 : vector<1x384xf32> to vector<8x384xf32>
    %208 = arith.addf %206, %207 : vector<8x384xf32>
    %209 = vector.extract_strided_slice %205 {offsets = [0, 0], sizes = [8, 128], strides = [1, 1]} : vector<8x384xf32> to vector<8x128xf32>
    %210 = vector.extract_strided_slice %208 {offsets = [0, 0], sizes = [8, 128], strides = [1, 1]} : vector<8x384xf32> to vector<8x128xf32>
    %211 = arith.addf %209, %210 : vector<8x128xf32>
    %212 = arith.negf %211 : vector<8x128xf32>
    %213 = math.exp %212 : vector<8x128xf32>
    %cst_63 = arith.constant 1.000000e+00 : f32
    %214 = vector.broadcast %cst_63 : f32 to vector<8x128xf32>
    %215 = arith.addf %214, %213 : vector<8x128xf32>
    %216 = arith.divf %214, %215 : vector<8x128xf32>
    %217 = vector.extract_strided_slice %205 {offsets = [0, 128], sizes = [8, 128], strides = [1, 1]} : vector<8x384xf32> to vector<8x128xf32>
    %218 = vector.extract_strided_slice %208 {offsets = [0, 128], sizes = [8, 128], strides = [1, 1]} : vector<8x384xf32> to vector<8x128xf32>
    %219 = arith.addf %217, %218 : vector<8x128xf32>
    %220 = arith.negf %219 : vector<8x128xf32>
    %221 = math.exp %220 : vector<8x128xf32>
    %cst_64 = arith.constant 1.000000e+00 : f32
    %222 = vector.broadcast %cst_64 : f32 to vector<8x128xf32>
    %223 = arith.addf %222, %221 : vector<8x128xf32>
    %224 = arith.divf %222, %223 : vector<8x128xf32>
    %225 = vector.extract_strided_slice %205 {offsets = [0, 256], sizes = [8, 128], strides = [1, 1]} : vector<8x384xf32> to vector<8x128xf32>
    %226 = vector.extract_strided_slice %208 {offsets = [0, 256], sizes = [8, 128], strides = [1, 1]} : vector<8x384xf32> to vector<8x128xf32>
    %227 = arith.mulf %216, %226 : vector<8x128xf32>
    %228 = arith.addf %225, %227 : vector<8x128xf32>
    %229 = math.tanh %228 : vector<8x128xf32>
    %cst_65 = arith.constant 1.000000e+00 : f32
    %230 = vector.broadcast %cst_65 : f32 to vector<8x128xf32>
    %231 = arith.subf %230, %224 : vector<8x128xf32>
    %232 = arith.mulf %231, %229 : vector<8x128xf32>
    %233 = arith.mulf %224, %195 : vector<8x128xf32>
    %234 = arith.addf %232, %233 : vector<8x128xf32>
    %c5_i32 = arith.constant 5 : i32
    %235 = arith.index_cast %c5_i32 : i32 to index
    %c0_66 = arith.constant 0 : index
    %c0_67 = arith.constant 0 : index
    %236 = vector.load %arg16[%235, %c0_66, %c0_67] : memref<10x8x384xf32, #tpu.memory_space<vmem>>, vector<1x8x384xf32>
    %237 = vector.shape_cast %236 : vector<1x8x384xf32> to vector<8x384xf32>
    %c9_i32_68 = arith.constant 9 : i32
    %238 = arith.subi %c9_i32_68, %c5_i32 : i32
    %239 = arith.index_cast %238 : i32 to index
    %c0_69 = arith.constant 0 : index
    %c0_70 = arith.constant 0 : index
    %240 = vector.load %arg16[%239, %c0_69, %c0_70] : memref<10x8x384xf32, #tpu.memory_space<vmem>>, vector<1x8x384xf32>
    %241 = vector.shape_cast %240 : vector<1x8x384xf32> to vector<8x384xf32>
    %242 = vector.shape_cast %20 : vector<1x384xi1> to vector<1x384xi1>
    %243 = vector.broadcast %242 : vector<1x384xi1> to vector<8x384xi1>
    %244 = arith.select %243, %237, %241 : vector<8x384xi1>, vector<8x384xf32>
    %cst_71 = arith.constant dense<0.000000e+00> : vector<8x384xf32>
    %245 = tpu.matmul %234, %37, %cst_71 {dimension_numbers = #tpu.dot_dimension_numbers<[1], [0], [0], [1], [0, 0, 1, 1], [], []>} : vector<8x128xf32>, vector<128x384xf32>, vector<8x384xf32> -> vector<8x384xf32>
    %246 = vector.broadcast %38 : vector<1x384xf32> to vector<8x384xf32>
    %247 = arith.addf %245, %246 : vector<8x384xf32>
    %248 = vector.extract_strided_slice %244 {offsets = [0, 0], sizes = [8, 128], strides = [1, 1]} : vector<8x384xf32> to vector<8x128xf32>
    %249 = vector.extract_strided_slice %247 {offsets = [0, 0], sizes = [8, 128], strides = [1, 1]} : vector<8x384xf32> to vector<8x128xf32>
    %250 = arith.addf %248, %249 : vector<8x128xf32>
    %251 = arith.negf %250 : vector<8x128xf32>
    %252 = math.exp %251 : vector<8x128xf32>
    %cst_72 = arith.constant 1.000000e+00 : f32
    %253 = vector.broadcast %cst_72 : f32 to vector<8x128xf32>
    %254 = arith.addf %253, %252 : vector<8x128xf32>
    %255 = arith.divf %253, %254 : vector<8x128xf32>
    %256 = vector.extract_strided_slice %244 {offsets = [0, 128], sizes = [8, 128], strides = [1, 1]} : vector<8x384xf32> to vector<8x128xf32>
    %257 = vector.extract_strided_slice %247 {offsets = [0, 128], sizes = [8, 128], strides = [1, 1]} : vector<8x384xf32> to vector<8x128xf32>
    %258 = arith.addf %256, %257 : vector<8x128xf32>
    %259 = arith.negf %258 : vector<8x128xf32>
    %260 = math.exp %259 : vector<8x128xf32>
    %cst_73 = arith.constant 1.000000e+00 : f32
    %261 = vector.broadcast %cst_73 : f32 to vector<8x128xf32>
    %262 = arith.addf %261, %260 : vector<8x128xf32>
    %263 = arith.divf %261, %262 : vector<8x128xf32>
    %264 = vector.extract_strided_slice %244 {offsets = [0, 256], sizes = [8, 128], strides = [1, 1]} : vector<8x384xf32> to vector<8x128xf32>
    %265 = vector.extract_strided_slice %247 {offsets = [0, 256], sizes = [8, 128], strides = [1, 1]} : vector<8x384xf32> to vector<8x128xf32>
    %266 = arith.mulf %255, %265 : vector<8x128xf32>
    %267 = arith.addf %264, %266 : vector<8x128xf32>
    %268 = math.tanh %267 : vector<8x128xf32>
    %cst_74 = arith.constant 1.000000e+00 : f32
    %269 = vector.broadcast %cst_74 : f32 to vector<8x128xf32>
    %270 = arith.subf %269, %263 : vector<8x128xf32>
    %271 = arith.mulf %270, %268 : vector<8x128xf32>
    %272 = arith.mulf %263, %234 : vector<8x128xf32>
    %273 = arith.addf %271, %272 : vector<8x128xf32>
    %c6_i32 = arith.constant 6 : i32
    %274 = arith.index_cast %c6_i32 : i32 to index
    %c0_75 = arith.constant 0 : index
    %c0_76 = arith.constant 0 : index
    %275 = vector.load %arg16[%274, %c0_75, %c0_76] : memref<10x8x384xf32, #tpu.memory_space<vmem>>, vector<1x8x384xf32>
    %276 = vector.shape_cast %275 : vector<1x8x384xf32> to vector<8x384xf32>
    %c9_i32_77 = arith.constant 9 : i32
    %277 = arith.subi %c9_i32_77, %c6_i32 : i32
    %278 = arith.index_cast %277 : i32 to index
    %c0_78 = arith.constant 0 : index
    %c0_79 = arith.constant 0 : index
    %279 = vector.load %arg16[%278, %c0_78, %c0_79] : memref<10x8x384xf32, #tpu.memory_space<vmem>>, vector<1x8x384xf32>
    %280 = vector.shape_cast %279 : vector<1x8x384xf32> to vector<8x384xf32>
    %281 = vector.shape_cast %20 : vector<1x384xi1> to vector<1x384xi1>
    %282 = vector.broadcast %281 : vector<1x384xi1> to vector<8x384xi1>
    %283 = arith.select %282, %276, %280 : vector<8x384xi1>, vector<8x384xf32>
    %cst_80 = arith.constant dense<0.000000e+00> : vector<8x384xf32>
    %284 = tpu.matmul %273, %37, %cst_80 {dimension_numbers = #tpu.dot_dimension_numbers<[1], [0], [0], [1], [0, 0, 1, 1], [], []>} : vector<8x128xf32>, vector<128x384xf32>, vector<8x384xf32> -> vector<8x384xf32>
    %285 = vector.broadcast %38 : vector<1x384xf32> to vector<8x384xf32>
    %286 = arith.addf %284, %285 : vector<8x384xf32>
    %287 = vector.extract_strided_slice %283 {offsets = [0, 0], sizes = [8, 128], strides = [1, 1]} : vector<8x384xf32> to vector<8x128xf32>
    %288 = vector.extract_strided_slice %286 {offsets = [0, 0], sizes = [8, 128], strides = [1, 1]} : vector<8x384xf32> to vector<8x128xf32>
    %289 = arith.addf %287, %288 : vector<8x128xf32>
    %290 = arith.negf %289 : vector<8x128xf32>
    %291 = math.exp %290 : vector<8x128xf32>
    %cst_81 = arith.constant 1.000000e+00 : f32
    %292 = vector.broadcast %cst_81 : f32 to vector<8x128xf32>
    %293 = arith.addf %292, %291 : vector<8x128xf32>
    %294 = arith.divf %292, %293 : vector<8x128xf32>
    %295 = vector.extract_strided_slice %283 {offsets = [0, 128], sizes = [8, 128], strides = [1, 1]} : vector<8x384xf32> to vector<8x128xf32>
    %296 = vector.extract_strided_slice %286 {offsets = [0, 128], sizes = [8, 128], strides = [1, 1]} : vector<8x384xf32> to vector<8x128xf32>
    %297 = arith.addf %295, %296 : vector<8x128xf32>
    %298 = arith.negf %297 : vector<8x128xf32>
    %299 = math.exp %298 : vector<8x128xf32>
    %cst_82 = arith.constant 1.000000e+00 : f32
    %300 = vector.broadcast %cst_82 : f32 to vector<8x128xf32>
    %301 = arith.addf %300, %299 : vector<8x128xf32>
    %302 = arith.divf %300, %301 : vector<8x128xf32>
    %303 = vector.extract_strided_slice %283 {offsets = [0, 256], sizes = [8, 128], strides = [1, 1]} : vector<8x384xf32> to vector<8x128xf32>
    %304 = vector.extract_strided_slice %286 {offsets = [0, 256], sizes = [8, 128], strides = [1, 1]} : vector<8x384xf32> to vector<8x128xf32>
    %305 = arith.mulf %294, %304 : vector<8x128xf32>
    %306 = arith.addf %303, %305 : vector<8x128xf32>
    %307 = math.tanh %306 : vector<8x128xf32>
    %cst_83 = arith.constant 1.000000e+00 : f32
    %308 = vector.broadcast %cst_83 : f32 to vector<8x128xf32>
    %309 = arith.subf %308, %302 : vector<8x128xf32>
    %310 = arith.mulf %309, %307 : vector<8x128xf32>
    %311 = arith.mulf %302, %273 : vector<8x128xf32>
    %312 = arith.addf %310, %311 : vector<8x128xf32>
    %c7_i32 = arith.constant 7 : i32
    %313 = arith.index_cast %c7_i32 : i32 to index
    %c0_84 = arith.constant 0 : index
    %c0_85 = arith.constant 0 : index
    %314 = vector.load %arg16[%313, %c0_84, %c0_85] : memref<10x8x384xf32, #tpu.memory_space<vmem>>, vector<1x8x384xf32>
    %315 = vector.shape_cast %314 : vector<1x8x384xf32> to vector<8x384xf32>
    %c9_i32_86 = arith.constant 9 : i32
    %316 = arith.subi %c9_i32_86, %c7_i32 : i32
    %317 = arith.index_cast %316 : i32 to index
    %c0_87 = arith.constant 0 : index
    %c0_88 = arith.constant 0 : index
    %318 = vector.load %arg16[%317, %c0_87, %c0_88] : memref<10x8x384xf32, #tpu.memory_space<vmem>>, vector<1x8x384xf32>
    %319 = vector.shape_cast %318 : vector<1x8x384xf32> to vector<8x384xf32>
    %320 = vector.shape_cast %20 : vector<1x384xi1> to vector<1x384xi1>
    %321 = vector.broadcast %320 : vector<1x384xi1> to vector<8x384xi1>
    %322 = arith.select %321, %315, %319 : vector<8x384xi1>, vector<8x384xf32>
    %cst_89 = arith.constant dense<0.000000e+00> : vector<8x384xf32>
    %323 = tpu.matmul %312, %37, %cst_89 {dimension_numbers = #tpu.dot_dimension_numbers<[1], [0], [0], [1], [0, 0, 1, 1], [], []>} : vector<8x128xf32>, vector<128x384xf32>, vector<8x384xf32> -> vector<8x384xf32>
    %324 = vector.broadcast %38 : vector<1x384xf32> to vector<8x384xf32>
    %325 = arith.addf %323, %324 : vector<8x384xf32>
    %326 = vector.extract_strided_slice %322 {offsets = [0, 0], sizes = [8, 128], strides = [1, 1]} : vector<8x384xf32> to vector<8x128xf32>
    %327 = vector.extract_strided_slice %325 {offsets = [0, 0], sizes = [8, 128], strides = [1, 1]} : vector<8x384xf32> to vector<8x128xf32>
    %328 = arith.addf %326, %327 : vector<8x128xf32>
    %329 = arith.negf %328 : vector<8x128xf32>
    %330 = math.exp %329 : vector<8x128xf32>
    %cst_90 = arith.constant 1.000000e+00 : f32
    %331 = vector.broadcast %cst_90 : f32 to vector<8x128xf32>
    %332 = arith.addf %331, %330 : vector<8x128xf32>
    %333 = arith.divf %331, %332 : vector<8x128xf32>
    %334 = vector.extract_strided_slice %322 {offsets = [0, 128], sizes = [8, 128], strides = [1, 1]} : vector<8x384xf32> to vector<8x128xf32>
    %335 = vector.extract_strided_slice %325 {offsets = [0, 128], sizes = [8, 128], strides = [1, 1]} : vector<8x384xf32> to vector<8x128xf32>
    %336 = arith.addf %334, %335 : vector<8x128xf32>
    %337 = arith.negf %336 : vector<8x128xf32>
    %338 = math.exp %337 : vector<8x128xf32>
    %cst_91 = arith.constant 1.000000e+00 : f32
    %339 = vector.broadcast %cst_91 : f32 to vector<8x128xf32>
    %340 = arith.addf %339, %338 : vector<8x128xf32>
    %341 = arith.divf %339, %340 : vector<8x128xf32>
    %342 = vector.extract_strided_slice %322 {offsets = [0, 256], sizes = [8, 128], strides = [1, 1]} : vector<8x384xf32> to vector<8x128xf32>
    %343 = vector.extract_strided_slice %325 {offsets = [0, 256], sizes = [8, 128], strides = [1, 1]} : vector<8x384xf32> to vector<8x128xf32>
    %344 = arith.mulf %333, %343 : vector<8x128xf32>
    %345 = arith.addf %342, %344 : vector<8x128xf32>
    %346 = math.tanh %345 : vector<8x128xf32>
    %cst_92 = arith.constant 1.000000e+00 : f32
    %347 = vector.broadcast %cst_92 : f32 to vector<8x128xf32>
    %348 = arith.subf %347, %341 : vector<8x128xf32>
    %349 = arith.mulf %348, %346 : vector<8x128xf32>
    %350 = arith.mulf %341, %312 : vector<8x128xf32>
    %351 = arith.addf %349, %350 : vector<8x128xf32>
    %c8_i32 = arith.constant 8 : i32
    %352 = arith.index_cast %c8_i32 : i32 to index
    %c0_93 = arith.constant 0 : index
    %c0_94 = arith.constant 0 : index
    %353 = vector.load %arg16[%352, %c0_93, %c0_94] : memref<10x8x384xf32, #tpu.memory_space<vmem>>, vector<1x8x384xf32>
    %354 = vector.shape_cast %353 : vector<1x8x384xf32> to vector<8x384xf32>
    %c9_i32_95 = arith.constant 9 : i32
    %355 = arith.subi %c9_i32_95, %c8_i32 : i32
    %356 = arith.index_cast %355 : i32 to index
    %c0_96 = arith.constant 0 : index
    %c0_97 = arith.constant 0 : index
    %357 = vector.load %arg16[%356, %c0_96, %c0_97] : memref<10x8x384xf32, #tpu.memory_space<vmem>>, vector<1x8x384xf32>
    %358 = vector.shape_cast %357 : vector<1x8x384xf32> to vector<8x384xf32>
    %359 = vector.shape_cast %20 : vector<1x384xi1> to vector<1x384xi1>
    %360 = vector.broadcast %359 : vector<1x384xi1> to vector<8x384xi1>
    %361 = arith.select %360, %354, %358 : vector<8x384xi1>, vector<8x384xf32>
    %cst_98 = arith.constant dense<0.000000e+00> : vector<8x384xf32>
    %362 = tpu.matmul %351, %37, %cst_98 {dimension_numbers = #tpu.dot_dimension_numbers<[1], [0], [0], [1], [0, 0, 1, 1], [], []>} : vector<8x128xf32>, vector<128x384xf32>, vector<8x384xf32> -> vector<8x384xf32>
    %363 = vector.broadcast %38 : vector<1x384xf32> to vector<8x384xf32>
    %364 = arith.addf %362, %363 : vector<8x384xf32>
    %365 = vector.extract_strided_slice %361 {offsets = [0, 0], sizes = [8, 128], strides = [1, 1]} : vector<8x384xf32> to vector<8x128xf32>
    %366 = vector.extract_strided_slice %364 {offsets = [0, 0], sizes = [8, 128], strides = [1, 1]} : vector<8x384xf32> to vector<8x128xf32>
    %367 = arith.addf %365, %366 : vector<8x128xf32>
    %368 = arith.negf %367 : vector<8x128xf32>
    %369 = math.exp %368 : vector<8x128xf32>
    %cst_99 = arith.constant 1.000000e+00 : f32
    %370 = vector.broadcast %cst_99 : f32 to vector<8x128xf32>
    %371 = arith.addf %370, %369 : vector<8x128xf32>
    %372 = arith.divf %370, %371 : vector<8x128xf32>
    %373 = vector.extract_strided_slice %361 {offsets = [0, 128], sizes = [8, 128], strides = [1, 1]} : vector<8x384xf32> to vector<8x128xf32>
    %374 = vector.extract_strided_slice %364 {offsets = [0, 128], sizes = [8, 128], strides = [1, 1]} : vector<8x384xf32> to vector<8x128xf32>
    %375 = arith.addf %373, %374 : vector<8x128xf32>
    %376 = arith.negf %375 : vector<8x128xf32>
    %377 = math.exp %376 : vector<8x128xf32>
    %cst_100 = arith.constant 1.000000e+00 : f32
    %378 = vector.broadcast %cst_100 : f32 to vector<8x128xf32>
    %379 = arith.addf %378, %377 : vector<8x128xf32>
    %380 = arith.divf %378, %379 : vector<8x128xf32>
    %381 = vector.extract_strided_slice %361 {offsets = [0, 256], sizes = [8, 128], strides = [1, 1]} : vector<8x384xf32> to vector<8x128xf32>
    %382 = vector.extract_strided_slice %364 {offsets = [0, 256], sizes = [8, 128], strides = [1, 1]} : vector<8x384xf32> to vector<8x128xf32>
    %383 = arith.mulf %372, %382 : vector<8x128xf32>
    %384 = arith.addf %381, %383 : vector<8x128xf32>
    %385 = math.tanh %384 : vector<8x128xf32>
    %cst_101 = arith.constant 1.000000e+00 : f32
    %386 = vector.broadcast %cst_101 : f32 to vector<8x128xf32>
    %387 = arith.subf %386, %380 : vector<8x128xf32>
    %388 = arith.mulf %387, %385 : vector<8x128xf32>
    %389 = arith.mulf %380, %351 : vector<8x128xf32>
    %390 = arith.addf %388, %389 : vector<8x128xf32>
    %c9_i32_102 = arith.constant 9 : i32
    %391 = arith.index_cast %c9_i32_102 : i32 to index
    %c0_103 = arith.constant 0 : index
    %c0_104 = arith.constant 0 : index
    %392 = vector.load %arg16[%391, %c0_103, %c0_104] : memref<10x8x384xf32, #tpu.memory_space<vmem>>, vector<1x8x384xf32>
    %393 = vector.shape_cast %392 : vector<1x8x384xf32> to vector<8x384xf32>
    %c9_i32_105 = arith.constant 9 : i32
    %394 = arith.subi %c9_i32_105, %c9_i32_102 : i32
    %395 = arith.index_cast %394 : i32 to index
    %c0_106 = arith.constant 0 : index
    %c0_107 = arith.constant 0 : index
    %396 = vector.load %arg16[%395, %c0_106, %c0_107] : memref<10x8x384xf32, #tpu.memory_space<vmem>>, vector<1x8x384xf32>
    %397 = vector.shape_cast %396 : vector<1x8x384xf32> to vector<8x384xf32>
    %398 = vector.shape_cast %20 : vector<1x384xi1> to vector<1x384xi1>
    %399 = vector.broadcast %398 : vector<1x384xi1> to vector<8x384xi1>
    %400 = arith.select %399, %393, %397 : vector<8x384xi1>, vector<8x384xf32>
    %cst_108 = arith.constant dense<0.000000e+00> : vector<8x384xf32>
    %401 = tpu.matmul %390, %37, %cst_108 {dimension_numbers = #tpu.dot_dimension_numbers<[1], [0], [0], [1], [0, 0, 1, 1], [], []>} : vector<8x128xf32>, vector<128x384xf32>, vector<8x384xf32> -> vector<8x384xf32>
    %402 = vector.broadcast %38 : vector<1x384xf32> to vector<8x384xf32>
    %403 = arith.addf %401, %402 : vector<8x384xf32>
    %404 = vector.extract_strided_slice %400 {offsets = [0, 0], sizes = [8, 128], strides = [1, 1]} : vector<8x384xf32> to vector<8x128xf32>
    %405 = vector.extract_strided_slice %403 {offsets = [0, 0], sizes = [8, 128], strides = [1, 1]} : vector<8x384xf32> to vector<8x128xf32>
    %406 = arith.addf %404, %405 : vector<8x128xf32>
    %407 = arith.negf %406 : vector<8x128xf32>
    %408 = math.exp %407 : vector<8x128xf32>
    %cst_109 = arith.constant 1.000000e+00 : f32
    %409 = vector.broadcast %cst_109 : f32 to vector<8x128xf32>
    %410 = arith.addf %409, %408 : vector<8x128xf32>
    %411 = arith.divf %409, %410 : vector<8x128xf32>
    %412 = vector.extract_strided_slice %400 {offsets = [0, 128], sizes = [8, 128], strides = [1, 1]} : vector<8x384xf32> to vector<8x128xf32>
    %413 = vector.extract_strided_slice %403 {offsets = [0, 128], sizes = [8, 128], strides = [1, 1]} : vector<8x384xf32> to vector<8x128xf32>
    %414 = arith.addf %412, %413 : vector<8x128xf32>
    %415 = arith.negf %414 : vector<8x128xf32>
    %416 = math.exp %415 : vector<8x128xf32>
    %cst_110 = arith.constant 1.000000e+00 : f32
    %417 = vector.broadcast %cst_110 : f32 to vector<8x128xf32>
    %418 = arith.addf %417, %416 : vector<8x128xf32>
    %419 = arith.divf %417, %418 : vector<8x128xf32>
    %420 = vector.extract_strided_slice %400 {offsets = [0, 256], sizes = [8, 128], strides = [1, 1]} : vector<8x384xf32> to vector<8x128xf32>
    %421 = vector.extract_strided_slice %403 {offsets = [0, 256], sizes = [8, 128], strides = [1, 1]} : vector<8x384xf32> to vector<8x128xf32>
    %422 = arith.mulf %411, %421 : vector<8x128xf32>
    %423 = arith.addf %420, %422 : vector<8x128xf32>
    %424 = math.tanh %423 : vector<8x128xf32>
    %cst_111 = arith.constant 1.000000e+00 : f32
    %425 = vector.broadcast %cst_111 : f32 to vector<8x128xf32>
    %426 = arith.subf %425, %419 : vector<8x128xf32>
    %427 = arith.mulf %426, %424 : vector<8x128xf32>
    %428 = arith.mulf %419, %390 : vector<8x128xf32>
    %429 = arith.addf %427, %428 : vector<8x128xf32>
    %c10_i32 = arith.constant 10 : i32
    %c0_112 = arith.constant 0 : index
    %c0_113 = arith.constant 0 : index
    %430 = vector.load %arg4[%c0_112, %c0_113] : memref<128x16xf32, #tpu.memory_space<vmem>>, vector<128x16xf32>
    %c0_114 = arith.constant 0 : index
    %c0_115 = arith.constant 0 : index
    %431 = vector.load %arg9[%c0_114, %c0_115] : memref<16x384xf32, #tpu.memory_space<vmem>>, vector<16x384xf32>
    %cst_116 = arith.constant dense<0.000000e+00> : vector<128x384xf32>
    %432 = tpu.matmul %430, %431, %cst_116 {dimension_numbers = #tpu.dot_dimension_numbers<[1], [0], [0], [1], [0, 0, 1, 1], [], []>} : vector<128x16xf32>, vector<16x384xf32>, vector<128x384xf32> -> vector<128x384xf32>
    %c0_117 = arith.constant 0 : index
    %c0_118 = arith.constant 0 : index
    %433 = vector.load %arg10[%c0_117, %c0_118] : memref<128x384xf32, #tpu.memory_space<vmem>>, vector<128x384xf32>
    %c0_119 = arith.constant 0 : index
    %c0_120 = arith.constant 0 : index
    %434 = vector.load %arg11[%c0_119, %c0_120] : memref<1x384xf32, #tpu.memory_space<vmem>>, vector<1x384xf32>
    %c0_121 = arith.constant 0 : index
    %c0_122 = arith.constant 0 : index
    %435 = vector.load %arg12[%c0_121, %c0_122] : memref<1x384xf32, #tpu.memory_space<vmem>>, vector<1x384xf32>
    %c0_123 = arith.constant 0 : index
    %c0_124 = arith.constant 0 : index
    %436 = vector.load %arg13[%c0_123, %c0_124] : memref<128x128xf32, #tpu.memory_space<vmem>>, vector<128x128xf32>
    %c0_125 = arith.constant 0 : index
    %c0_126 = arith.constant 0 : index
    %437 = vector.load %arg14[%c0_125, %c0_126] : memref<1x128xf32, #tpu.memory_space<vmem>>, vector<1x128xf32>
    %c0_127 = arith.constant 0 : index
    %c0_128 = arith.constant 0 : index
    %c0_129 = arith.constant 0 : index
    %438 = vector.load %arg1[%c0_127, %c0_128, %c0_129] : memref<8x8x1xi32, #tpu.memory_space<vmem>>, vector<1x8x1xi32>
    %439 = vector.shape_cast %438 : vector<1x8x1xi32> to vector<8x1xi32>
    %c0_i32_130 = arith.constant 0 : i32
    %440 = vector.broadcast %439 : vector<8x1xi32> to vector<8x128xi32>
    %441 = vector.broadcast %1 : vector<1x128xi32> to vector<8x128xi32>
    %442 = arith.cmpi eq, %440, %441 : vector<8x128xi32>
    %443 = arith.extui %442 : vector<8x128xi1> to vector<8x128xi32>
    %444 = arith.sitofp %443 : vector<8x128xi32> to vector<8x128xf32>
    %cst_131 = arith.constant dense<0.000000e+00> : vector<8x384xf32>
    %445 = tpu.matmul %444, %432, %cst_131 {dimension_numbers = #tpu.dot_dimension_numbers<[1], [0], [0], [1], [0, 0, 1, 1], [], []>} : vector<8x128xf32>, vector<128x384xf32>, vector<8x384xf32> -> vector<8x384xf32>
    %446 = vector.broadcast %434 : vector<1x384xf32> to vector<8x384xf32>
    %447 = arith.addf %445, %446 : vector<8x384xf32>
    %cst_132 = arith.constant dense<0.000000e+00> : vector<8x384xf32>
    %448 = tpu.matmul %429, %433, %cst_132 {dimension_numbers = #tpu.dot_dimension_numbers<[1], [0], [0], [1], [0, 0, 1, 1], [], []>} : vector<8x128xf32>, vector<128x384xf32>, vector<8x384xf32> -> vector<8x384xf32>
    %449 = vector.broadcast %435 : vector<1x384xf32> to vector<8x384xf32>
    %450 = arith.addf %448, %449 : vector<8x384xf32>
    %451 = vector.extract_strided_slice %447 {offsets = [0, 0], sizes = [8, 128], strides = [1, 1]} : vector<8x384xf32> to vector<8x128xf32>
    %452 = vector.extract_strided_slice %450 {offsets = [0, 0], sizes = [8, 128], strides = [1, 1]} : vector<8x384xf32> to vector<8x128xf32>
    %453 = arith.addf %451, %452 : vector<8x128xf32>
    %454 = arith.negf %453 : vector<8x128xf32>
    %455 = math.exp %454 : vector<8x128xf32>
    %cst_133 = arith.constant 1.000000e+00 : f32
    %456 = vector.broadcast %cst_133 : f32 to vector<8x128xf32>
    %457 = arith.addf %456, %455 : vector<8x128xf32>
    %458 = arith.divf %456, %457 : vector<8x128xf32>
    %459 = vector.extract_strided_slice %447 {offsets = [0, 128], sizes = [8, 128], strides = [1, 1]} : vector<8x384xf32> to vector<8x128xf32>
    %460 = vector.extract_strided_slice %450 {offsets = [0, 128], sizes = [8, 128], strides = [1, 1]} : vector<8x384xf32> to vector<8x128xf32>
    %461 = arith.addf %459, %460 : vector<8x128xf32>
    %462 = arith.negf %461 : vector<8x128xf32>
    %463 = math.exp %462 : vector<8x128xf32>
    %cst_134 = arith.constant 1.000000e+00 : f32
    %464 = vector.broadcast %cst_134 : f32 to vector<8x128xf32>
    %465 = arith.addf %464, %463 : vector<8x128xf32>
    %466 = arith.divf %464, %465 : vector<8x128xf32>
    %467 = vector.extract_strided_slice %447 {offsets = [0, 256], sizes = [8, 128], strides = [1, 1]} : vector<8x384xf32> to vector<8x128xf32>
    %468 = vector.extract_strided_slice %450 {offsets = [0, 256], sizes = [8, 128], strides = [1, 1]} : vector<8x384xf32> to vector<8x128xf32>
    %469 = arith.mulf %458, %468 : vector<8x128xf32>
    %470 = arith.addf %467, %469 : vector<8x128xf32>
    %471 = math.tanh %470 : vector<8x128xf32>
    %cst_135 = arith.constant 1.000000e+00 : f32
    %472 = vector.broadcast %cst_135 : f32 to vector<8x128xf32>
    %473 = arith.subf %472, %466 : vector<8x128xf32>
    %474 = arith.mulf %473, %471 : vector<8x128xf32>
    %475 = arith.mulf %466, %429 : vector<8x128xf32>
    %476 = arith.addf %474, %475 : vector<8x128xf32>
    %cst_136 = arith.constant dense<0.000000e+00> : vector<8x128xf32>
    %477 = tpu.matmul %476, %436, %cst_136 {dimension_numbers = #tpu.dot_dimension_numbers<[1], [0], [0], [1], [0, 0, 1, 1], [], []>} : vector<8x128xf32>, vector<128x128xf32>, vector<8x128xf32> -> vector<8x128xf32>
    %478 = vector.broadcast %437 : vector<1x128xf32> to vector<8x128xf32>
    %479 = arith.addf %477, %478 : vector<8x128xf32>
    %480 = arith.index_cast %c0_i32_130 : i32 to index
    %c0_137 = arith.constant 0 : index
    %c0_138 = arith.constant 0 : index
    %481 = vector.load %arg15[%480, %c0_137, %c0_138] : memref<7x8x128xf32, #tpu.memory_space<vmem>>, vector<1x8x128xf32>
    %482 = vector.shape_cast %481 : vector<1x8x128xf32> to vector<8x128xf32>
    %483 = vector.shape_cast %479 : vector<8x128xf32> to vector<1x8x128xf32>
    tpu.vector_store %arg15[%480, %c0_137, %c0_138], %483 {strides = array<i32>} : memref<7x8x128xf32, #tpu.memory_space<vmem>>, vector<1x8x128xf32>,
    %cst_139 = arith.constant dense<0xFF800000> : vector<8xf32>
    %484 = vector.multi_reduction <maximumf>, %479, %cst_139 [1] : vector<8x128xf32> to vector<8xf32>
    %485 = vector.shape_cast %484 : vector<8xf32> to vector<8x1xf32>
    %486 = vector.broadcast %485 : vector<8x1xf32> to vector<8x128xf32>
    %487 = arith.cmpf oeq, %479, %486 : vector<8x128xf32>
    %c128_i32_140 = arith.constant 128 : i32
    %488 = vector.shape_cast %1 : vector<1x128xi32> to vector<1x128xi32>
    %489 = vector.broadcast %488 : vector<1x128xi32> to vector<8x128xi32>
    %490 = vector.broadcast %c128_i32_140 : i32 to vector<8x128xi32>
    %491 = arith.select %487, %489, %490 : vector<8x128xi1>, vector<8x128xi32>
    %cst_141 = arith.constant dense<2147483647> : vector<8xi32>
    %492 = vector.multi_reduction <minsi>, %491, %cst_141 [1] : vector<8x128xi32> to vector<8xi32>
    %493 = vector.shape_cast %492 : vector<8xi32> to vector<8x1xi32>
    %494 = arith.index_cast %c0_i32_130 : i32 to index
    %495 = memref.load %arg2[%494] : memref<7xi32, #tpu.memory_space<smem>>
    %c0_i32_142 = arith.constant 0 : i32
    %496 = arith.cmpi sgt, %495, %c0_i32_142 : i32
    %c1_i32_143 = arith.constant 1 : i32
    %497 = arith.addi %c0_i32_130, %c1_i32_143 : i32
    %498 = arith.index_cast %497 : i32 to index
    %c0_144 = arith.constant 0 : index
    %c0_145 = arith.constant 0 : index
    %499 = vector.load %arg1[%498, %c0_144, %c0_145] : memref<8x8x1xi32, #tpu.memory_space<vmem>>, vector<1x8x1xi32>
    %500 = vector.shape_cast %499 : vector<1x8x1xi32> to vector<8x1xi32>
    %501 = arith.select %496, %500, %493 : vector<8x1xi32>
    %c1_i32_146 = arith.constant 1 : i32
    %502 = vector.broadcast %501 : vector<8x1xi32> to vector<8x128xi32>
    %503 = vector.broadcast %1 : vector<1x128xi32> to vector<8x128xi32>
    %504 = arith.cmpi eq, %502, %503 : vector<8x128xi32>
    %505 = arith.extui %504 : vector<8x128xi1> to vector<8x128xi32>
    %506 = arith.sitofp %505 : vector<8x128xi32> to vector<8x128xf32>
    %cst_147 = arith.constant dense<0.000000e+00> : vector<8x384xf32>
    %507 = tpu.matmul %506, %432, %cst_147 {dimension_numbers = #tpu.dot_dimension_numbers<[1], [0], [0], [1], [0, 0, 1, 1], [], []>} : vector<8x128xf32>, vector<128x384xf32>, vector<8x384xf32> -> vector<8x384xf32>
    %508 = vector.broadcast %434 : vector<1x384xf32> to vector<8x384xf32>
    %509 = arith.addf %507, %508 : vector<8x384xf32>
    %cst_148 = arith.constant dense<0.000000e+00> : vector<8x384xf32>
    %510 = tpu.matmul %476, %433, %cst_148 {dimension_numbers = #tpu.dot_dimension_numbers<[1], [0], [0], [1], [0, 0, 1, 1], [], []>} : vector<8x128xf32>, vector<128x384xf32>, vector<8x384xf32> -> vector<8x384xf32>
    %511 = vector.broadcast %435 : vector<1x384xf32> to vector<8x384xf32>
    %512 = arith.addf %510, %511 : vector<8x384xf32>
    %513 = vector.extract_strided_slice %509 {offsets = [0, 0], sizes = [8, 128], strides = [1, 1]} : vector<8x384xf32> to vector<8x128xf32>
    %514 = vector.extract_strided_slice %512 {offsets = [0, 0], sizes = [8, 128], strides = [1, 1]} : vector<8x384xf32> to vector<8x128xf32>
    %515 = arith.addf %513, %514 : vector<8x128xf32>
    %516 = arith.negf %515 : vector<8x128xf32>
    %517 = math.exp %516 : vector<8x128xf32>
    %cst_149 = arith.constant 1.000000e+00 : f32
    %518 = vector.broadcast %cst_149 : f32 to vector<8x128xf32>
    %519 = arith.addf %518, %517 : vector<8x128xf32>
    %520 = arith.divf %518, %519 : vector<8x128xf32>
    %521 = vector.extract_strided_slice %509 {offsets = [0, 128], sizes = [8, 128], strides = [1, 1]} : vector<8x384xf32> to vector<8x128xf32>
    %522 = vector.extract_strided_slice %512 {offsets = [0, 128], sizes = [8, 128], strides = [1, 1]} : vector<8x384xf32> to vector<8x128xf32>
    %523 = arith.addf %521, %522 : vector<8x128xf32>
    %524 = arith.negf %523 : vector<8x128xf32>
    %525 = math.exp %524 : vector<8x128xf32>
    %cst_150 = arith.constant 1.000000e+00 : f32
    %526 = vector.broadcast %cst_150 : f32 to vector<8x128xf32>
    %527 = arith.addf %526, %525 : vector<8x128xf32>
    %528 = arith.divf %526, %527 : vector<8x128xf32>
    %529 = vector.extract_strided_slice %509 {offsets = [0, 256], sizes = [8, 128], strides = [1, 1]} : vector<8x384xf32> to vector<8x128xf32>
    %530 = vector.extract_strided_slice %512 {offsets = [0, 256], sizes = [8, 128], strides = [1, 1]} : vector<8x384xf32> to vector<8x128xf32>
    %531 = arith.mulf %520, %530 : vector<8x128xf32>
    %532 = arith.addf %529, %531 : vector<8x128xf32>
    %533 = math.tanh %532 : vector<8x128xf32>
    %cst_151 = arith.constant 1.000000e+00 : f32
    %534 = vector.broadcast %cst_151 : f32 to vector<8x128xf32>
    %535 = arith.subf %534, %528 : vector<8x128xf32>
    %536 = arith.mulf %535, %533 : vector<8x128xf32>
    %537 = arith.mulf %528, %476 : vector<8x128xf32>
    %538 = arith.addf %536, %537 : vector<8x128xf32>
    %cst_152 = arith.constant dense<0.000000e+00> : vector<8x128xf32>
    %539 = tpu.matmul %538, %436, %cst_152 {dimension_numbers = #tpu.dot_dimension_numbers<[1], [0], [0], [1], [0, 0, 1, 1], [], []>} : vector<8x128xf32>, vector<128x128xf32>, vector<8x128xf32> -> vector<8x128xf32>
    %540 = vector.broadcast %437 : vector<1x128xf32> to vector<8x128xf32>
    %541 = arith.addf %539, %540 : vector<8x128xf32>
    %542 = arith.index_cast %c1_i32_146 : i32 to index
    %c0_153 = arith.constant 0 : index
    %c0_154 = arith.constant 0 : index
    %543 = vector.load %arg15[%542, %c0_153, %c0_154] : memref<7x8x128xf32, #tpu.memory_space<vmem>>, vector<1x8x128xf32>
    %544 = vector.shape_cast %543 : vector<1x8x128xf32> to vector<8x128xf32>
    %545 = vector.shape_cast %541 : vector<8x128xf32> to vector<1x8x128xf32>
    tpu.vector_store %arg15[%542, %c0_153, %c0_154], %545 {strides = array<i32>} : memref<7x8x128xf32, #tpu.memory_space<vmem>>, vector<1x8x128xf32>,
    %cst_155 = arith.constant dense<0xFF800000> : vector<8xf32>
    %546 = vector.multi_reduction <maximumf>, %541, %cst_155 [1] : vector<8x128xf32> to vector<8xf32>
    %547 = vector.shape_cast %546 : vector<8xf32> to vector<8x1xf32>
    %548 = vector.broadcast %547 : vector<8x1xf32> to vector<8x128xf32>
    %549 = arith.cmpf oeq, %541, %548 : vector<8x128xf32>
    %c128_i32_156 = arith.constant 128 : i32
    %550 = vector.shape_cast %1 : vector<1x128xi32> to vector<1x128xi32>
    %551 = vector.broadcast %550 : vector<1x128xi32> to vector<8x128xi32>
    %552 = vector.broadcast %c128_i32_156 : i32 to vector<8x128xi32>
    %553 = arith.select %549, %551, %552 : vector<8x128xi1>, vector<8x128xi32>
    %cst_157 = arith.constant dense<2147483647> : vector<8xi32>
    %554 = vector.multi_reduction <minsi>, %553, %cst_157 [1] : vector<8x128xi32> to vector<8xi32>
    %555 = vector.shape_cast %554 : vector<8xi32> to vector<8x1xi32>
    %556 = arith.index_cast %c1_i32_146 : i32 to index
    %557 = memref.load %arg2[%556] : memref<7xi32, #tpu.memory_space<smem>>
    %c0_i32_158 = arith.constant 0 : i32
    %558 = arith.cmpi sgt, %557, %c0_i32_158 : i32
    %c1_i32_159 = arith.constant 1 : i32
    %559 = arith.addi %c1_i32_146, %c1_i32_159 : i32
    %560 = arith.index_cast %559 : i32 to index
    %c0_160 = arith.constant 0 : index
    %c0_161 = arith.constant 0 : index
    %561 = vector.load %arg1[%560, %c0_160, %c0_161] : memref<8x8x1xi32, #tpu.memory_space<vmem>>, vector<1x8x1xi32>
    %562 = vector.shape_cast %561 : vector<1x8x1xi32> to vector<8x1xi32>
    %563 = arith.select %558, %562, %555 : vector<8x1xi32>
    %c2_i32_162 = arith.constant 2 : i32
    %564 = vector.broadcast %563 : vector<8x1xi32> to vector<8x128xi32>
    %565 = vector.broadcast %1 : vector<1x128xi32> to vector<8x128xi32>
    %566 = arith.cmpi eq, %564, %565 : vector<8x128xi32>
    %567 = arith.extui %566 : vector<8x128xi1> to vector<8x128xi32>
    %568 = arith.sitofp %567 : vector<8x128xi32> to vector<8x128xf32>
    %cst_163 = arith.constant dense<0.000000e+00> : vector<8x384xf32>
    %569 = tpu.matmul %568, %432, %cst_163 {dimension_numbers = #tpu.dot_dimension_numbers<[1], [0], [0], [1], [0, 0, 1, 1], [], []>} : vector<8x128xf32>, vector<128x384xf32>, vector<8x384xf32> -> vector<8x384xf32>
    %570 = vector.broadcast %434 : vector<1x384xf32> to vector<8x384xf32>
    %571 = arith.addf %569, %570 : vector<8x384xf32>
    %cst_164 = arith.constant dense<0.000000e+00> : vector<8x384xf32>
    %572 = tpu.matmul %538, %433, %cst_164 {dimension_numbers = #tpu.dot_dimension_numbers<[1], [0], [0], [1], [0, 0, 1, 1], [], []>} : vector<8x128xf32>, vector<128x384xf32>, vector<8x384xf32> -> vector<8x384xf32>
    %573 = vector.broadcast %435 : vector<1x384xf32> to vector<8x384xf32>
    %574 = arith.addf %572, %573 : vector<8x384xf32>
    %575 = vector.extract_strided_slice %571 {offsets = [0, 0], sizes = [8, 128], strides = [1, 1]} : vector<8x384xf32> to vector<8x128xf32>
    %576 = vector.extract_strided_slice %574 {offsets = [0, 0], sizes = [8, 128], strides = [1, 1]} : vector<8x384xf32> to vector<8x128xf32>
    %577 = arith.addf %575, %576 : vector<8x128xf32>
    %578 = arith.negf %577 : vector<8x128xf32>
    %579 = math.exp %578 : vector<8x128xf32>
    %cst_165 = arith.constant 1.000000e+00 : f32
    %580 = vector.broadcast %cst_165 : f32 to vector<8x128xf32>
    %581 = arith.addf %580, %579 : vector<8x128xf32>
    %582 = arith.divf %580, %581 : vector<8x128xf32>
    %583 = vector.extract_strided_slice %571 {offsets = [0, 128], sizes = [8, 128], strides = [1, 1]} : vector<8x384xf32> to vector<8x128xf32>
    %584 = vector.extract_strided_slice %574 {offsets = [0, 128], sizes = [8, 128], strides = [1, 1]} : vector<8x384xf32> to vector<8x128xf32>
    %585 = arith.addf %583, %584 : vector<8x128xf32>
    %586 = arith.negf %585 : vector<8x128xf32>
    %587 = math.exp %586 : vector<8x128xf32>
    %cst_166 = arith.constant 1.000000e+00 : f32
    %588 = vector.broadcast %cst_166 : f32 to vector<8x128xf32>
    %589 = arith.addf %588, %587 : vector<8x128xf32>
    %590 = arith.divf %588, %589 : vector<8x128xf32>
    %591 = vector.extract_strided_slice %571 {offsets = [0, 256], sizes = [8, 128], strides = [1, 1]} : vector<8x384xf32> to vector<8x128xf32>
    %592 = vector.extract_strided_slice %574 {offsets = [0, 256], sizes = [8, 128], strides = [1, 1]} : vector<8x384xf32> to vector<8x128xf32>
    %593 = arith.mulf %582, %592 : vector<8x128xf32>
    %594 = arith.addf %591, %593 : vector<8x128xf32>
    %595 = math.tanh %594 : vector<8x128xf32>
    %cst_167 = arith.constant 1.000000e+00 : f32
    %596 = vector.broadcast %cst_167 : f32 to vector<8x128xf32>
    %597 = arith.subf %596, %590 : vector<8x128xf32>
    %598 = arith.mulf %597, %595 : vector<8x128xf32>
    %599 = arith.mulf %590, %538 : vector<8x128xf32>
    %600 = arith.addf %598, %599 : vector<8x128xf32>
    %cst_168 = arith.constant dense<0.000000e+00> : vector<8x128xf32>
    %601 = tpu.matmul %600, %436, %cst_168 {dimension_numbers = #tpu.dot_dimension_numbers<[1], [0], [0], [1], [0, 0, 1, 1], [], []>} : vector<8x128xf32>, vector<128x128xf32>, vector<8x128xf32> -> vector<8x128xf32>
    %602 = vector.broadcast %437 : vector<1x128xf32> to vector<8x128xf32>
    %603 = arith.addf %601, %602 : vector<8x128xf32>
    %604 = arith.index_cast %c2_i32_162 : i32 to index
    %c0_169 = arith.constant 0 : index
    %c0_170 = arith.constant 0 : index
    %605 = vector.load %arg15[%604, %c0_169, %c0_170] : memref<7x8x128xf32, #tpu.memory_space<vmem>>, vector<1x8x128xf32>
    %606 = vector.shape_cast %605 : vector<1x8x128xf32> to vector<8x128xf32>
    %607 = vector.shape_cast %603 : vector<8x128xf32> to vector<1x8x128xf32>
    tpu.vector_store %arg15[%604, %c0_169, %c0_170], %607 {strides = array<i32>} : memref<7x8x128xf32, #tpu.memory_space<vmem>>, vector<1x8x128xf32>,
    %cst_171 = arith.constant dense<0xFF800000> : vector<8xf32>
    %608 = vector.multi_reduction <maximumf>, %603, %cst_171 [1] : vector<8x128xf32> to vector<8xf32>
    %609 = vector.shape_cast %608 : vector<8xf32> to vector<8x1xf32>
    %610 = vector.broadcast %609 : vector<8x1xf32> to vector<8x128xf32>
    %611 = arith.cmpf oeq, %603, %610 : vector<8x128xf32>
    %c128_i32_172 = arith.constant 128 : i32
    %612 = vector.shape_cast %1 : vector<1x128xi32> to vector<1x128xi32>
    %613 = vector.broadcast %612 : vector<1x128xi32> to vector<8x128xi32>
    %614 = vector.broadcast %c128_i32_172 : i32 to vector<8x128xi32>
    %615 = arith.select %611, %613, %614 : vector<8x128xi1>, vector<8x128xi32>
    %cst_173 = arith.constant dense<2147483647> : vector<8xi32>
    %616 = vector.multi_reduction <minsi>, %615, %cst_173 [1] : vector<8x128xi32> to vector<8xi32>
    %617 = vector.shape_cast %616 : vector<8xi32> to vector<8x1xi32>
    %618 = arith.index_cast %c2_i32_162 : i32 to index
    %619 = memref.load %arg2[%618] : memref<7xi32, #tpu.memory_space<smem>>
    %c0_i32_174 = arith.constant 0 : i32
    %620 = arith.cmpi sgt, %619, %c0_i32_174 : i32
    %c1_i32_175 = arith.constant 1 : i32
    %621 = arith.addi %c2_i32_162, %c1_i32_175 : i32
    %622 = arith.index_cast %621 : i32 to index
    %c0_176 = arith.constant 0 : index
    %c0_177 = arith.constant 0 : index
    %623 = vector.load %arg1[%622, %c0_176, %c0_177] : memref<8x8x1xi32, #tpu.memory_space<vmem>>, vector<1x8x1xi32>
    %624 = vector.shape_cast %623 : vector<1x8x1xi32> to vector<8x1xi32>
    %625 = arith.select %620, %624, %617 : vector<8x1xi32>
    %c3_i32_178 = arith.constant 3 : i32
    %626 = vector.broadcast %625 : vector<8x1xi32> to vector<8x128xi32>
    %627 = vector.broadcast %1 : vector<1x128xi32> to vector<8x128xi32>
    %628 = arith.cmpi eq, %626, %627 : vector<8x128xi32>
    %629 = arith.extui %628 : vector<8x128xi1> to vector<8x128xi32>
    %630 = arith.sitofp %629 : vector<8x128xi32> to vector<8x128xf32>
    %cst_179 = arith.constant dense<0.000000e+00> : vector<8x384xf32>
    %631 = tpu.matmul %630, %432, %cst_179 {dimension_numbers = #tpu.dot_dimension_numbers<[1], [0], [0], [1], [0, 0, 1, 1], [], []>} : vector<8x128xf32>, vector<128x384xf32>, vector<8x384xf32> -> vector<8x384xf32>
    %632 = vector.broadcast %434 : vector<1x384xf32> to vector<8x384xf32>
    %633 = arith.addf %631, %632 : vector<8x384xf32>
    %cst_180 = arith.constant dense<0.000000e+00> : vector<8x384xf32>
    %634 = tpu.matmul %600, %433, %cst_180 {dimension_numbers = #tpu.dot_dimension_numbers<[1], [0], [0], [1], [0, 0, 1, 1], [], []>} : vector<8x128xf32>, vector<128x384xf32>, vector<8x384xf32> -> vector<8x384xf32>
    %635 = vector.broadcast %435 : vector<1x384xf32> to vector<8x384xf32>
    %636 = arith.addf %634, %635 : vector<8x384xf32>
    %637 = vector.extract_strided_slice %633 {offsets = [0, 0], sizes = [8, 128], strides = [1, 1]} : vector<8x384xf32> to vector<8x128xf32>
    %638 = vector.extract_strided_slice %636 {offsets = [0, 0], sizes = [8, 128], strides = [1, 1]} : vector<8x384xf32> to vector<8x128xf32>
    %639 = arith.addf %637, %638 : vector<8x128xf32>
    %640 = arith.negf %639 : vector<8x128xf32>
    %641 = math.exp %640 : vector<8x128xf32>
    %cst_181 = arith.constant 1.000000e+00 : f32
    %642 = vector.broadcast %cst_181 : f32 to vector<8x128xf32>
    %643 = arith.addf %642, %641 : vector<8x128xf32>
    %644 = arith.divf %642, %643 : vector<8x128xf32>
    %645 = vector.extract_strided_slice %633 {offsets = [0, 128], sizes = [8, 128], strides = [1, 1]} : vector<8x384xf32> to vector<8x128xf32>
    %646 = vector.extract_strided_slice %636 {offsets = [0, 128], sizes = [8, 128], strides = [1, 1]} : vector<8x384xf32> to vector<8x128xf32>
    %647 = arith.addf %645, %646 : vector<8x128xf32>
    %648 = arith.negf %647 : vector<8x128xf32>
    %649 = math.exp %648 : vector<8x128xf32>
    %cst_182 = arith.constant 1.000000e+00 : f32
    %650 = vector.broadcast %cst_182 : f32 to vector<8x128xf32>
    %651 = arith.addf %650, %649 : vector<8x128xf32>
    %652 = arith.divf %650, %651 : vector<8x128xf32>
    %653 = vector.extract_strided_slice %633 {offsets = [0, 256], sizes = [8, 128], strides = [1, 1]} : vector<8x384xf32> to vector<8x128xf32>
    %654 = vector.extract_strided_slice %636 {offsets = [0, 256], sizes = [8, 128], strides = [1, 1]} : vector<8x384xf32> to vector<8x128xf32>
    %655 = arith.mulf %644, %654 : vector<8x128xf32>
    %656 = arith.addf %653, %655 : vector<8x128xf32>
    %657 = math.tanh %656 : vector<8x128xf32>
    %cst_183 = arith.constant 1.000000e+00 : f32
    %658 = vector.broadcast %cst_183 : f32 to vector<8x128xf32>
    %659 = arith.subf %658, %652 : vector<8x128xf32>
    %660 = arith.mulf %659, %657 : vector<8x128xf32>
    %661 = arith.mulf %652, %600 : vector<8x128xf32>
    %662 = arith.addf %660, %661 : vector<8x128xf32>
    %cst_184 = arith.constant dense<0.000000e+00> : vector<8x128xf32>
    %663 = tpu.matmul %662, %436, %cst_184 {dimension_numbers = #tpu.dot_dimension_numbers<[1], [0], [0], [1], [0, 0, 1, 1], [], []>} : vector<8x128xf32>, vector<128x128xf32>, vector<8x128xf32> -> vector<8x128xf32>
    %664 = vector.broadcast %437 : vector<1x128xf32> to vector<8x128xf32>
    %665 = arith.addf %663, %664 : vector<8x128xf32>
    %666 = arith.index_cast %c3_i32_178 : i32 to index
    %c0_185 = arith.constant 0 : index
    %c0_186 = arith.constant 0 : index
    %667 = vector.load %arg15[%666, %c0_185, %c0_186] : memref<7x8x128xf32, #tpu.memory_space<vmem>>, vector<1x8x128xf32>
    %668 = vector.shape_cast %667 : vector<1x8x128xf32> to vector<8x128xf32>
    %669 = vector.shape_cast %665 : vector<8x128xf32> to vector<1x8x128xf32>
    tpu.vector_store %arg15[%666, %c0_185, %c0_186], %669 {strides = array<i32>} : memref<7x8x128xf32, #tpu.memory_space<vmem>>, vector<1x8x128xf32>,
    %cst_187 = arith.constant dense<0xFF800000> : vector<8xf32>
    %670 = vector.multi_reduction <maximumf>, %665, %cst_187 [1] : vector<8x128xf32> to vector<8xf32>
    %671 = vector.shape_cast %670 : vector<8xf32> to vector<8x1xf32>
    %672 = vector.broadcast %671 : vector<8x1xf32> to vector<8x128xf32>
    %673 = arith.cmpf oeq, %665, %672 : vector<8x128xf32>
    %c128_i32_188 = arith.constant 128 : i32
    %674 = vector.shape_cast %1 : vector<1x128xi32> to vector<1x128xi32>
    %675 = vector.broadcast %674 : vector<1x128xi32> to vector<8x128xi32>
    %676 = vector.broadcast %c128_i32_188 : i32 to vector<8x128xi32>
    %677 = arith.select %673, %675, %676 : vector<8x128xi1>, vector<8x128xi32>
    %cst_189 = arith.constant dense<2147483647> : vector<8xi32>
    %678 = vector.multi_reduction <minsi>, %677, %cst_189 [1] : vector<8x128xi32> to vector<8xi32>
    %679 = vector.shape_cast %678 : vector<8xi32> to vector<8x1xi32>
    %680 = arith.index_cast %c3_i32_178 : i32 to index
    %681 = memref.load %arg2[%680] : memref<7xi32, #tpu.memory_space<smem>>
    %c0_i32_190 = arith.constant 0 : i32
    %682 = arith.cmpi sgt, %681, %c0_i32_190 : i32
    %c1_i32_191 = arith.constant 1 : i32
    %683 = arith.addi %c3_i32_178, %c1_i32_191 : i32
    %684 = arith.index_cast %683 : i32 to index
    %c0_192 = arith.constant 0 : index
    %c0_193 = arith.constant 0 : index
    %685 = vector.load %arg1[%684, %c0_192, %c0_193] : memref<8x8x1xi32, #tpu.memory_space<vmem>>, vector<1x8x1xi32>
    %686 = vector.shape_cast %685 : vector<1x8x1xi32> to vector<8x1xi32>
    %687 = arith.select %682, %686, %679 : vector<8x1xi32>
    %c4_i32_194 = arith.constant 4 : i32
    %688 = vector.broadcast %687 : vector<8x1xi32> to vector<8x128xi32>
    %689 = vector.broadcast %1 : vector<1x128xi32> to vector<8x128xi32>
    %690 = arith.cmpi eq, %688, %689 : vector<8x128xi32>
    %691 = arith.extui %690 : vector<8x128xi1> to vector<8x128xi32>
    %692 = arith.sitofp %691 : vector<8x128xi32> to vector<8x128xf32>
    %cst_195 = arith.constant dense<0.000000e+00> : vector<8x384xf32>
    %693 = tpu.matmul %692, %432, %cst_195 {dimension_numbers = #tpu.dot_dimension_numbers<[1], [0], [0], [1], [0, 0, 1, 1], [], []>} : vector<8x128xf32>, vector<128x384xf32>, vector<8x384xf32> -> vector<8x384xf32>
    %694 = vector.broadcast %434 : vector<1x384xf32> to vector<8x384xf32>
    %695 = arith.addf %693, %694 : vector<8x384xf32>
    %cst_196 = arith.constant dense<0.000000e+00> : vector<8x384xf32>
    %696 = tpu.matmul %662, %433, %cst_196 {dimension_numbers = #tpu.dot_dimension_numbers<[1], [0], [0], [1], [0, 0, 1, 1], [], []>} : vector<8x128xf32>, vector<128x384xf32>, vector<8x384xf32> -> vector<8x384xf32>
    %697 = vector.broadcast %435 : vector<1x384xf32> to vector<8x384xf32>
    %698 = arith.addf %696, %697 : vector<8x384xf32>
    %699 = vector.extract_strided_slice %695 {offsets = [0, 0], sizes = [8, 128], strides = [1, 1]} : vector<8x384xf32> to vector<8x128xf32>
    %700 = vector.extract_strided_slice %698 {offsets = [0, 0], sizes = [8, 128], strides = [1, 1]} : vector<8x384xf32> to vector<8x128xf32>
    %701 = arith.addf %699, %700 : vector<8x128xf32>
    %702 = arith.negf %701 : vector<8x128xf32>
    %703 = math.exp %702 : vector<8x128xf32>
    %cst_197 = arith.constant 1.000000e+00 : f32
    %704 = vector.broadcast %cst_197 : f32 to vector<8x128xf32>
    %705 = arith.addf %704, %703 : vector<8x128xf32>
    %706 = arith.divf %704, %705 : vector<8x128xf32>
    %707 = vector.extract_strided_slice %695 {offsets = [0, 128], sizes = [8, 128], strides = [1, 1]} : vector<8x384xf32> to vector<8x128xf32>
    %708 = vector.extract_strided_slice %698 {offsets = [0, 128], sizes = [8, 128], strides = [1, 1]} : vector<8x384xf32> to vector<8x128xf32>
    %709 = arith.addf %707, %708 : vector<8x128xf32>
    %710 = arith.negf %709 : vector<8x128xf32>
    %711 = math.exp %710 : vector<8x128xf32>
    %cst_198 = arith.constant 1.000000e+00 : f32
    %712 = vector.broadcast %cst_198 : f32 to vector<8x128xf32>
    %713 = arith.addf %712, %711 : vector<8x128xf32>
    %714 = arith.divf %712, %713 : vector<8x128xf32>
    %715 = vector.extract_strided_slice %695 {offsets = [0, 256], sizes = [8, 128], strides = [1, 1]} : vector<8x384xf32> to vector<8x128xf32>
    %716 = vector.extract_strided_slice %698 {offsets = [0, 256], sizes = [8, 128], strides = [1, 1]} : vector<8x384xf32> to vector<8x128xf32>
    %717 = arith.mulf %706, %716 : vector<8x128xf32>
    %718 = arith.addf %715, %717 : vector<8x128xf32>
    %719 = math.tanh %718 : vector<8x128xf32>
    %cst_199 = arith.constant 1.000000e+00 : f32
    %720 = vector.broadcast %cst_199 : f32 to vector<8x128xf32>
    %721 = arith.subf %720, %714 : vector<8x128xf32>
    %722 = arith.mulf %721, %719 : vector<8x128xf32>
    %723 = arith.mulf %714, %662 : vector<8x128xf32>
    %724 = arith.addf %722, %723 : vector<8x128xf32>
    %cst_200 = arith.constant dense<0.000000e+00> : vector<8x128xf32>
    %725 = tpu.matmul %724, %436, %cst_200 {dimension_numbers = #tpu.dot_dimension_numbers<[1], [0], [0], [1], [0, 0, 1, 1], [], []>} : vector<8x128xf32>, vector<128x128xf32>, vector<8x128xf32> -> vector<8x128xf32>
    %726 = vector.broadcast %437 : vector<1x128xf32> to vector<8x128xf32>
    %727 = arith.addf %725, %726 : vector<8x128xf32>
    %728 = arith.index_cast %c4_i32_194 : i32 to index
    %c0_201 = arith.constant 0 : index
    %c0_202 = arith.constant 0 : index
    %729 = vector.load %arg15[%728, %c0_201, %c0_202] : memref<7x8x128xf32, #tpu.memory_space<vmem>>, vector<1x8x128xf32>
    %730 = vector.shape_cast %729 : vector<1x8x128xf32> to vector<8x128xf32>
    %731 = vector.shape_cast %727 : vector<8x128xf32> to vector<1x8x128xf32>
    tpu.vector_store %arg15[%728, %c0_201, %c0_202], %731 {strides = array<i32>} : memref<7x8x128xf32, #tpu.memory_space<vmem>>, vector<1x8x128xf32>,
    %cst_203 = arith.constant dense<0xFF800000> : vector<8xf32>
    %732 = vector.multi_reduction <maximumf>, %727, %cst_203 [1] : vector<8x128xf32> to vector<8xf32>
    %733 = vector.shape_cast %732 : vector<8xf32> to vector<8x1xf32>
    %734 = vector.broadcast %733 : vector<8x1xf32> to vector<8x128xf32>
    %735 = arith.cmpf oeq, %727, %734 : vector<8x128xf32>
    %c128_i32_204 = arith.constant 128 : i32
    %736 = vector.shape_cast %1 : vector<1x128xi32> to vector<1x128xi32>
    %737 = vector.broadcast %736 : vector<1x128xi32> to vector<8x128xi32>
    %738 = vector.broadcast %c128_i32_204 : i32 to vector<8x128xi32>
    %739 = arith.select %735, %737, %738 : vector<8x128xi1>, vector<8x128xi32>
    %cst_205 = arith.constant dense<2147483647> : vector<8xi32>
    %740 = vector.multi_reduction <minsi>, %739, %cst_205 [1] : vector<8x128xi32> to vector<8xi32>
    %741 = vector.shape_cast %740 : vector<8xi32> to vector<8x1xi32>
    %742 = arith.index_cast %c4_i32_194 : i32 to index
    %743 = memref.load %arg2[%742] : memref<7xi32, #tpu.memory_space<smem>>
    %c0_i32_206 = arith.constant 0 : i32
    %744 = arith.cmpi sgt, %743, %c0_i32_206 : i32
    %c1_i32_207 = arith.constant 1 : i32
    %745 = arith.addi %c4_i32_194, %c1_i32_207 : i32
    %746 = arith.index_cast %745 : i32 to index
    %c0_208 = arith.constant 0 : index
    %c0_209 = arith.constant 0 : index
    %747 = vector.load %arg1[%746, %c0_208, %c0_209] : memref<8x8x1xi32, #tpu.memory_space<vmem>>, vector<1x8x1xi32>
    %748 = vector.shape_cast %747 : vector<1x8x1xi32> to vector<8x1xi32>
    %749 = arith.select %744, %748, %741 : vector<8x1xi32>
    %c5_i32_210 = arith.constant 5 : i32
    %750 = vector.broadcast %749 : vector<8x1xi32> to vector<8x128xi32>
    %751 = vector.broadcast %1 : vector<1x128xi32> to vector<8x128xi32>
    %752 = arith.cmpi eq, %750, %751 : vector<8x128xi32>
    %753 = arith.extui %752 : vector<8x128xi1> to vector<8x128xi32>
    %754 = arith.sitofp %753 : vector<8x128xi32> to vector<8x128xf32>
    %cst_211 = arith.constant dense<0.000000e+00> : vector<8x384xf32>
    %755 = tpu.matmul %754, %432, %cst_211 {dimension_numbers = #tpu.dot_dimension_numbers<[1], [0], [0], [1], [0, 0, 1, 1], [], []>} : vector<8x128xf32>, vector<128x384xf32>, vector<8x384xf32> -> vector<8x384xf32>
    %756 = vector.broadcast %434 : vector<1x384xf32> to vector<8x384xf32>
    %757 = arith.addf %755, %756 : vector<8x384xf32>
    %cst_212 = arith.constant dense<0.000000e+00> : vector<8x384xf32>
    %758 = tpu.matmul %724, %433, %cst_212 {dimension_numbers = #tpu.dot_dimension_numbers<[1], [0], [0], [1], [0, 0, 1, 1], [], []>} : vector<8x128xf32>, vector<128x384xf32>, vector<8x384xf32> -> vector<8x384xf32>
    %759 = vector.broadcast %435 : vector<1x384xf32> to vector<8x384xf32>
    %760 = arith.addf %758, %759 : vector<8x384xf32>
    %761 = vector.extract_strided_slice %757 {offsets = [0, 0], sizes = [8, 128], strides = [1, 1]} : vector<8x384xf32> to vector<8x128xf32>
    %762 = vector.extract_strided_slice %760 {offsets = [0, 0], sizes = [8, 128], strides = [1, 1]} : vector<8x384xf32> to vector<8x128xf32>
    %763 = arith.addf %761, %762 : vector<8x128xf32>
    %764 = arith.negf %763 : vector<8x128xf32>
    %765 = math.exp %764 : vector<8x128xf32>
    %cst_213 = arith.constant 1.000000e+00 : f32
    %766 = vector.broadcast %cst_213 : f32 to vector<8x128xf32>
    %767 = arith.addf %766, %765 : vector<8x128xf32>
    %768 = arith.divf %766, %767 : vector<8x128xf32>
    %769 = vector.extract_strided_slice %757 {offsets = [0, 128], sizes = [8, 128], strides = [1, 1]} : vector<8x384xf32> to vector<8x128xf32>
    %770 = vector.extract_strided_slice %760 {offsets = [0, 128], sizes = [8, 128], strides = [1, 1]} : vector<8x384xf32> to vector<8x128xf32>
    %771 = arith.addf %769, %770 : vector<8x128xf32>
    %772 = arith.negf %771 : vector<8x128xf32>
    %773 = math.exp %772 : vector<8x128xf32>
    %cst_214 = arith.constant 1.000000e+00 : f32
    %774 = vector.broadcast %cst_214 : f32 to vector<8x128xf32>
    %775 = arith.addf %774, %773 : vector<8x128xf32>
    %776 = arith.divf %774, %775 : vector<8x128xf32>
    %777 = vector.extract_strided_slice %757 {offsets = [0, 256], sizes = [8, 128], strides = [1, 1]} : vector<8x384xf32> to vector<8x128xf32>
    %778 = vector.extract_strided_slice %760 {offsets = [0, 256], sizes = [8, 128], strides = [1, 1]} : vector<8x384xf32> to vector<8x128xf32>
    %779 = arith.mulf %768, %778 : vector<8x128xf32>
    %780 = arith.addf %777, %779 : vector<8x128xf32>
    %781 = math.tanh %780 : vector<8x128xf32>
    %cst_215 = arith.constant 1.000000e+00 : f32
    %782 = vector.broadcast %cst_215 : f32 to vector<8x128xf32>
    %783 = arith.subf %782, %776 : vector<8x128xf32>
    %784 = arith.mulf %783, %781 : vector<8x128xf32>
    %785 = arith.mulf %776, %724 : vector<8x128xf32>
    %786 = arith.addf %784, %785 : vector<8x128xf32>
    %cst_216 = arith.constant dense<0.000000e+00> : vector<8x128xf32>
    %787 = tpu.matmul %786, %436, %cst_216 {dimension_numbers = #tpu.dot_dimension_numbers<[1], [0], [0], [1], [0, 0, 1, 1], [], []>} : vector<8x128xf32>, vector<128x128xf32>, vector<8x128xf32> -> vector<8x128xf32>
    %788 = vector.broadcast %437 : vector<1x128xf32> to vector<8x128xf32>
    %789 = arith.addf %787, %788 : vector<8x128xf32>
    %790 = arith.index_cast %c5_i32_210 : i32 to index
    %c0_217 = arith.constant 0 : index
    %c0_218 = arith.constant 0 : index
    %791 = vector.load %arg15[%790, %c0_217, %c0_218] : memref<7x8x128xf32, #tpu.memory_space<vmem>>, vector<1x8x128xf32>
    %792 = vector.shape_cast %791 : vector<1x8x128xf32> to vector<8x128xf32>
    %793 = vector.shape_cast %789 : vector<8x128xf32> to vector<1x8x128xf32>
    tpu.vector_store %arg15[%790, %c0_217, %c0_218], %793 {strides = array<i32>} : memref<7x8x128xf32, #tpu.memory_space<vmem>>, vector<1x8x128xf32>,
    %cst_219 = arith.constant dense<0xFF800000> : vector<8xf32>
    %794 = vector.multi_reduction <maximumf>, %789, %cst_219 [1] : vector<8x128xf32> to vector<8xf32>
    %795 = vector.shape_cast %794 : vector<8xf32> to vector<8x1xf32>
    %796 = vector.broadcast %795 : vector<8x1xf32> to vector<8x128xf32>
    %797 = arith.cmpf oeq, %789, %796 : vector<8x128xf32>
    %c128_i32_220 = arith.constant 128 : i32
    %798 = vector.shape_cast %1 : vector<1x128xi32> to vector<1x128xi32>
    %799 = vector.broadcast %798 : vector<1x128xi32> to vector<8x128xi32>
    %800 = vector.broadcast %c128_i32_220 : i32 to vector<8x128xi32>
    %801 = arith.select %797, %799, %800 : vector<8x128xi1>, vector<8x128xi32>
    %cst_221 = arith.constant dense<2147483647> : vector<8xi32>
    %802 = vector.multi_reduction <minsi>, %801, %cst_221 [1] : vector<8x128xi32> to vector<8xi32>
    %803 = vector.shape_cast %802 : vector<8xi32> to vector<8x1xi32>
    %804 = arith.index_cast %c5_i32_210 : i32 to index
    %805 = memref.load %arg2[%804] : memref<7xi32, #tpu.memory_space<smem>>
    %c0_i32_222 = arith.constant 0 : i32
    %806 = arith.cmpi sgt, %805, %c0_i32_222 : i32
    %c1_i32_223 = arith.constant 1 : i32
    %807 = arith.addi %c5_i32_210, %c1_i32_223 : i32
    %808 = arith.index_cast %807 : i32 to index
    %c0_224 = arith.constant 0 : index
    %c0_225 = arith.constant 0 : index
    %809 = vector.load %arg1[%808, %c0_224, %c0_225] : memref<8x8x1xi32, #tpu.memory_space<vmem>>, vector<1x8x1xi32>
    %810 = vector.shape_cast %809 : vector<1x8x1xi32> to vector<8x1xi32>
    %811 = arith.select %806, %810, %803 : vector<8x1xi32>
    %c6_i32_226 = arith.constant 6 : i32
    %812 = vector.broadcast %811 : vector<8x1xi32> to vector<8x128xi32>
    %813 = vector.broadcast %1 : vector<1x128xi32> to vector<8x128xi32>
    %814 = arith.cmpi eq, %812, %813 : vector<8x128xi32>
    %815 = arith.extui %814 : vector<8x128xi1> to vector<8x128xi32>
    %816 = arith.sitofp %815 : vector<8x128xi32> to vector<8x128xf32>
    %cst_227 = arith.constant dense<0.000000e+00> : vector<8x384xf32>
    %817 = tpu.matmul %816, %432, %cst_227 {dimension_numbers = #tpu.dot_dimension_numbers<[1], [0], [0], [1], [0, 0, 1, 1], [], []>} : vector<8x128xf32>, vector<128x384xf32>, vector<8x384xf32> -> vector<8x384xf32>
    %818 = vector.broadcast %434 : vector<1x384xf32> to vector<8x384xf32>
    %819 = arith.addf %817, %818 : vector<8x384xf32>
    %cst_228 = arith.constant dense<0.000000e+00> : vector<8x384xf32>
    %820 = tpu.matmul %786, %433, %cst_228 {dimension_numbers = #tpu.dot_dimension_numbers<[1], [0], [0], [1], [0, 0, 1, 1], [], []>} : vector<8x128xf32>, vector<128x384xf32>, vector<8x384xf32> -> vector<8x384xf32>
    %821 = vector.broadcast %435 : vector<1x384xf32> to vector<8x384xf32>
    %822 = arith.addf %820, %821 : vector<8x384xf32>
    %823 = vector.extract_strided_slice %819 {offsets = [0, 0], sizes = [8, 128], strides = [1, 1]} : vector<8x384xf32> to vector<8x128xf32>
    %824 = vector.extract_strided_slice %822 {offsets = [0, 0], sizes = [8, 128], strides = [1, 1]} : vector<8x384xf32> to vector<8x128xf32>
    %825 = arith.addf %823, %824 : vector<8x128xf32>
    %826 = arith.negf %825 : vector<8x128xf32>
    %827 = math.exp %826 : vector<8x128xf32>
    %cst_229 = arith.constant 1.000000e+00 : f32
    %828 = vector.broadcast %cst_229 : f32 to vector<8x128xf32>
    %829 = arith.addf %828, %827 : vector<8x128xf32>
    %830 = arith.divf %828, %829 : vector<8x128xf32>
    %831 = vector.extract_strided_slice %819 {offsets = [0, 128], sizes = [8, 128], strides = [1, 1]} : vector<8x384xf32> to vector<8x128xf32>
    %832 = vector.extract_strided_slice %822 {offsets = [0, 128], sizes = [8, 128], strides = [1, 1]} : vector<8x384xf32> to vector<8x128xf32>
    %833 = arith.addf %831, %832 : vector<8x128xf32>
    %834 = arith.negf %833 : vector<8x128xf32>
    %835 = math.exp %834 : vector<8x128xf32>
    %cst_230 = arith.constant 1.000000e+00 : f32
    %836 = vector.broadcast %cst_230 : f32 to vector<8x128xf32>
    %837 = arith.addf %836, %835 : vector<8x128xf32>
    %838 = arith.divf %836, %837 : vector<8x128xf32>
    %839 = vector.extract_strided_slice %819 {offsets = [0, 256], sizes = [8, 128], strides = [1, 1]} : vector<8x384xf32> to vector<8x128xf32>
    %840 = vector.extract_strided_slice %822 {offsets = [0, 256], sizes = [8, 128], strides = [1, 1]} : vector<8x384xf32> to vector<8x128xf32>
    %841 = arith.mulf %830, %840 : vector<8x128xf32>
    %842 = arith.addf %839, %841 : vector<8x128xf32>
    %843 = math.tanh %842 : vector<8x128xf32>
    %cst_231 = arith.constant 1.000000e+00 : f32
    %844 = vector.broadcast %cst_231 : f32 to vector<8x128xf32>
    %845 = arith.subf %844, %838 : vector<8x128xf32>
    %846 = arith.mulf %845, %843 : vector<8x128xf32>
    %847 = arith.mulf %838, %786 : vector<8x128xf32>
    %848 = arith.addf %846, %847 : vector<8x128xf32>
    %cst_232 = arith.constant dense<0.000000e+00> : vector<8x128xf32>
    %849 = tpu.matmul %848, %436, %cst_232 {dimension_numbers = #tpu.dot_dimension_numbers<[1], [0], [0], [1], [0, 0, 1, 1], [], []>} : vector<8x128xf32>, vector<128x128xf32>, vector<8x128xf32> -> vector<8x128xf32>
    %850 = vector.broadcast %437 : vector<1x128xf32> to vector<8x128xf32>
    %851 = arith.addf %849, %850 : vector<8x128xf32>
    %852 = arith.index_cast %c6_i32_226 : i32 to index
    %c0_233 = arith.constant 0 : index
    %c0_234 = arith.constant 0 : index
    %853 = vector.load %arg15[%852, %c0_233, %c0_234] : memref<7x8x128xf32, #tpu.memory_space<vmem>>, vector<1x8x128xf32>
    %854 = vector.shape_cast %853 : vector<1x8x128xf32> to vector<8x128xf32>
    %855 = vector.shape_cast %851 : vector<8x128xf32> to vector<1x8x128xf32>
    tpu.vector_store %arg15[%852, %c0_233, %c0_234], %855 {strides = array<i32>} : memref<7x8x128xf32, #tpu.memory_space<vmem>>, vector<1x8x128xf32>,
    %cst_235 = arith.constant dense<0xFF800000> : vector<8xf32>
    %856 = vector.multi_reduction <maximumf>, %851, %cst_235 [1] : vector<8x128xf32> to vector<8xf32>
    %857 = vector.shape_cast %856 : vector<8xf32> to vector<8x1xf32>
    %858 = vector.broadcast %857 : vector<8x1xf32> to vector<8x128xf32>
    %859 = arith.cmpf oeq, %851, %858 : vector<8x128xf32>
    %c128_i32_236 = arith.constant 128 : i32
    %860 = vector.shape_cast %1 : vector<1x128xi32> to vector<1x128xi32>
    %861 = vector.broadcast %860 : vector<1x128xi32> to vector<8x128xi32>
    %862 = vector.broadcast %c128_i32_236 : i32 to vector<8x128xi32>
    %863 = arith.select %859, %861, %862 : vector<8x128xi1>, vector<8x128xi32>
    %cst_237 = arith.constant dense<2147483647> : vector<8xi32>
    %864 = vector.multi_reduction <minsi>, %863, %cst_237 [1] : vector<8x128xi32> to vector<8xi32>
    %865 = vector.shape_cast %864 : vector<8xi32> to vector<8x1xi32>
    %866 = arith.index_cast %c6_i32_226 : i32 to index
    %867 = memref.load %arg2[%866] : memref<7xi32, #tpu.memory_space<smem>>
    %c0_i32_238 = arith.constant 0 : i32
    %868 = arith.cmpi sgt, %867, %c0_i32_238 : i32
    %c1_i32_239 = arith.constant 1 : i32
    %869 = arith.addi %c6_i32_226, %c1_i32_239 : i32
    %870 = arith.index_cast %869 : i32 to index
    %c0_240 = arith.constant 0 : index
    %c0_241 = arith.constant 0 : index
    %871 = vector.load %arg1[%870, %c0_240, %c0_241] : memref<8x8x1xi32, #tpu.memory_space<vmem>>, vector<1x8x1xi32>
    %872 = vector.shape_cast %871 : vector<1x8x1xi32> to vector<8x1xi32>
    %873 = arith.select %868, %872, %865 : vector<8x1xi32>
    %c7_i32_242 = arith.constant 7 : i32
    return
  }
}

</mosaic_0001>

<bundles_post_ra>
// kernel: _forward_fused.1
= control target key start
LH: loop header
LB: loop body
LE: loop exit
PB: predicated region body
PF: predicated region fallthrough
CT: control target
= control target key end

     0   :  { %20 = vsyncpa [#allocation5], 0  ;;  %s7502_s0 = inlined_call_operand.vmem [shape: s32[10,8,1], index: 0, kind: input, shape index: {}]   ;;  %s7503_s1 = inlined_call_operand.vmem [shape: s32[8,8,1], index: 1, kind: input, shape index: {}]   ;;  %s7504_s2 = inlined_call_operand.vmem [shape: s32[7], index: 2, kind: input, shape index: {}]   ;;  %s7505_s3 = inlined_call_operand.vmem [shape: f32[128,16], index: 3, kind: input, shape index: {}]   ;;  %s7506_s4 = inlined_call_operand.vmem [shape: f32[128,16], index: 4, kind: input, shape index: {}]   ;;  %s7507_s5 = inlined_call_operand.vmem [shape: f32[16,384], index: 5, kind: input, shape index: {}]   ;;  %s7508_s6 = inlined_call_operand.hbm [shape: f32[128,384], index: 6, kind: input, shape index: {}]   ;;  %s7509_s7 = inlined_call_operand.vmem [shape: f32[1,384], index: 7, kind: input, shape index: {}]   ;;  %s7510_s8 = inlined_call_operand.vmem [shape: f32[1,384], index: 8, kind: input, shape index: {}]   ;;  %s7511_s9 = inlined_call_operand.vmem [shape: f32[16,384], index: 9, kind: input, shape index: {}]   ;;  %s7512_s10 = inlined_call_operand.hbm [shape: f32[128,384], index: 10, kind: input, shape index: {}]   ;;  %s7513_s11 = inlined_call_operand.vmem [shape: f32[1,384], index: 11, kind: input, shape index: {}]   ;;  %s7514_s12 = inlined_call_operand.vmem [shape: f32[1,384], index: 12, kind: input, shape index: {}]   ;;  %s7515_s13 = inlined_call_operand.vmem [shape: f32[128,128], index: 13, kind: input, shape index: {}]   ;;  %s7516_s14 = inlined_call_operand.vmem [shape: f32[1,128], index: 14, kind: input, shape index: {}]   ;;  %s7517_s15 = inlined_call_operand.vmem [shape: f32[7,8,128], index: 15, kind: output, shape index: {}]  }
   0x1   :  { %21 = vsyncpa [#allocation4], 0  ;;  %s32_s20 = sshll.u32 %s7504_s2, 4  ;;  %s33_s20 = int_to_ptr.vmem [resolvable:$true] %s32_s20 }
   0x2   :  { %22 = vsyncpa [#allocation8], 0  ;;  %s46_s23 = sshll.u32 %s7508_s6, 4  ;;  %s4357_s24 = smov [#allocation3]   ;;  %s47_s23 = int_to_ptr.hbm [resolvable:$true] %s46_s23 }
   0x3   :  { %35 = dma.vmem_to_smem %s33_s20, 16, %s4357_s24, [#allocation5]  }
   0x4   :  { %s4358_s25 = smov [#allocation6]   ;;  %s4359_s27 = smov 384  }
   0x5   :  { %s48_s26 = sshll.u32 %s4358_s25, 4  ;;  %s4360_s28 = smov 24   ;;  %s49_s26 = int_to_ptr.vmem [resolvable:$true] %s48_s26 }
   0x6   :  { %54 = dma.hbm_to_vmem [thread:$0]  %s47_s23, 6144, %s49_s26, [#allocation4], %s4359_s27, %s4359_s27, %s4360_s28  }
   0x7   :  { %s65_s16 = sshll.u32 %s7512_s10, 4  ;;  %s4361_s2 = smov [#allocation7]   ;;  %s66_s16 = int_to_ptr.hbm [resolvable:$true] %s65_s16 }
   0x8   :  { %s67_s17 = sshll.u32 %s4361_s2, 4  ;;  %s68_s17 = int_to_ptr.vmem [resolvable:$true] %s67_s17 }
   0x9   :  { %73 = dma.hbm_to_vmem [thread:$0]  %s66_s16, 6144, %s68_s17, [#allocation8], %s4359_s27, %s4359_s27, %s4360_s28  }
   0xa   :  { %4351 = dma.done.wait [#allocation5], 16  }
   0xb   :  { %4352 = vsyncadd [#allocation5], 4294967280 }
   0xc   :  { %4353 = dma.done.wait [#allocation4], 6144  }
   0xd   :  { %4354 = vsyncadd [#allocation4], 4294961152 }
   0xe   :  { %4355 = dma.done.wait [#allocation8], 6144  }
   0xf   :  { %4356 = vsyncadd [#allocation8], 4294961152 }
  0x10   :  { %94 = sfence }
  0x11   :  { %v227_v0 = vld [vmem:[%s7507_s5 + $0x18] sm:$0xff]  ;;  %v229_v1 = vld [vmem:[%s7507_s5 + $0x28] sm:$0xff]  ;;  %v224_v2 = vld [vmem:[%s7507_s5] sm:$0xff]  ;;  %vm230_vm0 = vcmask 130048   ;;  %v4362_v21 = vmov 0   ;;  %s2416_s17 = sld [smem:[#allocation3]] }
  0x12   :  { %293 = vmatpush.msra.mxu0 %v227_v0  ;;  %423 = vmatpush.msra.mxu2 %v229_v1  ;;  %v226_v3 = vld [vmem:[%s7507_s5 + $0x10] sm:$0xff]  ;;  %v208_v4 = vld [vmem:[%s7505_s3] sm:$0xff]  ;;  %v4472_v5 = vld [vmem:[%s7505_s3 + $0x78] sm:$0xff]  ;;  %s3901_s20 = sld [smem:[#allocation3 + $0x1]] }
  0x13   :  { %3946 = vmatpush.msra.mxu1 %v227_v0  ;;  %v228_v6 = vld [vmem:[%s7507_s5 + $0x20] sm:$0xff]  ;;  %v225_v7 = vld [vmem:[%s7507_s5 + $0x8] sm:$0xff]  ;;  %v210_v9 = vld [vmem:[%s7505_s3 + $0x10] sm:$0xff]  ;;  %3956 = vset.pattern.permute.xlu0 %v4362_v21  ;;  %s3928_s18 = sld [smem:[#allocation3 + $0x4]] }
  0x14   :  { %294 = vmatpush.msra.mxu0 %v224_v2  ;;  %424 = vmatpush.msra.mxu2 %v226_v3  ;;  %v209_v8 = vld [vmem:[%s7505_s3 + $0x8] sm:$0xff]  ;;  %v211_v10 = vld [vmem:[%s7505_s3 + $0x18] sm:$0xff]  ;;  %v212_v11 = vld [vmem:[%s7505_s3 + $0x20] sm:$0xff]  ;;  %s3937_s21 = sld [smem:[#allocation3 + $0x5]] }
  0x15   :  { %3741 = vmatmul.msk.f32.vlgmr.msra.gmra.mxu0 %vm230_vm0, %v208_v4  ;;  %3773 = vmatmul.msk.f32.vlgmr.msra.gmra.mxu2 %vm230_vm0, %v208_v4  ;;  %v213_v12 = vld [vmem:[%s7505_s3 + $0x28] sm:$0xff]  ;;  %v214_v13 = vld [vmem:[%s7505_s3 + $0x30] sm:$0xff]  ;;  %v215_v14 = vld [vmem:[%s7505_s3 + $0x38] sm:$0xff] }
  0x16   :  { %3947 = vmatpush.msra.mxu1 %v224_v2  ;;  %v216_v15 = vld [vmem:[%s7505_s3 + $0x40] sm:$0xff]  ;;  %v217_v16 = vld [vmem:[%s7505_s3 + $0x48] sm:$0xff]  ;;  %v218_v17 = vld [vmem:[%s7505_s3 + $0x50] sm:$0xff]  ;;  %3957 = vset.pattern.permute.xlu1 %v4362_v21 }
  0x17   :  { %3756 = vmatmul.msk.f32.vlgmr.msra.gmra.mxu1 %vm230_vm0, %v4472_v5  ;;  %v219_v18 = vld [vmem:[%s7505_s3 + $0x58] sm:$0xff]  ;;  %v220_v19 = vld [vmem:[%s7505_s3 + $0x60] sm:$0xff]  ;;  %3958 = vset.pattern.permute.xlu2 %v4362_v21  ;;  %v221_v22 = vld [vmem:[%s7505_s3 + $0x68] sm:$0xff]  ;;  %v7518_v21 = vmov 1.0   ;;  %p2417_p0 = scmp.gt.s32.totalorder %s2416_s17, 0 }
  0x18   :  { %358 = vmatpush.msrb.mxu1 %v228_v6  ;;  %v138_v20 = vld [vmem:[%s7502_s0] sm:$0xff]  ;;  %v139_v23 = vld [vmem:[%s7502_s0 + $0x8] sm:$0xff]  ;;  %v222_v24 = vld [vmem:[%s7505_s3 + $0x70] sm:$0xff]  ;;  %p2638_p1 = scmp.gt.s32.totalorder %s3901_s20, 0 }
  0x19   :  { %149 = vperm.xlu0 %3956, %v138_v20   ;;  %v140_v25 = vld [vmem:[%s7502_s0 + $0x10] sm:$0xff]  ;;  %v141_v27 = vld [vmem:[%s7502_s0 + $0x18] sm:$0xff]  ;;  %v147_v28 = vld [vmem:[%s7502_s0 + $0x48] sm:$0xff]  ;;  %s2420_s6 = scalar_select %p2417_p0, 1, 0 }
  0x1a   :  { %359 = vmatpush.msrb.mxu1 %v225_v7  ;;  %v144_v26 = vld [vmem:[%s7502_s0 + $0x30] sm:$0xff]  ;;  %155 = vperm.xlu1 %3957, %v140_v25   ;;  %v145_v30 = vld [vmem:[%s7502_s0 + $0x38] sm:$0xff]  ;;  %v2186_v34 = vld [vmem:[%s7503_s1] sm:$0xff]  ;;  %s2641_s10 = scalar_select %p2638_p1, 1, 0 }
  0x1b   :  { %v142_v44 = vld [vmem:[%s7502_s0 + $0x20] sm:$0xff]  ;;  %v143_v48 = vld [vmem:[%s7502_s0 + $0x28] sm:$0xff]  ;;  %v4688_v25 = vld [vmem:[#allocation6 + $0x150] sm:$0xff]  ;;  %p3301_p4 = scmp.gt.s32.totalorder %s3928_s18, 0  ;;  %p3522_p5 = scmp.gt.s32.totalorder %s3937_s21, 0 }
  0x1c   :  { %161 = vperm.xlu2 %3958, %v142_v44   ;;  %v146_v52 = vld [vmem:[%s7502_s0 + $0x40] sm:$0xff]  ;;  %v4785_v44 = vld [vmem:[#allocation6 + $0x18] sm:$0xff] }
  0x1d   :  { %3742 = vmatmul.msk.f32.gmra.mxu0 %vm230_vm0, %v209_v8  ;;  %3774 = vmatmul.msk.f32.gmra.mxu2 %vm230_vm0, %v209_v8  ;;  %s3304_s5 = scalar_select %p3301_p4, 1, 0 }
  0x1e   :  { %s3525_s22 = scalar_select %p3522_p5, 1, 0 }
  0x1f   :  { %3757 = vmatmul.msk.f32.vlgmr.msrb.gmra.mxu1 %vm230_vm0, %v208_v4 }
  0x21   :  { %152 = vperm.xlu0 %3956, %v139_v23   ;;  %v4667_v23 = vld [vmem:[#allocation6 + $0x168] sm:$0xff] }
  0x22   :  { %158 = vperm.xlu1 %3957, %v141_v27   ;;  %725 = vmatpush.msra.mxu1 %v4667_v23  ;;  %v4694_v27 = vld [vmem:[#allocation6 + $0x170] sm:$0xff] }
  0x23   :  { %745 = vmatpush.msrb.mxu2 %v4694_v27 }
  0x24   :  { %164 = vperm.xlu2 %3958, %v143_v48   ;;  %726 = vmatpush.msra.mxu1 %v4688_v25 }
  0x25   :  { %3743 = vmatmul.msk.f32.gmra.mxu0 %vm230_vm0, %v210_v9  ;;  %3775 = vmatmul.msk.f32.gmra.mxu2 %vm230_vm0, %v210_v9 }
  0x27   :  { %3758 = vmatmul.msk.f32.gmra.mxu1 %vm230_vm0, %v209_v8 }
  0x29   :  { %167 = vperm.xlu0 %3956, %v144_v26   ;;  %v4690_v26 = vld [vmem:[#allocation6 + $0x138] sm:$0xff] }
  0x2a   :  { %170 = vperm.xlu1 %3957, %v145_v30   ;;  %727 = vmatpush.msra.mxu1 %v4690_v26 }
  0x2c   :  { %173 = vperm.xlu2 %3958, %v146_v52   ;;  %v4818_v52 = vld [vmem:[#allocation6 + $0x110] sm:$0xff] }
  0x2d   :  { %3744 = vmatmul.msk.f32.gmra.mxu0 %vm230_vm0, %v211_v10  ;;  %3776 = vmatmul.msk.f32.gmra.mxu2 %vm230_vm0, %v211_v10 }
  0x2f   :  { %3759 = vmatmul.msk.f32.gmra.mxu1 %vm230_vm0, %v210_v9 }
  0x31   :  { %176 = vperm.xlu0 %3956, %v147_v28   ;;  %v4696_v28 = vld [vmem:[#allocation6 + $0x120] sm:$0xff] }
  0x32   :  { %2188 = vperm.xlu1 %3957, %v2186_v34   ;;  %728 = vmatpush.msra.mxu1 %v4696_v28  ;;  %v4728_v34 = vld [vmem:[#allocation6 + $0xc0] sm:$0xff] }
  0x35   :  { %3745 = vmatmul.msk.f32.gmra.mxu0 %vm230_vm0, %v212_v11  ;;  %3777 = vmatmul.msk.f32.gmra.mxu2 %vm230_vm0, %v212_v11 }
  0x37   :  { %3760 = vmatmul.msk.f32.gmra.mxu1 %vm230_vm0, %v211_v10 }
  0x3d   :  { %3746 = vmatmul.msk.f32.gmra.mxu0 %vm230_vm0, %v213_v12  ;;  %3778 = vmatmul.msk.f32.gmra.mxu2 %vm230_vm0, %v213_v12 }
  0x3f   :  { %3761 = vmatmul.msk.f32.gmra.mxu1 %vm230_vm0, %v212_v11 }
  0x45   :  { %3747 = vmatmul.msk.f32.gmra.mxu0 %vm230_vm0, %v214_v13  ;;  %3779 = vmatmul.msk.f32.gmra.mxu2 %vm230_vm0, %v214_v13 }
  0x47   :  { %3762 = vmatmul.msk.f32.gmra.mxu1 %vm230_vm0, %v213_v12 }
  0x4d   :  { %3748 = vmatmul.msk.f32.gmra.mxu0 %vm230_vm0, %v215_v14  ;;  %3780 = vmatmul.msk.f32.gmra.mxu2 %vm230_vm0, %v215_v14 }
  0x4f   :  { %3763 = vmatmul.msk.f32.gmra.mxu1 %vm230_vm0, %v214_v13 }
  0x55   :  { %3749 = vmatmul.msk.f32.gmra.mxu0 %vm230_vm0, %v216_v15  ;;  %3781 = vmatmul.msk.f32.gmra.mxu2 %vm230_vm0, %v216_v15 }
  0x57   :  { %3764 = vmatmul.msk.f32.gmra.mxu1 %vm230_vm0, %v215_v14 }
  0x5d   :  { %3750 = vmatmul.msk.f32.gmra.mxu0 %vm230_vm0, %v217_v16  ;;  %3782 = vmatmul.msk.f32.gmra.mxu2 %vm230_vm0, %v217_v16 }
  0x5f   :  { %3765 = vmatmul.msk.f32.gmra.mxu1 %vm230_vm0, %v216_v15 }
  0x65   :  { %3751 = vmatmul.msk.f32.gmra.mxu0 %vm230_vm0, %v218_v17  ;;  %3783 = vmatmul.msk.f32.gmra.mxu2 %vm230_vm0, %v218_v17 }
  0x67   :  { %3766 = vmatmul.msk.f32.gmra.mxu1 %vm230_vm0, %v217_v16 }
  0x6d   :  { %3752 = vmatmul.msk.f32.gmra.mxu0 %vm230_vm0, %v219_v18  ;;  %3784 = vmatmul.msk.f32.gmra.mxu2 %vm230_vm0, %v219_v18 }
  0x6f   :  { %3767 = vmatmul.msk.f32.gmra.mxu1 %vm230_vm0, %v218_v17  ;;  %v95_v17 = vlaneseq }
  0x75   :  { %3753 = vmatmul.msk.f32.gmra.mxu0 %vm230_vm0, %v220_v19  ;;  %3785 = vmatmul.msk.f32.gmra.mxu2 %vm230_vm0, %v220_v19 }
  0x77   :  { %3768 = vmatmul.msk.f32.gmra.mxu1 %vm230_vm0, %v219_v18  ;;  %v4644_v18 = vand.u32 127, %v95_v17 }
  0x79   :  { %7867 = vst [vmem:[#allocation12_spill] sm:$0xff] %v4644_v18  ;;  %vm135_vm11 = vcmp.lt.s32.totalorder %v4644_v18, 32 }
  0x7d   :  { %3754 = vmatmul.msk.f32.gmra.mxu0 %vm230_vm0, %v221_v22  ;;  %3786 = vmatmul.msk.f32.gmra.mxu2 %vm230_vm0, %v221_v22 }
  0x7f   :  { %3769 = vmatmul.msk.f32.gmra.mxu1 %vm230_vm0, %v220_v19 }
  0x85   :  { %3755 = vmatmul.msk.f32.gmra.mxu0 %vm230_vm0, %v222_v24  ;;  %3787 = vmatmul.msk.f32.gmra.mxu2 %vm230_vm0, %v222_v24 }
  0x87   :  { %3770 = vmatmul.msk.f32.gmra.mxu1 %vm230_vm0, %v221_v22 }
  0x8b   :  { %v4647_v19 = vpop.permute.xlu0 %149 }
  0x8c   :  { %vm178_vm1 = vcmp.eq.s32.totalorder %v4647_v19, %v4644_v18 }
  0x8d   :  { %3788 = vmatmul.msk.f32.gmra.mxu2 %vm230_vm0, %v4472_v5 }
  0x8f   :  { %3771 = vmatmul.msk.f32.gmra.mxu1 %vm230_vm0, %v222_v24  ;;  %v4672_v24 = vpop.permute.xlu1 %155 }
  0x90   :  { %vm180_vm3 = vcmp.eq.s32.totalorder %v4672_v24, %v4644_v18 }
  0x92   :  { %v4589_v29 = vpop.f32.mrf.mxu0 }
  0x93   :  { %v4658_v22 = vpop.permute.xlu0 %152 }
  0x94   :  { %v341_v31 = vpop.f32.mrf.mxu1  ;;  %vm179_vm2 = vcmp.eq.s32.totalorder %v4658_v22, %v4644_v18 }
  0x95   :  { %482 = vmatpush.msra.mxu3 %v341_v31  ;;  %v4720_v31 = vld [vmem:[#allocation6 + $0xf0] sm:$0xff] }
  0x97   :  { %3772 = vmatmul.msk.f32.gmra.mxu1 %vm230_vm0, %v4472_v5  ;;  %v4706_v30 = vpop.permute.xlu1 %158 }
  0x98   :  { %v4596_v32 = vpop.f32.mrf.mxu2  ;;  %vm181_vm4 = vcmp.eq.s32.totalorder %v4706_v30, %v4644_v18 }
  0x9a   :  { %v4598_v33 = vpop.f32.mrf.mxu0 }
  0x9b   :  { %v4799_v48 = vpop.permute.xlu0 %167 }
  0x9c   :  { %v4603_v35 = vpop.f32.mrf.mxu1  ;;  %vm184_vm7 = vcmp.eq.s32.totalorder %v4799_v48, %v4644_v18  ;;  %v5102_v48 = vld [vmem:[%s7509_s7] sm:$0x7] }
  0xa0   :  { %v4605_v36 = vpop.f32.mrf.mxu2 }
  0xa2   :  { %v4607_v37 = vpop.f32.mrf.mxu0 }
  0xa4   :  { %v4609_v38 = vpop.f32.mrf.mxu1 }
  0xa8   :  { %v4611_v39 = vpop.f32.mrf.mxu2 }
  0xaa   :  { %v305_v40 = vpop.f32.mrf.mxu0 }
  0xac   :  { %v4613_v41 = vpop.f32.mrf.mxu1 }
  0xb0   :  { %v4615_v42 = vpop.f32.mrf.mxu2 }
  0xb2   :  { %v308_v43 = vpop.f32.mrf.mxu0 }
  0xb4   :  { %v4620_v45 = vpop.f32.mrf.mxu1 }
  0xb8   :  { %v4622_v46 = vpop.f32.mrf.mxu2 }
  0xba   :  { %v311_v47 = vpop.f32.mrf.mxu0 }
  0xbc   :  { %v4627_v49 = vpop.f32.mrf.mxu1 }
  0xc0   :  { %v4629_v50 = vpop.f32.mrf.mxu2 }
  0xc2   :  { %v314_v51 = vpop.f32.mrf.mxu0 }
  0xc4   :  { %v4634_v53 = vpop.f32.mrf.mxu1 }
  0xc8   :  { %v444_v54 = vpop.f32.mrf.mxu2 }
  0xca   :  { %v317_v55 = vpop.f32.mrf.mxu0 }
  0xcc   :  { %v4636_v56 = vpop.f32.mrf.mxu1 }
  0xd0   :  { %v447_v57 = vpop.f32.mrf.mxu2 }
  0xd2   :  { %v320_v58 = vpop.f32.mrf.mxu0 }
  0xd4   :  { %v4638_v59 = vpop.f32.mrf.mxu1 }
  0xd8   :  { %v450_v60 = vpop.f32.mrf.mxu2 }
  0xda   :  { %v323_v61 = vpop.f32.mrf.mxu0 }
  0xdc   :  { %v4640_v62 = vpop.f32.mrf.mxu1 }
  0xe0   :  { %v453_v63 = vpop.f32.mrf.mxu2 }
  0xe2   :  { %v326_v0 = vpop.f32.mrf.mxu0 }
  0xe4   :  { %v4642_v1 = vpop.f32.mrf.mxu1 }
  0xe8   :  { %v456_v2 = vpop.f32.mrf.mxu2 }
  0xea   :  { %v329_v3 = vpop.f32.mrf.mxu0 }
  0xec   :  { %v391_v4 = vpop.f32.mrf.mxu1 }
  0xf0   :  { %v459_v5 = vpop.f32.mrf.mxu2 }
  0xf2   :  { %v332_v6 = vpop.f32.mrf.mxu0 }
  0xf4   :  { %v394_v7 = vpop.f32.mrf.mxu1 }
  0xf8   :  { %v462_v8 = vpop.f32.mrf.mxu2 }
  0xfa   :  { %v335_v9 = vpop.f32.mrf.mxu0 }
  0xfc   :  { %v397_v11 = vpop.f32.mrf.mxu1 }
 0x100   :  { %v465_v10 = vpop.f32.mrf.mxu2 }
 0x102   :  { %v338_v12 = vpop.f32.mrf.mxu0 }
 0x103   :  { %483 = vmatpush.msra.mxu3 %v338_v12  ;;  %v4978_v12 = vld [vmem:[#allocation6 + $0x50] sm:$0xff] }
 0x104   :  { %v400_v14 = vpop.f32.mrf.mxu1 }
 0x105   :  { %484 = vmatpush.msra.mxu3 %v335_v9  ;;  %v4941_v9 = vld [vmem:[#allocation6 + $0x98] sm:$0xff] }
 0x107   :  { %485 = vmatpush.msra.mxu3 %v332_v6  ;;  %v4905_v6 = vld [vmem:[#allocation6 + $0xc8] sm:$0xff] }
 0x108   :  { %v468_v13 = vpop.f32.mrf.mxu2 }
 0x109   :  { %486 = vmatpush.msra.mxu3 %v329_v3  ;;  %v4886_v3 = vld [vmem:[#allocation6 + $0x58] sm:$0xff] }
 0x10a   :  { %7880 = vst [vmem:[#allocation25_spill] sm:$0xff] %v4886_v3 }
 0x10b   :  { %487 = vmatpush.msra.mxu3 %v326_v0  ;;  %v4876_v0 = vld [vmem:[#allocation6 + $0xe0] sm:$0xff] }
 0x10c   :  { %v403_v16 = vpop.f32.mrf.mxu1 }
 0x10d   :  { %488 = vmatpush.msra.mxu3 %v323_v61  ;;  %v4857_v61 = vld [vmem:[#allocation6 + $0xb8] sm:$0xff] }
 0x10e   :  { %7876 = vst [vmem:[#allocation21_spill] sm:$0xff] %v4857_v61 }
 0x10f   :  { %489 = vmatpush.msra.mxu3 %v320_v58  ;;  %v4847_v58 = vld [vmem:[#allocation6 + $0xf8] sm:$0xff] }
 0x110   :  { %v471_v15 = vpop.f32.mrf.mxu2 }
 0x111   :  { %490 = vmatpush.msra.mxu3 %v317_v55  ;;  %576 = vmatpush.msrb.mxu0 %v471_v15  ;;  %v4829_v55 = vpop.permute.xlu1 %170  ;;  %v5000_v15 = vld [vmem:[#allocation6 + $0x8] sm:$0xff] }
 0x112   :  { %vm185_vm8 = vcmp.eq.s32.totalorder %v4829_v55, %v4644_v18 }
 0x113   :  { %491 = vmatpush.msra.mxu3 %v314_v51  ;;  %577 = vmatpush.msrb.mxu0 %v468_v13  ;;  %v4815_v51 = vld [vmem:[#allocation6 + $0x148] sm:$0xff]  ;;  %v4985_v13 = vld [vmem:[#allocation6 + $0x38] sm:$0xff] }
 0x114   :  { %v406_v20 = vpop.f32.mrf.mxu1  ;;  %7870 = vst [vmem:[#allocation15_spill] sm:$0xff] %v4815_v51 }
 0x115   :  { %492 = vmatpush.msra.mxu3 %v311_v47  ;;  %578 = vmatpush.msrb.mxu0 %v465_v10  ;;  %v4795_v47 = vld [vmem:[#allocation6 + $0x178] sm:$0xff]  ;;  %v4956_v10 = vld [vmem:[#allocation6 + $0x80] sm:$0xff] }
 0x116   :  { %7868 = vst [vmem:[#allocation13_spill] sm:$0xff] %v4795_v47 }
 0x117   :  { %493 = vmatpush.msra.mxu3 %v308_v43  ;;  %579 = vmatpush.msrb.mxu0 %v462_v8  ;;  %v4783_v43 = vld [vmem:[#allocation6 + $0x30] sm:$0xff] }
 0x118   :  { %v4924_v8 = vld [vmem:[#allocation6 + $0xb0] sm:$0xff] }
 0x119   :  { %494 = vmatpush.msra.mxu3 %v305_v40  ;;  %580 = vmatpush.msrb.mxu0 %v459_v5  ;;  %v4754_v40 = vld [vmem:[#allocation6 + $0x78] sm:$0xff]  ;;  %v4902_v5 = vld [vmem:[#allocation6 + $0x28] sm:$0xff] }
 0x11a   :  { %7882 = vst [vmem:[#allocation27_spill] sm:$0xff] %v4902_v5 }
 0x11b   :  { %495 = vmatpush.msra.mxu3 %v4607_v37  ;;  %581 = vmatpush.msrb.mxu0 %v456_v2  ;;  %v4736_v37 = vld [vmem:[#allocation6 + $0xa8] sm:$0xff]  ;;  %v4884_v2 = vpop.permute.xlu0 %176 }
 0x11c   :  { %vm187_vm10 = vcmp.eq.s32.totalorder %v4884_v2, %v4644_v18 }
 0x11d   :  { %496 = vmatpush.msra.mxu3 %v4598_v33  ;;  %582 = vmatpush.msrb.mxu0 %v453_v63  ;;  %v4726_v33 = vld [vmem:[#allocation6 + $0x158] sm:$0xff]  ;;  %v4873_v63 = vld [vmem:[#allocation6 + $0x88] sm:$0xff] }
 0x11e   :  { %746 = vmatpush.msrb.mxu2 %v4726_v33  ;;  %7878 = vst [vmem:[#allocation23_spill] sm:$0xff] %v4873_v63 }
 0x11f   :  { %497 = vmatpush.msra.mxu3 %v4589_v29  ;;  %583 = vmatpush.msrb.mxu0 %v450_v60  ;;  %v4702_v29 = vld [vmem:[#allocation6 + $0x108] sm:$0xff] }
 0x120   :  { %3789 = vmatmul.msk.f32.vlgmr.msra.gmra.mxu3 %vm178_vm1, %v7518_v21  ;;  %729 = vmatpush.msra.mxu1 %v4702_v29 }
 0x121   :  { %529 = vmatpush.msrb.mxu3 %v406_v20  ;;  %584 = vmatpush.msrb.mxu0 %v447_v57  ;;  %v4844_v57 = vld [vmem:[#allocation6 + $0xe8] sm:$0xff] }
 0x122   :  { %730 = vmatpush.msra.mxu1 %v4720_v31  ;;  %7874 = vst [vmem:[#allocation19_spill] sm:$0xff] %v4844_v57 }
 0x123   :  { %530 = vmatpush.msrb.mxu3 %v403_v16  ;;  %585 = vmatpush.msrb.mxu0 %v444_v54  ;;  %v4826_v54 = vld [vmem:[#allocation6 + $0x118] sm:$0xff] }
 0x124   :  { %7872 = vst [vmem:[#allocation17_spill] sm:$0xff] %v4826_v54 }
 0x125   :  { %531 = vmatpush.msrb.mxu3 %v400_v14  ;;  %586 = vmatpush.msrb.mxu0 %v4629_v50  ;;  %v4813_v50 = vld [vmem:[#allocation6 + $0x160] sm:$0xff] }
 0x126   :  { %7869 = vst [vmem:[#allocation14_spill] sm:$0xff] %v4813_v50  ;;  %v4990_v14 = vld [vmem:[#allocation6 + $0x20] sm:$0xff] }
 0x127   :  { %532 = vmatpush.msrb.mxu3 %v397_v11  ;;  %587 = vmatpush.msrb.mxu0 %v4622_v46  ;;  %v4790_v46 = vld [vmem:[#allocation6] sm:$0xff]  ;;  %v4969_v11 = vld [vmem:[#allocation6 + $0x68] sm:$0xff] }
 0x128   :  { %3790 = vmatmul.msk.f32.gmra.mxu3 %vm179_vm2, %v7518_v21 }
 0x129   :  { %533 = vmatpush.msrb.mxu3 %v394_v7  ;;  %588 = vmatpush.msrb.mxu0 %v4615_v42  ;;  %v4907_v7 = vld [vmem:[#allocation6 + $0x10] sm:$0xff] }
 0x12a   :  { %7883 = vst [vmem:[#allocation28_spill] sm:$0xff] %v4907_v7 }
 0x12b   :  { %534 = vmatpush.msrb.mxu3 %v391_v4  ;;  %589 = vmatpush.msrb.mxu0 %v4611_v39  ;;  %v4752_v39 = vld [vmem:[#allocation6 + $0x90] sm:$0xff]  ;;  %v4900_v4 = vld [vmem:[#allocation6 + $0x40] sm:$0xff] }
 0x12c   :  { %7881 = vst [vmem:[#allocation26_spill] sm:$0xff] %v4900_v4 }
 0x12d   :  { %535 = vmatpush.msrb.mxu3 %v4642_v1  ;;  %590 = vmatpush.msrb.mxu0 %v4605_v36  ;;  %v4734_v36 = vpop.permute.xlu2 %161  ;;  %v4878_v1 = vld [vmem:[#allocation6 + $0x70] sm:$0xff] }
 0x12e   :  { %vm182_vm5 = vcmp.eq.s32.totalorder %v4734_v36, %v4644_v18  ;;  %7879 = vst [vmem:[#allocation24_spill] sm:$0xff] %v4878_v1 }
 0x12f   :  { %536 = vmatpush.msrb.mxu3 %v4640_v62  ;;  %591 = vmatpush.msrb.mxu0 %v4596_v32  ;;  %v4722_v32 = vld [vmem:[#allocation6 + $0xd8] sm:$0xff]  ;;  %v4871_v62 = vld [vmem:[#allocation6 + $0xa0] sm:$0xff] }
 0x130   :  { %3791 = vmatmul.msk.f32.gmra.mxu3 %vm180_vm3, %v7518_v21  ;;  %3809 = vmatmul.msk.f32.vlgmr.msrb.gmra.mxu0 %vm178_vm1, %v7518_v21  ;;  %7877 = vst [vmem:[#allocation22_spill] sm:$0xff] %v4871_v62 }
 0x131   :  { %537 = vmatpush.msrb.mxu3 %v4638_v59  ;;  %981 = vmatpush.msra.mxu0 %v4694_v27  ;;  %v4849_v59 = vld [vmem:[#allocation6 + $0xd0] sm:$0xff] }
 0x132   :  { %731 = vmatpush.msra.mxu1 %v4722_v32  ;;  %7875 = vst [vmem:[#allocation20_spill] sm:$0xff] %v4849_v59 }
 0x133   :  { %538 = vmatpush.msrb.mxu3 %v4636_v56  ;;  %982 = vmatpush.msra.mxu0 %v4726_v33  ;;  %v4842_v56 = vld [vmem:[#allocation6 + $0x100] sm:$0xff] }
 0x134   :  { %732 = vmatpush.msra.mxu1 %v4728_v34  ;;  %7873 = vst [vmem:[#allocation18_spill] sm:$0xff] %v4842_v56 }
 0x135   :  { %539 = vmatpush.msrb.mxu3 %v4634_v53  ;;  %v4770_v42 = vpop.permute.xlu2 %164  ;;  %v4820_v53 = vld [vmem:[#allocation6 + $0x130] sm:$0xff] }
 0x136   :  { %733 = vmatpush.msra.mxu1 %v4736_v37  ;;  %vm183_vm6 = vcmp.eq.s32.totalorder %v4770_v42, %v4644_v18  ;;  %7871 = vst [vmem:[#allocation16_spill] sm:$0xff] %v4820_v53 }
 0x137   :  { %540 = vmatpush.msrb.mxu3 %v4627_v49  ;;  %v4364_v49 = vmov 0.0  }
 0x138   :  { %3792 = vmatmul.msk.f32.gmra.mxu3 %vm181_vm4, %v7518_v21  ;;  %3810 = vmatmul.msk.f32.gmra.mxu0 %vm179_vm2, %v7518_v21 }
 0x139   :  { %541 = vmatpush.msrb.mxu3 %v4620_v45  ;;  %734 = vmatpush.msra.mxu1 %v4752_v39  ;;  %v4788_v45 = vld [vmem:[#allocation6 + $0x128] sm:$0xff] }
 0x13b   :  { %542 = vmatpush.msrb.mxu3 %v4613_v41  ;;  %735 = vmatpush.msra.mxu1 %v4754_v40  ;;  %v4766_v41 = vld [vmem:[#allocation6 + $0x48] sm:$0xff] }
 0x13d   :  { %543 = vmatpush.msrb.mxu3 %v4609_v38  ;;  %v4757_v38 = vld [vmem:[#allocation6 + $0x140] sm:$0xff]  ;;  %v4855_v60 = vpop.permute.xlu2 %173 }
 0x13e   :  { %747 = vmatpush.msrb.mxu2 %v4757_v38  ;;  %983 = vmatpush.msra.mxu0 %v4757_v38  ;;  %vm186_vm9 = vcmp.eq.s32.totalorder %v4855_v60, %v4644_v18 }
 0x13f   :  { %544 = vmatpush.msrb.mxu3 %v4603_v35  ;;  %v4760_v35 = vld [vmem:[#allocation6 + $0x60] sm:$0xff] }
 0x140   :  { %3793 = vmatmul.msk.f32.gmra.mxu3 %vm182_vm5, %v7518_v21  ;;  %3811 = vmatmul.msk.f32.gmra.mxu0 %vm180_vm3, %v7518_v21 }
 0x141   :  { %863 = vmatpush.msra.mxu3 %v4694_v27  ;;  %736 = vmatpush.msra.mxu1 %v4760_v35 }
 0x142   :  { %748 = vmatpush.msrb.mxu2 %v4788_v45  ;;  %984 = vmatpush.msra.mxu0 %v4788_v45 }
 0x143   :  { %864 = vmatpush.msra.mxu3 %v4726_v33  ;;  %737 = vmatpush.msra.mxu1 %v4766_v41 }
 0x144   :  { %749 = vmatpush.msrb.mxu2 %v4818_v52  ;;  %985 = vmatpush.msra.mxu0 %v4818_v52 }
 0x145   :  { %865 = vmatpush.msra.mxu3 %v4757_v38  ;;  %738 = vmatpush.msra.mxu1 %v4783_v43 }
 0x146   :  { %750 = vmatpush.msrb.mxu2 %v4847_v58  ;;  %986 = vmatpush.msra.mxu0 %v4847_v58 }
 0x147   :  { %866 = vmatpush.msra.mxu3 %v4788_v45  ;;  %739 = vmatpush.msra.mxu1 %v4785_v44 }
 0x148   :  { %3794 = vmatmul.msk.f32.gmra.mxu3 %vm183_vm6, %v7518_v21  ;;  %3812 = vmatmul.msk.f32.gmra.mxu0 %vm181_vm4, %v7518_v21 }
 0x149   :  { %740 = vmatpush.msra.mxu1 %v4790_v46  ;;  %867 = vmatpush.msra.mxu3 %v4818_v52 }
 0x14a   :  { %741 = vmatmul.f32.vlgmr.msra.gmra.mxu1 %v4364_v49  ;;  %751 = vmatpush.msrb.mxu2 %v4876_v0 }
 0x14b   :  { %765 = vmatpush.msrb.mxu1 %v4795_v47  ;;  %868 = vmatpush.msra.mxu3 %v4847_v58 }
 0x14c   :  { %987 = vmatpush.msra.mxu0 %v4876_v0  ;;  %752 = vmatpush.msrb.mxu2 %v4905_v6 }
 0x14d   :  { %766 = vmatpush.msrb.mxu1 %v4813_v50  ;;  %869 = vmatpush.msra.mxu3 %v4876_v0 }
 0x14e   :  { %988 = vmatpush.msra.mxu0 %v4905_v6  ;;  %753 = vmatpush.msrb.mxu2 %v4924_v8 }
 0x14f   :  { %767 = vmatpush.msrb.mxu1 %v4815_v51  ;;  %870 = vmatpush.msra.mxu3 %v4905_v6 }
 0x150   :  { %3795 = vmatmul.msk.f32.gmra.mxu3 %vm184_vm7, %v7518_v21  ;;  %3813 = vmatmul.msk.f32.gmra.mxu0 %vm182_vm5, %v7518_v21 }
 0x151   :  { %768 = vmatpush.msrb.mxu1 %v4820_v53  ;;  %871 = vmatpush.msra.mxu3 %v4924_v8 }
 0x152   :  { %989 = vmatpush.msra.mxu0 %v4924_v8  ;;  %754 = vmatpush.msrb.mxu2 %v4941_v9 }
 0x153   :  { %769 = vmatpush.msrb.mxu1 %v4826_v54  ;;  %872 = vmatpush.msra.mxu3 %v4941_v9 }
 0x154   :  { %990 = vmatpush.msra.mxu0 %v4941_v9  ;;  %755 = vmatpush.msrb.mxu2 %v4956_v10 }
 0x155   :  { %770 = vmatpush.msrb.mxu1 %v4842_v56  ;;  %873 = vmatpush.msra.mxu3 %v4956_v10 }
 0x156   :  { %991 = vmatpush.msra.mxu0 %v4956_v10  ;;  %756 = vmatpush.msrb.mxu2 %v4969_v11 }
 0x157   :  { %771 = vmatpush.msrb.mxu1 %v4844_v57  ;;  %874 = vmatpush.msra.mxu3 %v4969_v11 }
 0x158   :  { %3796 = vmatmul.msk.f32.gmra.mxu3 %vm185_vm8, %v7518_v21  ;;  %3814 = vmatmul.msk.f32.gmra.mxu0 %vm183_vm6, %v7518_v21 }
 0x159   :  { %772 = vmatpush.msrb.mxu1 %v4849_v59  ;;  %992 = vmatpush.msra.mxu0 %v4969_v11 }
 0x15a   :  { %757 = vmatpush.msrb.mxu2 %v4978_v12  ;;  %875 = vmatpush.msra.mxu3 %v4978_v12 }
 0x15b   :  { %773 = vmatpush.msrb.mxu1 %v4857_v61  ;;  %993 = vmatpush.msra.mxu0 %v4978_v12 }
 0x15c   :  { %758 = vmatpush.msrb.mxu2 %v4985_v13  ;;  %876 = vmatpush.msra.mxu3 %v4985_v13 }
 0x15d   :  { %774 = vmatpush.msrb.mxu1 %v4871_v62  ;;  %994 = vmatpush.msra.mxu0 %v4985_v13 }
 0x15e   :  { %759 = vmatpush.msrb.mxu2 %v4990_v14  ;;  %877 = vmatpush.msra.mxu3 %v4990_v14 }
 0x15f   :  { %775 = vmatpush.msrb.mxu1 %v4873_v63  ;;  %995 = vmatpush.msra.mxu0 %v4990_v14 }
 0x160   :  { %3797 = vmatmul.msk.f32.gmra.mxu3 %vm186_vm9, %v7518_v21  ;;  %3815 = vmatmul.msk.f32.gmra.mxu0 %vm184_vm7, %v7518_v21 }
 0x161   :  { %776 = vmatpush.msrb.mxu1 %v4878_v1  ;;  %760 = vmatpush.msrb.mxu2 %v5000_v15 }
 0x162   :  { %878 = vmatpush.msra.mxu3 %v5000_v15  ;;  %761 = vmatmul.f32.vlgmr.msrb.gmra.mxu2 %v4364_v49 }
 0x163   :  { %777 = vmatpush.msrb.mxu1 %v4886_v3  ;;  %843 = vmatpush.msra.mxu2 %v4667_v23 }
 0x164   :  { %996 = vmatpush.msra.mxu0 %v5000_v15 }
 0x165   :  { %778 = vmatpush.msrb.mxu1 %v4900_v4  ;;  %844 = vmatpush.msra.mxu2 %v4688_v25 }
 0x166   :  { %1119 = vmatpush.msrb.mxu0 %v4795_v47 }
 0x167   :  { %779 = vmatpush.msrb.mxu1 %v4902_v5  ;;  %845 = vmatpush.msra.mxu2 %v4690_v26 }
 0x168   :  { %3798 = vmatmul.msk.f32.gmra.mxu3 %vm187_vm10, %v7518_v21  ;;  %3816 = vmatmul.msk.f32.gmra.mxu0 %vm185_vm8, %v7518_v21 }
 0x169   :  { %780 = vmatpush.msrb.mxu1 %v4907_v7  ;;  %1120 = vmatpush.msrb.mxu0 %v4813_v50 }
 0x16a   :  { %781 = vmatmul.f32.vlgmr.msrb.gmra.mxu1 %v4364_v49  ;;  %846 = vmatpush.msra.mxu2 %v4696_v28  ;;  %v476_v49 = vperm.slane %v5102_v48, 0 }
 0x16b   :  { %883 = vmatpush.msra.mxu1 %v4795_v47  ;;  %1121 = vmatpush.msrb.mxu0 %v4815_v51 }
 0x16c   :  { %847 = vmatpush.msra.mxu2 %v4702_v29 }
 0x16d   :  { %884 = vmatpush.msra.mxu1 %v4813_v50  ;;  %1122 = vmatpush.msrb.mxu0 %v4820_v53 }
 0x16e   :  { %848 = vmatpush.msra.mxu2 %v4720_v31 }
 0x16f   :  { %885 = vmatpush.msra.mxu1 %v4815_v51  ;;  %1123 = vmatpush.msrb.mxu0 %v4826_v54 }
 0x170   :  { %3799 = vmatmul.msk.f32.vlgmr.msrb.gmra.mxu3 %vm178_vm1, %v7518_v21  ;;  %3817 = vmatmul.msk.f32.gmra.mxu0 %vm186_vm9, %v7518_v21 }
 0x171   :  { %886 = vmatpush.msra.mxu1 %v4820_v53  ;;  %1001 = vmatpush.msrb.mxu3 %v4795_v47 }
 0x172   :  { %1124 = vmatpush.msrb.mxu0 %v4842_v56  ;;  %849 = vmatpush.msra.mxu2 %v4722_v32 }
 0x173   :  { %887 = vmatpush.msra.mxu1 %v4826_v54  ;;  %1002 = vmatpush.msrb.mxu3 %v4813_v50 }
 0x174   :  { %1125 = vmatpush.msrb.mxu0 %v4844_v57  ;;  %850 = vmatpush.msra.mxu2 %v4728_v34 }
 0x175   :  { %888 = vmatpush.msra.mxu1 %v4842_v56  ;;  %1003 = vmatpush.msrb.mxu3 %v4815_v51 }
 0x176   :  { %1126 = vmatpush.msrb.mxu0 %v4849_v59  ;;  %851 = vmatpush.msra.mxu2 %v4736_v37 }
 0x177   :  { %889 = vmatpush.msra.mxu1 %v4844_v57  ;;  %1004 = vmatpush.msrb.mxu3 %v4820_v53 }
 0x178   :  { %3800 = vmatmul.msk.f32.gmra.mxu3 %vm179_vm2, %v7518_v21  ;;  %3818 = vmatmul.msk.f32.gmra.mxu0 %vm187_vm10, %v7518_v21 }
 0x179   :  { %890 = vmatpush.msra.mxu1 %v4849_v59  ;;  %1005 = vmatpush.msrb.mxu3 %v4826_v54 }
 0x17a   :  { %1127 = vmatpush.msrb.mxu0 %v4857_v61  ;;  %852 = vmatpush.msra.mxu2 %v4752_v39 }
 0x17b   :  { %891 = vmatpush.msra.mxu1 %v4857_v61  ;;  %1006 = vmatpush.msrb.mxu3 %v4842_v56 }
 0x17c   :  { %1128 = vmatpush.msrb.mxu0 %v4871_v62  ;;  %853 = vmatpush.msra.mxu2 %v4754_v40 }
 0x17d   :  { %892 = vmatpush.msra.mxu1 %v4871_v62  ;;  %1007 = vmatpush.msrb.mxu3 %v4844_v57  ;;  %v7908_v57 = vmov 0 }
 0x17e   :  { %1129 = vmatpush.msrb.mxu0 %v4873_v63  ;;  %854 = vmatpush.msra.mxu2 %v4760_v35 }
 0x17f   :  { %893 = vmatpush.msra.mxu1 %v4873_v63  ;;  %1008 = vmatpush.msrb.mxu3 %v4849_v59 }
 0x180   :  { %3801 = vmatmul.msk.f32.gmra.mxu3 %vm180_vm3, %v7518_v21  ;;  %1130 = vmatpush.msrb.mxu0 %v4878_v1 }
 0x181   :  { %894 = vmatpush.msra.mxu1 %v4878_v1  ;;  %1009 = vmatpush.msrb.mxu3 %v4857_v61 }
 0x182   :  { %855 = vmatpush.msra.mxu2 %v4766_v41  ;;  %1131 = vmatpush.msrb.mxu0 %v4886_v3 }
 0x183   :  { %895 = vmatpush.msra.mxu1 %v4886_v3  ;;  %1010 = vmatpush.msrb.mxu3 %v4871_v62 }
 0x184   :  { %856 = vmatpush.msra.mxu2 %v4783_v43  ;;  %1132 = vmatpush.msrb.mxu0 %v4900_v4 }
 0x185   :  { %896 = vmatpush.msra.mxu1 %v4900_v4  ;;  %1011 = vmatpush.msrb.mxu3 %v4873_v63 }
 0x186   :  { %857 = vmatpush.msra.mxu2 %v4785_v44  ;;  %1133 = vmatpush.msrb.mxu0 %v4902_v5 }
 0x187   :  { %897 = vmatpush.msra.mxu1 %v4902_v5  ;;  %1012 = vmatpush.msrb.mxu3 %v4878_v1 }
 0x188   :  { %3802 = vmatmul.msk.f32.gmra.mxu3 %vm181_vm4, %v7518_v21  ;;  %858 = vmatpush.msra.mxu2 %v4790_v46 }
 0x189   :  { %898 = vmatpush.msra.mxu1 %v4907_v7  ;;  %1013 = vmatpush.msrb.mxu3 %v4886_v3 }
 0x18a   :  { %961 = vmatpush.msrb.mxu2 %v4667_v23  ;;  %1134 = vmatpush.msrb.mxu0 %v4907_v7 }
 0x18b   :  { %1079 = vmatpush.msrb.mxu1 %v4667_v23  ;;  %1014 = vmatpush.msrb.mxu3 %v4900_v4 }
 0x18c   :  { %962 = vmatpush.msrb.mxu2 %v4688_v25 }
 0x18d   :  { %1080 = vmatpush.msrb.mxu1 %v4688_v25  ;;  %1015 = vmatpush.msrb.mxu3 %v4902_v5 }
 0x18e   :  { %963 = vmatpush.msrb.mxu2 %v4690_v26 }
 0x18f   :  { %1081 = vmatpush.msrb.mxu1 %v4690_v26  ;;  %1016 = vmatpush.msrb.mxu3 %v4907_v7  ;;  %v98_v7 = vadd.s32 256, %v4644_v18 }
 0x190   :  { %3803 = vmatmul.msk.f32.gmra.mxu3 %vm182_vm5, %v7518_v21  ;;  %964 = vmatpush.msrb.mxu2 %v4696_v28 }
 0x191   :  { %1082 = vmatpush.msrb.mxu1 %v4696_v28  ;;  %v117_v4 = vand.u32 127, %v98_v7 }
 0x192   :  { %965 = vmatpush.msrb.mxu2 %v4702_v29 }
 0x193   :  { %1083 = vmatpush.msrb.mxu1 %v4702_v29  ;;  %vm5129_vm12 = vcmp.lt.s32.totalorder %v117_v4, 32 }
 0x194   :  { %966 = vmatpush.msrb.mxu2 %v4720_v31 }
 0x195   :  { %1084 = vmatpush.msrb.mxu1 %v4720_v31 }
 0x196   :  { %967 = vmatpush.msrb.mxu2 %v4722_v32 }
 0x197   :  { %1085 = vmatpush.msrb.mxu1 %v4722_v32 }
 0x198   :  { %3804 = vmatmul.msk.f32.gmra.mxu3 %vm183_vm6, %v7518_v21  ;;  %968 = vmatpush.msrb.mxu2 %v4728_v34 }
 0x199   :  { %1086 = vmatpush.msrb.mxu1 %v4728_v34 }
 0x19a   :  { %969 = vmatpush.msrb.mxu2 %v4736_v37 }
 0x19b   :  { %1087 = vmatpush.msrb.mxu1 %v4736_v37 }
 0x19c   :  { %970 = vmatpush.msrb.mxu2 %v4752_v39 }
 0x19d   :  { %1088 = vmatpush.msrb.mxu1 %v4752_v39 }
 0x19e   :  { %971 = vmatpush.msrb.mxu2 %v4754_v40 }
 0x19f   :  { %1089 = vmatpush.msrb.mxu1 %v4754_v40 }
 0x1a0   :  { %3805 = vmatmul.msk.f32.gmra.mxu3 %vm184_vm7, %v7518_v21  ;;  %972 = vmatpush.msrb.mxu2 %v4760_v35 }
 0x1a1   :  { %1090 = vmatpush.msrb.mxu1 %v4760_v35 }
 0x1a2   :  { %973 = vmatpush.msrb.mxu2 %v4766_v41 }
 0x1a3   :  { %v5026_v16 = vpop.f32.mrf.mxu3  ;;  %1091 = vmatpush.msrb.mxu1 %v4766_v41 }
 0x1a4   :  { %974 = vmatpush.msrb.mxu2 %v4783_v43 }
 0x1a5   :  { %1092 = vmatpush.msrb.mxu1 %v4783_v43 }
 0x1a6   :  { %975 = vmatpush.msrb.mxu2 %v4785_v44 }
 0x1a7   :  { %1093 = vmatpush.msrb.mxu1 %v4785_v44 }
 0x1a8   :  { %3806 = vmatmul.msk.f32.gmra.mxu3 %vm185_vm8, %v7518_v21  ;;  %976 = vmatpush.msrb.mxu2 %v4790_v46 }
 0x1a9   :  { %1094 = vmatpush.msrb.mxu1 %v4790_v46 }
 0x1ab   :  { %v5047_v17 = vpop.f32.mrf.mxu3 }
 0x1ad   :  { %v5053_v19 = vpop.f32.mrf.mxu0 }
 0x1b0   :  { %3807 = vmatmul.msk.f32.gmra.mxu3 %vm186_vm9, %v7518_v21 }
 0x1b3   :  { %v505_v20 = vpop.f32.mrf.mxu3 }
 0x1b5   :  { %v5074_v22 = vpop.f32.mrf.mxu0 }
 0x1b8   :  { %3808 = vmatmul.msk.f32.gmra.mxu3 %vm187_vm10, %v7518_v21 }
 0x1bb   :  { %v508_v24 = vpop.f32.mrf.mxu3 }
 0x1bc   :  { %v5124_v3 = vadd.f32 %v508_v24, %v476_v49 }
 0x1bd   :  { %v599_v30 = vpop.f32.mrf.mxu0 }
 0x1be   :  { %7887 = vst [vmem:[#allocation32_spill] sm:$0xff] %v5124_v3 }
 0x1c3   :  { %v511_v36 = vpop.f32.mrf.mxu3 }
 0x1c4   :  { %v5108_v60 = vadd.f32 %v511_v36, %v476_v49 }
 0x1c5   :  { %v602_v42 = vpop.f32.mrf.mxu0 }
 0x1c6   :  { %7884 = vst [vmem:[#allocation29_spill] sm:$0xff] %v5108_v60 }
 0x1cb   :  { %v514_v55 = vpop.f32.mrf.mxu3 }
 0x1cc   :  { %v5110_v2 = vadd.f32 %v514_v55, %v476_v49  ;;  %v478_v55 = vperm.slane %v5102_v48, 2 }
 0x1cd   :  { %v605_v21 = vpop.f32.mrf.mxu0 }
 0x1ce   :  { %7885 = vst [vmem:[#allocation30_spill] sm:$0xff] %v5110_v2  ;;  %v5119_v5 = vsel %vm135_vm11, %v5110_v2, %v5108_v60  ;;  %v5153_v62 = vadd.f32 %v602_v42, %v478_v55 }
 0x1cf   :  { %7886 = vst [vmem:[#allocation31_spill] sm:$0xff] %v5119_v5  ;;  %v5133_v5 = vadd.f32 %v605_v21, %v478_v55  ;;  %v5149_v21 = vadd.f32 %v505_v20, %v476_v49 }
 0x1d0   :  { %7896 = vst [vmem:[#allocation39_spill] sm:$0xff] %v5153_v62 }
 0x1d1   :  { %7891 = vst [vmem:[#allocation34_spill] sm:$0xff] %v5133_v5 }
 0x1d2   :  { %7894 = vst [vmem:[#allocation37_spill] sm:$0xff] %v5149_v21 }
 0x1d3   :  { %v517_v36 = vpop.f32.mrf.mxu3 }
 0x1d4   :  { %v5126_v1 = vadd.f32 %v517_v36, %v476_v49 }
 0x1d5   :  { %v608_v60 = vpop.f32.mrf.mxu0 }
 0x1d6   :  { %7888 = vst [vmem:[#allocation33_spill] sm:$0xff] %v5126_v1  ;;  %v5135_v2 = vadd.f32 %v608_v60, %v478_v55  ;;  %v5142_v7 = vsel %vm135_vm11, %v5126_v1, %v5124_v3 }
 0x1d7   :  { %7893 = vst [vmem:[#allocation36_spill] sm:$0xff] %v5142_v7 }
 0x1d8   :  { %7892 = vst [vmem:[#allocation35_spill] sm:$0xff] %v5135_v2 }
 0x1db   :  { %v520_v24 = vpop.f32.mrf.mxu3 }
 0x1dc   :  { %v5151_v60 = vadd.f32 %v520_v24, %v476_v49  ;;  %v5168_v24 = vadd.f32 %v5047_v17, %v476_v49 }
 0x1dd   :  { %v611_v36 = vpop.f32.mrf.mxu0 }
 0x1de   :  { %7895 = vst [vmem:[#allocation38_spill] sm:$0xff] %v5151_v60  ;;  %v5155_v61 = vadd.f32 %v611_v36, %v478_v55  ;;  %v5161_v7 = vsel %vm135_vm11, %v5151_v60, %v5149_v21  ;;  %v5172_v36 = vadd.f32 %v599_v30, %v478_v55  ;;  %v5188_v30 = vadd.f32 %v5074_v22, %v478_v55 }
 0x1df   :  { %7898 = vst [vmem:[#allocation41_spill] sm:$0xff] %v5161_v7 }
 0x1e0   :  { %7897 = vst [vmem:[#allocation40_spill] sm:$0xff] %v5155_v61 }
 0x1e1   :  { %7899 = vst [vmem:[#allocation42_spill] sm:$0xff] %v5172_v36  ;;  %v701_v36 = vld [vmem:[%s7510_s8] sm:$0x7] }
 0x1e2   :  { %7902 = vst [vmem:[#allocation45_spill] sm:$0xff] %v5188_v30  ;;  %v5213_v21 = vperm.slane %v701_v36, 0 }
 0x1e3   :  { %v523_v20 = vpop.f32.mrf.mxu3 }
 0x1e4   :  { %v5170_v5 = vadd.f32 %v523_v20, %v476_v49  ;;  %v500_v20 = vadd.f32 %v5026_v16, %v476_v49  ;;  %v5201_v16 = vadd.f32 %v5053_v19, %v478_v55  ;;  %7907 = vst [vmem:[#allocation50_spill] sm:$0xff] %v5213_v21  ;;  %v742_v19 = vpop.f32.mrf.mxu1 }
 0x1e5   :  { %v614_v42 = vpop.f32.mrf.mxu0 }
 0x1e6   :  { %v5174_v2 = vadd.f32 %v614_v42, %v478_v55  ;;  %v5180_v7 = vsel %vm135_vm11, %v5170_v5, %v5168_v24  ;;  %7905 = vst [vmem:[#allocation48_spill] sm:$0xff] %v5201_v16 }
 0x1e7   :  { %7901 = vst [vmem:[#allocation44_spill] sm:$0xff] %v5180_v7 }
 0x1e8   :  { %7900 = vst [vmem:[#allocation43_spill] sm:$0xff] %v5174_v2  ;;  %v97_v2 = vadd.s32 128, %v4644_v18 }
 0x1eb   :  { %v526_v17 = vpop.f32.mrf.mxu3 }
 0x1ec   :  { %v527_v62 = vadd.f32 %v526_v17, %v476_v49  ;;  %v782_v50 = vpop.f32.mrf.mxu1 }
 0x1ed   :  { %v617_v61 = vpop.f32.mrf.mxu0 }
 0x1ee   :  { %v5190_v42 = vadd.f32 %v617_v61, %v478_v55  ;;  %v5194_v3 = vsel %vm135_vm11, %v527_v62, %v500_v20  ;;  %v715_v60 = vsel %vm135_vm11, %v500_v20, %v527_v62  ;;  %v477_v61 = vperm.slane %v5102_v48, 1 }
 0x1ef   :  { %7904 = vst [vmem:[#allocation47_spill] sm:$0xff] %v5194_v3 }
 0x1f0   :  { %7903 = vst [vmem:[#allocation46_spill] sm:$0xff] %v5190_v42 }
 0x1f3   :  { %v546_v4 = vpop.f32.mrf.mxu3 }
 0x1f5   :  { %v620_v1 = vpop.f32.mrf.mxu0 }
 0x1f6   :  { %v5203_v49 = vadd.f32 %v620_v1, %v478_v55  ;;  %v110_v1 = vand.u32 127, %v97_v2  ;;  %v743_v55 = vadd.f32 %v742_v19, %v5213_v21 }
 0x1f8   :  { %7906 = vst [vmem:[#allocation49_spill] sm:$0xff] %v5203_v49  ;;  %vm5219_vm13 = vcmp.lt.s32.totalorder %v110_v1, 32  ;;  %v785_v56 = vadd.f32 %v743_v55, %v715_v60 }
 0x1f9   :  { %v7909_v57 = vsel %vm5219_vm13, 4294967295, %v7908_v57 }
 0x1fa   :  { %7910 = vst [vmem:[#allocation51_spill] sm:$0xff] %v7909_v57  ;;  %v3819_v19 = vmul.f32 -1.442695, %v785_v56  ;;  %v5258_v56 = vadd.f32 %v546_v4, %v477_v61 }
 0x1fb   :  { %v549_v22 = vpop.f32.mrf.mxu3 }
 0x1fc   :  { %3960 = vpow2.f32 %v3819_v19  ;;  %7920 = vst [vmem:[#allocation61_spill] sm:$0xff] %v5258_v56 }
 0x202   :  { %v3961_v60 = vpop.eup %3960 }
 0x203   :  { %v552_v17 = vpop.f32.mrf.mxu3  ;;  %v789_v55 = vadd.f32 1.0, %v3961_v60  ;;  %v762_v60 = vpop.f32.mrf.mxu2 }
 0x204   :  { %v5239_v20 = vadd.f32 %v552_v17, %v477_v61 }
 0x205   :  { %3962 = vrcp.f32 %v789_v55  ;;  %v801_v4 = vand.u32 2147483648, %v789_v55  ;;  %vm795_vm15 = vweird.f32 %v789_v55 }
 0x206   :  { %7915 = vst [vmem:[#allocation56_spill] sm:$0xff] %v5239_v20 }
 0x207   :  { %v802_v42 = vor.u32 1.1754944e-38, %v801_v4 }
 0x20b   :  { %v555_v3 = vpop.f32.mrf.mxu3 }
 0x20c   :  { %v5231_v62 = vadd.f32 %v555_v3, %v477_v61  ;;  %v5247_v3 = vadd.f32 %v549_v22, %v477_v61 }
 0x20e   :  { %7913 = vst [vmem:[#allocation54_spill] sm:$0xff] %v5231_v62 }
 0x20f   :  { %7917 = vst [vmem:[#allocation58_spill] sm:$0xff] %v5247_v3 }
 0x213   :  { %v558_v7 = vpop.f32.mrf.mxu3 }
 0x214   :  { %v5223_v54 = vadd.f32 %v558_v7, %v477_v61  ;;  %v3963_v7 = vpop.eup %3962 }
 0x215   :  { %v791_v2 = vmul.f32 %v3963_v7, %v789_v55  ;;  %vm796_vm14 = vweird.f32 %v3963_v7 }
 0x216   :  { %7911 = vst [vmem:[#allocation52_spill] sm:$0xff] %v5223_v54  ;;  %vm797_vm1 = vmor %vm795_vm15, %vm796_vm14 }
 0x217   :  { %v792_v22 = vsub.f32 1.0, %v791_v2 }
 0x21b   :  { %v561_v59 = vpop.f32.mrf.mxu3 }
 0x21c   :  { %v5225_v53 = vadd.f32 %v561_v59, %v477_v61 }
 0x21e   :  { %7912 = vst [vmem:[#allocation53_spill] sm:$0xff] %v5225_v53 }
 0x223   :  { %v564_v51 = vpop.f32.mrf.mxu3 }
 0x224   :  { %v5233_v48 = vadd.f32 %v564_v51, %v477_v61 }
 0x226   :  { %7914 = vst [vmem:[#allocation55_spill] sm:$0xff] %v5233_v48 }
 0x22b   :  { %v567_v59 = vpop.f32.mrf.mxu3 }
 0x22c   :  { %v5241_v1 = vadd.f32 %v567_v59, %v477_v61  ;;  %v5255_v59 = vperm.slane %v701_v36, 1 }
 0x22e   :  { %7916 = vst [vmem:[#allocation57_spill] sm:$0xff] %v5241_v1  ;;  %v763_v53 = vadd.f32 %v762_v60, %v5255_v59  ;;  %v793_v1 = vmul.f32 %v3963_v7, %v792_v22 }
 0x22f   :  { %7919 = vst [vmem:[#allocation60_spill] sm:$0xff] %v5255_v59 }
 0x230   :  { %v794_v60 = vadd.f32 %v3963_v7, %v793_v1 }
 0x232   :  { %v798_v47 = vsel %vm797_vm1, %v3963_v7, %v794_v60 }
 0x233   :  { %v570_v51 = vpop.f32.mrf.mxu3 }
 0x234   :  { %v5249_v19 = vadd.f32 %v570_v51, %v477_v61 }
 0x236   :  { %7918 = vst [vmem:[#allocation59_spill] sm:$0xff] %v5249_v19 }
 0x23b   :  { %v573_v54 = vpop.f32.mrf.mxu3 }
 0x23c   :  { %v5260_v62 = vadd.f32 %v573_v54, %v477_v61  ;;  %v5270_v54 = vperm.slane %v701_v36, 2  ;;  %v799_v61 = vand.u32 2147483647, %v789_v55  ;;  %v717_v36 = vsel %vm5129_vm12, %v5201_v16, %v5203_v49  ;;  %v5539_v16 = vld [vmem:[#allocation6 + $0x40] sm:$0xff]  ;;  %v5544_v49 = vld [vmem:[#allocation6 + $0x28] sm:$0xff] }
 0x23e   :  { %7921 = vst [vmem:[#allocation62_spill] sm:$0xff] %v5260_v62  ;;  %v716_v51 = vsel %vm5219_vm13, %v5258_v56, %v5260_v62  ;;  %v783_v57 = vadd.f32 %v782_v50, %v5270_v54  ;;  %vm800_vm2 = vcmp.eq.f32.partialorder %v799_v61, 8.507059e+37  ;;  %v7954_v62 = vld [vmem:[#allocation32_spill] sm:$0xff] }
 0x23f   :  { %v805_v48 = vadd.f32 %v763_v53, %v716_v51  ;;  %v803_v53 = vsel %vm800_vm2, %v802_v42, %v798_v47 }
 0x241   :  { %v3820_v20 = vmul.f32 -1.442695, %v805_v48  ;;  %v825_v48 = vmul.f32 %v803_v53, %v783_v57 }
 0x243   :  { %3964 = vpow2.f32 %v3820_v20  ;;  %v826_v55 = vadd.f32 %v825_v48, %v717_v36 }
 0x249   :  { %v3965_v2 = vpop.eup %3964 }
 0x24a   :  { %v809_v30 = vadd.f32 1.0, %v3965_v2 }
 0x24c   :  { %3966 = vrcp.f32 %v809_v30  ;;  %v821_v51 = vand.u32 2147483648, %v809_v30  ;;  %v819_v7 = vand.u32 2147483647, %v809_v30  ;;  %vm815_vm4 = vweird.f32 %v809_v30 }
 0x24d   :  { %3968 = vtanh.f32 %v826_v55 }
 0x24e   :  { %v822_v50 = vor.u32 1.1754944e-38, %v821_v51  ;;  %vm820_vm6 = vcmp.eq.f32.partialorder %v819_v7, 8.507059e+37 }
 0x252   :  { %v3967_v20 = vpop.eup %3966 }
 0x253   :  { %v811_v1 = vmul.f32 %v3967_v20, %v809_v30  ;;  %vm816_vm3 = vweird.f32 %v3967_v20  ;;  %v3969_v4 = vpop.eup %3968 }
 0x254   :  { %vm817_vm5 = vmor %vm815_vm4, %vm816_vm3 }
 0x255   :  { %v812_v22 = vsub.f32 1.0, %v811_v1 }
 0x257   :  { %v813_v17 = vmul.f32 %v3967_v20, %v812_v22 }
 0x259   :  { %v814_v60 = vadd.f32 %v3967_v20, %v813_v17 }
 0x25b   :  { %v818_v47 = vsel %vm817_vm5, %v3967_v20, %v814_v60 }
 0x25c   :  { %v823_v57 = vsel %vm820_vm6, %v822_v50, %v818_v47 }
 0x25d   :  { %v828_v42 = vsub.f32 1.0, %v823_v57  ;;  %v830_v2 = vmul.f32 0.0, %v823_v57 }
 0x25f   :  { %v829_v61 = vmul.f32 %v3969_v4, %v828_v42  ;;  %v7923_v42 = vld [vmem:[#allocation46_spill] sm:$0xff]  ;;  %v7924_v4 = vld [vmem:[#allocation45_spill] sm:$0xff] }
 0x261   :  { %v5277_v53 = vadd.f32 %v830_v2, %v829_v61  ;;  %v842_v61 = vsel %vm5129_vm12, %v7924_v4, %v7923_v42 }
 0x263   :  { %859 = vmatmul.f32.vlgmr.msra.gmra.mxu2 %v5277_v53  ;;  %879 = vmatmul.f32.vlgmr.msra.gmra.mxu3 %v5277_v53 }
 0x264   :  { %899 = vmatmul.f32.vlgmr.msra.gmra.mxu1 %v5277_v53  ;;  %1099 = vmatpush.msra.mxu2 %v4694_v27 }
 0x265   :  { %1197 = vmatpush.msra.mxu3 %v4667_v23  ;;  %1217 = vmatpush.msra.mxu1 %v4694_v27 }
 0x266   :  { %1100 = vmatpush.msra.mxu2 %v4726_v33 }
 0x267   :  { %1198 = vmatpush.msra.mxu3 %v4688_v25  ;;  %1218 = vmatpush.msra.mxu1 %v4726_v33 }
 0x268   :  { %1101 = vmatpush.msra.mxu2 %v4757_v38 }
 0x269   :  { %1199 = vmatpush.msra.mxu3 %v4690_v26  ;;  %1219 = vmatpush.msra.mxu1 %v4757_v38 }
 0x26a   :  { %1102 = vmatpush.msra.mxu2 %v4788_v45 }
 0x26b   :  { %1200 = vmatpush.msra.mxu3 %v4696_v28  ;;  %1220 = vmatpush.msra.mxu1 %v4788_v45  ;;  %v840_v28 = vsel %vm135_vm11, %v5168_v24, %v5170_v5 }
 0x26c   :  { %1103 = vmatpush.msra.mxu2 %v4818_v52 }
 0x26d   :  { %1201 = vmatpush.msra.mxu3 %v4702_v29  ;;  %1221 = vmatpush.msra.mxu1 %v4818_v52 }
 0x26e   :  { %1104 = vmatpush.msra.mxu2 %v4847_v58 }
 0x26f   :  { %1202 = vmatpush.msra.mxu3 %v4720_v31  ;;  %1222 = vmatpush.msra.mxu1 %v4847_v58  ;;  %v841_v31 = vsel %vm5219_vm13, %v5247_v3, %v5249_v19 }
 0x270   :  { %1105 = vmatpush.msra.mxu2 %v4876_v0 }
 0x271   :  { %1203 = vmatpush.msra.mxu3 %v4722_v32  ;;  %1223 = vmatpush.msra.mxu1 %v4876_v0 }
 0x272   :  { %1106 = vmatpush.msra.mxu2 %v4905_v6 }
 0x273   :  { %1204 = vmatpush.msra.mxu3 %v4728_v34  ;;  %1224 = vmatpush.msra.mxu1 %v4905_v6 }
 0x274   :  { %1107 = vmatpush.msra.mxu2 %v4924_v8 }
 0x275   :  { %1205 = vmatpush.msra.mxu3 %v4736_v37  ;;  %1225 = vmatpush.msra.mxu1 %v4924_v8 }
 0x276   :  { %1108 = vmatpush.msra.mxu2 %v4941_v9 }
 0x277   :  { %1206 = vmatpush.msra.mxu3 %v4752_v39  ;;  %1226 = vmatpush.msra.mxu1 %v4941_v9 }
 0x278   :  { %1109 = vmatpush.msra.mxu2 %v4956_v10 }
 0x279   :  { %1207 = vmatpush.msra.mxu3 %v4754_v40  ;;  %1227 = vmatpush.msra.mxu1 %v4956_v10 }
 0x27a   :  { %1110 = vmatpush.msra.mxu2 %v4969_v11 }
 0x27b   :  { %1208 = vmatpush.msra.mxu3 %v4760_v35  ;;  %1228 = vmatpush.msra.mxu1 %v4969_v11 }
 0x27c   :  { %1111 = vmatpush.msra.mxu2 %v4978_v12 }
 0x27d   :  { %1209 = vmatpush.msra.mxu3 %v4766_v41  ;;  %1229 = vmatpush.msra.mxu1 %v4978_v12 }
 0x27e   :  { %1112 = vmatpush.msra.mxu2 %v4985_v13 }
 0x27f   :  { %1210 = vmatpush.msra.mxu3 %v4783_v43  ;;  %1230 = vmatpush.msra.mxu1 %v4985_v13 }
 0x280   :  { %1113 = vmatpush.msra.mxu2 %v4990_v14 }
 0x281   :  { %1211 = vmatpush.msra.mxu3 %v4785_v44  ;;  %1231 = vmatpush.msra.mxu1 %v4990_v14 }
 0x282   :  { %1114 = vmatpush.msra.mxu2 %v5000_v15 }
 0x283   :  { %1212 = vmatpush.msra.mxu3 %v4790_v46  ;;  %1232 = vmatpush.msra.mxu1 %v5000_v15 }
 0x2e1   :  { %v900_v36 = vpop.f32.mrf.mxu1 }
 0x2e2   :  { %v901_v51 = vadd.f32 %v900_v36, %v5270_v54  ;;  %v5391_v36 = vld [vmem:[#allocation6 + $0xc0] sm:$0xff] }
 0x2e6   :  { %v860_v23 = vpop.f32.mrf.mxu2  ;;  %v880_v25 = vpop.f32.mrf.mxu3 }
 0x2e7   :  { %v861_v26 = vadd.f32 %v860_v23, %v5213_v21  ;;  %v881_v27 = vadd.f32 %v880_v25, %v5255_v59 }
 0x2e9   :  { %v903_v32 = vadd.f32 %v861_v26, %v840_v28  ;;  %v923_v33 = vadd.f32 %v881_v27, %v841_v31 }
 0x2eb   :  { %v3821_v34 = vmul.f32 -1.442695, %v903_v32  ;;  %v3822_v37 = vmul.f32 -1.442695, %v923_v33 }
 0x2ed   :  { %3970 = vpow2.f32 %v3821_v34 }
 0x2ee   :  { %3972 = vpow2.f32 %v3822_v37  ;;  %v7925_v37 = vld [vmem:[#allocation13_spill] sm:$0xff] }
 0x2f3   :  { %v3971_v39 = vpop.eup %3970 }
 0x2f4   :  { %v3973_v40 = vpop.eup %3972  ;;  %v907_v35 = vadd.f32 1.0, %v3971_v39  ;;  %v5352_v39 = vld [vmem:[#allocation6 + $0x168] sm:$0xff] }
 0x2f5   :  { %v927_v41 = vadd.f32 1.0, %v3973_v40  ;;  %v5355_v40 = vld [vmem:[#allocation6 + $0x170] sm:$0xff] }
 0x2f6   :  { %3974 = vrcp.f32 %v907_v35  ;;  %v919_v30 = vand.u32 2147483648, %v907_v35  ;;  %v917_v20 = vand.u32 2147483647, %v907_v35  ;;  %vm913_vm8 = vweird.f32 %v907_v35 }
 0x2f7   :  { %3976 = vrcp.f32 %v927_v41  ;;  %v939_v47 = vand.u32 2147483648, %v927_v41  ;;  %vm933_vm15 = vweird.f32 %v927_v41  ;;  %v937_v2 = vand.u32 2147483647, %v927_v41 }
 0x2f8   :  { %v920_v22 = vor.u32 1.1754944e-38, %v919_v30  ;;  %vm918_vm10 = vcmp.eq.f32.partialorder %v917_v20, 8.507059e+37  ;;  %v5376_v30 = vld [vmem:[#allocation6 + $0x108] sm:$0xff]  ;;  %v5386_v20 = vld [vmem:[#allocation6 + $0xd8] sm:$0xff] }
 0x2f9   :  { %v940_v26 = vor.u32 1.1754944e-38, %v939_v47  ;;  %vm938_vm2 = vcmp.eq.f32.partialorder %v937_v2, 8.507059e+37  ;;  %v7942_v47 = vld [vmem:[#allocation28_spill] sm:$0xff] }
 0x2fc   :  { %v3975_v43 = vpop.eup %3974 }
 0x2fd   :  { %v3977_v44 = vpop.eup %3976  ;;  %v909_v46 = vmul.f32 %v3975_v43, %v907_v35  ;;  %vm914_vm7 = vweird.f32 %v3975_v43  ;;  %v7926_v35 = vld [vmem:[#allocation14_spill] sm:$0xff] }
 0x2fe   :  { %v929_v5 = vmul.f32 %v3977_v44, %v927_v41  ;;  %vm915_vm9 = vmor %vm913_vm8, %vm914_vm7  ;;  %vm934_vm14 = vweird.f32 %v3977_v44  ;;  %v5362_v41 = vld [vmem:[#allocation6 + $0x158] sm:$0xff] }
 0x2ff   :  { %v910_v24 = vsub.f32 1.0, %v909_v46  ;;  %vm935_vm1 = vmor %vm933_vm15, %vm934_vm14  ;;  %v7928_v46 = vld [vmem:[#allocation16_spill] sm:$0xff] }
 0x300   :  { %v930_v17 = vsub.f32 1.0, %v929_v5  ;;  %v5371_v5 = vld [vmem:[#allocation6 + $0x120] sm:$0xff]  ;;  %7950 = vst [vmem:[#allocation16_spill] sm:$0xff] %v5539_v16 }
 0x301   :  { %v911_v48 = vmul.f32 %v3975_v43, %v910_v24  ;;  %v7929_v24 = vld [vmem:[#allocation17_spill] sm:$0xff] }
 0x302   :  { %v931_v1 = vmul.f32 %v3977_v44, %v930_v17  ;;  %v7930_v17 = vld [vmem:[#allocation18_spill] sm:$0xff]  ;;  %7951 = vst [vmem:[#allocation17_spill] sm:$0xff] %v5544_v49 }
 0x303   :  { %v912_v55 = vadd.f32 %v3975_v43, %v911_v48  ;;  %v5381_v48 = vld [vmem:[#allocation6 + $0xf0] sm:$0xff] }
 0x304   :  { %v932_v50 = vadd.f32 %v3977_v44, %v931_v1  ;;  %v5396_v1 = vld [vmem:[#allocation6 + $0xa8] sm:$0xff] }
 0x305   :  { %v916_v7 = vsel %vm915_vm9, %v3975_v43, %v912_v55  ;;  %v7927_v43 = vld [vmem:[#allocation15_spill] sm:$0xff]  ;;  %v5401_v55 = vld [vmem:[#allocation6 + $0x90] sm:$0xff] }
 0x306   :  { %v921_v60 = vsel %vm918_vm10, %v920_v22, %v916_v7  ;;  %v936_v25 = vsel %vm935_vm1, %v3977_v44, %v932_v50  ;;  %v5366_v44 = vld [vmem:[#allocation6 + $0x138] sm:$0xff]  ;;  %v5416_v7 = vld [vmem:[#allocation6 + $0x48] sm:$0xff] }
 0x307   :  { %v943_v57 = vmul.f32 %v921_v60, %v901_v51  ;;  %v941_v27 = vsel %vm938_vm2, %v940_v26, %v936_v25  ;;  %v5406_v22 = vld [vmem:[#allocation6 + $0x78] sm:$0xff]  ;;  %v5411_v51 = vld [vmem:[#allocation6 + $0x60] sm:$0xff]  ;;  %v5421_v60 = vld [vmem:[#allocation6 + $0x30] sm:$0xff] }
 0x308   :  { %v946_v28 = vsub.f32 1.0, %v941_v27  ;;  %v948_v33 = vmul.f32 %v941_v27, %v5277_v53  ;;  %v5359_v53 = vld [vmem:[#allocation6 + $0x150] sm:$0xff]  ;;  %7939 = vst [vmem:[#allocation13_spill] sm:$0xff] %v5421_v60  ;;  %v5426_v50 = vld [vmem:[#allocation6 + $0x18] sm:$0xff]  ;;  %v7945_v25 = vld [vmem:[#allocation56_spill] sm:$0xff] }
 0x309   :  { %v944_v23 = vadd.f32 %v943_v57, %v842_v61  ;;  %7941 = vst [vmem:[#allocation14_spill] sm:$0xff] %v5426_v50  ;;  %v5431_v57 = vld [vmem:[#allocation6] sm:$0xff] }
 0x30a   :  { %7943 = vst [vmem:[#allocation15_spill] sm:$0xff] %v5431_v57 }
 0x30b   :  { %3978 = vtanh.f32 %v944_v23  ;;  %v7944_v23 = vld [vmem:[#allocation57_spill] sm:$0xff] }
 0x30c   :  { %v959_v26 = vsel %vm5219_vm13, %v7945_v25, %v7944_v23 }
 0x311   :  { %v3979_v31 = vpop.eup %3978 }
 0x312   :  { %v947_v32 = vmul.f32 %v3979_v31, %v946_v28 }
 0x314   :  { %v5346_v34 = vadd.f32 %v948_v33, %v947_v32  ;;  %v7946_v33 = vld [vmem:[#allocation38_spill] sm:$0xff] }
 0x316   :  { %977 = vmatmul.f32.vlgmr.msrb.gmra.mxu2 %v5346_v34  ;;  %997 = vmatmul.f32.vlgmr.msra.gmra.mxu0 %v5346_v34 }
 0x317   :  { %1017 = vmatmul.f32.vlgmr.msrb.gmra.mxu3 %v5346_v34  ;;  %1237 = vmatpush.msrb.mxu2 %v7925_v37  ;;  %v7947_v37 = vld [vmem:[#allocation37_spill] sm:$0xff] }
 0x318   :  { %1307 = vmatpush.msra.mxu0 %v5352_v39  ;;  %1327 = vmatpush.msrb.mxu3 %v5355_v40 }
 0x319   :  { %1238 = vmatpush.msrb.mxu2 %v7926_v35  ;;  %v958_v35 = vsel %vm135_vm11, %v7947_v37, %v7946_v33 }
 0x31a   :  { %1308 = vmatpush.msra.mxu0 %v5359_v53  ;;  %1328 = vmatpush.msrb.mxu3 %v5362_v41 }
 0x31b   :  { %1239 = vmatpush.msrb.mxu2 %v7927_v43 }
 0x31c   :  { %1309 = vmatpush.msra.mxu0 %v5366_v44  ;;  %1329 = vmatpush.msrb.mxu3 %v4757_v38  ;;  %v7931_v38 = vld [vmem:[#allocation19_spill] sm:$0xff] }
 0x31d   :  { %1240 = vmatpush.msrb.mxu2 %v7928_v46 }
 0x31e   :  { %1310 = vmatpush.msra.mxu0 %v5371_v5  ;;  %1330 = vmatpush.msrb.mxu3 %v4788_v45  ;;  %v7932_v45 = vld [vmem:[#allocation20_spill] sm:$0xff] }
 0x31f   :  { %1241 = vmatpush.msrb.mxu2 %v7929_v24 }
 0x320   :  { %1311 = vmatpush.msra.mxu0 %v5376_v30  ;;  %1331 = vmatpush.msrb.mxu3 %v4818_v52  ;;  %v7933_v52 = vld [vmem:[#allocation21_spill] sm:$0xff] }
 0x321   :  { %1242 = vmatpush.msrb.mxu2 %v7930_v17 }
 0x322   :  { %1312 = vmatpush.msra.mxu0 %v5381_v48  ;;  %1332 = vmatpush.msrb.mxu3 %v4847_v58  ;;  %v7934_v58 = vld [vmem:[#allocation22_spill] sm:$0xff] }
 0x323   :  { %1243 = vmatpush.msrb.mxu2 %v7931_v38 }
 0x324   :  { %1313 = vmatpush.msra.mxu0 %v5386_v20  ;;  %1333 = vmatpush.msrb.mxu3 %v4876_v0  ;;  %v7935_v0 = vld [vmem:[#allocation23_spill] sm:$0xff] }
 0x325   :  { %1244 = vmatpush.msrb.mxu2 %v7932_v45 }
 0x326   :  { %1314 = vmatpush.msra.mxu0 %v5391_v36  ;;  %1334 = vmatpush.msrb.mxu3 %v4905_v6  ;;  %v7936_v6 = vld [vmem:[#allocation24_spill] sm:$0xff] }
 0x327   :  { %1245 = vmatpush.msrb.mxu2 %v7933_v52 }
 0x328   :  { %1315 = vmatpush.msra.mxu0 %v5396_v1  ;;  %1335 = vmatpush.msrb.mxu3 %v4924_v8  ;;  %v7937_v8 = vld [vmem:[#allocation25_spill] sm:$0xff] }
 0x329   :  { %1246 = vmatpush.msrb.mxu2 %v7934_v58 }
 0x32a   :  { %1316 = vmatpush.msra.mxu0 %v5401_v55  ;;  %1336 = vmatpush.msrb.mxu3 %v4941_v9  ;;  %v7938_v9 = vld [vmem:[#allocation26_spill] sm:$0xff] }
 0x32b   :  { %1247 = vmatpush.msrb.mxu2 %v7935_v0 }
 0x32c   :  { %1317 = vmatpush.msra.mxu0 %v5406_v22  ;;  %1337 = vmatpush.msrb.mxu3 %v4956_v10  ;;  %v7940_v10 = vld [vmem:[#allocation27_spill] sm:$0xff] }
 0x32d   :  { %1248 = vmatpush.msrb.mxu2 %v7936_v6 }
 0x32e   :  { %1318 = vmatpush.msra.mxu0 %v5411_v51  ;;  %1338 = vmatpush.msrb.mxu3 %v4969_v11 }
 0x32f   :  { %1249 = vmatpush.msrb.mxu2 %v7937_v8 }
 0x330   :  { %1319 = vmatpush.msra.mxu0 %v5416_v7  ;;  %1339 = vmatpush.msrb.mxu3 %v4978_v12 }
 0x331   :  { %1250 = vmatpush.msrb.mxu2 %v7938_v9 }
 0x332   :  { %1320 = vmatpush.msra.mxu0 %v5421_v60  ;;  %1340 = vmatpush.msrb.mxu3 %v4985_v13 }
 0x333   :  { %1251 = vmatpush.msrb.mxu2 %v7940_v10 }
 0x334   :  { %1321 = vmatpush.msra.mxu0 %v5426_v50  ;;  %1341 = vmatpush.msrb.mxu3 %v4990_v14 }
 0x335   :  { %1252 = vmatpush.msrb.mxu2 %v7942_v47 }
 0x336   :  { %1322 = vmatpush.msra.mxu0 %v5431_v57  ;;  %1342 = vmatpush.msrb.mxu3 %v5000_v15 }
 0x393   :  { %v998_v61 = vpop.f32.mrf.mxu0 }
 0x394   :  { %v999_v2 = vadd.f32 %v998_v61, %v5255_v59 }
 0x396   :  { %v1041_v27 = vadd.f32 %v999_v2, %v959_v26 }
 0x398   :  { %v3824_v28 = vmul.f32 -1.442695, %v1041_v27 }
 0x399   :  { %v978_v31 = vpop.f32.mrf.mxu2 }
 0x39a   :  { %3980 = vpow2.f32 %v3824_v28  ;;  %v979_v32 = vadd.f32 %v978_v31, %v5213_v21  ;;  %v1018_v2 = vpop.f32.mrf.mxu3 }
 0x39b   :  { %v1019_v31 = vadd.f32 %v1018_v2, %v5270_v54 }
 0x39c   :  { %v1021_v43 = vadd.f32 %v979_v32, %v958_v35 }
 0x39e   :  { %v3823_v46 = vmul.f32 -1.442695, %v1021_v43 }
 0x3a0   :  { %v3981_v24 = vpop.eup %3980  ;;  %3982 = vpow2.f32 %v3823_v46  ;;  %v7948_v46 = vld [vmem:[#allocation43_spill] sm:$0xff] }
 0x3a1   :  { %v1045_v17 = vadd.f32 1.0, %v3981_v24  ;;  %v7949_v24 = vld [vmem:[#allocation42_spill] sm:$0xff] }
 0x3a3   :  { %3984 = vrcp.f32 %v1045_v17  ;;  %v1057_v43 = vand.u32 2147483648, %v1045_v17  ;;  %vm1051_vm8 = vweird.f32 %v1045_v17 }
 0x3a6   :  { %v3983_v38 = vpop.eup %3982 }
 0x3a7   :  { %v1025_v45 = vadd.f32 1.0, %v3983_v38  ;;  %v960_v38 = vsel %vm5129_vm12, %v7949_v24, %v7948_v46  ;;  %v7955_v24 = vld [vmem:[#allocation55_spill] sm:$0xff]  ;;  %v7956_v46 = vld [vmem:[#allocation54_spill] sm:$0xff] }
 0x3a8   :  { %v1077_v25 = vsel %vm5219_vm13, %v7956_v46, %v7955_v24 }
 0x3a9   :  { %3986 = vrcp.f32 %v1025_v45  ;;  %v3985_v52 = vpop.eup %3984  ;;  %v1037_v10 = vand.u32 2147483648, %v1025_v45  ;;  %v1035_v61 = vand.u32 2147483647, %v1025_v45  ;;  %vm1031_vm4 = vweird.f32 %v1025_v45 }
 0x3aa   :  { %v1047_v58 = vmul.f32 %v3985_v52, %v1045_v17  ;;  %vm1052_vm7 = vweird.f32 %v3985_v52 }
 0x3ab   :  { %v1038_v28 = vor.u32 1.1754944e-38, %v1037_v10  ;;  %vm1036_vm6 = vcmp.eq.f32.partialorder %v1035_v61, 8.507059e+37  ;;  %vm1053_vm9 = vmor %vm1051_vm8, %vm1052_vm7 }
 0x3ac   :  { %v1048_v8 = vsub.f32 1.0, %v1047_v58  ;;  %v1055_v58 = vand.u32 2147483647, %v1045_v17  ;;  %v5456_v17 = vld [vmem:[#allocation6 + $0x178] sm:$0xff] }
 0x3ae   :  { %v1049_v26 = vmul.f32 %v3985_v52, %v1048_v8  ;;  %v1058_v8 = vor.u32 1.1754944e-38, %v1057_v43  ;;  %vm1056_vm10 = vcmp.eq.f32.partialorder %v1055_v58, 8.507059e+37  ;;  %v5498_v43 = vld [vmem:[#allocation6 + $0xe0] sm:$0xff]  ;;  %v5505_v58 = vld [vmem:[#allocation6 + $0xc8] sm:$0xff] }
 0x3af   :  { %v3987_v0 = vpop.eup %3986 }
 0x3b0   :  { %v1027_v6 = vmul.f32 %v3987_v0, %v1025_v45  ;;  %vm1032_vm3 = vweird.f32 %v3987_v0  ;;  %v1050_v37 = vadd.f32 %v3985_v52, %v1049_v26  ;;  %v5470_v26 = vld [vmem:[#allocation6 + $0x140] sm:$0xff] }
 0x3b1   :  { %vm1033_vm5 = vmor %vm1031_vm4, %vm1032_vm3 }
 0x3b2   :  { %v1028_v9 = vsub.f32 1.0, %v1027_v6  ;;  %v1054_v45 = vsel %vm1053_vm9, %v3985_v52, %v1050_v37  ;;  %v5461_v52 = vld [vmem:[#allocation6 + $0x160] sm:$0xff]  ;;  %v5491_v37 = vld [vmem:[#allocation6 + $0xf8] sm:$0xff] }
 0x3b4   :  { %v1029_v47 = vmul.f32 %v3987_v0, %v1028_v9 }
 0x3b6   :  { %v1030_v27 = vadd.f32 %v3987_v0, %v1029_v47 }
 0x3b8   :  { %v1034_v32 = vsel %vm1033_vm5, %v3987_v0, %v1030_v27  ;;  %v1059_v0 = vsel %vm1056_vm10, %v1058_v8, %v1054_v45  ;;  %v5473_v27 = vld [vmem:[#allocation6 + $0x130] sm:$0xff]  ;;  %v5515_v8 = vld [vmem:[#allocation6 + $0xa0] sm:$0xff] }
 0x3b9   :  { %v1039_v33 = vsel %vm1036_vm6, %v1038_v28, %v1034_v32  ;;  %v1064_v9 = vsub.f32 1.0, %v1059_v0  ;;  %v1066_v61 = vmul.f32 %v1059_v0, %v5346_v34  ;;  %v5466_v34 = vld [vmem:[#allocation6 + $0x148] sm:$0xff]  ;;  %v5484_v32 = vld [vmem:[#allocation6 + $0x110] sm:$0xff]  ;;  %v5519_v0 = vld [vmem:[#allocation6 + $0x98] sm:$0xff] }
 0x3ba   :  { %v1061_v35 = vmul.f32 %v1039_v33, %v1019_v31  ;;  %v5477_v28 = vld [vmem:[#allocation6 + $0x128] sm:$0xff]  ;;  %v5480_v31 = vld [vmem:[#allocation6 + $0x118] sm:$0xff]  ;;  %v5487_v33 = vld [vmem:[#allocation6 + $0x100] sm:$0xff] }
 0x3bb   :  { %v5512_v45 = vld [vmem:[#allocation6 + $0xb0] sm:$0xff] }
 0x3bc   :  { %v1062_v6 = vadd.f32 %v1061_v35, %v960_v38  ;;  %v5494_v35 = vld [vmem:[#allocation6 + $0xe8] sm:$0xff]  ;;  %v5501_v38 = vld [vmem:[#allocation6 + $0xd0] sm:$0xff] }
 0x3be   :  { %3988 = vtanh.f32 %v1062_v6  ;;  %v5508_v6 = vld [vmem:[#allocation6 + $0xb8] sm:$0xff] }
 0x3c4   :  { %v3989_v10 = vpop.eup %3988 }
 0x3c5   :  { %v1065_v47 = vmul.f32 %v3989_v10, %v1064_v9  ;;  %v5522_v9 = vld [vmem:[#allocation6 + $0x88] sm:$0xff]  ;;  %v5526_v10 = vld [vmem:[#allocation6 + $0x80] sm:$0xff] }
 0x3c7   :  { %v5451_v2 = vadd.f32 %v1066_v61, %v1065_v47  ;;  %v5529_v47 = vld [vmem:[#allocation6 + $0x70] sm:$0xff]  ;;  %v5534_v61 = vld [vmem:[#allocation6 + $0x58] sm:$0xff] }
 0x3c9   :  { %1095 = vmatmul.f32.vlgmr.msrb.gmra.mxu1 %v5451_v2  ;;  %1115 = vmatmul.f32.vlgmr.msra.gmra.mxu2 %v5451_v2 }
 0x3ca   :  { %1135 = vmatmul.f32.vlgmr.msrb.gmra.mxu0 %v5451_v2  ;;  %1347 = vmatpush.msrb.mxu1 %v5456_v17 }
 0x3cb   :  { %1417 = vmatpush.msra.mxu2 %v5352_v39  ;;  %1437 = vmatpush.msrb.mxu0 %v5355_v40 }
 0x3cc   :  { %1348 = vmatpush.msrb.mxu1 %v5461_v52 }
 0x3cd   :  { %1418 = vmatpush.msra.mxu2 %v5359_v53  ;;  %1438 = vmatpush.msrb.mxu0 %v5362_v41 }
 0x3ce   :  { %1349 = vmatpush.msrb.mxu1 %v5466_v34 }
 0x3cf   :  { %1419 = vmatpush.msra.mxu2 %v5366_v44  ;;  %1439 = vmatpush.msrb.mxu0 %v5470_v26 }
 0x3d0   :  { %1350 = vmatpush.msrb.mxu1 %v5473_v27 }
 0x3d1   :  { %1420 = vmatpush.msra.mxu2 %v5371_v5  ;;  %1440 = vmatpush.msrb.mxu0 %v5477_v28 }
 0x3d2   :  { %1351 = vmatpush.msrb.mxu1 %v5480_v31 }
 0x3d3   :  { %1421 = vmatpush.msra.mxu2 %v5376_v30  ;;  %1441 = vmatpush.msrb.mxu0 %v5484_v32 }
 0x3d4   :  { %1352 = vmatpush.msrb.mxu1 %v5487_v33 }
 0x3d5   :  { %1422 = vmatpush.msra.mxu2 %v5381_v48  ;;  %1442 = vmatpush.msrb.mxu0 %v5491_v37 }
 0x3d6   :  { %1353 = vmatpush.msrb.mxu1 %v5494_v35 }
 0x3d7   :  { %1423 = vmatpush.msra.mxu2 %v5386_v20  ;;  %1443 = vmatpush.msrb.mxu0 %v5498_v43 }
 0x3d8   :  { %1354 = vmatpush.msrb.mxu1 %v5501_v38 }
 0x3d9   :  { %1424 = vmatpush.msra.mxu2 %v5391_v36  ;;  %1444 = vmatpush.msrb.mxu0 %v5505_v58 }
 0x3da   :  { %1355 = vmatpush.msrb.mxu1 %v5508_v6 }
 0x3db   :  { %1425 = vmatpush.msra.mxu2 %v5396_v1  ;;  %1445 = vmatpush.msrb.mxu0 %v5512_v45 }
 0x3dc   :  { %1356 = vmatpush.msrb.mxu1 %v5515_v8 }
 0x3dd   :  { %1426 = vmatpush.msra.mxu2 %v5401_v55  ;;  %1446 = vmatpush.msrb.mxu0 %v5519_v0 }
 0x3de   :  { %1357 = vmatpush.msrb.mxu1 %v5522_v9 }
 0x3df   :  { %1427 = vmatpush.msra.mxu2 %v5406_v22  ;;  %1447 = vmatpush.msrb.mxu0 %v5526_v10 }
 0x3e0   :  { %1358 = vmatpush.msrb.mxu1 %v5529_v47 }
 0x3e1   :  { %1428 = vmatpush.msra.mxu2 %v5411_v51  ;;  %1448 = vmatpush.msrb.mxu0 %v4969_v11  ;;  %v5549_v11 = vld [vmem:[#allocation6 + $0x10] sm:$0xff] }
 0x3e2   :  { %1359 = vmatpush.msrb.mxu1 %v5534_v61  ;;  %7952 = vst [vmem:[#allocation18_spill] sm:$0xff] %v5549_v11 }
 0x3e3   :  { %1429 = vmatpush.msra.mxu2 %v5416_v7  ;;  %1449 = vmatpush.msrb.mxu0 %v4978_v12 }
 0x3e4   :  { %1360 = vmatpush.msrb.mxu1 %v5539_v16 }
 0x3e5   :  { %1430 = vmatpush.msra.mxu2 %v5421_v60  ;;  %1450 = vmatpush.msrb.mxu0 %v4985_v13  ;;  %v7953_v13 = vld [vmem:[#allocation33_spill] sm:$0xff] }
 0x3e6   :  { %1361 = vmatpush.msrb.mxu1 %v5544_v49  ;;  %v1076_v4 = vsel %vm135_vm11, %v7954_v62, %v7953_v13 }
 0x3e7   :  { %1431 = vmatpush.msra.mxu2 %v5426_v50  ;;  %1451 = vmatpush.msrb.mxu0 %v4990_v14 }
 0x3e8   :  { %1362 = vmatpush.msrb.mxu1 %v5549_v11  ;;  %v7958_v11 = vld [vmem:[#allocation39_spill] sm:$0xff] }
 0x3e9   :  { %1432 = vmatpush.msra.mxu2 %v5431_v57  ;;  %1452 = vmatpush.msrb.mxu0 %v5000_v15 }
 0x446   :  { %v1096_v12 = vpop.f32.mrf.mxu1 }
 0x447   :  { %v1097_v56 = vadd.f32 %v1096_v12, %v5213_v21 }
 0x449   :  { %v1139_v42 = vadd.f32 %v1097_v56, %v1076_v4 }
 0x44b   :  { %v3825_v3 = vmul.f32 -1.442695, %v1139_v42 }
 0x44c   :  { %v1116_v19 = vpop.f32.mrf.mxu2 }
 0x44d   :  { %3990 = vpow2.f32 %v3825_v3  ;;  %v1117_v14 = vadd.f32 %v1116_v19, %v5255_v59  ;;  %v1136_v59 = vpop.f32.mrf.mxu0 }
 0x44f   :  { %v1159_v15 = vadd.f32 %v1117_v14, %v1077_v25 }
 0x451   :  { %v3826_v23 = vmul.f32 -1.442695, %v1159_v15 }
 0x453   :  { %v3991_v57 = vpop.eup %3990  ;;  %3992 = vpow2.f32 %v3826_v23 }
 0x454   :  { %v1143_v12 = vadd.f32 1.0, %v3991_v57  ;;  %v1137_v57 = vadd.f32 %v1136_v59, %v5270_v54 }
 0x456   :  { %3994 = vrcp.f32 %v1143_v12  ;;  %v1155_v3 = vand.u32 2147483648, %v1143_v12  ;;  %v1153_v19 = vand.u32 2147483647, %v1143_v12  ;;  %vm1149_vm15 = vweird.f32 %v1143_v12 }
 0x458   :  { %v1156_v14 = vor.u32 1.1754944e-38, %v1155_v3  ;;  %vm1154_vm2 = vcmp.eq.f32.partialorder %v1153_v19, 8.507059e+37 }
 0x459   :  { %v3993_v21 = vpop.eup %3992 }
 0x45a   :  { %v1163_v18 = vadd.f32 1.0, %v3993_v21 }
 0x45c   :  { %v3995_v62 = vpop.eup %3994  ;;  %3996 = vrcp.f32 %v1163_v18  ;;  %vm1169_vm4 = vweird.f32 %v1163_v18 }
 0x45d   :  { %v1145_v56 = vmul.f32 %v3995_v62, %v1143_v12  ;;  %vm1150_vm14 = vweird.f32 %v3995_v62 }
 0x45e   :  { %vm1151_vm1 = vmor %vm1149_vm15, %vm1150_vm14 }
 0x45f   :  { %v1146_v42 = vsub.f32 1.0, %v1145_v56  ;;  %v1175_v56 = vand.u32 2147483648, %v1163_v18 }
 0x461   :  { %v1147_v4 = vmul.f32 %v3995_v62, %v1146_v42  ;;  %v7957_v42 = vld [vmem:[#allocation40_spill] sm:$0xff] }
 0x462   :  { %v3997_v13 = vpop.eup %3996  ;;  %v1078_v50 = vsel %vm5129_vm12, %v7958_v11, %v7957_v42  ;;  %v7971_v42 = vld [vmem:[#allocation30_spill] sm:$0xff] }
 0x463   :  { %v1148_v29 = vadd.f32 %v3995_v62, %v1147_v4  ;;  %v1165_v25 = vmul.f32 %v3997_v13, %v1163_v18  ;;  %vm1170_vm3 = vweird.f32 %v3997_v13  ;;  %v1173_v4 = vand.u32 2147483647, %v1163_v18  ;;  %v5610_v18 = vld [vmem:[#allocation6 + $0x68] sm:$0xff] }
 0x464   :  { %vm1171_vm5 = vmor %vm1169_vm4, %vm1170_vm3 }
 0x465   :  { %v1152_v23 = vsel %vm1151_vm1, %v3995_v62, %v1148_v29  ;;  %v1166_v21 = vsub.f32 1.0, %v1165_v25  ;;  %v1176_v29 = vor.u32 1.1754944e-38, %v1175_v56  ;;  %vm1174_vm6 = vcmp.eq.f32.partialorder %v1173_v4, 8.507059e+37  ;;  %v7966_v56 = vld [vmem:[#allocation60_spill] sm:$0xff] }
 0x466   :  { %v1157_v15 = vsel %vm1154_vm2, %v1156_v14, %v1152_v23  ;;  %v7964_v23 = vld [vmem:[#allocation15_spill] sm:$0xff] }
 0x467   :  { %v1179_v46 = vmul.f32 %v1157_v15, %v1137_v57  ;;  %v1167_v24 = vmul.f32 %v3997_v13, %v1166_v21  ;;  %v5630_v21 = vld [vmem:[#allocation6 + $0x8] sm:$0xff] }
 0x468   :  { %7965 = vst [vmem:[#allocation21_spill] sm:$0xff] %v5630_v21 }
 0x469   :  { %v1180_v12 = vadd.f32 %v1179_v46, %v1078_v50  ;;  %v1168_v49 = vadd.f32 %v3997_v13, %v1167_v24  ;;  %v5620_v50 = vld [vmem:[#allocation6 + $0x38] sm:$0xff]  ;;  %v7960_v46 = vld [vmem:[#allocation17_spill] sm:$0xff]  ;;  %v7961_v24 = vld [vmem:[#allocation14_spill] sm:$0xff] }
 0x46a   :  { %7959 = vst [vmem:[#allocation19_spill] sm:$0xff] %v5620_v50 }
 0x46b   :  { %3998 = vtanh.f32 %v1180_v12  ;;  %v1172_v59 = vsel %vm1171_vm5, %v3997_v13, %v1168_v49  ;;  %v5615_v49 = vld [vmem:[#allocation6 + $0x50] sm:$0xff]  ;;  %v7967_v12 = vld [vmem:[#allocation53_spill] sm:$0xff] }
 0x46c   :  { %v1177_v62 = vsel %vm1174_vm6, %v1176_v29, %v1172_v59  ;;  %v7963_v13 = vld [vmem:[#allocation18_spill] sm:$0xff]  ;;  %v7968_v59 = vld [vmem:[#allocation52_spill] sm:$0xff] }
 0x46d   :  { %v1182_v3 = vsub.f32 1.0, %v1177_v62  ;;  %v1184_v14 = vmul.f32 %v1177_v62, %v5451_v2  ;;  %v5625_v2 = vld [vmem:[#allocation6 + $0x20] sm:$0xff]  ;;  %v1195_v62 = vsel %vm5219_vm13, %v7968_v59, %v7967_v12 }
 0x46e   :  { %7962 = vst [vmem:[#allocation20_spill] sm:$0xff] %v5625_v2 }
 0x471   :  { %v3999_v19 = vpop.eup %3998 }
 0x472   :  { %v1183_v25 = vmul.f32 %v3999_v19, %v1182_v3 }
 0x474   :  { %v5570_v57 = vadd.f32 %v1184_v14, %v1183_v25  ;;  %v7970_v14 = vld [vmem:[#allocation50_spill] sm:$0xff] }
 0x476   :  { %1213 = vmatmul.f32.vlgmr.msra.gmra.mxu3 %v5570_v57  ;;  %1233 = vmatmul.f32.vlgmr.msra.gmra.mxu1 %v5570_v57 }
 0x477   :  { %1253 = vmatmul.f32.vlgmr.msrb.gmra.mxu2 %v5570_v57  ;;  %1457 = vmatpush.msra.mxu3 %v5456_v17 }
 0x478   :  { %1527 = vmatpush.msra.mxu1 %v5352_v39  ;;  %1547 = vmatpush.msrb.mxu2 %v5355_v40 }
 0x479   :  { %1458 = vmatpush.msra.mxu3 %v5461_v52 }
 0x47a   :  { %1528 = vmatpush.msra.mxu1 %v5359_v53  ;;  %1548 = vmatpush.msrb.mxu2 %v5362_v41 }
 0x47b   :  { %1459 = vmatpush.msra.mxu3 %v5466_v34 }
 0x47c   :  { %1529 = vmatpush.msra.mxu1 %v5366_v44  ;;  %1549 = vmatpush.msrb.mxu2 %v5470_v26 }
 0x47d   :  { %1460 = vmatpush.msra.mxu3 %v5473_v27 }
 0x47e   :  { %1530 = vmatpush.msra.mxu1 %v5371_v5  ;;  %1550 = vmatpush.msrb.mxu2 %v5477_v28 }
 0x47f   :  { %1461 = vmatpush.msra.mxu3 %v5480_v31 }
 0x480   :  { %1531 = vmatpush.msra.mxu1 %v5376_v30  ;;  %1551 = vmatpush.msrb.mxu2 %v5484_v32 }
 0x481   :  { %1462 = vmatpush.msra.mxu3 %v5487_v33 }
 0x482   :  { %1532 = vmatpush.msra.mxu1 %v5381_v48  ;;  %1552 = vmatpush.msrb.mxu2 %v5491_v37 }
 0x483   :  { %1463 = vmatpush.msra.mxu3 %v5494_v35 }
 0x484   :  { %1533 = vmatpush.msra.mxu1 %v5386_v20  ;;  %1553 = vmatpush.msrb.mxu2 %v5498_v43 }
 0x485   :  { %1464 = vmatpush.msra.mxu3 %v5501_v38 }
 0x486   :  { %1534 = vmatpush.msra.mxu1 %v5391_v36  ;;  %1554 = vmatpush.msrb.mxu2 %v5505_v58 }
 0x487   :  { %1465 = vmatpush.msra.mxu3 %v5508_v6 }
 0x488   :  { %1535 = vmatpush.msra.mxu1 %v5396_v1  ;;  %1555 = vmatpush.msrb.mxu2 %v5512_v45 }
 0x489   :  { %1466 = vmatpush.msra.mxu3 %v5515_v8 }
 0x48a   :  { %1536 = vmatpush.msra.mxu1 %v5401_v55  ;;  %1556 = vmatpush.msrb.mxu2 %v5519_v0 }
 0x48b   :  { %1467 = vmatpush.msra.mxu3 %v5522_v9 }
 0x48c   :  { %1537 = vmatpush.msra.mxu1 %v5406_v22  ;;  %1557 = vmatpush.msrb.mxu2 %v5526_v10 }
 0x48d   :  { %1468 = vmatpush.msra.mxu3 %v5529_v47 }
 0x48e   :  { %1538 = vmatpush.msra.mxu1 %v5411_v51  ;;  %1558 = vmatpush.msrb.mxu2 %v5610_v18 }
 0x48f   :  { %1469 = vmatpush.msra.mxu3 %v5534_v61 }
 0x490   :  { %1539 = vmatpush.msra.mxu1 %v5416_v7  ;;  %1559 = vmatpush.msrb.mxu2 %v5615_v49 }
 0x491   :  { %1470 = vmatpush.msra.mxu3 %v5539_v16 }
 0x492   :  { %1540 = vmatpush.msra.mxu1 %v5421_v60  ;;  %1560 = vmatpush.msrb.mxu2 %v5620_v50  ;;  %v7975_v60 = vld [vmem:[#allocation34_spill] sm:$0xff] }
 0x493   :  { %1471 = vmatpush.msra.mxu3 %v7960_v46 }
 0x494   :  { %1541 = vmatpush.msra.mxu1 %v7961_v24  ;;  %1561 = vmatpush.msrb.mxu2 %v5625_v2 }
 0x495   :  { %1472 = vmatpush.msra.mxu3 %v7963_v13 }
 0x496   :  { %1542 = vmatpush.msra.mxu1 %v7964_v23  ;;  %1562 = vmatpush.msrb.mxu2 %v5630_v21  ;;  %v7972_v23 = vld [vmem:[#allocation29_spill] sm:$0xff] }
 0x497   :  { %v1194_v2 = vsel %vm135_vm11, %v7972_v23, %v7971_v42 }
 0x4f3   :  { %v1234_v15 = vpop.f32.mrf.mxu1 }
 0x4f4   :  { %v1235_v4 = vadd.f32 %v1234_v15, %v7966_v56 }
 0x4f6   :  { %v1277_v3 = vadd.f32 %v1235_v4, %v1195_v62 }
 0x4f8   :  { %v3828_v19 = vmul.f32 -1.442695, %v1277_v3 }
 0x4f9   :  { %v1214_v25 = vpop.f32.mrf.mxu3 }
 0x4fa   :  { %4000 = vpow2.f32 %v3828_v19  ;;  %v1215_v11 = vadd.f32 %v1214_v25, %v7970_v14 }
 0x4fc   :  { %v1257_v21 = vadd.f32 %v1215_v11, %v1194_v2  ;;  %v1254_v11 = vpop.f32.mrf.mxu2 }
 0x4fe   :  { %v3827_v24 = vmul.f32 -1.442695, %v1257_v21 }
 0x500   :  { %v4001_v46 = vpop.eup %4000  ;;  %4002 = vpow2.f32 %v3827_v24  ;;  %v1255_v24 = vadd.f32 %v1254_v11, %v5270_v54 }
 0x501   :  { %v1281_v15 = vadd.f32 1.0, %v4001_v46 }
 0x503   :  { %4004 = vrcp.f32 %v1281_v15  ;;  %v1293_v50 = vand.u32 2147483648, %v1281_v15  ;;  %vm1287_vm14 = vweird.f32 %v1281_v15 }
 0x506   :  { %v4003_v56 = vpop.eup %4002 }
 0x507   :  { %v1261_v29 = vadd.f32 1.0, %v4003_v56 }
 0x509   :  { %4006 = vrcp.f32 %v1261_v29  ;;  %v4005_v4 = vpop.eup %4004  ;;  %v1273_v12 = vand.u32 2147483648, %v1261_v29  ;;  %v1271_v13 = vand.u32 2147483647, %v1261_v29  ;;  %vm1267_vm11 = vweird.f32 %v1261_v29 }
 0x50a   :  { %v1283_v62 = vmul.f32 %v4005_v4, %v1281_v15  ;;  %vm1288_vm10 = vweird.f32 %v4005_v4 }
 0x50b   :  { %v1274_v46 = vor.u32 1.1754944e-38, %v1273_v12  ;;  %vm1272_vm9 = vcmp.eq.f32.partialorder %v1271_v13, 8.507059e+37  ;;  %vm1289_vm15 = vmor %vm1287_vm14, %vm1288_vm10  ;;  %v1294_v12 = vor.u32 1.1754944e-38, %v1293_v50  ;;  %v7977_v50 = vld [vmem:[#allocation19_spill] sm:$0xff] }
 0x50c   :  { %v1284_v59 = vsub.f32 1.0, %v1283_v62 }
 0x50e   :  { %v1285_v42 = vmul.f32 %v4005_v4, %v1284_v59  ;;  %v1291_v59 = vand.u32 2147483647, %v1281_v15  ;;  %v7978_v15 = vld [vmem:[#allocation17_spill] sm:$0xff] }
 0x50f   :  { %v4007_v3 = vpop.eup %4006 }
 0x510   :  { %v1263_v19 = vmul.f32 %v4007_v3, %v1261_v29  ;;  %vm1268_vm7 = vweird.f32 %v4007_v3  ;;  %v1286_v21 = vadd.f32 %v4005_v4, %v1285_v42  ;;  %vm1292_vm1 = vcmp.eq.f32.partialorder %v1291_v59, 8.507059e+37 }
 0x511   :  { %vm1269_vm8 = vmor %vm1267_vm11, %vm1268_vm7 }
 0x512   :  { %v1264_v25 = vsub.f32 1.0, %v1263_v19  ;;  %v7974_v19 = vld [vmem:[#allocation35_spill] sm:$0xff] }
 0x514   :  { %v1265_v14 = vmul.f32 %v4007_v3, %v1264_v25  ;;  %v1196_v25 = vsel %vm5129_vm12, %v7975_v60, %v7974_v19 }
 0x516   :  { %v1266_v2 = vadd.f32 %v4007_v3, %v1265_v14  ;;  %v1290_v14 = vsel %vm1289_vm15, %v4005_v4, %v1286_v21  ;;  %v7979_v4 = vld [vmem:[#allocation14_spill] sm:$0xff]  ;;  %v7982_v21 = vld [vmem:[#allocation15_spill] sm:$0xff] }
 0x518   :  { %v1270_v23 = vsel %vm1269_vm8, %v4007_v3, %v1266_v2  ;;  %v1295_v3 = vsel %vm1292_vm1, %v1294_v12, %v1290_v14 }
 0x519   :  { %v1275_v56 = vsel %vm1272_vm9, %v1274_v46, %v1270_v23  ;;  %v1300_v13 = vsub.f32 1.0, %v1295_v3  ;;  %v1302_v2 = vmul.f32 %v1295_v3, %v5570_v57  ;;  %v7976_v57 = vld [vmem:[#allocation13_spill] sm:$0xff]  ;;  %v7981_v23 = vld [vmem:[#allocation18_spill] sm:$0xff] }
 0x51a   :  { %v1297_v62 = vmul.f32 %v1275_v56, %v1255_v24  ;;  %v7980_v24 = vld [vmem:[#allocation20_spill] sm:$0xff]  ;;  %v7983_v56 = vld [vmem:[#allocation21_spill] sm:$0xff] }
 0x51c   :  { %v1298_v29 = vadd.f32 %v1297_v62, %v1196_v25  ;;  %v7984_v25 = vld [vmem:[#allocation50_spill] sm:$0xff] }
 0x51e   :  { %4008 = vtanh.f32 %v1298_v29  ;;  %v7985_v29 = vld [vmem:[#allocation31_spill] sm:$0xff] }
 0x524   :  { %v4009_v42 = vpop.eup %4008 }
 0x525   :  { %v1301_v11 = vmul.f32 %v4009_v42, %v1300_v13  ;;  %v7986_v13 = vld [vmem:[#allocation60_spill] sm:$0xff] }
 0x527   :  { %v5649_v46 = vadd.f32 %v1302_v2, %v1301_v11  ;;  %v7988_v2 = vld [vmem:[#allocation53_spill] sm:$0xff] }
 0x529   :  { %1323 = vmatmul.f32.vlgmr.msra.gmra.mxu0 %v5649_v46  ;;  %1343 = vmatmul.f32.vlgmr.msrb.gmra.mxu3 %v5649_v46 }
 0x52a   :  { %1363 = vmatmul.f32.vlgmr.msrb.gmra.mxu1 %v5649_v46  ;;  %1567 = vmatpush.msra.mxu0 %v5456_v17 }
 0x52b   :  { %1637 = vmatpush.msrb.mxu3 %v5352_v39  ;;  %1657 = vmatpush.msrb.mxu1 %v5355_v40 }
 0x52c   :  { %1568 = vmatpush.msra.mxu0 %v5461_v52 }
 0x52d   :  { %1638 = vmatpush.msrb.mxu3 %v5359_v53  ;;  %1658 = vmatpush.msrb.mxu1 %v5362_v41 }
 0x52e   :  { %1569 = vmatpush.msra.mxu0 %v5466_v34 }
 0x52f   :  { %1639 = vmatpush.msrb.mxu3 %v5366_v44  ;;  %1659 = vmatpush.msrb.mxu1 %v5470_v26 }
 0x530   :  { %1570 = vmatpush.msra.mxu0 %v5473_v27 }
 0x531   :  { %1640 = vmatpush.msrb.mxu3 %v5371_v5  ;;  %1660 = vmatpush.msrb.mxu1 %v5477_v28 }
 0x532   :  { %1571 = vmatpush.msra.mxu0 %v5480_v31 }
 0x533   :  { %1641 = vmatpush.msrb.mxu3 %v5376_v30  ;;  %1661 = vmatpush.msrb.mxu1 %v5484_v32 }
 0x534   :  { %1572 = vmatpush.msra.mxu0 %v5487_v33 }
 0x535   :  { %1642 = vmatpush.msrb.mxu3 %v5381_v48  ;;  %1662 = vmatpush.msrb.mxu1 %v5491_v37 }
 0x536   :  { %1573 = vmatpush.msra.mxu0 %v5494_v35 }
 0x537   :  { %1643 = vmatpush.msrb.mxu3 %v5386_v20  ;;  %1663 = vmatpush.msrb.mxu1 %v5498_v43 }
 0x538   :  { %1574 = vmatpush.msra.mxu0 %v5501_v38 }
 0x539   :  { %1644 = vmatpush.msrb.mxu3 %v5391_v36  ;;  %1664 = vmatpush.msrb.mxu1 %v5505_v58 }
 0x53a   :  { %1575 = vmatpush.msra.mxu0 %v5508_v6 }
 0x53b   :  { %1645 = vmatpush.msrb.mxu3 %v5396_v1  ;;  %1665 = vmatpush.msrb.mxu1 %v5512_v45 }
 0x53c   :  { %1576 = vmatpush.msra.mxu0 %v5515_v8 }
 0x53d   :  { %1646 = vmatpush.msrb.mxu3 %v5401_v55  ;;  %1666 = vmatpush.msrb.mxu1 %v5519_v0 }
 0x53e   :  { %1577 = vmatpush.msra.mxu0 %v5522_v9 }
 0x53f   :  { %1647 = vmatpush.msrb.mxu3 %v5406_v22  ;;  %1667 = vmatpush.msrb.mxu1 %v5526_v10 }
 0x540   :  { %1578 = vmatpush.msra.mxu0 %v5529_v47 }
 0x541   :  { %1648 = vmatpush.msrb.mxu3 %v5411_v51  ;;  %1668 = vmatpush.msrb.mxu1 %v5610_v18 }
 0x542   :  { %1579 = vmatpush.msra.mxu0 %v5534_v61 }
 0x543   :  { %1649 = vmatpush.msrb.mxu3 %v5416_v7  ;;  %1669 = vmatpush.msrb.mxu1 %v5615_v49 }
 0x544   :  { %1580 = vmatpush.msra.mxu0 %v5539_v16 }
 0x545   :  { %1650 = vmatpush.msrb.mxu3 %v7976_v57  ;;  %1670 = vmatpush.msrb.mxu1 %v7977_v50 }
 0x546   :  { %1581 = vmatpush.msra.mxu0 %v7978_v15 }
 0x547   :  { %1651 = vmatpush.msrb.mxu3 %v7979_v4  ;;  %1671 = vmatpush.msrb.mxu1 %v7980_v24  ;;  %v7989_v24 = vld [vmem:[#allocation52_spill] sm:$0xff] }
 0x548   :  { %1582 = vmatpush.msra.mxu0 %v7981_v23  ;;  %v7990_v4 = vsel %vm5219_vm13, %v7988_v2, %v7989_v24 }
 0x549   :  { %1652 = vmatpush.msrb.mxu3 %v7982_v21  ;;  %1672 = vmatpush.msrb.mxu1 %v7983_v56 }
 0x5a6   :  { %v1324_v62 = vpop.f32.mrf.mxu0 }
 0x5a7   :  { %v1325_v59 = vadd.f32 %v1324_v62, %v7984_v25 }
 0x5a9   :  { %v1367_v14 = vadd.f32 %v1325_v59, %v7985_v29 }
 0x5ab   :  { %v3829_v12 = vmul.f32 -1.442695, %v1367_v14 }
 0x5ac   :  { %v1344_v3 = vpop.f32.mrf.mxu3 }
 0x5ad   :  { %4010 = vpow2.f32 %v3829_v12  ;;  %v1345_v42 = vadd.f32 %v1344_v3, %v7986_v13  ;;  %v1364_v13 = vpop.f32.mrf.mxu1 }
 0x5af   :  { %v1387_v23 = vadd.f32 %v1345_v42, %v7990_v4 }
 0x5b1   :  { %v3830_v15 = vmul.f32 -1.442695, %v1387_v23 }
 0x5b3   :  { %v4011_v21 = vpop.eup %4010  ;;  %4012 = vpow2.f32 %v3830_v15  ;;  %v1365_v15 = vadd.f32 %v1364_v13, %v5270_v54 }
 0x5b4   :  { %v1371_v56 = vadd.f32 1.0, %v4011_v21 }
 0x5b6   :  { %4014 = vrcp.f32 %v1371_v56  ;;  %v1383_v14 = vand.u32 2147483648, %v1371_v56  ;;  %v1381_v3 = vand.u32 2147483647, %v1371_v56  ;;  %vm1377_vm3 = vweird.f32 %v1371_v56 }
 0x5b8   :  { %v1384_v24 = vor.u32 1.1754944e-38, %v1383_v14  ;;  %vm1382_vm5 = vcmp.eq.f32.partialorder %v1381_v3, 8.507059e+37 }
 0x5b9   :  { %v4013_v50 = vpop.eup %4012 }
 0x5ba   :  { %v1391_v62 = vadd.f32 1.0, %v4013_v50 }
 0x5bc   :  { %v4015_v25 = vpop.eup %4014  ;;  %4016 = vrcp.f32 %v1391_v62  ;;  %vm1397_vm7 = vweird.f32 %v1391_v62 }
 0x5bd   :  { %v1373_v59 = vmul.f32 %v4015_v25, %v1371_v56  ;;  %vm1378_vm2 = vweird.f32 %v4015_v25 }
 0x5be   :  { %vm1379_vm4 = vmor %vm1377_vm3, %vm1378_vm2 }
 0x5bf   :  { %v1374_v29 = vsub.f32 1.0, %v1373_v59  ;;  %v1403_v59 = vand.u32 2147483648, %v1391_v62 }
 0x5c1   :  { %v1375_v12 = vmul.f32 %v4015_v25, %v1374_v29  ;;  %v1401_v29 = vand.u32 2147483647, %v1391_v62 }
 0x5c2   :  { %v4017_v11 = vpop.eup %4016 }
 0x5c3   :  { %v1376_v57 = vadd.f32 %v4015_v25, %v1375_v12  ;;  %v1393_v4 = vmul.f32 %v4017_v11, %v1391_v62  ;;  %vm1398_vm6 = vweird.f32 %v4017_v11  ;;  %v7991_v12 = vsel %vm5129_vm12, %v7974_v19, %v7975_v60 }
 0x5c4   :  { %vm1399_vm11 = vmor %vm1397_vm7, %vm1398_vm6  ;;  %vm1402_vm8 = vcmp.eq.f32.partialorder %v1401_v29, 8.507059e+37 }
 0x5c5   :  { %v1380_v23 = vsel %vm1379_vm4, %v4015_v25, %v1376_v57  ;;  %v1394_v50 = vsub.f32 1.0, %v1393_v4  ;;  %v1404_v57 = vor.u32 1.1754944e-38, %v1403_v59 }
 0x5c6   :  { %v1385_v21 = vsel %vm1382_vm5, %v1384_v24, %v1380_v23 }
 0x5c7   :  { %v1407_v42 = vmul.f32 %v1385_v21, %v1365_v15  ;;  %v1395_v2 = vmul.f32 %v4017_v11, %v1394_v50 }
 0x5c9   :  { %v1408_v56 = vadd.f32 %v1407_v42, %v7991_v12  ;;  %v1396_v16 = vadd.f32 %v4017_v11, %v1395_v2 }
 0x5cb   :  { %4018 = vtanh.f32 %v1408_v56  ;;  %v1400_v13 = vsel %vm1399_vm11, %v4017_v11, %v1396_v16  ;;  %v7992_v16 = vld [vmem:[#allocation16_spill] sm:$0xff] }
 0x5cc   :  { %v1405_v25 = vsel %vm1402_vm8, %v1404_v57, %v1400_v13 }
 0x5cd   :  { %v1410_v14 = vsub.f32 1.0, %v1405_v25  ;;  %v1412_v24 = vmul.f32 %v1405_v25, %v5649_v46 }
 0x5d1   :  { %v4019_v3 = vpop.eup %4018 }
 0x5d2   :  { %v1411_v4 = vmul.f32 %v4019_v3, %v1410_v14 }
 0x5d4   :  { %v5717_v15 = vadd.f32 %v1412_v24, %v1411_v4 }
 0x5d6   :  { %1433 = vmatmul.f32.vlgmr.msra.gmra.mxu2 %v5717_v15  ;;  %1453 = vmatmul.f32.vlgmr.msrb.gmra.mxu0 %v5717_v15 }
 0x5d7   :  { %1473 = vmatmul.f32.vlgmr.msra.gmra.mxu3 %v5717_v15  ;;  %1677 = vmatpush.msra.mxu2 %v5456_v17 }
 0x5d8   :  { %1747 = vmatpush.msrb.mxu0 %v5352_v39  ;;  %1767 = vmatpush.msra.mxu3 %v5355_v40  ;;  %v7993_v39 = vld [vmem:[#allocation13_spill] sm:$0xff]  ;;  %v7994_v40 = vld [vmem:[#allocation19_spill] sm:$0xff] }
 0x5d9   :  { %1678 = vmatpush.msra.mxu2 %v5461_v52 }
 0x5da   :  { %1748 = vmatpush.msrb.mxu0 %v5359_v53  ;;  %1768 = vmatpush.msra.mxu3 %v5362_v41  ;;  %v7995_v53 = vld [vmem:[#allocation17_spill] sm:$0xff]  ;;  %v7996_v41 = vld [vmem:[#allocation14_spill] sm:$0xff] }
 0x5db   :  { %1679 = vmatpush.msra.mxu2 %v5466_v34 }
 0x5dc   :  { %1749 = vmatpush.msrb.mxu0 %v5366_v44  ;;  %1769 = vmatpush.msra.mxu3 %v5470_v26  ;;  %v7997_v44 = vld [vmem:[#allocation20_spill] sm:$0xff] }
 0x5dd   :  { %1680 = vmatpush.msra.mxu2 %v5473_v27 }
 0x5de   :  { %1750 = vmatpush.msrb.mxu0 %v5371_v5  ;;  %1770 = vmatpush.msra.mxu3 %v5477_v28  ;;  %v7998_v5 = vld [vmem:[#allocation18_spill] sm:$0xff] }
 0x5df   :  { %1681 = vmatpush.msra.mxu2 %v5480_v31 }
 0x5e0   :  { %1751 = vmatpush.msrb.mxu0 %v5376_v30  ;;  %1771 = vmatpush.msra.mxu3 %v5484_v32  ;;  %v7999_v30 = vld [vmem:[#allocation15_spill] sm:$0xff]  ;;  %v8006_v32 = vld [vmem:[#allocation50_spill] sm:$0xff] }
 0x5e1   :  { %1682 = vmatpush.msra.mxu2 %v5487_v33 }
 0x5e2   :  { %1752 = vmatpush.msrb.mxu0 %v5381_v48  ;;  %1772 = vmatpush.msra.mxu3 %v5491_v37  ;;  %v8000_v48 = vld [vmem:[#allocation21_spill] sm:$0xff] }
 0x5e3   :  { %1683 = vmatpush.msra.mxu2 %v5494_v35 }
 0x5e4   :  { %1753 = vmatpush.msrb.mxu0 %v5386_v20  ;;  %1773 = vmatpush.msra.mxu3 %v5498_v43  ;;  %v8007_v43 = vld [vmem:[#allocation36_spill] sm:$0xff] }
 0x5e5   :  { %1684 = vmatpush.msra.mxu2 %v5501_v38 }
 0x5e6   :  { %1754 = vmatpush.msrb.mxu0 %v5391_v36  ;;  %1774 = vmatpush.msra.mxu3 %v5505_v58  ;;  %v8001_v36 = vld [vmem:[#allocation60_spill] sm:$0xff] }
 0x5e7   :  { %1685 = vmatpush.msra.mxu2 %v5508_v6 }
 0x5e8   :  { %1755 = vmatpush.msrb.mxu0 %v5396_v1  ;;  %1775 = vmatpush.msra.mxu3 %v5512_v45 }
 0x5e9   :  { %1686 = vmatpush.msra.mxu2 %v5515_v8 }
 0x5ea   :  { %1756 = vmatpush.msrb.mxu0 %v5401_v55  ;;  %1776 = vmatpush.msra.mxu3 %v5519_v0  ;;  %v6216_v55 = vld [vmem:[#allocation7 + $0x8] sm:$0xff] }
 0x5eb   :  { %1687 = vmatpush.msra.mxu2 %v5522_v9  ;;  %8052 = vst [vmem:[#allocation17_spill] sm:$0xff] %v6216_v55 }
 0x5ec   :  { %1757 = vmatpush.msrb.mxu0 %v5406_v22  ;;  %1777 = vmatpush.msra.mxu3 %v5526_v10  ;;  %v8003_v22 = vld [vmem:[#allocation55_spill] sm:$0xff] }
 0x5ed   :  { %1688 = vmatpush.msra.mxu2 %v5529_v47 }
 0x5ee   :  { %1758 = vmatpush.msrb.mxu0 %v5411_v51  ;;  %1778 = vmatpush.msra.mxu3 %v5610_v18  ;;  %v8004_v51 = vld [vmem:[#allocation54_spill] sm:$0xff] }
 0x5ef   :  { %1689 = vmatpush.msra.mxu2 %v5534_v61 }
 0x5f0   :  { %1759 = vmatpush.msrb.mxu0 %v5416_v7  ;;  %1779 = vmatpush.msra.mxu3 %v5615_v49  ;;  %v8005_v7 = vsel %vm5219_vm13, %v8003_v22, %v8004_v51 }
 0x5f1   :  { %1690 = vmatpush.msra.mxu2 %v7992_v16 }
 0x5f2   :  { %1760 = vmatpush.msrb.mxu0 %v7993_v39  ;;  %1780 = vmatpush.msra.mxu3 %v7994_v40  ;;  %v8008_v39 = vld [vmem:[#allocation40_spill] sm:$0xff]  ;;  %v8009_v40 = vld [vmem:[#allocation39_spill] sm:$0xff] }
 0x5f3   :  { %1691 = vmatpush.msra.mxu2 %v7995_v53 }
 0x5f4   :  { %1761 = vmatpush.msrb.mxu0 %v7996_v41  ;;  %1781 = vmatpush.msra.mxu3 %v7997_v44  ;;  %v8010_v41 = vsel %vm5129_vm12, %v8008_v39, %v8009_v40 }
 0x5f5   :  { %1692 = vmatpush.msra.mxu2 %v7998_v5 }
 0x5f6   :  { %1762 = vmatpush.msrb.mxu0 %v7999_v30  ;;  %1782 = vmatpush.msra.mxu3 %v8000_v48 }
 0x653   :  { %v1454_v20 = vpop.f32.mrf.mxu0 }
 0x654   :  { %v1455_v1 = vadd.f32 %v1454_v20, %v8001_v36 }
 0x656   :  { %v1497_v60 = vadd.f32 %v1455_v1, %v8005_v7 }
 0x658   :  { %v3832_v26 = vmul.f32 -1.442695, %v1497_v60 }
 0x659   :  { %v1434_v28 = vpop.f32.mrf.mxu2 }
 0x65a   :  { %4020 = vpow2.f32 %v3832_v26  ;;  %v1435_v37 = vadd.f32 %v1434_v28, %v8006_v32  ;;  %v1474_v59 = vpop.f32.mrf.mxu3 }
 0x65b   :  { %v1475_v13 = vadd.f32 %v1474_v59, %v5270_v54 }
 0x65c   :  { %v1477_v58 = vadd.f32 %v1435_v37, %v8007_v43 }
 0x65e   :  { %v3831_v45 = vmul.f32 -1.442695, %v1477_v58 }
 0x660   :  { %v4021_v0 = vpop.eup %4020  ;;  %4022 = vpow2.f32 %v3831_v45 }
 0x661   :  { %v1501_v10 = vadd.f32 1.0, %v4021_v0 }
 0x663   :  { %4024 = vrcp.f32 %v1501_v10  ;;  %v1513_v4 = vand.u32 2147483648, %v1501_v10  ;;  %vm1507_vm2 = vweird.f32 %v1501_v10  ;;  %v1511_v24 = vand.u32 2147483647, %v1501_v10 }
 0x665   :  { %v1514_v48 = vor.u32 1.1754944e-38, %v1513_v4  ;;  %vm1512_vm4 = vcmp.eq.f32.partialorder %v1511_v24, 8.507059e+37 }
 0x666   :  { %v4023_v18 = vpop.eup %4022 }
 0x667   :  { %v1481_v49 = vadd.f32 1.0, %v4023_v18 }
 0x669   :  { %4026 = vrcp.f32 %v1481_v49  ;;  %v4025_v19 = vpop.eup %4024  ;;  %v1493_v21 = vand.u32 2147483648, %v1481_v49  ;;  %v1491_v2 = vand.u32 2147483647, %v1481_v49  ;;  %vm1487_vm10 = vweird.f32 %v1481_v49 }
 0x66a   :  { %v1503_v46 = vmul.f32 %v4025_v19, %v1501_v10  ;;  %vm1508_vm1 = vweird.f32 %v4025_v19 }
 0x66b   :  { %v1494_v56 = vor.u32 1.1754944e-38, %v1493_v21  ;;  %vm1492_vm15 = vcmp.eq.f32.partialorder %v1491_v2, 8.507059e+37  ;;  %vm1509_vm3 = vmor %vm1507_vm2, %vm1508_vm1 }
 0x66c   :  { %v1504_v23 = vsub.f32 1.0, %v1503_v46 }
 0x66e   :  { %v1505_v29 = vmul.f32 %v4025_v19, %v1504_v23 }
 0x66f   :  { %v4027_v11 = vpop.eup %4026 }
 0x670   :  { %v1483_v62 = vmul.f32 %v4027_v11, %v1481_v49  ;;  %vm1488_vm9 = vweird.f32 %v4027_v11  ;;  %v1506_v14 = vadd.f32 %v4025_v19, %v1505_v29  ;;  %v8015_v29 = vld [vmem:[#allocation43_spill] sm:$0xff] }
 0x671   :  { %vm1489_vm14 = vmor %vm1487_vm10, %vm1488_vm9 }
 0x672   :  { %v1484_v50 = vsub.f32 1.0, %v1483_v62  ;;  %v1510_v30 = vsel %vm1509_vm3, %v4025_v19, %v1506_v14 }
 0x673   :  { %v1515_v20 = vsel %vm1512_vm4, %v1514_v48, %v1510_v30  ;;  %v5842_v30 = vld [vmem:[%s7506_s4 + $0x8] sm:$0xff]  ;;  %v5849_v48 = vld [vmem:[%s7506_s4 + $0x10] sm:$0xff] }
 0x674   :  { %v1485_v42 = vmul.f32 %v4027_v11, %v1484_v50  ;;  %v1520_v1 = vsub.f32 1.0, %v1515_v20  ;;  %v1522_v7 = vmul.f32 %v1515_v20, %v5717_v15  ;;  %v5856_v20 = vld [vmem:[%s7506_s4 + $0x18] sm:$0xff] }
 0x676   :  { %v1486_v12 = vadd.f32 %v4027_v11, %v1485_v42 }
 0x678   :  { %v1490_v57 = vsel %vm1489_vm14, %v4027_v11, %v1486_v12  ;;  %v8016_v12 = vld [vmem:[#allocation42_spill] sm:$0xff] }
 0x679   :  { %v1495_v25 = vsel %vm1492_vm15, %v1494_v56, %v1490_v57  ;;  %v8017_v56 = vsel %vm5129_vm12, %v8015_v29, %v8016_v12 }
 0x67a   :  { %v1517_v3 = vmul.f32 %v1495_v25, %v1475_v13 }
 0x67c   :  { %v1518_v44 = vadd.f32 %v1517_v3, %v8010_v41 }
 0x67e   :  { %4028 = vtanh.f32 %v1518_v44  ;;  %v5835_v44 = vld [vmem:[%s7506_s4] sm:$0xff] }
 0x684   :  { %v4029_v22 = vpop.eup %4028 }
 0x685   :  { %v1521_v51 = vmul.f32 %v4029_v22, %v1520_v1  ;;  %v5863_v1 = vld [vmem:[%s7506_s4 + $0x20] sm:$0xff]  ;;  %v5870_v22 = vld [vmem:[%s7506_s4 + $0x28] sm:$0xff] }
 0x687   :  { %v5785_v60 = vadd.f32 %v1522_v7, %v1521_v51  ;;  %v5877_v51 = vld [vmem:[%s7506_s4 + $0x30] sm:$0xff]  ;;  %v5884_v7 = vld [vmem:[%s7506_s4 + $0x38] sm:$0xff] }
 0x689   :  { %1543 = vmatmul.f32.vlgmr.msra.gmra.mxu1 %v5785_v60  ;;  %1563 = vmatmul.f32.vlgmr.msrb.gmra.mxu2 %v5785_v60 }
 0x68a   :  { %1583 = vmatmul.f32.vlgmr.msra.gmra.mxu0 %v5785_v60  ;;  %1787 = vmatpush.msra.mxu1 %v5456_v17 }
 0x68c   :  { %1788 = vmatpush.msra.mxu1 %v5461_v52 }
 0x68e   :  { %1789 = vmatpush.msra.mxu1 %v5466_v34  ;;  %v8011_v34 = vld [vmem:[#allocation41_spill] sm:$0xff] }
 0x690   :  { %1790 = vmatpush.msra.mxu1 %v5473_v27 }
 0x692   :  { %1791 = vmatpush.msra.mxu1 %v5480_v31 }
 0x694   :  { %1792 = vmatpush.msra.mxu1 %v5487_v33 }
 0x696   :  { %1793 = vmatpush.msra.mxu1 %v5494_v35 }
 0x698   :  { %1794 = vmatpush.msra.mxu1 %v5501_v38  ;;  %v8012_v38 = vld [vmem:[#allocation57_spill] sm:$0xff] }
 0x69a   :  { %1795 = vmatpush.msra.mxu1 %v5508_v6  ;;  %v8013_v6 = vld [vmem:[#allocation56_spill] sm:$0xff] }
 0x69c   :  { %1796 = vmatpush.msra.mxu1 %v5515_v8  ;;  %v8014_v8 = vsel %vm5219_vm13, %v8012_v38, %v8013_v6  ;;  %v5941_v6 = vld [vmem:[%s7506_s4 + $0x78] sm:$0xff] }
 0x69e   :  { %1797 = vmatpush.msra.mxu1 %v5522_v9 }
 0x6a0   :  { %1798 = vmatpush.msra.mxu1 %v5529_v47 }
 0x6a2   :  { %1799 = vmatpush.msra.mxu1 %v5534_v61 }
 0x6a4   :  { %1800 = vmatpush.msra.mxu1 %v7992_v16  ;;  %v1873_v16 = vld [vmem:[%s7511_s9 + $0x18] sm:$0xff] }
 0x6a5   :  { %1938 = vmatpush.msrb.mxu2 %v1873_v16 }
 0x6a6   :  { %1801 = vmatpush.msra.mxu1 %v7995_v53  ;;  %v1870_v53 = vld [vmem:[%s7511_s9] sm:$0xff] }
 0x6a7   :  { %1939 = vmatpush.msrb.mxu2 %v1870_v53 }
 0x6a8   :  { %1802 = vmatpush.msra.mxu1 %v7998_v5 }
 0x706   :  { %v1544_v17 = vpop.f32.mrf.mxu1 }
 0x707   :  { %v1545_v52 = vadd.f32 %v1544_v17, %v8006_v32  ;;  %v1584_v18 = vpop.f32.mrf.mxu0  ;;  %v5898_v17 = vld [vmem:[%s7506_s4 + $0x48] sm:$0xff] }
 0x708   :  { %v1585_v11 = vadd.f32 %v1584_v18, %v5270_v54 }
 0x709   :  { %v1587_v27 = vadd.f32 %v1545_v52, %v8011_v34  ;;  %v5905_v52 = vld [vmem:[%s7506_s4 + $0x50] sm:$0xff]  ;;  %v5912_v34 = vld [vmem:[%s7506_s4 + $0x58] sm:$0xff] }
 0x70b   :  { %v3833_v31 = vmul.f32 -1.442695, %v1587_v27  ;;  %v5919_v27 = vld [vmem:[%s7506_s4 + $0x60] sm:$0xff] }
 0x70c   :  { %v1564_v33 = vpop.f32.mrf.mxu2 }
 0x70d   :  { %4030 = vpow2.f32 %v3833_v31  ;;  %v1565_v35 = vadd.f32 %v1564_v33, %v8001_v36  ;;  %v5926_v31 = vld [vmem:[%s7506_s4 + $0x68] sm:$0xff]  ;;  %v5933_v33 = vld [vmem:[%s7506_s4 + $0x70] sm:$0xff] }
 0x70f   :  { %v1607_v9 = vadd.f32 %v1565_v35, %v8014_v8  ;;  %v8018_v8 = vld [vmem:[#allocation59_spill] sm:$0xff] }
 0x711   :  { %v3834_v47 = vmul.f32 -1.442695, %v1607_v9  ;;  %v8019_v9 = vld [vmem:[#allocation58_spill] sm:$0xff] }
 0x713   :  { %v4031_v61 = vpop.eup %4030  ;;  %4032 = vpow2.f32 %v3834_v47  ;;  %v8020_v47 = vsel %vm5219_vm13, %v8018_v8, %v8019_v9 }
 0x714   :  { %v1591_v15 = vadd.f32 1.0, %v4031_v61 }
 0x716   :  { %4034 = vrcp.f32 %v1591_v15  ;;  %v1603_v58 = vand.u32 2147483648, %v1591_v15  ;;  %v1601_v0 = vand.u32 2147483647, %v1591_v15  ;;  %vm1597_vm6 = vweird.f32 %v1591_v15 }
 0x718   :  { %v1604_v46 = vor.u32 1.1754944e-38, %v1603_v58  ;;  %vm1602_vm11 = vcmp.eq.f32.partialorder %v1601_v0, 8.507059e+37 }
 0x719   :  { %v4033_v5 = vpop.eup %4032 }
 0x71a   :  { %v1611_v26 = vadd.f32 1.0, %v4033_v5 }
 0x71c   :  { %v4035_v28 = vpop.eup %4034  ;;  %4036 = vrcp.f32 %v1611_v26  ;;  %v1623_v2 = vand.u32 2147483648, %v1611_v26  ;;  %v1621_v59 = vand.u32 2147483647, %v1611_v26  ;;  %vm1617_vm9 = vweird.f32 %v1611_v26 }
 0x71d   :  { %v1593_v37 = vmul.f32 %v4035_v28, %v1591_v15  ;;  %vm1598_vm5 = vweird.f32 %v4035_v28 }
 0x71e   :  { %vm1599_vm7 = vmor %vm1597_vm6, %vm1598_vm5  ;;  %v1624_v14 = vor.u32 1.1754944e-38, %v1623_v2  ;;  %vm1622_vm14 = vcmp.eq.f32.partialorder %v1621_v59, 8.507059e+37 }
 0x71f   :  { %v1594_v43 = vsub.f32 1.0, %v1593_v37 }
 0x721   :  { %v1595_v45 = vmul.f32 %v4035_v28, %v1594_v43 }
 0x722   :  { %v4037_v10 = vpop.eup %4036 }
 0x723   :  { %v1596_v49 = vadd.f32 %v4035_v28, %v1595_v45  ;;  %v1613_v19 = vmul.f32 %v4037_v10, %v1611_v26  ;;  %vm1618_vm8 = vweird.f32 %v4037_v10  ;;  %v8021_v26 = vld [vmem:[#allocation44_spill] sm:$0xff] }
 0x724   :  { %vm1619_vm10 = vmor %vm1617_vm9, %vm1618_vm8 }
 0x725   :  { %v1600_v62 = vsel %vm1599_vm7, %v4035_v28, %v1596_v49  ;;  %v1614_v23 = vsub.f32 1.0, %v1613_v19  ;;  %v1874_v19 = vld [vmem:[%s7511_s9 + $0x20] sm:$0xff] }
 0x726   :  { %v1605_v50 = vsel %vm1602_vm11, %v1604_v46, %v1600_v62  ;;  %v1871_v46 = vld [vmem:[%s7511_s9 + $0x8] sm:$0xff]  ;;  %2003 = vmatpush.msra.mxu0 %v1874_v19  ;;  %v6002_v19 = vld [vmem:[#allocation7 + $0x150] sm:$0xff] }
 0x727   :  { %v1627_v21 = vmul.f32 %v1605_v50, %v1585_v11  ;;  %v1615_v42 = vmul.f32 %v4037_v10, %v1614_v23 }
 0x728   :  { %2004 = vmatpush.msra.mxu0 %v1871_v46  ;;  %v6005_v46 = vld [vmem:[#allocation7 + $0x138] sm:$0xff] }
 0x729   :  { %v1628_v13 = vadd.f32 %v1627_v21, %v8017_v56  ;;  %v1616_v57 = vadd.f32 %v4037_v10, %v1615_v42 }
 0x72b   :  { %4038 = vtanh.f32 %v1628_v13  ;;  %v1620_v25 = vsel %vm1619_vm10, %v4037_v10, %v1616_v57 }
 0x72c   :  { %v1625_v3 = vsel %vm1622_vm14, %v1624_v14, %v1620_v25 }
 0x72d   :  { %v1630_v4 = vsub.f32 1.0, %v1625_v3  ;;  %v1632_v40 = vmul.f32 %v1625_v3, %v5785_v60  ;;  %v5891_v60 = vld [vmem:[%s7506_s4 + $0x40] sm:$0xff] }
 0x731   :  { %v4039_v24 = vpop.eup %4038 }
 0x732   :  { %v1631_v39 = vmul.f32 %v4039_v24, %v1630_v4 }
 0x734   :  { %v5827_v41 = vadd.f32 %v1632_v40, %v1631_v39 }
 0x736   :  { %1653 = vmatmul.f32.vlgmr.msrb.gmra.mxu3 %v5827_v41  ;;  %1673 = vmatmul.f32.vlgmr.msrb.gmra.mxu1 %v5827_v41 }
 0x737   :  { %1693 = vmatmul.f32.vlgmr.msra.gmra.mxu2 %v5827_v41 }
 0x73f   :  { %3839 = vmatmul.msk.f32.vlgmr.msrb.gmra.mxu2 %vm230_vm0, %v5835_v44 }
 0x747   :  { %3840 = vmatmul.msk.f32.gmra.mxu2 %vm230_vm0, %v5842_v30 }
 0x74f   :  { %3841 = vmatmul.msk.f32.gmra.mxu2 %vm230_vm0, %v5849_v48 }
 0x757   :  { %3842 = vmatmul.msk.f32.gmra.mxu2 %vm230_vm0, %v5856_v20 }
 0x75f   :  { %3843 = vmatmul.msk.f32.gmra.mxu2 %vm230_vm0, %v5863_v1 }
 0x767   :  { %3844 = vmatmul.msk.f32.gmra.mxu2 %vm230_vm0, %v5870_v22 }
 0x76f   :  { %3845 = vmatmul.msk.f32.gmra.mxu2 %vm230_vm0, %v5877_v51 }
 0x777   :  { %3846 = vmatmul.msk.f32.gmra.mxu2 %vm230_vm0, %v5884_v7 }
 0x77f   :  { %3847 = vmatmul.msk.f32.gmra.mxu2 %vm230_vm0, %v5891_v60 }
 0x787   :  { %3848 = vmatmul.msk.f32.gmra.mxu2 %vm230_vm0, %v5898_v17 }
 0x78f   :  { %3849 = vmatmul.msk.f32.gmra.mxu2 %vm230_vm0, %v5905_v52 }
 0x797   :  { %3850 = vmatmul.msk.f32.gmra.mxu2 %vm230_vm0, %v5912_v34 }
 0x79f   :  { %3851 = vmatmul.msk.f32.gmra.mxu2 %vm230_vm0, %v5919_v27 }
 0x7a7   :  { %3852 = vmatmul.msk.f32.gmra.mxu2 %vm230_vm0, %v5926_v31 }
 0x7af   :  { %3853 = vmatmul.msk.f32.gmra.mxu2 %vm230_vm0, %v5933_v33 }
 0x7b3   :  { %v1674_v35 = vpop.f32.mrf.mxu1 }
 0x7b4   :  { %v1675_v38 = vadd.f32 %v1674_v35, %v8001_v36  ;;  %v8026_v35 = vld [vmem:[#allocation46_spill] sm:$0xff] }
 0x7b6   :  { %v1717_v61 = vadd.f32 %v1675_v38, %v8020_v47  ;;  %v8027_v38 = vld [vmem:[#allocation45_spill] sm:$0xff] }
 0x7b7   :  { %3854 = vmatmul.msk.f32.gmra.mxu2 %vm230_vm0, %v5941_v6  ;;  %v8028_v8 = vsel %vm5129_vm12, %v8026_v35, %v8027_v38 }
 0x7b8   :  { %v3836_v15 = vmul.f32 -1.442695, %v1717_v61 }
 0x7b9   :  { %v1654_v16 = vpop.f32.mrf.mxu3 }
 0x7ba   :  { %4040 = vpow2.f32 %v3836_v15  ;;  %v1655_v53 = vadd.f32 %v1654_v16, %v8006_v32  ;;  %v1694_v5 = vpop.f32.mrf.mxu2 }
 0x7bb   :  { %v1695_v57 = vadd.f32 %v1694_v5, %v5270_v54 }
 0x7bc   :  { %v1697_v28 = vadd.f32 %v1655_v53, %v8021_v26  ;;  %v1875_v53 = vld [vmem:[%s7511_s9 + $0x28] sm:$0xff] }
 0x7bd   :  { %2068 = vmatpush.msrb.mxu3 %v1875_v53  ;;  %v6194_v53 = vld [vmem:[#allocation7 + $0x68] sm:$0xff] }
 0x7be   :  { %v3835_v37 = vmul.f32 -1.442695, %v1697_v28 }
 0x7c0   :  { %v4041_v43 = vpop.eup %4040  ;;  %4042 = vpow2.f32 %v3835_v37 }
 0x7c1   :  { %v1721_v58 = vadd.f32 1.0, %v4041_v43 }
 0x7c2   :  { %v5952_v45 = vpop.f32.mrf.mxu2 }
 0x7c3   :  { %8022 = vst [vmem:[#allocation22_spill] sm:$0xff] %v5952_v45  ;;  %4044 = vrcp.f32 %v1721_v58  ;;  %v1733_v4 = vand.u32 2147483648, %v1721_v58  ;;  %vm1727_vm5 = vweird.f32 %v1721_v58  ;;  %v1731_v40 = vand.u32 2147483647, %v1721_v58 }
 0x7c5   :  { %v1734_v61 = vor.u32 1.1754944e-38, %v1733_v4  ;;  %vm1732_vm7 = vcmp.eq.f32.partialorder %v1731_v40, 8.507059e+37  ;;  %v6164_v4 = vld [vmem:[#allocation7 + $0x110] sm:$0xff]  ;;  %v6177_v40 = vld [vmem:[#allocation7 + $0xc8] sm:$0xff] }
 0x7c6   :  { %v4043_v0 = vpop.eup %4042 }
 0x7c7   :  { %v1701_v10 = vadd.f32 1.0, %v4043_v0 }
 0x7c9   :  { %4046 = vrcp.f32 %v1701_v10  ;;  %v4045_v18 = vpop.eup %4044  ;;  %v1713_v2 = vand.u32 2147483648, %v1701_v10  ;;  %v1711_v29 = vand.u32 2147483647, %v1701_v10  ;;  %vm1707_vm1 = vweird.f32 %v1701_v10 }
 0x7ca   :  { %v5954_v49 = vpop.f32.mrf.mxu2  ;;  %v1723_v11 = vmul.f32 %v4045_v18, %v1721_v58  ;;  %vm1728_vm4 = vweird.f32 %v4045_v18  ;;  %v1872_v58 = vld [vmem:[%s7511_s9 + $0x10] sm:$0xff]  ;;  %s3910_s9 = sld [smem:[#allocation3 + $0x2]] }
 0x7cb   :  { %8023 = vst [vmem:[#allocation23_spill] sm:$0xff] %v5954_v49  ;;  %v1714_v13 = vor.u32 1.1754944e-38, %v1713_v2  ;;  %vm1712_vm3 = vcmp.eq.f32.partialorder %v1711_v29, 8.507059e+37  ;;  %vm1729_vm6 = vmor %vm1727_vm5, %vm1728_vm4  ;;  %2069 = vmatpush.msrb.mxu3 %v1872_v58  ;;  %v6038_v2 = vld [vmem:[#allocation7 + $0x90] sm:$0xff] }
 0x7cc   :  { %v1724_v50 = vsub.f32 1.0, %v1723_v11  ;;  %v6018_v11 = vld [vmem:[#allocation7 + $0x108] sm:$0xff] }
 0x7ce   :  { %v1725_v12 = vmul.f32 %v4045_v18, %v1724_v50 }
 0x7cf   :  { %v4047_v62 = vpop.eup %4046 }
 0x7d0   :  { %v1703_v23 = vmul.f32 %v4047_v62, %v1701_v10  ;;  %vm1708_vm15 = vweird.f32 %v4047_v62  ;;  %v1726_v14 = vadd.f32 %v4045_v18, %v1725_v12  ;;  %v6054_v12 = vld [vmem:[#allocation7 + $0x48] sm:$0xff]  ;;  %p2859_p2 = scmp.gt.s32.totalorder %s3910_s9, 0 }
 0x7d1   :  { %vm1709_vm2 = vmor %vm1707_vm1, %vm1708_vm15 }
 0x7d2   :  { %v1704_v21 = vsub.f32 1.0, %v1703_v23  ;;  %v5962_v42 = vpop.f32.mrf.mxu2  ;;  %v1730_v47 = vsel %vm1729_vm6, %v4045_v18, %v1726_v14  ;;  %v6000_v18 = vld [vmem:[#allocation7 + $0x168] sm:$0xff]  ;;  %v6023_v23 = vld [vmem:[#allocation7 + $0xd8] sm:$0xff]  ;;  %s2862_s24 = scalar_select %p2859_p2, 1, 0 }
 0x7d3   :  { %8024 = vst [vmem:[#allocation24_spill] sm:$0xff] %v5962_v42  ;;  %v1735_v15 = vsel %vm1732_vm7, %v1734_v61, %v1730_v47  ;;  %2267 = vmatpush.msra.mxu2 %v6000_v18 }
 0x7d4   :  { %v1705_v59 = vmul.f32 %v4047_v62, %v1704_v21  ;;  %v1740_v5 = vsub.f32 1.0, %v1735_v15  ;;  %v1742_v37 = vmul.f32 %v1735_v15, %v5827_v41  ;;  %v6036_v21 = vld [vmem:[#allocation7 + $0xa8] sm:$0xff] }
 0x7d5   :  { %2268 = vmatpush.msra.mxu2 %v6002_v19 }
 0x7d6   :  { %v1706_v56 = vadd.f32 %v4047_v62, %v1705_v59  ;;  %v6041_v59 = vld [vmem:[#allocation7 + $0x78] sm:$0xff] }
 0x7d7   :  { %2269 = vmatpush.msra.mxu2 %v6005_v46 }
 0x7d8   :  { %v1710_v25 = vsel %vm1709_vm2, %v4047_v62, %v1706_v56  ;;  %v6020_v62 = vld [vmem:[#allocation7 + $0xf0] sm:$0xff] }
 0x7d9   :  { %v1715_v3 = vsel %vm1712_vm3, %v1714_v13, %v1710_v25  ;;  %v6056_v56 = vld [vmem:[#allocation7 + $0x30] sm:$0xff]  ;;  %v6059_v13 = vld [vmem:[#allocation7 + $0x18] sm:$0xff] }
 0x7da   :  { %v1737_v24 = vmul.f32 %v1715_v3, %v1695_v57  ;;  %v5965_v39 = vpop.f32.mrf.mxu2  ;;  %8036 = vst [vmem:[#allocation30_spill] sm:$0xff] %v6059_v13  ;;  %v6161_v3 = vld [vmem:[#allocation7 + $0x128] sm:$0xff] }
 0x7db   :  { %8025 = vst [vmem:[#allocation25_spill] sm:$0xff] %v5965_v39 }
 0x7dc   :  { %v1738_v9 = vadd.f32 %v1737_v24, %v8028_v8  ;;  %v6167_v24 = vld [vmem:[#allocation7 + $0xf8] sm:$0xff]  ;;  %v6181_v8 = vld [vmem:[#allocation7 + $0xb0] sm:$0xff] }
 0x7de   :  { %4048 = vtanh.f32 %v1738_v9  ;;  %v8045_v9 = vld [vmem:[#allocation47_spill] sm:$0xff] }
 0x7e2   :  { %v5972_v16 = vpop.f32.mrf.mxu2 }
 0x7e3   :  { %8029 = vst [vmem:[#allocation26_spill] sm:$0xff] %v5972_v16 }
 0x7e4   :  { %v4049_v26 = vpop.eup %4048 }
 0x7e5   :  { %v1741_v28 = vmul.f32 %v4049_v26, %v1740_v5 }
 0x7e7   :  { %v5978_v43 = vadd.f32 %v1742_v37, %v1741_v28  ;;  %v6200_v28 = vld [vmem:[#allocation7 + $0x50] sm:$0xff] }
 0x7e8   :  { %v8047_v37 = vld [vmem:[#allocation62_spill] sm:$0xff] }
 0x7e9   :  { %1763 = vmatmul.f32.vlgmr.msrb.gmra.mxu0 %v5978_v43  ;;  %1783 = vmatmul.f32.vlgmr.msra.gmra.mxu3 %v5978_v43 }
 0x7ea   :  { %1803 = vmatmul.f32.vlgmr.msra.gmra.mxu1 %v5978_v43  ;;  %v5986_v0 = vpop.f32.mrf.mxu2 }
 0x7eb   :  { %8030 = vst [vmem:[#allocation27_spill] sm:$0xff] %v5986_v0 }
 0x7f1   :  { %3855 = vmatmul.msk.f32.vlgmr.msra.gmra.mxu0 %vm230_vm0, %v5835_v44  ;;  %3871 = vmatmul.msk.f32.vlgmr.msrb.gmra.mxu3 %vm230_vm0, %v5835_v44  ;;  %v6013_v44 = vld [vmem:[#allocation7 + $0x120] sm:$0xff] }
 0x7f2   :  { %v5992_v41 = vpop.f32.mrf.mxu2  ;;  %2270 = vmatpush.msra.mxu2 %v6013_v44 }
 0x7f3   :  { %8031 = vst [vmem:[#allocation28_spill] sm:$0xff] %v5992_v41 }
 0x7f4   :  { %2271 = vmatpush.msra.mxu2 %v6018_v11 }
 0x7f6   :  { %2272 = vmatpush.msra.mxu2 %v6020_v62 }
 0x7f8   :  { %2273 = vmatpush.msra.mxu2 %v6023_v23 }
 0x7f9   :  { %3856 = vmatmul.msk.f32.gmra.mxu0 %vm230_vm0, %v5842_v30  ;;  %3872 = vmatmul.msk.f32.gmra.mxu3 %vm230_vm0, %v5842_v30 }
 0x7fa   :  { %v5998_v10 = vpop.f32.mrf.mxu2 }
 0x7fb   :  { %8032 = vst [vmem:[#allocation38_spill] sm:$0xff] %v5998_v10 }
 0x801   :  { %3857 = vmatmul.msk.f32.gmra.mxu0 %vm230_vm0, %v5849_v48  ;;  %3873 = vmatmul.msk.f32.gmra.mxu3 %vm230_vm0, %v5849_v48  ;;  %v6031_v48 = vld [vmem:[#allocation7 + $0xc0] sm:$0xff] }
 0x802   :  { %v6015_v30 = vpop.f32.mrf.mxu2  ;;  %2274 = vmatpush.msra.mxu2 %v6031_v48 }
 0x803   :  { %8033 = vst [vmem:[#allocation37_spill] sm:$0xff] %v6015_v30 }
 0x804   :  { %2275 = vmatpush.msra.mxu2 %v6036_v21 }
 0x806   :  { %2276 = vmatpush.msra.mxu2 %v6038_v2 }
 0x808   :  { %2277 = vmatpush.msra.mxu2 %v6041_v59 }
 0x809   :  { %3858 = vmatmul.msk.f32.gmra.mxu0 %vm230_vm0, %v5856_v20  ;;  %3874 = vmatmul.msk.f32.gmra.mxu3 %vm230_vm0, %v5856_v20  ;;  %v6049_v20 = vld [vmem:[#allocation7 + $0x60] sm:$0xff] }
 0x80a   :  { %v6033_v50 = vpop.f32.mrf.mxu2  ;;  %2278 = vmatpush.msra.mxu2 %v6049_v20 }
 0x80b   :  { %8034 = vst [vmem:[#allocation33_spill] sm:$0xff] %v6033_v50 }
 0x80c   :  { %2279 = vmatpush.msra.mxu2 %v6054_v12 }
 0x80e   :  { %2280 = vmatpush.msra.mxu2 %v6056_v56 }
 0x810   :  { %2281 = vmatpush.msra.mxu2 %v6059_v13 }
 0x811   :  { %3859 = vmatmul.msk.f32.gmra.mxu0 %vm230_vm0, %v5863_v1  ;;  %3875 = vmatmul.msk.f32.gmra.mxu3 %vm230_vm0, %v5863_v1  ;;  %v6067_v1 = vld [vmem:[#allocation7] sm:$0xff] }
 0x812   :  { %v6051_v29 = vpop.f32.mrf.mxu2  ;;  %8037 = vst [vmem:[#allocation29_spill] sm:$0xff] %v6067_v1  ;;  %2282 = vmatpush.msra.mxu2 %v6067_v1 }
 0x813   :  { %8035 = vst [vmem:[#allocation32_spill] sm:$0xff] %v6051_v29 }
 0x819   :  { %3860 = vmatmul.msk.f32.gmra.mxu0 %vm230_vm0, %v5870_v22  ;;  %3876 = vmatmul.msk.f32.gmra.mxu3 %vm230_vm0, %v5870_v22 }
 0x81a   :  { %v6069_v57 = vpop.f32.mrf.mxu2 }
 0x81b   :  { %8038 = vst [vmem:[#allocation35_spill] sm:$0xff] %v6069_v57 }
 0x821   :  { %3861 = vmatmul.msk.f32.gmra.mxu0 %vm230_vm0, %v5877_v51  ;;  %3877 = vmatmul.msk.f32.gmra.mxu3 %vm230_vm0, %v5877_v51 }
 0x822   :  { %v6076_v25 = vpop.f32.mrf.mxu2 }
 0x823   :  { %8039 = vst [vmem:[#allocation34_spill] sm:$0xff] %v6076_v25 }
 0x829   :  { %3862 = vmatmul.msk.f32.gmra.mxu0 %vm230_vm0, %v5884_v7  ;;  %3878 = vmatmul.msk.f32.gmra.mxu3 %vm230_vm0, %v5884_v7  ;;  %v6136_v7 = vpop.permute.xlu1 %2188 }
 0x82a   :  { %v6082_v22 = vpop.f32.mrf.mxu2 }
 0x82b   :  { %8040 = vst [vmem:[#allocation31_spill] sm:$0xff] %v6082_v22 }
 0x831   :  { %3863 = vmatmul.msk.f32.gmra.mxu0 %vm230_vm0, %v5891_v60  ;;  %3879 = vmatmul.msk.f32.gmra.mxu3 %vm230_vm0, %v5891_v60  ;;  %v6140_v60 = vld [vmem:[#allocation7 + $0x170] sm:$0xff] }
 0x832   :  { %v6088_v14 = vpop.f32.mrf.mxu2  ;;  %2287 = vmatpush.msrb.mxu0 %v6140_v60 }
 0x833   :  { %8041 = vst [vmem:[#allocation53_spill] sm:$0xff] %v6088_v14 }
 0x839   :  { %3864 = vmatmul.msk.f32.gmra.mxu0 %vm230_vm0, %v5898_v17  ;;  %3880 = vmatmul.msk.f32.gmra.mxu3 %vm230_vm0, %v5898_v17  ;;  %v8043_v17 = vld [vmem:[#allocation12_spill] sm:$0xff] }
 0x83a   :  { %v6094_v51 = vpop.f32.mrf.mxu2  ;;  %vm2190_vm11 = vcmp.eq.s32.totalorder %v6136_v7, %v8043_v17  ;;  %v6422_v7 = vld [vmem:[%s7515_s13 + $0x78] sm:$0xff] }
 0x83b   :  { %8042 = vst [vmem:[#allocation52_spill] sm:$0xff] %v6094_v51  ;;  %2200 = vmatpush.msrb.mxu1 %v6094_v51  ;;  %2430 = vmatpush.msrb.mxu2 %v6094_v51 }
 0x83c   :  { %8098 = vst [vmem:[#allocation76_spill] sm:$0xff] %v6422_v7  ;;  %2377 = vmatpush.msra.mxu3 %v6422_v7 }
 0x83d   :  { %2201 = vmatpush.msrb.mxu1 %v6088_v14  ;;  %2431 = vmatpush.msrb.mxu2 %v6088_v14 }
 0x83f   :  { %2202 = vmatpush.msrb.mxu1 %v6082_v22  ;;  %2432 = vmatpush.msrb.mxu2 %v6082_v22 }
 0x841   :  { %2203 = vmatpush.msrb.mxu1 %v6076_v25  ;;  %2433 = vmatpush.msrb.mxu2 %v6076_v25 }
 0x842   :  { %3865 = vmatmul.msk.f32.gmra.mxu0 %vm230_vm0, %v5905_v52  ;;  %3881 = vmatmul.msk.f32.gmra.mxu3 %vm230_vm0, %v5905_v52  ;;  %v6147_v52 = vld [vmem:[#allocation7 + $0x158] sm:$0xff] }
 0x843   :  { %2204 = vmatpush.msrb.mxu1 %v6069_v57  ;;  %2434 = vmatpush.msrb.mxu2 %v6069_v57 }
 0x844   :  { %2288 = vmatpush.msrb.mxu0 %v6147_v52 }
 0x845   :  { %2205 = vmatpush.msrb.mxu1 %v6051_v29  ;;  %2435 = vmatpush.msrb.mxu2 %v6051_v29 }
 0x847   :  { %2206 = vmatpush.msrb.mxu1 %v6033_v50  ;;  %2436 = vmatpush.msrb.mxu2 %v6033_v50 }
 0x849   :  { %2207 = vmatpush.msrb.mxu1 %v6015_v30  ;;  %2437 = vmatpush.msrb.mxu2 %v6015_v30 }
 0x84a   :  { %3866 = vmatmul.msk.f32.gmra.mxu0 %vm230_vm0, %v5912_v34  ;;  %3882 = vmatmul.msk.f32.gmra.mxu3 %vm230_vm0, %v5912_v34  ;;  %v8044_v34 = vmov 1.0  }
 0x84b   :  { %2208 = vmatpush.msrb.mxu1 %v5998_v10  ;;  %2438 = vmatpush.msrb.mxu2 %v5998_v10 }
 0x84d   :  { %2209 = vmatpush.msrb.mxu1 %v5992_v41  ;;  %2439 = vmatpush.msrb.mxu2 %v5992_v41 }
 0x84f   :  { %2210 = vmatpush.msrb.mxu1 %v5986_v0  ;;  %2440 = vmatpush.msrb.mxu2 %v5986_v0 }
 0x851   :  { %2211 = vmatpush.msrb.mxu1 %v5972_v16  ;;  %2441 = vmatpush.msrb.mxu2 %v5972_v16 }
 0x852   :  { %3867 = vmatmul.msk.f32.gmra.mxu0 %vm230_vm0, %v5919_v27  ;;  %3883 = vmatmul.msk.f32.gmra.mxu3 %vm230_vm0, %v5919_v27  ;;  %v6158_v27 = vld [vmem:[#allocation7 + $0x140] sm:$0xff] }
 0x853   :  { %2212 = vmatpush.msrb.mxu1 %v5965_v39  ;;  %2442 = vmatpush.msrb.mxu2 %v5965_v39 }
 0x854   :  { %2289 = vmatpush.msrb.mxu0 %v6158_v27 }
 0x855   :  { %2213 = vmatpush.msrb.mxu1 %v5962_v42  ;;  %2443 = vmatpush.msrb.mxu2 %v5962_v42 }
 0x856   :  { %2290 = vmatpush.msrb.mxu0 %v6161_v3 }
 0x857   :  { %2214 = vmatpush.msrb.mxu1 %v5954_v49  ;;  %2444 = vmatpush.msrb.mxu2 %v5954_v49 }
 0x858   :  { %2291 = vmatpush.msrb.mxu0 %v6164_v4 }
 0x859   :  { %2215 = vmatpush.msrb.mxu1 %v5952_v45  ;;  %2445 = vmatpush.msrb.mxu2 %v5952_v45 }
 0x85a   :  { %3868 = vmatmul.msk.f32.gmra.mxu0 %vm230_vm0, %v5926_v31  ;;  %3888 = vmatmul.msk.f32.vlgmr.msrb.gmra.mxu1 %vm2190_vm11, %v8044_v34 }
 0x85b   :  { %3884 = vmatmul.msk.f32.gmra.mxu3 %vm230_vm0, %v5926_v31  ;;  %2292 = vmatpush.msrb.mxu0 %v6167_v24  ;;  %v6174_v31 = vld [vmem:[#allocation7 + $0xe0] sm:$0xff] }
 0x85d   :  { %2293 = vmatpush.msrb.mxu0 %v6174_v31 }
 0x85f   :  { %2294 = vmatpush.msrb.mxu0 %v6177_v40 }
 0x861   :  { %2295 = vmatpush.msrb.mxu0 %v6181_v8 }
 0x862   :  { %3869 = vmatmul.msk.f32.gmra.mxu0 %vm230_vm0, %v5933_v33 }
 0x863   :  { %3885 = vmatmul.msk.f32.gmra.mxu3 %vm230_vm0, %v5933_v33  ;;  %v6185_v33 = vld [vmem:[#allocation7 + $0x98] sm:$0xff] }
 0x864   :  { %2296 = vmatpush.msrb.mxu0 %v6185_v33 }
 0x866   :  { %v1764_v35 = vpop.f32.mrf.mxu0 }
 0x867   :  { %v1765_v38 = vadd.f32 %v1764_v35, %v8006_v32  ;;  %v6192_v32 = vld [vmem:[#allocation7 + $0x80] sm:$0xff]  ;;  %v1804_v0 = vpop.f32.mrf.mxu1 }
 0x868   :  { %2297 = vmatpush.msrb.mxu0 %v6192_v32  ;;  %v1805_v50 = vadd.f32 %v1804_v0, %v5270_v54 }
 0x869   :  { %v1807_v47 = vadd.f32 %v1765_v38, %v8045_v9  ;;  %v6208_v38 = vld [vmem:[#allocation7 + $0x38] sm:$0xff] }
 0x86a   :  { %3870 = vmatmul.msk.f32.gmra.mxu0 %vm230_vm0, %v5941_v6 }
 0x86b   :  { %v3837_v61 = vmul.f32 -1.442695, %v1807_v47  ;;  %3886 = vmatmul.msk.f32.gmra.mxu3 %vm230_vm0, %v5941_v6  ;;  %v8048_v6 = vld [vmem:[#allocation61_spill] sm:$0xff]  ;;  %2298 = vmatpush.msrb.mxu0 %v6194_v53 }
 0x86c   :  { %v1784_v15 = vpop.f32.mrf.mxu3  ;;  %v8049_v58 = vsel %vm5219_vm13, %v8047_v37, %v8048_v6 }
 0x86d   :  { %4050 = vpow2.f32 %v3837_v61  ;;  %v1785_v5 = vadd.f32 %v1784_v15, %v8001_v36  ;;  %2299 = vmatpush.msrb.mxu0 %v6200_v28  ;;  %v6211_v36 = vld [vmem:[#allocation7 + $0x20] sm:$0xff] }
 0x86e   :  { %v6198_v26 = vpop.f32.mrf.mxu0  ;;  %8050 = vst [vmem:[#allocation13_spill] sm:$0xff] %v6211_v36 }
 0x86f   :  { %8046 = vst [vmem:[#allocation16_spill] sm:$0xff] %v6198_v26  ;;  %v1827_v35 = vadd.f32 %v1785_v5, %v8049_v58  ;;  %2300 = vmatpush.msrb.mxu0 %v6208_v38 }
 0x871   :  { %v3838_v9 = vmul.f32 -1.442695, %v1827_v35  ;;  %2301 = vmatpush.msrb.mxu0 %v6211_v36 }
 0x873   :  { %v4051_v47 = vpop.eup %4050  ;;  %4052 = vpow2.f32 %v3838_v9  ;;  %2302 = vmatpush.msrb.mxu0 %v6216_v55 }
 0x874   :  { %v1811_v61 = vadd.f32 1.0, %v4051_v47  ;;  %v6214_v15 = vpop.f32.mrf.mxu3 }
 0x875   :  { %8051 = vst [vmem:[#allocation19_spill] sm:$0xff] %v6214_v15 }
 0x876   :  { %4054 = vrcp.f32 %v1811_v61  ;;  %v6219_v5 = vpop.f32.mrf.mxu0  ;;  %v1823_v49 = vand.u32 2147483648, %v1811_v61  ;;  %v1821_v39 = vand.u32 2147483647, %v1811_v61  ;;  %vm1817_vm13 = vweird.f32 %v1811_v61 }
 0x877   :  { %8053 = vst [vmem:[#allocation14_spill] sm:$0xff] %v6219_v5 }
 0x878   :  { %v1824_v30 = vor.u32 1.1754944e-38, %v1823_v49  ;;  %vm1822_vm9 = vcmp.eq.f32.partialorder %v1821_v39, 8.507059e+37 }
 0x879   :  { %v4053_v37 = vpop.eup %4052 }
 0x87a   :  { %v1831_v6 = vadd.f32 1.0, %v4053_v37 }
 0x87c   :  { %v4055_v58 = vpop.eup %4054  ;;  %4056 = vrcp.f32 %v1831_v6  ;;  %v6222_v35 = vpop.f32.mrf.mxu3  ;;  %v1843_v14 = vand.u32 2147483648, %v1831_v6  ;;  %v1841_v51 = vand.u32 2147483647, %v1831_v6  ;;  %vm1837_vm14 = vweird.f32 %v1831_v6 }
 0x87d   :  { %8054 = vst [vmem:[#allocation20_spill] sm:$0xff] %v6222_v35  ;;  %v1813_v9 = vmul.f32 %v4055_v58, %v1811_v61  ;;  %vm1818_vm0 = vweird.f32 %v4055_v58  ;;  %v8059_v61 = vld [vmem:[#allocation48_spill] sm:$0xff] }
 0x87e   :  { %v6224_v45 = vpop.f32.mrf.mxu0  ;;  %vm1819_vm8 = vmor %vm1817_vm13, %vm1818_vm0  ;;  %v1844_v39 = vor.u32 1.1754944e-38, %v1843_v14  ;;  %vm1842_vm1 = vcmp.eq.f32.partialorder %v1841_v51, 8.507059e+37 }
 0x87f   :  { %8055 = vst [vmem:[#allocation18_spill] sm:$0xff] %v6224_v45  ;;  %v1814_v47 = vsub.f32 1.0, %v1813_v9 }
 0x881   :  { %v1815_v42 = vmul.f32 %v4055_v58, %v1814_v47 }
 0x882   :  { %v4057_v16 = vpop.eup %4056 }
 0x883   :  { %v1816_v41 = vadd.f32 %v4055_v58, %v1815_v42  ;;  %v1833_v10 = vmul.f32 %v4057_v16, %v1831_v6  ;;  %vm1838_vm10 = vweird.f32 %v4057_v16  ;;  %v8058_v42 = vld [vmem:[#allocation49_spill] sm:$0xff] }
 0x884   :  { %v6226_v37 = vpop.f32.mrf.mxu3  ;;  %v8060_v49 = vsel %vm5129_vm12, %v8058_v42, %v8059_v61  ;;  %vm1839_vm15 = vmor %vm1837_vm14, %vm1838_vm10 }
 0x885   :  { %8056 = vst [vmem:[#allocation15_spill] sm:$0xff] %v6226_v37  ;;  %v1820_v29 = vsel %vm1819_vm8, %v4055_v58, %v1816_v41  ;;  %v1834_v57 = vsub.f32 1.0, %v1833_v10 }
 0x886   :  { %v1825_v25 = vsel %vm1822_vm9, %v1824_v30, %v1820_v29  ;;  %v6229_v9 = vpop.f32.mrf.mxu0 }
 0x887   :  { %8057 = vst [vmem:[#allocation21_spill] sm:$0xff] %v6229_v9  ;;  %v1847_v47 = vmul.f32 %v1825_v25, %v1805_v50  ;;  %v1835_v22 = vmul.f32 %v4057_v16, %v1834_v57 }
 0x889   :  { %v1848_v1 = vadd.f32 %v1847_v47, %v8060_v49  ;;  %v1836_v13 = vadd.f32 %v4057_v16, %v1835_v22 }
 0x88b   :  { %4058 = vtanh.f32 %v1848_v1  ;;  %v1840_v54 = vsel %vm1839_vm15, %v4057_v16, %v1836_v13 }
 0x88c   :  { %v1845_v0 = vsel %vm1842_vm1, %v1844_v39, %v1840_v54  ;;  %v6236_v41 = vpop.f32.mrf.mxu3 }
 0x88d   :  { %8061 = vst [vmem:[#allocation60_spill] sm:$0xff] %v6236_v41  ;;  %v1850_v30 = vsub.f32 1.0, %v1845_v0  ;;  %v1852_v63 = vmul.f32 %v1845_v0, %v5978_v43 }
 0x88e   :  { %v6238_v10 = vpop.f32.mrf.mxu0 }
 0x88f   :  { %8062 = vst [vmem:[#allocation51_spill] sm:$0xff] %v6238_v10 }
 0x891   :  { %v4059_v50 = vpop.eup %4058 }
 0x892   :  { %v1851_v29 = vmul.f32 %v4059_v50, %v1850_v30 }
 0x894   :  { %v6241_v57 = vadd.f32 %v1852_v63, %v1851_v29  ;;  %v6247_v16 = vpop.f32.mrf.mxu3 }
 0x895   :  { %8064 = vst [vmem:[#allocation54_spill] sm:$0xff] %v6247_v16 }
 0x896   :  { %v6243_v25 = vpop.f32.mrf.mxu0  ;;  %2283 = vmatmul.f32.vlgmr.msra.gmra.mxu2 %v6241_v57  ;;  %2303 = vmatmul.f32.vlgmr.msrb.gmra.mxu0 %v6241_v57 }
 0x897   :  { %8063 = vst [vmem:[#allocation55_spill] sm:$0xff] %v6243_v25  ;;  %2510 = vmatpush.msra.mxu2 %v6140_v60 }
 0x899   :  { %2511 = vmatpush.msra.mxu2 %v6147_v52 }
 0x89b   :  { %2512 = vmatpush.msra.mxu2 %v6158_v27 }
 0x89c   :  { %v6256_v43 = vpop.f32.mrf.mxu3 }
 0x89d   :  { %2513 = vmatpush.msra.mxu2 %v6161_v3  ;;  %8066 = vst [vmem:[#allocation36_spill] sm:$0xff] %v6256_v43 }
 0x89e   :  { %v6253_v13 = vpop.f32.mrf.mxu0 }
 0x89f   :  { %8065 = vst [vmem:[#allocation50_spill] sm:$0xff] %v6253_v13  ;;  %2514 = vmatpush.msra.mxu2 %v6164_v4 }
 0x8a1   :  { %2515 = vmatpush.msra.mxu2 %v6167_v24 }
 0x8a3   :  { %2516 = vmatpush.msra.mxu2 %v6174_v31 }
 0x8a4   :  { %v6265_v22 = vpop.f32.mrf.mxu3 }
 0x8a5   :  { %2517 = vmatpush.msra.mxu2 %v6177_v40  ;;  %8068 = vst [vmem:[#allocation39_spill] sm:$0xff] %v6265_v22 }
 0x8a6   :  { %v6261_v1 = vpop.f32.mrf.mxu0 }
 0x8a7   :  { %8067 = vst [vmem:[#allocation40_spill] sm:$0xff] %v6261_v1  ;;  %2518 = vmatpush.msra.mxu2 %v6181_v8 }
 0x8a9   :  { %2519 = vmatpush.msra.mxu2 %v6185_v33 }
 0x8ab   :  { %2520 = vmatpush.msra.mxu2 %v6192_v32 }
 0x8ac   :  { %v6274_v51 = vpop.f32.mrf.mxu3 }
 0x8ad   :  { %2521 = vmatpush.msra.mxu2 %v6194_v53  ;;  %8070 = vst [vmem:[#allocation57_spill] sm:$0xff] %v6274_v51 }
 0x8ae   :  { %v6269_v14 = vpop.f32.mrf.mxu0 }
 0x8af   :  { %8069 = vst [vmem:[#allocation41_spill] sm:$0xff] %v6269_v14  ;;  %2522 = vmatpush.msra.mxu2 %v6200_v28 }
 0x8b1   :  { %2523 = vmatpush.msra.mxu2 %v6208_v38 }
 0x8b3   :  { %2524 = vmatpush.msra.mxu2 %v6211_v36  ;;  %v6403_v36 = vld [vmem:[#allocation7 + $0x10] sm:$0xff] }
 0x8b4   :  { %v6281_v47 = vpop.f32.mrf.mxu3  ;;  %8097 = vst [vmem:[#allocation75_spill] sm:$0xff] %v6403_v36 }
 0x8b5   :  { %2525 = vmatpush.msra.mxu2 %v6216_v55  ;;  %8073 = vst [vmem:[#allocation42_spill] sm:$0xff] %v6281_v47  ;;  %v6399_v55 = vld [vmem:[#allocation7 + $0x28] sm:$0xff] }
 0x8b6   :  { %v6277_v6 = vpop.f32.mrf.mxu0  ;;  %8096 = vst [vmem:[#allocation74_spill] sm:$0xff] %v6399_v55 }
 0x8b7   :  { %8071 = vst [vmem:[#allocation56_spill] sm:$0xff] %v6277_v6 }
 0x8bc   :  { %v6285_v61 = vpop.f32.mrf.mxu3 }
 0x8bd   :  { %8075 = vst [vmem:[#allocation58_spill] sm:$0xff] %v6285_v61 }
 0x8bf   :  { %v6279_v58 = vpop.f32.mrf.mxu0 }
 0x8c0   :  { %8072 = vst [vmem:[#allocation43_spill] sm:$0xff] %v6279_v58 }
 0x8c5   :  { %v6289_v54 = vpop.f32.mrf.mxu3 }
 0x8c6   :  { %8077 = vst [vmem:[#allocation46_spill] sm:$0xff] %v6289_v54 }
 0x8c7   :  { %v6283_v42 = vpop.f32.mrf.mxu0 }
 0x8c8   :  { %8074 = vst [vmem:[#allocation59_spill] sm:$0xff] %v6283_v42 }
 0x8cd   :  { %v6293_v0 = vpop.f32.mrf.mxu3 }
 0x8ce   :  { %8079 = vst [vmem:[#allocation12_spill] sm:$0xff] %v6293_v0 }
 0x8cf   :  { %v6287_v49 = vpop.f32.mrf.mxu0 }
 0x8d0   :  { %8076 = vst [vmem:[#allocation44_spill] sm:$0xff] %v6287_v49 }
 0x8d5   :  { %v6299_v29 = vpop.f32.mrf.mxu3 }
 0x8d6   :  { %8082 = vst [vmem:[#allocation61_spill] sm:$0xff] %v6299_v29 }
 0x8d7   :  { %v6291_v39 = vpop.f32.mrf.mxu0 }
 0x8d8   :  { %8078 = vst [vmem:[#allocation45_spill] sm:$0xff] %v6291_v39 }
 0x8de   :  { %v6311_v63 = vpop.f32.mrf.mxu3 }
 0x8df   :  { %v6295_v30 = vpop.f32.mrf.mxu0  ;;  %8083 = vst [vmem:[#allocation49_spill] sm:$0xff] %v6311_v63 }
 0x8e0   :  { %8080 = vst [vmem:[#allocation47_spill] sm:$0xff] %v6295_v30 }
 0x8e7   :  { %v6297_v50 = vpop.f32.mrf.mxu0 }
 0x8e8   :  { %8081 = vst [vmem:[#allocation62_spill] sm:$0xff] %v6297_v50  ;;  %2220 = vmatpush.msra.mxu1 %v6297_v50  ;;  %2450 = vmatpush.msra.mxu0 %v6297_v50  ;;  %v6395_v50 = vld [vmem:[#allocation7 + $0x40] sm:$0xff] }
 0x8e9   :  { %8095 = vst [vmem:[#allocation73_spill] sm:$0xff] %v6395_v50 }
 0x8ea   :  { %2221 = vmatpush.msra.mxu1 %v6295_v30  ;;  %2451 = vmatpush.msra.mxu0 %v6295_v30  ;;  %v6391_v30 = vld [vmem:[#allocation7 + $0x58] sm:$0xff] }
 0x8eb   :  { %8094 = vst [vmem:[#allocation72_spill] sm:$0xff] %v6391_v30 }
 0x8ec   :  { %2222 = vmatpush.msra.mxu1 %v6291_v39  ;;  %2452 = vmatpush.msra.mxu0 %v6291_v39  ;;  %v6387_v39 = vld [vmem:[#allocation7 + $0x70] sm:$0xff] }
 0x8ed   :  { %8093 = vst [vmem:[#allocation71_spill] sm:$0xff] %v6387_v39 }
 0x8ee   :  { %2223 = vmatpush.msra.mxu1 %v6287_v49  ;;  %2453 = vmatpush.msra.mxu0 %v6287_v49  ;;  %v6383_v49 = vld [vmem:[#allocation7 + $0x88] sm:$0xff] }
 0x8ef   :  { %8092 = vst [vmem:[#allocation70_spill] sm:$0xff] %v6383_v49 }
 0x8f0   :  { %2224 = vmatpush.msra.mxu1 %v6283_v42  ;;  %2454 = vmatpush.msra.mxu0 %v6283_v42  ;;  %v6323_v42 = vpop.f32.mrf.mxu3 }
 0x8f2   :  { %2225 = vmatpush.msra.mxu1 %v6279_v58  ;;  %2455 = vmatpush.msra.mxu0 %v6279_v58  ;;  %v6379_v58 = vld [vmem:[#allocation7 + $0xa0] sm:$0xff] }
 0x8f3   :  { %8091 = vst [vmem:[#allocation69_spill] sm:$0xff] %v6379_v58 }
 0x8f4   :  { %2226 = vmatpush.msra.mxu1 %v6277_v6  ;;  %2456 = vmatpush.msra.mxu0 %v6277_v6  ;;  %v6375_v6 = vld [vmem:[#allocation7 + $0xb8] sm:$0xff] }
 0x8f5   :  { %8090 = vst [vmem:[#allocation68_spill] sm:$0xff] %v6375_v6 }
 0x8f6   :  { %2227 = vmatpush.msra.mxu1 %v6269_v14  ;;  %2457 = vmatpush.msra.mxu0 %v6269_v14  ;;  %v6371_v14 = vld [vmem:[#allocation7 + $0xd0] sm:$0xff] }
 0x8f7   :  { %8089 = vst [vmem:[#allocation67_spill] sm:$0xff] %v6371_v14 }
 0x8f8   :  { %2228 = vmatpush.msra.mxu1 %v6261_v1  ;;  %2458 = vmatpush.msra.mxu0 %v6261_v1  ;;  %v6367_v1 = vld [vmem:[#allocation7 + $0xe8] sm:$0xff] }
 0x8f9   :  { %8088 = vst [vmem:[#allocation66_spill] sm:$0xff] %v6367_v1 }
 0x8fa   :  { %2229 = vmatpush.msra.mxu1 %v6253_v13  ;;  %2459 = vmatpush.msra.mxu0 %v6253_v13  ;;  %v6335_v13 = vpop.f32.mrf.mxu3 }
 0x8fc   :  { %2230 = vmatpush.msra.mxu1 %v6243_v25  ;;  %2460 = vmatpush.msra.mxu0 %v6243_v25  ;;  %v6339_v25 = vld [vmem:[#allocation7 + $0x178] sm:$0xff] }
 0x8fe   :  { %2231 = vmatpush.msra.mxu1 %v6238_v10  ;;  %2461 = vmatpush.msra.mxu0 %v6238_v10  ;;  %v6363_v10 = vld [vmem:[#allocation7 + $0x100] sm:$0xff] }
 0x8ff   :  { %8087 = vst [vmem:[#allocation65_spill] sm:$0xff] %v6363_v10 }
 0x900   :  { %2232 = vmatpush.msra.mxu1 %v6229_v9  ;;  %2462 = vmatpush.msra.mxu0 %v6229_v9  ;;  %v6359_v9 = vld [vmem:[#allocation7 + $0x118] sm:$0xff] }
 0x901   :  { %8086 = vst [vmem:[#allocation64_spill] sm:$0xff] %v6359_v9 }
 0x902   :  { %2233 = vmatpush.msra.mxu1 %v6224_v45  ;;  %2463 = vmatpush.msra.mxu0 %v6224_v45  ;;  %v6347_v45 = vld [vmem:[#allocation7 + $0x160] sm:$0xff] }
 0x904   :  { %2234 = vmatpush.msra.mxu1 %v6219_v5  ;;  %2464 = vmatpush.msra.mxu0 %v6219_v5  ;;  %v6351_v5 = vld [vmem:[#allocation7 + $0x148] sm:$0xff] }
 0x905   :  { %8084 = vst [vmem:[#allocation48_spill] sm:$0xff] %v6351_v5 }
 0x906   :  { %2235 = vmatpush.msra.mxu1 %v6198_v26  ;;  %2465 = vmatpush.msra.mxu0 %v6198_v26  ;;  %v6355_v26 = vld [vmem:[#allocation7 + $0x130] sm:$0xff] }
 0x907   :  { %3889 = vmatmul.msk.f32.vlgmr.msra.gmra.mxu1 %vm2190_vm11, %v8044_v34  ;;  %8085 = vst [vmem:[#allocation63_spill] sm:$0xff] %v6355_v26 }
 0x908   :  { %2530 = vmatpush.msrb.mxu0 %v6339_v25  ;;  %2240 = vmatpush.msrb.mxu1 %v6335_v13 }
 0x90a   :  { %2241 = vmatpush.msrb.mxu1 %v6323_v42  ;;  %2531 = vmatpush.msrb.mxu0 %v6347_v45 }
 0x90c   :  { %2242 = vmatpush.msrb.mxu1 %v6311_v63  ;;  %2532 = vmatpush.msrb.mxu0 %v6351_v5 }
 0x90e   :  { %2243 = vmatpush.msrb.mxu1 %v6299_v29  ;;  %2533 = vmatpush.msrb.mxu0 %v6355_v26 }
 0x910   :  { %2244 = vmatpush.msrb.mxu1 %v6293_v0  ;;  %2534 = vmatpush.msrb.mxu0 %v6359_v9 }
 0x912   :  { %2245 = vmatpush.msrb.mxu1 %v6289_v54  ;;  %2535 = vmatpush.msrb.mxu0 %v6363_v10 }
 0x914   :  { %2246 = vmatpush.msrb.mxu1 %v6285_v61  ;;  %2536 = vmatpush.msrb.mxu0 %v6367_v1 }
 0x916   :  { %2247 = vmatpush.msrb.mxu1 %v6281_v47  ;;  %2537 = vmatpush.msrb.mxu0 %v6371_v14 }
 0x918   :  { %2248 = vmatpush.msrb.mxu1 %v6274_v51  ;;  %2538 = vmatpush.msrb.mxu0 %v6375_v6 }
 0x91a   :  { %2249 = vmatpush.msrb.mxu1 %v6265_v22  ;;  %2539 = vmatpush.msrb.mxu0 %v6379_v58 }
 0x91c   :  { %2250 = vmatpush.msrb.mxu1 %v6256_v43  ;;  %2540 = vmatpush.msrb.mxu0 %v6383_v49 }
 0x91e   :  { %2251 = vmatpush.msrb.mxu1 %v6247_v16  ;;  %2541 = vmatpush.msrb.mxu0 %v6387_v39 }
 0x920   :  { %2252 = vmatpush.msrb.mxu1 %v6236_v41  ;;  %2542 = vmatpush.msrb.mxu0 %v6391_v30 }
 0x922   :  { %2253 = vmatpush.msrb.mxu1 %v6226_v37  ;;  %2543 = vmatpush.msrb.mxu0 %v6395_v50 }
 0x924   :  { %2254 = vmatpush.msrb.mxu1 %v6222_v35  ;;  %2544 = vmatpush.msrb.mxu0 %v6399_v55 }
 0x926   :  { %2255 = vmatpush.msrb.mxu1 %v6214_v15  ;;  %2545 = vmatpush.msrb.mxu0 %v6403_v36 }
 0x927   :  { %3890 = vmatmul.msk.f32.vlgmr.msrb.gmra.mxu1 %vm2190_vm11, %v8044_v34 }
 0x928   :  { %2307 = vmatpush.msra.mxu1 %v6339_v25 }
 0x92a   :  { %2308 = vmatpush.msra.mxu1 %v6347_v45 }
 0x92c   :  { %2309 = vmatpush.msra.mxu1 %v6351_v5 }
 0x92e   :  { %2310 = vmatpush.msra.mxu1 %v6355_v26 }
 0x930   :  { %2311 = vmatpush.msra.mxu1 %v6359_v9 }
 0x932   :  { %2312 = vmatpush.msra.mxu1 %v6363_v10  ;;  %v6553_v10 = vld [vmem:[%s7515_s13 + $0x8] sm:$0xff] }
 0x933   :  { %8113 = vst [vmem:[#allocation91_spill] sm:$0xff] %v6553_v10 }
 0x934   :  { %2313 = vmatpush.msra.mxu1 %v6367_v1  ;;  %v6432_v1 = vld [vmem:[%s7515_s13 + $0x70] sm:$0xff] }
 0x935   :  { %8099 = vst [vmem:[#allocation77_spill] sm:$0xff] %v6432_v1  ;;  %2378 = vmatpush.msra.mxu3 %v6432_v1 }
 0x936   :  { %2314 = vmatpush.msra.mxu1 %v6371_v14  ;;  %v6515_v14 = vld [vmem:[%s7515_s13 + $0x28] sm:$0xff] }
 0x937   :  { %8108 = vst [vmem:[#allocation86_spill] sm:$0xff] %v6515_v14 }
 0x938   :  { %2315 = vmatpush.msra.mxu1 %v6375_v6  ;;  %v6508_v6 = vld [vmem:[%s7515_s13 + $0x30] sm:$0xff] }
 0x939   :  { %8107 = vst [vmem:[#allocation85_spill] sm:$0xff] %v6508_v6 }
 0x93a   :  { %2316 = vmatpush.msra.mxu1 %v6379_v58  ;;  %v6501_v58 = vld [vmem:[%s7515_s13 + $0x38] sm:$0xff] }
 0x93b   :  { %8106 = vst [vmem:[#allocation84_spill] sm:$0xff] %v6501_v58 }
 0x93c   :  { %2317 = vmatpush.msra.mxu1 %v6383_v49  ;;  %v6442_v49 = vld [vmem:[%s7515_s13 + $0x68] sm:$0xff] }
 0x93d   :  { %8100 = vst [vmem:[#allocation78_spill] sm:$0xff] %v6442_v49  ;;  %2379 = vmatpush.msra.mxu3 %v6442_v49 }
 0x93e   :  { %2318 = vmatpush.msra.mxu1 %v6387_v39  ;;  %v6447_v39 = vld [vmem:[%s7515_s13 + $0x60] sm:$0xff] }
 0x93f   :  { %8101 = vst [vmem:[#allocation79_spill] sm:$0xff] %v6447_v39  ;;  %2380 = vmatpush.msra.mxu3 %v6447_v39 }
 0x940   :  { %2319 = vmatpush.msra.mxu1 %v6391_v30  ;;  %v6494_v30 = vld [vmem:[%s7515_s13 + $0x40] sm:$0xff] }
 0x941   :  { %8105 = vst [vmem:[#allocation83_spill] sm:$0xff] %v6494_v30 }
 0x942   :  { %2320 = vmatpush.msra.mxu1 %v6395_v50  ;;  %v6489_v50 = vld [vmem:[%s7515_s13 + $0x48] sm:$0xff] }
 0x943   :  { %8104 = vst [vmem:[#allocation82_spill] sm:$0xff] %v6489_v50 }
 0x944   :  { %2321 = vmatpush.msra.mxu1 %v6399_v55  ;;  %v6462_v55 = vld [vmem:[%s7515_s13 + $0x50] sm:$0xff] }
 0x945   :  { %8103 = vst [vmem:[#allocation81_spill] sm:$0xff] %v6462_v55 }
 0x946   :  { %2322 = vmatpush.msra.mxu1 %v6403_v36  ;;  %v6455_v36 = vld [vmem:[%s7515_s13 + $0x58] sm:$0xff] }
 0x947   :  { %2323 = vmatmul.f32.vlgmr.msra.gmra.mxu1 %v6241_v57  ;;  %8102 = vst [vmem:[#allocation80_spill] sm:$0xff] %v6455_v36  ;;  %2381 = vmatpush.msra.mxu3 %v6455_v36 }
 0x948   :  { %2470 = vmatpush.msrb.mxu1 %v6335_v13 }
 0x949   :  { %2382 = vmatpush.msra.mxu3 %v6462_v55 }
 0x94a   :  { %2471 = vmatpush.msrb.mxu1 %v6323_v42 }
 0x94b   :  { %2383 = vmatpush.msra.mxu3 %v6489_v50 }
 0x94c   :  { %2472 = vmatpush.msrb.mxu1 %v6311_v63 }
 0x94d   :  { %2384 = vmatpush.msra.mxu3 %v6494_v30 }
 0x94e   :  { %2473 = vmatpush.msrb.mxu1 %v6299_v29 }
 0x94f   :  { %2385 = vmatpush.msra.mxu3 %v6501_v58 }
 0x950   :  { %2474 = vmatpush.msrb.mxu1 %v6293_v0 }
 0x951   :  { %2386 = vmatpush.msra.mxu3 %v6508_v6 }
 0x952   :  { %2475 = vmatpush.msrb.mxu1 %v6289_v54 }
 0x953   :  { %2387 = vmatpush.msra.mxu3 %v6515_v14 }
 0x954   :  { %2476 = vmatpush.msrb.mxu1 %v6285_v61 }
 0x956   :  { %2477 = vmatpush.msrb.mxu1 %v6281_v47 }
 0x958   :  { %2478 = vmatpush.msrb.mxu1 %v6274_v51 }
 0x95a   :  { %2479 = vmatpush.msrb.mxu1 %v6265_v22 }
 0x95c   :  { %2480 = vmatpush.msrb.mxu1 %v6256_v43 }
 0x95e   :  { %2481 = vmatpush.msrb.mxu1 %v6247_v16 }
 0x960   :  { %2482 = vmatpush.msrb.mxu1 %v6236_v41 }
 0x962   :  { %2483 = vmatpush.msrb.mxu1 %v6226_v37 }
 0x964   :  { %2484 = vmatpush.msrb.mxu1 %v6222_v35 }
 0x966   :  { %2485 = vmatpush.msrb.mxu1 %v6214_v15 }
 0x968   :  { %2597 = vmatpush.msra.mxu1 %v6422_v7 }
 0x96a   :  { %2598 = vmatpush.msra.mxu1 %v6432_v1 }
 0x96c   :  { %2599 = vmatpush.msra.mxu1 %v6442_v49 }
 0x96e   :  { %2600 = vmatpush.msra.mxu1 %v6447_v39 }
 0x970   :  { %2601 = vmatpush.msra.mxu1 %v6455_v36  ;;  %v2284_v36 = vpop.f32.mrf.mxu2 }
 0x972   :  { %2602 = vmatpush.msra.mxu1 %v6462_v55  ;;  %v2217_v55 = vpop.f32.mrf.mxu1 }
 0x974   :  { %2603 = vmatpush.msra.mxu1 %v6489_v50  ;;  %v6541_v50 = vld [vmem:[%s7513_s11] sm:$0x7] }
 0x975   :  { %v6558_v9 = vperm.slane %v6541_v50, 0  ;;  %v6573_v26 = vperm.slane %v6541_v50, 1 }
 0x976   :  { %2604 = vmatpush.msra.mxu1 %v6494_v30  ;;  %v6522_v30 = vld [vmem:[%s7515_s13 + $0x20] sm:$0xff] }
 0x977   :  { %8109 = vst [vmem:[#allocation87_spill] sm:$0xff] %v6522_v30  ;;  %2388 = vmatpush.msra.mxu3 %v6522_v30 }
 0x978   :  { %2605 = vmatpush.msra.mxu1 %v6501_v58  ;;  %v6529_v58 = vld [vmem:[%s7515_s13 + $0x18] sm:$0xff]  ;;  %8114 = vst [vmem:[#allocation92_spill] sm:$0xff] %v6558_v9 }
 0x979   :  { %8110 = vst [vmem:[#allocation88_spill] sm:$0xff] %v6529_v58  ;;  %2389 = vmatpush.msra.mxu3 %v6529_v58 }
 0x97a   :  { %2606 = vmatpush.msra.mxu1 %v6508_v6  ;;  %v6536_v6 = vld [vmem:[%s7515_s13 + $0x10] sm:$0xff]  ;;  %8116 = vst [vmem:[#allocation94_spill] sm:$0xff] %v6573_v26 }
 0x97b   :  { %8111 = vst [vmem:[#allocation89_spill] sm:$0xff] %v6536_v6  ;;  %2390 = vmatpush.msra.mxu3 %v6536_v6 }
 0x97c   :  { %2607 = vmatpush.msra.mxu1 %v6515_v14  ;;  %v2168_v14 = vld [vmem:[%s7514_s12] sm:$0x7] }
 0x97d   :  { %2391 = vmatpush.msra.mxu3 %v6553_v10  ;;  %v6576_v1 = vperm.slane %v2168_v14, 1 }
 0x97e   :  { %2608 = vmatpush.msra.mxu1 %v6522_v30  ;;  %v6548_v30 = vperm.slane %v2168_v14, 0 }
 0x97f   :  { %8117 = vst [vmem:[#allocation95_spill] sm:$0xff] %v6576_v1 }
 0x980   :  { %2609 = vmatpush.msra.mxu1 %v6529_v58  ;;  %8112 = vst [vmem:[#allocation90_spill] sm:$0xff] %v6548_v30  ;;  %v6563_v58 = vld [vmem:[%s7515_s13] sm:$0xff]  ;;  %v2285_v39 = vadd.f32 %v2284_v36, %v6548_v30 }
 0x981   :  { %8115 = vst [vmem:[#allocation93_spill] sm:$0xff] %v6563_v58  ;;  %2392 = vmatpush.msra.mxu3 %v6563_v58 }
 0x982   :  { %2610 = vmatpush.msra.mxu1 %v6536_v6  ;;  %v2218_v6 = vadd.f32 %v2217_v55, %v6558_v9 }
 0x983   :  { %2490 = vmatpush.msrb.mxu3 %v6000_v18 }
 0x984   :  { %2611 = vmatpush.msra.mxu1 %v6553_v10  ;;  %v2327_v49 = vadd.f32 %v2285_v39, %v2218_v6  ;;  %v2237_v5 = vpop.f32.mrf.mxu1  ;;  %v2304_v10 = vpop.f32.mrf.mxu0 }
 0x985   :  { %2491 = vmatpush.msrb.mxu3 %v6002_v19  ;;  %v2238_v36 = vadd.f32 %v2237_v5, %v6573_v26  ;;  %v2305_v55 = vadd.f32 %v2304_v10, %v6576_v1 }
 0x986   :  { %2612 = vmatpush.msra.mxu1 %v6563_v58  ;;  %v3891_v30 = vmul.f32 -1.442695, %v2327_v49 }
 0x987   :  { %2492 = vmatpush.msrb.mxu3 %v6005_v46  ;;  %v2347_v18 = vadd.f32 %v2305_v55, %v2238_v36  ;;  %v6597_v55 = vperm.slane %v6541_v50, 2 }
 0x988   :  { %4060 = vpow2.f32 %v3891_v30 }
 0x989   :  { %2493 = vmatpush.msrb.mxu3 %v6013_v44  ;;  %v3892_v19 = vmul.f32 -1.442695, %v2347_v18 }
 0x98b   :  { %2494 = vmatpush.msrb.mxu3 %v6018_v11  ;;  %4062 = vpow2.f32 %v3892_v19 }
 0x98d   :  { %2495 = vmatpush.msrb.mxu3 %v6020_v62  ;;  %v8118_v62 = vld [vmem:[#allocation30_spill] sm:$0xff] }
 0x98e   :  { %v4061_v6 = vpop.eup %4060 }
 0x98f   :  { %2496 = vmatpush.msrb.mxu3 %v6023_v23  ;;  %v2331_v46 = vadd.f32 1.0, %v4061_v6 }
 0x991   :  { %2497 = vmatpush.msrb.mxu3 %v6031_v48  ;;  %v4063_v44 = vpop.eup %4062  ;;  %4064 = vrcp.f32 %v2331_v46  ;;  %v8119_v48 = vld [vmem:[#allocation29_spill] sm:$0xff]  ;;  %v2343_v30 = vand.u32 2147483648, %v2331_v46  ;;  %vm2337_vm2 = vweird.f32 %v2331_v46 }
 0x992   :  { %v2351_v11 = vadd.f32 1.0, %v4063_v44 }
 0x993   :  { %2498 = vmatpush.msrb.mxu3 %v6036_v21  ;;  %v2344_v6 = vor.u32 1.1754944e-38, %v2343_v30 }
 0x994   :  { %4066 = vrcp.f32 %v2351_v11  ;;  %vm2357_vm6 = vweird.f32 %v2351_v11 }
 0x995   :  { %2499 = vmatpush.msrb.mxu3 %v6038_v2 }
 0x997   :  { %2500 = vmatpush.msrb.mxu3 %v6041_v59  ;;  %v4065_v23 = vpop.eup %4064 }
 0x998   :  { %v2333_v21 = vmul.f32 %v4065_v23, %v2331_v46  ;;  %vm2338_vm12 = vweird.f32 %v4065_v23 }
 0x999   :  { %2501 = vmatpush.msrb.mxu3 %v6049_v20  ;;  %vm2339_vm3 = vmor %vm2337_vm2, %vm2338_vm12 }
 0x99a   :  { %v4067_v2 = vpop.eup %4066  ;;  %v2334_v5 = vsub.f32 1.0, %v2333_v21  ;;  %v2363_v21 = vand.u32 2147483648, %v2351_v11 }
 0x99b   :  { %2502 = vmatpush.msrb.mxu3 %v6054_v12  ;;  %v2353_v10 = vmul.f32 %v4067_v2, %v2351_v11  ;;  %v6594_v12 = vperm.slane %v2168_v14, 2  ;;  %vm2358_vm5 = vweird.f32 %v4067_v2 }
 0x99c   :  { %v2335_v59 = vmul.f32 %v4065_v23, %v2334_v5  ;;  %vm2359_vm7 = vmor %vm2357_vm6, %vm2358_vm5  ;;  %v2364_v50 = vor.u32 1.1754944e-38, %v2363_v21  ;;  %v8130_v21 = vld [vmem:[#allocation27_spill] sm:$0xff] }
 0x99d   :  { %2503 = vmatpush.msrb.mxu3 %v6056_v56  ;;  %v2354_v20 = vsub.f32 1.0, %v2353_v10  ;;  %v2341_v56 = vand.u32 2147483647, %v2331_v46  ;;  %v2361_v46 = vand.u32 2147483647, %v2351_v11  ;;  %v8122_v11 = vld [vmem:[#allocation31_spill] sm:$0xff] }
 0x99e   :  { %v2336_v39 = vadd.f32 %v4065_v23, %v2335_v59 }
 0x99f   :  { %2504 = vmatpush.msrb.mxu3 %v8118_v62  ;;  %v2355_v36 = vmul.f32 %v4067_v2, %v2354_v20  ;;  %vm2342_vm4 = vcmp.eq.f32.partialorder %v2341_v56, 8.507059e+37  ;;  %vm2362_vm11 = vcmp.eq.f32.partialorder %v2361_v46, 8.507059e+37  ;;  %v8133_v46 = vld [vmem:[#allocation24_spill] sm:$0xff] }
 0x9a0   :  { %v2340_v18 = vsel %vm2339_vm3, %v4065_v23, %v2336_v39 }
 0x9a1   :  { %2505 = vmatpush.msrb.mxu3 %v8119_v48  ;;  %v2345_v62 = vsel %vm2342_vm4, %v2344_v6, %v2340_v18  ;;  %v2356_v48 = vadd.f32 %v4067_v2, %v2355_v36  ;;  %v8121_v36 = vld [vmem:[#allocation53_spill] sm:$0xff]  ;;  %v8125_v6 = vld [vmem:[#allocation32_spill] sm:$0xff] }
 0x9a3   :  { %v2360_v59 = vsel %vm2359_vm7, %v4067_v2, %v2356_v48  ;;  %v8123_v2 = vld [vmem:[#allocation34_spill] sm:$0xff]  ;;  %v8129_v48 = vld [vmem:[#allocation28_spill] sm:$0xff] }
 0x9a4   :  { %v2257_v49 = vpop.f32.mrf.mxu1  ;;  %v2365_v23 = vsel %vm2362_vm11, %v2364_v50, %v2360_v59  ;;  %v8135_v59 = vld [vmem:[#allocation22_spill] sm:$0xff]  ;;  %v2421_v50 = vstv %s2420_s6 }
 0x9a5   :  { %v2258_v14 = vadd.f32 %v2257_v49, %v6597_v55  ;;  %v2370_v20 = vsub.f32 1.0, %v2365_v23  ;;  %v2372_v56 = vmul.f32 %v2365_v23, %v6241_v57  ;;  %v8120_v49 = vld [vmem:[#allocation52_spill] sm:$0xff]  ;;  %v8127_v57 = vld [vmem:[#allocation37_spill] sm:$0xff]  ;;  %vm2422_vm8 = vcmp.eq.s32.totalorder %v2421_v50, 1 }
 0x9a6   :  { %v8147_v50 = vld [vmem:[#allocation56_spill] sm:$0xff] }
 0x9c4   :  { %v2324_v19 = vpop.f32.mrf.mxu1 }
 0x9c5   :  { %v2325_v44 = vadd.f32 %v2324_v19, %v6594_v12  ;;  %v8124_v19 = vld [vmem:[#allocation35_spill] sm:$0xff] }
 0x9c7   :  { %v2367_v5 = vmul.f32 %v2345_v62, %v2325_v44  ;;  %v8126_v44 = vld [vmem:[#allocation33_spill] sm:$0xff]  ;;  %v8128_v62 = vld [vmem:[#allocation38_spill] sm:$0xff] }
 0x9c9   :  { %v2368_v10 = vadd.f32 %v2367_v5, %v2258_v14  ;;  %v8131_v14 = vld [vmem:[#allocation26_spill] sm:$0xff]  ;;  %v8132_v5 = vld [vmem:[#allocation25_spill] sm:$0xff] }
 0x9cb   :  { %4068 = vtanh.f32 %v2368_v10  ;;  %v8134_v10 = vld [vmem:[#allocation23_spill] sm:$0xff] }
 0x9d1   :  { %v4069_v39 = vpop.eup %4068 }
 0x9d2   :  { %v2371_v30 = vmul.f32 %v4069_v39, %v2370_v20 }
 0x9d4   :  { %v6602_v18 = vadd.f32 %v2372_v56, %v2371_v30  ;;  %v3893_v30 = vld [vmem:[%s7503_s1 + $0x8] sm:$0xff] }
 0x9d6   :  { %2393 = vmatmul.f32.vlgmr.msra.gmra.mxu3 %v6602_v18 }
 0x9d7   :  { %2651 = vmatpush.msra.mxu3 %v8120_v49 }
 0x9d9   :  { %2652 = vmatpush.msra.mxu3 %v8121_v36 }
 0x9db   :  { %2653 = vmatpush.msra.mxu3 %v8122_v11 }
 0x9dd   :  { %2654 = vmatpush.msra.mxu3 %v8123_v2 }
 0x9de   :  { %2506 = vmatmul.f32.vlgmr.msrb.gmra.mxu3 %v6602_v18 }
 0x9df   :  { %2655 = vmatpush.msra.mxu3 %v8124_v19 }
 0x9e1   :  { %2656 = vmatpush.msra.mxu3 %v8125_v6 }
 0x9e3   :  { %2657 = vmatpush.msra.mxu3 %v8126_v44 }
 0x9e5   :  { %2658 = vmatpush.msra.mxu3 %v8127_v57 }
 0x9e7   :  { %2659 = vmatpush.msra.mxu3 %v8128_v62 }
 0x9e9   :  { %2660 = vmatpush.msra.mxu3 %v8129_v48 }
 0x9eb   :  { %2661 = vmatpush.msra.mxu3 %v8130_v21 }
 0x9ed   :  { %2662 = vmatpush.msra.mxu3 %v8131_v14 }
 0x9ef   :  { %2663 = vmatpush.msra.mxu3 %v8132_v5 }
 0x9f1   :  { %2664 = vmatpush.msra.mxu3 %v8133_v46 }
 0x9f3   :  { %2665 = vmatpush.msra.mxu3 %v8134_v10 }
 0x9f5   :  { %2666 = vmatpush.msra.mxu3 %v8135_v59 }
 0x9f7   :  { %2731 = vmatpush.msrb.mxu3 %v6140_v60  ;;  %v8136_v60 = vld [vmem:[#allocation13_spill] sm:$0xff] }
 0x9f9   :  { %2732 = vmatpush.msrb.mxu3 %v6147_v52  ;;  %v8137_v52 = vld [vmem:[#allocation17_spill] sm:$0xff] }
 0x9fb   :  { %2733 = vmatpush.msrb.mxu3 %v6158_v27  ;;  %v6641_v27 = vld [vmem:[%s7516_s14] ss:$0 sm:$0xff] }
 0x9fc   :  { %8138 = vst [vmem:[#allocation30_spill] sm:$0xff] %v6641_v27 }
 0x9fd   :  { %2734 = vmatpush.msrb.mxu3 %v6161_v3 }
 0x9ff   :  { %2735 = vmatpush.msrb.mxu3 %v6164_v4 }
 0xa01   :  { %2736 = vmatpush.msrb.mxu3 %v6167_v24 }
 0xa03   :  { %2737 = vmatpush.msrb.mxu3 %v6174_v31 }
 0xa05   :  { %2738 = vmatpush.msrb.mxu3 %v6177_v40 }
 0xa07   :  { %2739 = vmatpush.msrb.mxu3 %v6181_v8 }
 0xa09   :  { %2740 = vmatpush.msrb.mxu3 %v6185_v33 }
 0xa0b   :  { %2741 = vmatpush.msrb.mxu3 %v6192_v32 }
 0xa0d   :  { %2742 = vmatpush.msrb.mxu3 %v6194_v53 }
 0xa0f   :  { %2743 = vmatpush.msrb.mxu3 %v6200_v28 }
 0xa11   :  { %2744 = vmatpush.msrb.mxu3 %v6208_v38 }
 0xa13   :  { %2745 = vmatpush.msrb.mxu3 %v8136_v60 }
 0xa15   :  { %2746 = vmatpush.msrb.mxu3 %v8137_v52 }
 0xa59   :  { %v2394_v3 = vpop.f32.mrf.mxu3 }
 0xa5a   :  { %v2395_v4 = vadd.f32 %v6641_v27, %v2394_v3  ;;  %v8139_v3 = vld [vmem:[#allocation62_spill] sm:$0xff] }
 0xa5c   :  { %2397 = vst [vmem:[%s7517_s15] sm:$0xff] %v2395_v4  ;;  %2398 = vmax.xlane.f32.xlu2 %v2395_v4 }
 0xacf   :  { %v2399_v24 = vpop.xlane.xlu2 %2398 }
 0xad0   :  { %vm2400_vm0 = vcmp.eq.f32.partialorder %v2395_v4, %v2399_v24  ;;  %v6657_v4 = vld [vmem:[#allocation7 + $0x168] sm:$0xff]  ;;  %v8140_v24 = vld [vmem:[#allocation47_spill] sm:$0xff] }
 0xad1   :  { %v2401_v31 = vsel %vm2400_vm0, %v8043_v17, 128 }
 0xad2   :  { %v2403_v40 = vshra.s32 %v2401_v31, 16  ;;  %v2402_v33 = vand.u32 65535, %v2401_v31  ;;  %v6662_v31 = vld [vmem:[#allocation7 + $0x150] sm:$0xff] }
 0xad4   :  { %v2405_v8 = vcvt.s32.f32 %v2403_v40  ;;  %v2404_v53 = vcvt.s32.f32 %v2402_v33  ;;  %v8141_v40 = vld [vmem:[#allocation45_spill] sm:$0xff]  ;;  %v8142_v33 = vld [vmem:[#allocation44_spill] sm:$0xff] }
 0xad6   :  { %2406 = vmin.xlane.f32.xlu0 %v2405_v8 }
 0xb49   :  { %v2407_v32 = vpop.xlane.xlu0 %2406 }
 0xb4a   :  { %vm2408_vm13 = vcmp.eq.f32.partialorder %v2405_v8, %v2407_v32  ;;  %v2413_v38 = vcvt.f32.s32 %v2407_v32  ;;  %v6667_v8 = vld [vmem:[#allocation7 + $0x138] sm:$0xff] }
 0xb4b   :  { %v2409_v28 = vsel %vm2408_vm13, %v2404_v53, inf  ;;  %v8143_v32 = vld [vmem:[#allocation59_spill] sm:$0xff]  ;;  %v6676_v53 = vld [vmem:[#allocation7 + $0x120] sm:$0xff] }
 0xb4c   :  { %2410 = vmin.xlane.f32.xlu1 %v2409_v28  ;;  %v2414_v20 = vshll.u32 %v2413_v38, 16  ;;  %8144 = vst [vmem:[#allocation29_spill] sm:$0xff] %v6676_v53  ;;  %v8145_v28 = vld [vmem:[#allocation43_spill] sm:$0xff]  ;;  %v6681_v38 = vld [vmem:[#allocation7 + $0x108] sm:$0xff] }
 0xb4d   :  { %8146 = vst [vmem:[#allocation52_spill] sm:$0xff] %v6681_v38 }
 0xbbf   :  { %v2411_v23 = vpop.xlane.xlu1 %2410 }
 0xbc0   :  { %v2412_v39 = vcvt.f32.s32 %v2411_v23  ;;  %v6686_v23 = vld [vmem:[#allocation7 + $0xf0] sm:$0xff] }
 0xbc1   :  { %8148 = vst [vmem:[#allocation53_spill] sm:$0xff] %v6686_v23 }
 0xbc2   :  { %v2415_v56 = vadd.s32 %v2414_v20, %v2412_v39  ;;  %v8149_v20 = vld [vmem:[#allocation41_spill] sm:$0xff]  ;;  %v6691_v39 = vld [vmem:[#allocation7 + $0xd8] sm:$0xff] }
 0xbc3   :  { %8150 = vst [vmem:[#allocation31_spill] sm:$0xff] %v6691_v39 }
 0xbc4   :  { %v2423_v60 = vsel %vm2422_vm8, %v3893_v30, %v2415_v56  ;;  %v8151_v30 = vld [vmem:[#allocation40_spill] sm:$0xff] }
 0xbc5   :  { %2425 = vperm.xlu2 %3958, %v2423_v60   ;;  %v6696_v56 = vld [vmem:[#allocation7 + $0xc0] sm:$0xff]  ;;  %v8153_v60 = vld [vmem:[#allocation50_spill] sm:$0xff] }
 0xbc6   :  { %8152 = vst [vmem:[#allocation34_spill] sm:$0xff] %v6696_v56 }
 0xc1f   :  { %v2426_v52 = vpop.permute.xlu2 %2425 }
 0xc20   :  { %vm2427_vm9 = vcmp.eq.s32.totalorder %v2426_v52, %v8043_v17  ;;  %v6701_v52 = vld [vmem:[#allocation7 + $0xa8] sm:$0xff] }
 0xc21   :  { %3895 = vmatmul.msk.f32.vlgmr.msrb.gmra.mxu2 %vm2427_vm9, %v8044_v34  ;;  %3896 = vmatmul.msk.f32.vlgmr.msra.gmra.mxu0 %vm2427_vm9, %v8044_v34  ;;  %8154 = vst [vmem:[#allocation35_spill] sm:$0xff] %v6701_v52 }
 0xc22   :  { %3897 = vmatmul.msk.f32.vlgmr.msrb.gmra.mxu1 %vm2427_vm9, %v8044_v34  ;;  %2671 = vmatpush.msrb.mxu2 %v8139_v3 }
 0xc23   :  { %2691 = vmatpush.msra.mxu0 %v6335_v13  ;;  %2711 = vmatpush.msrb.mxu1 %v6657_v4 }
 0xc24   :  { %2672 = vmatpush.msrb.mxu2 %v8140_v24 }
 0xc25   :  { %2692 = vmatpush.msra.mxu0 %v6323_v42  ;;  %2712 = vmatpush.msrb.mxu1 %v6662_v31 }
 0xc26   :  { %2673 = vmatpush.msrb.mxu2 %v8141_v40 }
 0xc27   :  { %2693 = vmatpush.msra.mxu0 %v6311_v63  ;;  %2713 = vmatpush.msrb.mxu1 %v6667_v8 }
 0xc28   :  { %2674 = vmatpush.msrb.mxu2 %v8142_v33 }
 0xc29   :  { %2694 = vmatpush.msra.mxu0 %v6299_v29  ;;  %2526 = vmatmul.f32.vlgmr.msra.gmra.mxu2 %v6602_v18 }
 0xc2a   :  { %2546 = vmatmul.f32.vlgmr.msrb.gmra.mxu0 %v6602_v18  ;;  %2675 = vmatpush.msrb.mxu2 %v8143_v32 }
 0xc2b   :  { %2695 = vmatpush.msra.mxu0 %v6293_v0  ;;  %2714 = vmatpush.msrb.mxu1 %v6676_v53 }
 0xc2c   :  { %2676 = vmatpush.msrb.mxu2 %v8145_v28 }
 0xc2d   :  { %2696 = vmatpush.msra.mxu0 %v6289_v54  ;;  %2715 = vmatpush.msrb.mxu1 %v6681_v38 }
 0xc2e   :  { %2677 = vmatpush.msrb.mxu2 %v8147_v50 }
 0xc2f   :  { %2697 = vmatpush.msra.mxu0 %v6285_v61  ;;  %2716 = vmatpush.msrb.mxu1 %v6686_v23 }
 0xc30   :  { %2678 = vmatpush.msrb.mxu2 %v8149_v20 }
 0xc31   :  { %2698 = vmatpush.msra.mxu0 %v6281_v47  ;;  %2717 = vmatpush.msrb.mxu1 %v6691_v39  ;;  %v8155_v47 = vld [vmem:[#allocation55_spill] sm:$0xff]  ;;  %v6706_v39 = vld [vmem:[#allocation7 + $0x90] sm:$0xff] }
 0xc32   :  { %2679 = vmatpush.msrb.mxu2 %v8151_v30  ;;  %8156 = vst [vmem:[#allocation32_spill] sm:$0xff] %v6706_v39 }
 0xc33   :  { %2699 = vmatpush.msra.mxu0 %v6274_v51  ;;  %2718 = vmatpush.msrb.mxu1 %v6696_v56  ;;  %v8157_v51 = vld [vmem:[#allocation51_spill] sm:$0xff] }
 0xc34   :  { %2680 = vmatpush.msrb.mxu2 %v8153_v60  ;;  %v6711_v56 = vld [vmem:[#allocation7 + $0x78] sm:$0xff] }
 0xc35   :  { %2700 = vmatpush.msra.mxu0 %v6265_v22  ;;  %2719 = vmatpush.msrb.mxu1 %v6701_v52  ;;  %8158 = vst [vmem:[#allocation33_spill] sm:$0xff] %v6711_v56  ;;  %v8159_v22 = vld [vmem:[#allocation21_spill] sm:$0xff]  ;;  %v6716_v52 = vld [vmem:[#allocation7 + $0x60] sm:$0xff] }
 0xc36   :  { %2681 = vmatpush.msrb.mxu2 %v8155_v47  ;;  %8160 = vst [vmem:[#allocation37_spill] sm:$0xff] %v6716_v52 }
 0xc37   :  { %2701 = vmatpush.msra.mxu0 %v6256_v43  ;;  %2720 = vmatpush.msrb.mxu1 %v6706_v39  ;;  %v8161_v43 = vld [vmem:[#allocation18_spill] sm:$0xff]  ;;  %v6721_v39 = vld [vmem:[#allocation7 + $0x48] sm:$0xff] }
 0xc38   :  { %2682 = vmatpush.msrb.mxu2 %v8157_v51  ;;  %8162 = vst [vmem:[#allocation38_spill] sm:$0xff] %v6721_v39 }
 0xc39   :  { %2702 = vmatpush.msra.mxu0 %v6247_v16  ;;  %2721 = vmatpush.msrb.mxu1 %v6711_v56  ;;  %v8163_v16 = vld [vmem:[#allocation14_spill] sm:$0xff] }
 0xc3a   :  { %2683 = vmatpush.msrb.mxu2 %v8159_v22  ;;  %v6726_v56 = vld [vmem:[#allocation7 + $0x30] sm:$0xff] }
 0xc3b   :  { %2703 = vmatpush.msra.mxu0 %v6236_v41  ;;  %2722 = vmatpush.msrb.mxu1 %v6716_v52  ;;  %8164 = vst [vmem:[#allocation28_spill] sm:$0xff] %v6726_v56  ;;  %v8165_v41 = vld [vmem:[#allocation16_spill] sm:$0xff]  ;;  %v6731_v52 = vld [vmem:[#allocation7 + $0x18] sm:$0xff] }
 0xc3c   :  { %2684 = vmatpush.msrb.mxu2 %v8161_v43  ;;  %8166 = vst [vmem:[#allocation27_spill] sm:$0xff] %v6731_v52 }
 0xc3d   :  { %2704 = vmatpush.msra.mxu0 %v6226_v37  ;;  %2723 = vmatpush.msrb.mxu1 %v6721_v39  ;;  %v6736_v39 = vld [vmem:[#allocation7] sm:$0xff]  ;;  %v8176_v37 = vld [vmem:[#allocation81_spill] sm:$0xff] }
 0xc3e   :  { %2685 = vmatpush.msrb.mxu2 %v8163_v16  ;;  %8167 = vst [vmem:[#allocation26_spill] sm:$0xff] %v6736_v39  ;;  %v8172_v16 = vld [vmem:[#allocation79_spill] sm:$0xff] }
 0xc3f   :  { %2705 = vmatpush.msra.mxu0 %v6222_v35  ;;  %2724 = vmatpush.msrb.mxu1 %v6726_v56  ;;  %v8168_v35 = vld [vmem:[#allocation77_spill] sm:$0xff]  ;;  %v8169_v56 = vld [vmem:[#allocation48_spill] sm:$0xff] }
 0xc40   :  { %2686 = vmatpush.msrb.mxu2 %v8165_v41  ;;  %v8170_v41 = vld [vmem:[#allocation78_spill] sm:$0xff] }
 0xc41   :  { %2706 = vmatpush.msra.mxu0 %v6214_v15  ;;  %2725 = vmatpush.msrb.mxu1 %v6731_v52  ;;  %v8171_v15 = vld [vmem:[#allocation63_spill] sm:$0xff]  ;;  %v8173_v52 = vld [vmem:[#allocation64_spill] sm:$0xff] }
 0xc42   :  { %2751 = vmatpush.msra.mxu2 %v6339_v25  ;;  %v8174_v25 = vld [vmem:[#allocation80_spill] sm:$0xff] }
 0xc43   :  { %2818 = vmatpush.msrb.mxu0 %v6422_v7  ;;  %2726 = vmatpush.msrb.mxu1 %v6736_v39  ;;  %v8175_v7 = vld [vmem:[#allocation65_spill] sm:$0xff]  ;;  %v8177_v39 = vld [vmem:[#allocation66_spill] sm:$0xff] }
 0xc44   :  { %2752 = vmatpush.msra.mxu2 %v6347_v45  ;;  %v8178_v45 = vld [vmem:[#allocation82_spill] sm:$0xff] }
 0xc45   :  { %2819 = vmatpush.msrb.mxu0 %v8168_v35  ;;  %v8179_v35 = vld [vmem:[#allocation67_spill] sm:$0xff] }
 0xc46   :  { %2753 = vmatpush.msra.mxu2 %v8169_v56  ;;  %v8180_v56 = vld [vmem:[#allocation83_spill] sm:$0xff] }
 0xc47   :  { %2820 = vmatpush.msrb.mxu0 %v8170_v41  ;;  %v8181_v41 = vld [vmem:[#allocation68_spill] sm:$0xff] }
 0xc48   :  { %2754 = vmatpush.msra.mxu2 %v8171_v15  ;;  %v8182_v15 = vld [vmem:[#allocation84_spill] sm:$0xff] }
 0xc49   :  { %2821 = vmatpush.msrb.mxu0 %v8172_v16  ;;  %v8183_v16 = vld [vmem:[#allocation69_spill] sm:$0xff] }
 0xc4a   :  { %2755 = vmatpush.msra.mxu2 %v8173_v52  ;;  %v8184_v52 = vld [vmem:[#allocation85_spill] sm:$0xff] }
 0xc4b   :  { %2822 = vmatpush.msrb.mxu0 %v8174_v25  ;;  %v8185_v25 = vld [vmem:[#allocation70_spill] sm:$0xff] }
 0xc4c   :  { %2756 = vmatpush.msra.mxu2 %v8175_v7  ;;  %v8186_v7 = vld [vmem:[#allocation86_spill] sm:$0xff] }
 0xc4d   :  { %2823 = vmatpush.msrb.mxu0 %v8176_v37  ;;  %v8187_v37 = vld [vmem:[#allocation71_spill] sm:$0xff] }
 0xc4e   :  { %2757 = vmatpush.msra.mxu2 %v8177_v39  ;;  %v8188_v39 = vld [vmem:[#allocation87_spill] sm:$0xff] }
 0xc4f   :  { %2824 = vmatpush.msrb.mxu0 %v8178_v45  ;;  %v8189_v45 = vld [vmem:[#allocation72_spill] sm:$0xff] }
 0xc50   :  { %2758 = vmatpush.msra.mxu2 %v8179_v35  ;;  %v8190_v35 = vld [vmem:[#allocation88_spill] sm:$0xff] }
 0xc51   :  { %2825 = vmatpush.msrb.mxu0 %v8180_v56  ;;  %v8191_v56 = vld [vmem:[#allocation73_spill] sm:$0xff] }
 0xc52   :  { %2759 = vmatpush.msra.mxu2 %v8181_v41  ;;  %v8192_v41 = vld [vmem:[#allocation89_spill] sm:$0xff] }
 0xc53   :  { %2826 = vmatpush.msrb.mxu0 %v8182_v15  ;;  %v8193_v15 = vld [vmem:[#allocation74_spill] sm:$0xff] }
 0xc54   :  { %2760 = vmatpush.msra.mxu2 %v8183_v16  ;;  %v8194_v16 = vld [vmem:[#allocation91_spill] sm:$0xff] }
 0xc55   :  { %2827 = vmatpush.msrb.mxu0 %v8184_v52  ;;  %v8195_v52 = vld [vmem:[#allocation75_spill] sm:$0xff] }
 0xc56   :  { %2761 = vmatpush.msra.mxu2 %v8185_v25  ;;  %v2507_v25 = vpop.f32.mrf.mxu3 }
 0xc57   :  { %2828 = vmatpush.msrb.mxu0 %v8186_v7  ;;  %v8196_v7 = vld [vmem:[#allocation90_spill] sm:$0xff] }
 0xc58   :  { %2762 = vmatpush.msra.mxu2 %v8187_v37 }
 0xc59   :  { %2829 = vmatpush.msrb.mxu0 %v8188_v39  ;;  %v2508_v39 = vadd.f32 %v2507_v25, %v8196_v7 }
 0xc5a   :  { %2763 = vmatpush.msra.mxu2 %v8189_v45 }
 0xc5b   :  { %2830 = vmatpush.msrb.mxu0 %v8190_v35 }
 0xc5c   :  { %2764 = vmatpush.msra.mxu2 %v8191_v56 }
 0xc5d   :  { %2831 = vmatpush.msrb.mxu0 %v8192_v41 }
 0xc5e   :  { %2765 = vmatpush.msra.mxu2 %v8193_v15 }
 0xc5f   :  { %2832 = vmatpush.msrb.mxu0 %v8194_v16 }
 0xc60   :  { %2766 = vmatpush.msra.mxu2 %v8195_v52 }
 0xc61   :  { %2833 = vmatpush.msrb.mxu0 %v6563_v58 }
 0xc9e   :  { %v2467_v22 = vpop.f32.mrf.mxu0 }
 0xc9f   :  { %v2468_v41 = vadd.f32 %v2467_v22, %v6573_v26 }
 0xca4   :  { %v2447_v37 = vpop.f32.mrf.mxu2 }
 0xca5   :  { %v2448_v45 = vadd.f32 %v2447_v37, %v6558_v9 }
 0xca7   :  { %v2550_v43 = vadd.f32 %v2508_v39, %v2448_v45  ;;  %v2547_v45 = vpop.f32.mrf.mxu0 }
 0xca9   :  { %v3898_v35 = vmul.f32 -1.442695, %v2550_v43 }
 0xcab   :  { %4070 = vpow2.f32 %v3898_v35 }
 0xcac   :  { %v2527_v56 = vpop.f32.mrf.mxu2 }
 0xcad   :  { %v2528_v15 = vadd.f32 %v2527_v56, %v6576_v1 }
 0xcaf   :  { %v2570_v16 = vadd.f32 %v2528_v15, %v2468_v41  ;;  %v2487_v41 = vpop.f32.mrf.mxu1 }
 0xcb0   :  { %v2488_v1 = vadd.f32 %v2487_v41, %v6597_v55 }
 0xcb1   :  { %v4071_v51 = vpop.eup %4070  ;;  %v3899_v52 = vmul.f32 -1.442695, %v2570_v16 }
 0xcb2   :  { %v2554_v47 = vadd.f32 1.0, %v4071_v51  ;;  %v2548_v51 = vadd.f32 %v2547_v45, %v6594_v12 }
 0xcb3   :  { %4072 = vpow2.f32 %v3899_v52 }
 0xcb4   :  { %4074 = vrcp.f32 %v2554_v47  ;;  %v2566_v43 = vand.u32 2147483648, %v2554_v47  ;;  %v2564_v35 = vand.u32 2147483647, %v2554_v47  ;;  %vm2560_vm14 = vweird.f32 %v2554_v47 }
 0xcb6   :  { %v2567_v16 = vor.u32 1.1754944e-38, %v2566_v43  ;;  %vm2565_vm1 = vcmp.eq.f32.partialorder %v2564_v35, 8.507059e+37 }
 0xcb9   :  { %v4073_v58 = vpop.eup %4072 }
 0xcba   :  { %v4075_v60 = vpop.eup %4074  ;;  %v2574_v25 = vadd.f32 1.0, %v4073_v58 }
 0xcbb   :  { %v2556_v7 = vmul.f32 %v4075_v60, %v2554_v47  ;;  %vm2561_vm10 = vweird.f32 %v4075_v60 }
 0xcbc   :  { %4076 = vrcp.f32 %v2574_v25  ;;  %vm2562_vm15 = vmor %vm2560_vm14, %vm2561_vm10  ;;  %vm2580_vm2 = vweird.f32 %v2574_v25 }
 0xcbd   :  { %v2557_v39 = vsub.f32 1.0, %v2556_v7 }
 0xcbf   :  { %v2558_v37 = vmul.f32 %v4075_v60, %v2557_v39  ;;  %v2586_v39 = vand.u32 2147483648, %v2574_v25 }
 0xcc1   :  { %v2559_v22 = vadd.f32 %v4075_v60, %v2558_v37  ;;  %v2584_v37 = vand.u32 2147483647, %v2574_v25  ;;  %v2587_v43 = vor.u32 1.1754944e-38, %v2586_v39  ;;  %v6835_v39 = vld [vmem:[#allocation7 + $0x38] sm:$0xff] }
 0xcc2   :  { %v4077_v56 = vpop.eup %4076  ;;  %8201 = vst [vmem:[#allocation13_spill] sm:$0xff] %v6835_v39 }
 0xcc3   :  { %v2563_v15 = vsel %vm2562_vm15, %v4075_v60, %v2559_v22  ;;  %v2576_v52 = vmul.f32 %v4077_v56, %v2574_v25  ;;  %vm2581_vm12 = vweird.f32 %v4077_v56  ;;  %vm2585_vm4 = vcmp.eq.f32.partialorder %v2584_v37, 8.507059e+37  ;;  %v6814_v25 = vld [vmem:[#allocation7 + $0xe0] sm:$0xff] }
 0xcc4   :  { %v2568_v58 = vsel %vm2565_vm1, %v2567_v16, %v2563_v15  ;;  %vm2582_vm3 = vmor %vm2580_vm2, %vm2581_vm12  ;;  %v6823_v15 = vld [vmem:[#allocation7 + $0x98] sm:$0xff]  ;;  %v6838_v37 = vld [vmem:[#allocation7 + $0x20] sm:$0xff] }
 0xcc5   :  { %v2590_v7 = vmul.f32 %v2568_v58, %v2548_v51  ;;  %v2577_v26 = vsub.f32 1.0, %v2576_v52  ;;  %v6820_v51 = vld [vmem:[#allocation7 + $0xb0] sm:$0xff]  ;;  %8197 = vst [vmem:[#allocation25_spill] sm:$0xff] %v6823_v15  ;;  %v6826_v52 = vld [vmem:[#allocation7 + $0x80] sm:$0xff]  ;;  %v6829_v58 = vld [vmem:[#allocation7 + $0x68] sm:$0xff] }
 0xcc6   :  { %8198 = vst [vmem:[#allocation24_spill] sm:$0xff] %v6826_v52 }
 0xcc7   :  { %v2591_v9 = vadd.f32 %v2590_v7, %v2488_v1  ;;  %v2578_v30 = vmul.f32 %v4077_v56, %v2577_v26  ;;  %v6796_v26 = vld [vmem:[#allocation7 + $0x170] sm:$0xff]  ;;  %v6802_v1 = vld [vmem:[#allocation7 + $0x140] sm:$0xff]  ;;  %8199 = vst [vmem:[#allocation23_spill] sm:$0xff] %v6829_v58 }
 0xcc8   :  { %v6832_v7 = vld [vmem:[#allocation7 + $0x50] sm:$0xff]  ;;  %8202 = vst [vmem:[#allocation17_spill] sm:$0xff] %v6838_v37 }
 0xcc9   :  { %4078 = vtanh.f32 %v2591_v9  ;;  %v2579_v47 = vadd.f32 %v4077_v56, %v2578_v30  ;;  %v6799_v9 = vld [vmem:[#allocation7 + $0x158] sm:$0xff]  ;;  %8200 = vst [vmem:[#allocation22_spill] sm:$0xff] %v6832_v7 }
 0xcca   :  { %v6811_v30 = vld [vmem:[#allocation7 + $0xf8] sm:$0xff] }
 0xccb   :  { %v2583_v20 = vsel %vm2582_vm3, %v4077_v56, %v2579_v47  ;;  %v6817_v56 = vld [vmem:[#allocation7 + $0xc8] sm:$0xff] }
 0xccc   :  { %v2588_v60 = vsel %vm2585_vm4, %v2587_v43, %v2583_v20  ;;  %v6808_v20 = vld [vmem:[#allocation7 + $0x110] sm:$0xff]  ;;  %v6841_v47 = vld [vmem:[#allocation7 + $0x8] sm:$0xff] }
 0xccd   :  { %v2593_v35 = vsub.f32 1.0, %v2588_v60  ;;  %v2595_v41 = vmul.f32 %v2588_v60, %v6602_v18  ;;  %v6805_v18 = vld [vmem:[#allocation7 + $0x128] sm:$0xff]  ;;  %8203 = vst [vmem:[#allocation62_spill] sm:$0xff] %v6841_v47 }
 0xccf   :  { %v4079_v45 = vpop.eup %4078 }
 0xcd0   :  { %v2594_v22 = vmul.f32 %v4079_v45, %v2593_v35 }
 0xcd2   :  { %v6776_v16 = vadd.f32 %v2595_v41, %v2594_v22 }
 0xcd4   :  { %2613 = vmatmul.f32.vlgmr.msra.gmra.mxu1 %v6776_v16 }
 0xcd5   :  { %2872 = vmatpush.msra.mxu1 %v8120_v49 }
 0xcd7   :  { %2873 = vmatpush.msra.mxu1 %v8121_v36 }
 0xcd9   :  { %2874 = vmatpush.msra.mxu1 %v8122_v11 }
 0xcdb   :  { %2875 = vmatpush.msra.mxu1 %v8123_v2 }
 0xcdc   :  { %2727 = vmatmul.f32.vlgmr.msrb.gmra.mxu1 %v6776_v16 }
 0xcdd   :  { %2876 = vmatpush.msra.mxu1 %v8124_v19 }
 0xcdf   :  { %2877 = vmatpush.msra.mxu1 %v8125_v6 }
 0xce1   :  { %2878 = vmatpush.msra.mxu1 %v8126_v44 }
 0xce3   :  { %2879 = vmatpush.msra.mxu1 %v8127_v57 }
 0xce5   :  { %2880 = vmatpush.msra.mxu1 %v8128_v62 }
 0xce7   :  { %2881 = vmatpush.msra.mxu1 %v8129_v48 }
 0xce9   :  { %2882 = vmatpush.msra.mxu1 %v8130_v21 }
 0xceb   :  { %2883 = vmatpush.msra.mxu1 %v8131_v14 }
 0xced   :  { %2884 = vmatpush.msra.mxu1 %v8132_v5 }
 0xcef   :  { %2885 = vmatpush.msra.mxu1 %v8133_v46 }
 0xcf1   :  { %2886 = vmatpush.msra.mxu1 %v8134_v10 }
 0xcf3   :  { %2887 = vmatpush.msra.mxu1 %v8135_v59 }
 0xcf5   :  { %2952 = vmatpush.msrb.mxu1 %v6796_v26 }
 0xcf7   :  { %2953 = vmatpush.msrb.mxu1 %v6799_v9 }
 0xcf9   :  { %2954 = vmatpush.msrb.mxu1 %v6802_v1 }
 0xcfb   :  { %2955 = vmatpush.msrb.mxu1 %v6805_v18 }
 0xcfd   :  { %2956 = vmatpush.msrb.mxu1 %v6808_v20 }
 0xcff   :  { %2957 = vmatpush.msrb.mxu1 %v6811_v30 }
 0xd01   :  { %2958 = vmatpush.msrb.mxu1 %v6814_v25 }
 0xd03   :  { %2959 = vmatpush.msrb.mxu1 %v6817_v56 }
 0xd05   :  { %2960 = vmatpush.msrb.mxu1 %v6820_v51 }
 0xd07   :  { %2961 = vmatpush.msrb.mxu1 %v6823_v15 }
 0xd09   :  { %2962 = vmatpush.msrb.mxu1 %v6826_v52 }
 0xd0b   :  { %2963 = vmatpush.msrb.mxu1 %v6829_v58 }
 0xd0d   :  { %2964 = vmatpush.msrb.mxu1 %v6832_v7 }
 0xd0f   :  { %2965 = vmatpush.msrb.mxu1 %v6835_v39 }
 0xd11   :  { %2966 = vmatpush.msrb.mxu1 %v6838_v37 }
 0xd13   :  { %2967 = vmatpush.msrb.mxu1 %v6841_v47 }
 0xd51   :  { %v2614_v43 = vpop.f32.mrf.mxu1 }
 0xd52   :  { %v2615_v60 = vadd.f32 %v6641_v27, %v2614_v43  ;;  %v2642_v27 = vstv %s2641_s10 }
 0xd53   :  { %vm2643_vm7 = vcmp.eq.s32.totalorder %v2642_v27, 1  ;;  %v8204_v27 = vld [vmem:[#allocation41_spill] sm:$0xff] }
 0xd54   :  { %3900 = vst [vmem:[%s7517_s15 + $0x8] sm:$0xff] %v2615_v60  ;;  %2619 = vmax.xlane.f32.xlu0 %v2615_v60 }
 0xdc7   :  { %v2620_v35 = vpop.xlane.xlu0 %2619 }
 0xdc8   :  { %vm2621_vm5 = vcmp.eq.f32.partialorder %v2615_v60, %v2620_v35  ;;  %v3902_v60 = vld [vmem:[%s7503_s1 + $0x10] sm:$0xff] }
 0xdc9   :  { %v2622_v45 = vsel %vm2621_vm5, %v8043_v17, 128 }
 0xdca   :  { %v2624_v22 = vshra.s32 %v2622_v45, 16  ;;  %v2623_v37 = vand.u32 65535, %v2622_v45 }
 0xdcc   :  { %v2626_v41 = vcvt.s32.f32 %v2624_v22  ;;  %v2625_v7 = vcvt.s32.f32 %v2623_v37  ;;  %v8211_v22 = vld [vmem:[#allocation39_spill] sm:$0xff] }
 0xdce   :  { %2627 = vmin.xlane.f32.xlu1 %v2626_v41 }
 0xe41   :  { %v2628_v39 = vpop.xlane.xlu1 %2627 }
 0xe42   :  { %vm2629_vm6 = vcmp.eq.f32.partialorder %v2626_v41, %v2628_v39  ;;  %v2634_v43 = vcvt.f32.s32 %v2628_v39  ;;  %v8209_v39 = vld [vmem:[#allocation34_spill] sm:$0xff]  ;;  %v8212_v41 = vld [vmem:[#allocation35_spill] sm:$0xff] }
 0xe43   :  { %v2630_v47 = vsel %vm2629_vm6, %v2625_v7, inf  ;;  %v8208_v7 = vld [vmem:[#allocation57_spill] sm:$0xff] }
 0xe44   :  { %2631 = vmin.xlane.f32.xlu0 %v2630_v47  ;;  %v2635_v52 = vshll.u32 %v2634_v43, 16  ;;  %v8210_v47 = vld [vmem:[#allocation50_spill] sm:$0xff]  ;;  %v8213_v43 = vld [vmem:[#allocation55_spill] sm:$0xff] }
 0xeb7   :  { %v2632_v58 = vpop.xlane.xlu0 %2631 }
 0xeb8   :  { %v2633_v15 = vcvt.f32.s32 %v2632_v58  ;;  %v8207_v58 = vld [vmem:[#allocation40_spill] sm:$0xff] }
 0xeba   :  { %v2636_v35 = vadd.s32 %v2635_v52, %v2633_v15  ;;  %v8205_v15 = vld [vmem:[#allocation42_spill] sm:$0xff]  ;;  %v8206_v52 = vld [vmem:[#allocation31_spill] sm:$0xff] }
 0xebc   :  { %v2644_v45 = vsel %vm2643_vm7, %v3902_v60, %v2636_v35  ;;  %v8214_v60 = vld [vmem:[#allocation36_spill] sm:$0xff] }
 0xebd   :  { %2646 = vperm.xlu1 %3957, %v2644_v45   ;;  %v8215_v35 = vld [vmem:[#allocation32_spill] sm:$0xff]  ;;  %v8216_v45 = vld [vmem:[#allocation51_spill] sm:$0xff] }
 0xf2f   :  { %v2647_v37 = vpop.permute.xlu1 %2646 }
 0xf30   :  { %vm2648_vm11 = vcmp.eq.s32.totalorder %v2647_v37, %v8043_v17  ;;  %v8217_v37 = vld [vmem:[#allocation54_spill] sm:$0xff] }
 0xf31   :  { %3904 = vmatmul.msk.f32.vlgmr.msra.gmra.mxu3 %vm2648_vm11, %v8044_v34  ;;  %3905 = vmatmul.msk.f32.vlgmr.msrb.gmra.mxu2 %vm2648_vm11, %v8044_v34 }
 0xf32   :  { %3906 = vmatmul.msk.f32.vlgmr.msra.gmra.mxu0 %vm2648_vm11, %v8044_v34  ;;  %2892 = vmatpush.msra.mxu3 %v8139_v3 }
 0xf33   :  { %2912 = vmatpush.msrb.mxu2 %v6335_v13  ;;  %2932 = vmatpush.msra.mxu0 %v6657_v4 }
 0xf34   :  { %2893 = vmatpush.msra.mxu3 %v8140_v24 }
 0xf35   :  { %2913 = vmatpush.msrb.mxu2 %v6323_v42  ;;  %2933 = vmatpush.msra.mxu0 %v6662_v31 }
 0xf36   :  { %2894 = vmatpush.msra.mxu3 %v8141_v40 }
 0xf37   :  { %2914 = vmatpush.msrb.mxu2 %v6311_v63  ;;  %2934 = vmatpush.msra.mxu0 %v6667_v8 }
 0xf38   :  { %2895 = vmatpush.msra.mxu3 %v8142_v33 }
 0xf39   :  { %2915 = vmatpush.msrb.mxu2 %v6299_v29  ;;  %2747 = vmatmul.f32.vlgmr.msrb.gmra.mxu3 %v6776_v16 }
 0xf3a   :  { %2767 = vmatmul.f32.vlgmr.msra.gmra.mxu2 %v6776_v16  ;;  %2896 = vmatpush.msra.mxu3 %v8143_v32 }
 0xf3b   :  { %2916 = vmatpush.msrb.mxu2 %v6293_v0  ;;  %2935 = vmatpush.msra.mxu0 %v6676_v53 }
 0xf3c   :  { %2897 = vmatpush.msra.mxu3 %v8145_v28 }
 0xf3d   :  { %2917 = vmatpush.msrb.mxu2 %v6289_v54  ;;  %2936 = vmatpush.msra.mxu0 %v6681_v38 }
 0xf3e   :  { %2898 = vmatpush.msra.mxu3 %v8147_v50 }
 0xf3f   :  { %2918 = vmatpush.msrb.mxu2 %v6285_v61  ;;  %2937 = vmatpush.msra.mxu0 %v6686_v23 }
 0xf40   :  { %2899 = vmatpush.msra.mxu3 %v8204_v27 }
 0xf41   :  { %2919 = vmatpush.msrb.mxu2 %v8205_v15  ;;  %2938 = vmatpush.msra.mxu0 %v8206_v52 }
 0xf42   :  { %2900 = vmatpush.msra.mxu3 %v8207_v58  ;;  %v8218_v58 = vld [vmem:[#allocation33_spill] sm:$0xff] }
 0xf43   :  { %2920 = vmatpush.msrb.mxu2 %v8208_v7  ;;  %2939 = vmatpush.msra.mxu0 %v8209_v39  ;;  %v8219_v7 = vld [vmem:[#allocation21_spill] sm:$0xff]  ;;  %v8220_v39 = vld [vmem:[#allocation60_spill] sm:$0xff] }
 0xf44   :  { %2901 = vmatpush.msra.mxu3 %v8210_v47  ;;  %v8221_v47 = vld [vmem:[#allocation37_spill] sm:$0xff] }
 0xf45   :  { %2921 = vmatpush.msrb.mxu2 %v8211_v22  ;;  %2940 = vmatpush.msra.mxu0 %v8212_v41  ;;  %v8222_v22 = vld [vmem:[#allocation18_spill] sm:$0xff]  ;;  %v8223_v41 = vld [vmem:[#allocation15_spill] sm:$0xff] }
 0xf46   :  { %2902 = vmatpush.msra.mxu3 %v8213_v43  ;;  %v8224_v43 = vld [vmem:[#allocation38_spill] sm:$0xff] }
 0xf47   :  { %2922 = vmatpush.msrb.mxu2 %v8214_v60  ;;  %2941 = vmatpush.msra.mxu0 %v8215_v35  ;;  %v8225_v60 = vld [vmem:[#allocation14_spill] sm:$0xff]  ;;  %v8226_v35 = vld [vmem:[#allocation20_spill] sm:$0xff] }
 0xf48   :  { %2903 = vmatpush.msra.mxu3 %v8216_v45  ;;  %v8227_v45 = vld [vmem:[#allocation28_spill] sm:$0xff] }
 0xf49   :  { %2923 = vmatpush.msrb.mxu2 %v8217_v37  ;;  %2942 = vmatpush.msra.mxu0 %v8218_v58  ;;  %v8228_v37 = vld [vmem:[#allocation16_spill] sm:$0xff]  ;;  %v8229_v58 = vld [vmem:[#allocation19_spill] sm:$0xff] }
 0xf4a   :  { %2904 = vmatpush.msra.mxu3 %v8219_v7  ;;  %v8230_v7 = vld [vmem:[#allocation27_spill] sm:$0xff] }
 0xf4b   :  { %2924 = vmatpush.msrb.mxu2 %v8220_v39  ;;  %2943 = vmatpush.msra.mxu0 %v8221_v47  ;;  %v6905_v39 = vld [vmem:[#allocation7 + $0x178] sm:$0xff]  ;;  %v8265_v47 = vld [vmem:[#allocation92_spill] sm:$0xff] }
 0xf4c   :  { %2905 = vmatpush.msra.mxu3 %v8222_v22  ;;  %8231 = vst [vmem:[#allocation47_spill] sm:$0xff] %v6905_v39  ;;  %v8232_v22 = vld [vmem:[#allocation76_spill] sm:$0xff] }
 0xf4d   :  { %2925 = vmatpush.msrb.mxu2 %v8223_v41  ;;  %2944 = vmatpush.msra.mxu0 %v8224_v43  ;;  %v8233_v41 = vld [vmem:[#allocation26_spill] sm:$0xff]  ;;  %v6910_v43 = vld [vmem:[#allocation7 + $0x160] sm:$0xff] }
 0xf4e   :  { %2906 = vmatpush.msra.mxu3 %v8225_v60  ;;  %8234 = vst [vmem:[#allocation45_spill] sm:$0xff] %v6910_v43 }
 0xf4f   :  { %2926 = vmatpush.msrb.mxu2 %v8226_v35  ;;  %2945 = vmatpush.msra.mxu0 %v8227_v45  ;;  %v8235_v35 = vld [vmem:[#allocation77_spill] sm:$0xff] }
 0xf50   :  { %2907 = vmatpush.msra.mxu3 %v8228_v37  ;;  %v6914_v45 = vld [vmem:[#allocation7 + $0x148] sm:$0xff]  ;;  %v8264_v37 = vld [vmem:[#allocation90_spill] sm:$0xff] }
 0xf51   :  { %2927 = vmatpush.msrb.mxu2 %v8229_v58  ;;  %2946 = vmatpush.msra.mxu0 %v8230_v7  ;;  %8236 = vst [vmem:[#allocation48_spill] sm:$0xff] %v6914_v45  ;;  %v8237_v58 = vld [vmem:[#allocation78_spill] sm:$0xff] }
 0xf52   :  { %2972 = vmatpush.msrb.mxu3 %v6905_v39  ;;  %v6918_v7 = vld [vmem:[#allocation7 + $0x130] sm:$0xff]  ;;  %v8239_v39 = vld [vmem:[#allocation79_spill] sm:$0xff] }
 0xf53   :  { %3039 = vmatpush.msra.mxu2 %v8232_v22  ;;  %2947 = vmatpush.msra.mxu0 %v8233_v41  ;;  %8238 = vst [vmem:[#allocation63_spill] sm:$0xff] %v6918_v7  ;;  %v6922_v22 = vld [vmem:[#allocation7 + $0x118] sm:$0xff]  ;;  %v8241_v41 = vld [vmem:[#allocation80_spill] sm:$0xff] }
 0xf54   :  { %2973 = vmatpush.msrb.mxu3 %v6910_v43  ;;  %8240 = vst [vmem:[#allocation64_spill] sm:$0xff] %v6922_v22  ;;  %v6926_v43 = vld [vmem:[#allocation7 + $0x100] sm:$0xff] }
 0xf55   :  { %3040 = vmatpush.msra.mxu2 %v8235_v35  ;;  %8242 = vst [vmem:[#allocation65_spill] sm:$0xff] %v6926_v43  ;;  %v8243_v35 = vld [vmem:[#allocation81_spill] sm:$0xff] }
 0xf56   :  { %2974 = vmatpush.msrb.mxu3 %v6914_v45  ;;  %v6930_v45 = vld [vmem:[#allocation7 + $0xe8] sm:$0xff] }
 0xf57   :  { %3041 = vmatpush.msra.mxu2 %v8237_v58  ;;  %8244 = vst [vmem:[#allocation66_spill] sm:$0xff] %v6930_v45  ;;  %v8245_v58 = vld [vmem:[#allocation82_spill] sm:$0xff] }
 0xf58   :  { %2975 = vmatpush.msrb.mxu3 %v6918_v7  ;;  %v6934_v7 = vld [vmem:[#allocation7 + $0xd0] sm:$0xff] }
 0xf59   :  { %3042 = vmatpush.msra.mxu2 %v8239_v39  ;;  %8246 = vst [vmem:[#allocation67_spill] sm:$0xff] %v6934_v7  ;;  %v8247_v39 = vld [vmem:[#allocation83_spill] sm:$0xff] }
 0xf5a   :  { %2976 = vmatpush.msrb.mxu3 %v6922_v22  ;;  %v6938_v22 = vld [vmem:[#allocation7 + $0xb8] sm:$0xff] }
 0xf5b   :  { %3043 = vmatpush.msra.mxu2 %v8241_v41  ;;  %8248 = vst [vmem:[#allocation68_spill] sm:$0xff] %v6938_v22  ;;  %v8249_v41 = vld [vmem:[#allocation84_spill] sm:$0xff] }
 0xf5c   :  { %2977 = vmatpush.msrb.mxu3 %v6926_v43  ;;  %v6942_v43 = vld [vmem:[#allocation7 + $0xa0] sm:$0xff] }
 0xf5d   :  { %3044 = vmatpush.msra.mxu2 %v8243_v35  ;;  %8250 = vst [vmem:[#allocation69_spill] sm:$0xff] %v6942_v43  ;;  %v8251_v35 = vld [vmem:[#allocation85_spill] sm:$0xff] }
 0xf5e   :  { %2978 = vmatpush.msrb.mxu3 %v6930_v45  ;;  %v6946_v45 = vld [vmem:[#allocation7 + $0x88] sm:$0xff] }
 0xf5f   :  { %3045 = vmatpush.msra.mxu2 %v8245_v58  ;;  %8252 = vst [vmem:[#allocation70_spill] sm:$0xff] %v6946_v45  ;;  %v8253_v58 = vld [vmem:[#allocation86_spill] sm:$0xff] }
 0xf60   :  { %2979 = vmatpush.msrb.mxu3 %v6934_v7  ;;  %v6950_v7 = vld [vmem:[#allocation7 + $0x70] sm:$0xff] }
 0xf61   :  { %3046 = vmatpush.msra.mxu2 %v8247_v39  ;;  %8254 = vst [vmem:[#allocation71_spill] sm:$0xff] %v6950_v7  ;;  %v8255_v39 = vld [vmem:[#allocation87_spill] sm:$0xff] }
 0xf62   :  { %2980 = vmatpush.msrb.mxu3 %v6938_v22  ;;  %v6954_v22 = vld [vmem:[#allocation7 + $0x58] sm:$0xff] }
 0xf63   :  { %3047 = vmatpush.msra.mxu2 %v8249_v41  ;;  %8256 = vst [vmem:[#allocation72_spill] sm:$0xff] %v6954_v22  ;;  %v8257_v41 = vld [vmem:[#allocation88_spill] sm:$0xff] }
 0xf64   :  { %2981 = vmatpush.msrb.mxu3 %v6942_v43  ;;  %v6958_v43 = vld [vmem:[#allocation7 + $0x40] sm:$0xff] }
 0xf65   :  { %3048 = vmatpush.msra.mxu2 %v8251_v35  ;;  %8258 = vst [vmem:[#allocation73_spill] sm:$0xff] %v6958_v43  ;;  %v8259_v35 = vld [vmem:[#allocation89_spill] sm:$0xff] }
 0xf66   :  { %2982 = vmatpush.msrb.mxu3 %v6946_v45  ;;  %v6962_v45 = vld [vmem:[#allocation7 + $0x28] sm:$0xff] }
 0xf67   :  { %3049 = vmatpush.msra.mxu2 %v8253_v58  ;;  %8260 = vst [vmem:[#allocation74_spill] sm:$0xff] %v6962_v45  ;;  %v8261_v58 = vld [vmem:[#allocation91_spill] sm:$0xff] }
 0xf68   :  { %2983 = vmatpush.msrb.mxu3 %v6950_v7  ;;  %v6966_v7 = vld [vmem:[#allocation7 + $0x10] sm:$0xff] }
 0xf69   :  { %3050 = vmatpush.msra.mxu2 %v8255_v39  ;;  %8262 = vst [vmem:[#allocation75_spill] sm:$0xff] %v6966_v7  ;;  %v8263_v39 = vld [vmem:[#allocation93_spill] sm:$0xff] }
 0xf6a   :  { %2984 = vmatpush.msrb.mxu3 %v6954_v22  ;;  %v2728_v22 = vpop.f32.mrf.mxu1 }
 0xf6b   :  { %3051 = vmatpush.msra.mxu2 %v8257_v41  ;;  %v2729_v60 = vadd.f32 %v2728_v22, %v8264_v37 }
 0xf6c   :  { %2985 = vmatpush.msrb.mxu3 %v6958_v43 }
 0xf6d   :  { %3052 = vmatpush.msra.mxu2 %v8259_v35 }
 0xf6e   :  { %2986 = vmatpush.msrb.mxu3 %v6962_v45  ;;  %v8266_v45 = vld [vmem:[#allocation94_spill] sm:$0xff] }
 0xf6f   :  { %3053 = vmatpush.msra.mxu2 %v8261_v58  ;;  %v8267_v58 = vld [vmem:[#allocation95_spill] sm:$0xff] }
 0xf70   :  { %2987 = vmatpush.msrb.mxu3 %v6966_v7 }
 0xf71   :  { %3054 = vmatpush.msra.mxu2 %v8263_v39 }
 0xfb4   :  { %v2668_v41 = vpop.f32.mrf.mxu3  ;;  %v2688_v15 = vpop.f32.mrf.mxu2 }
 0xfb5   :  { %v2669_v43 = vadd.f32 %v2668_v41, %v8265_v47  ;;  %v2689_v23 = vadd.f32 %v2688_v15, %v8266_v45 }
 0xfb7   :  { %v2771_v52 = vadd.f32 %v2729_v60, %v2669_v43 }
 0xfb9   :  { %v3907_v35 = vmul.f32 -1.442695, %v2771_v52 }
 0xfbb   :  { %4080 = vpow2.f32 %v3907_v35 }
 0xfbc   :  { %v2748_v27 = vpop.f32.mrf.mxu3 }
 0xfbd   :  { %v2749_v61 = vadd.f32 %v2748_v27, %v8267_v58  ;;  %v2768_v35 = vpop.f32.mrf.mxu2 }
 0xfbf   :  { %v2791_v50 = vadd.f32 %v2749_v61, %v2689_v23  ;;  %v2708_v61 = vpop.f32.mrf.mxu0  ;;  %v2769_v23 = vadd.f32 %v2768_v35, %v6594_v12 }
 0xfc0   :  { %v2709_v58 = vadd.f32 %v2708_v61, %v6597_v55 }
 0xfc1   :  { %v4081_v38 = vpop.eup %4080  ;;  %v3908_v7 = vmul.f32 -1.442695, %v2791_v50 }
 0xfc2   :  { %v2775_v54 = vadd.f32 1.0, %v4081_v38 }
 0xfc3   :  { %4082 = vpow2.f32 %v3908_v7 }
 0xfc4   :  { %4084 = vrcp.f32 %v2775_v54  ;;  %v2787_v52 = vand.u32 2147483648, %v2775_v54  ;;  %v2785_v41 = vand.u32 2147483647, %v2775_v54  ;;  %vm2781_vm13 = vweird.f32 %v2775_v54 }
 0xfc6   :  { %v2788_v50 = vor.u32 1.1754944e-38, %v2787_v52  ;;  %vm2786_vm9 = vcmp.eq.f32.partialorder %v2785_v41, 8.507059e+37 }
 0xfc9   :  { %v4083_v39 = vpop.eup %4082 }
 0xfca   :  { %v4085_v28 = vpop.eup %4084  ;;  %v2795_v22 = vadd.f32 1.0, %v4083_v39 }
 0xfcb   :  { %v2777_v37 = vmul.f32 %v4085_v28, %v2775_v54  ;;  %vm2782_vm0 = vweird.f32 %v4085_v28 }
 0xfcc   :  { %4086 = vrcp.f32 %v2795_v22  ;;  %vm2783_vm8 = vmor %vm2781_vm13, %vm2782_vm0  ;;  %v2805_v53 = vand.u32 2147483647, %v2795_v22  ;;  %vm2801_vm14 = vweird.f32 %v2795_v22 }
 0xfcd   :  { %v2778_v43 = vsub.f32 1.0, %v2777_v37 }
 0xfce   :  { %vm2806_vm1 = vcmp.eq.f32.partialorder %v2805_v53, 8.507059e+37  ;;  %v8269_v53 = vld [vmem:[#allocation24_spill] sm:$0xff] }
 0xfcf   :  { %v2779_v60 = vmul.f32 %v4085_v28, %v2778_v43  ;;  %v2807_v43 = vand.u32 2147483648, %v2795_v22 }
 0xfd1   :  { %v2780_v15 = vadd.f32 %v4085_v28, %v2779_v60  ;;  %v2808_v52 = vor.u32 1.1754944e-38, %v2807_v43 }
 0xfd2   :  { %v4087_v27 = vpop.eup %4086 }
 0xfd3   :  { %v2797_v38 = vmul.f32 %v4087_v27, %v2795_v22  ;;  %v2784_v7 = vsel %vm2783_vm8, %v4085_v28, %v2780_v15  ;;  %vm2802_vm10 = vweird.f32 %v4087_v27  ;;  %v8274_v22 = vld [vmem:[#allocation62_spill] sm:$0xff] }
 0xfd4   :  { %v2789_v39 = vsel %vm2786_vm9, %v2788_v50, %v2784_v7  ;;  %vm2803_vm15 = vmor %vm2801_vm14, %vm2802_vm10 }
 0xfd5   :  { %v2798_v37 = vsub.f32 1.0, %v2797_v38  ;;  %v2811_v45 = vmul.f32 %v2789_v39, %v2769_v23  ;;  %v8275_v38 = vld [vmem:[#allocation30_spill] sm:$0xff] }
 0xfd7   :  { %v2799_v47 = vmul.f32 %v4087_v27, %v2798_v37  ;;  %v2812_v60 = vadd.f32 %v2811_v45, %v2709_v58  ;;  %v8272_v45 = vld [vmem:[#allocation13_spill] sm:$0xff] }
 0xfd8   :  { %v8273_v58 = vld [vmem:[#allocation17_spill] sm:$0xff] }
 0xfd9   :  { %v2800_v54 = vadd.f32 %v4087_v27, %v2799_v47  ;;  %4088 = vtanh.f32 %v2812_v60  ;;  %v8271_v47 = vld [vmem:[#allocation22_spill] sm:$0xff] }
 0xfdb   :  { %v2804_v0 = vsel %vm2803_vm15, %v4087_v27, %v2800_v54 }
 0xfdc   :  { %v2809_v35 = vsel %vm2806_vm1, %v2808_v52, %v2804_v0  ;;  %v8268_v0 = vld [vmem:[#allocation25_spill] sm:$0xff] }
 0xfdd   :  { %v2814_v28 = vsub.f32 1.0, %v2809_v35  ;;  %v2816_v61 = vmul.f32 %v2809_v35, %v6776_v16  ;;  %v8270_v16 = vld [vmem:[#allocation23_spill] sm:$0xff] }
 0xfdf   :  { %v4089_v41 = vpop.eup %4088 }
 0xfe0   :  { %v2815_v15 = vmul.f32 %v4089_v41, %v2814_v28  ;;  %v2863_v41 = vstv %s2862_s24 }
 0xfe1   :  { %vm2864_vm3 = vcmp.eq.s32.totalorder %v2863_v41, 1  ;;  %v8286_v41 = vld [vmem:[#allocation31_spill] sm:$0xff] }
 0xfe2   :  { %v6977_v50 = vadd.f32 %v2816_v61, %v2815_v15 }
 0xfe4   :  { %2834 = vmatmul.f32.vlgmr.msrb.gmra.mxu0 %v6977_v50 }
 0xfe5   :  { %3093 = vmatpush.msrb.mxu0 %v8120_v49 }
 0xfe7   :  { %3094 = vmatpush.msrb.mxu0 %v8121_v36 }
 0xfe9   :  { %3095 = vmatpush.msrb.mxu0 %v8122_v11 }
 0xfeb   :  { %3096 = vmatpush.msrb.mxu0 %v8123_v2 }
 0xfec   :  { %2948 = vmatmul.f32.vlgmr.msra.gmra.mxu0 %v6977_v50 }
 0xfed   :  { %3097 = vmatpush.msrb.mxu0 %v8124_v19 }
 0xfef   :  { %3098 = vmatpush.msrb.mxu0 %v8125_v6 }
 0xff1   :  { %3099 = vmatpush.msrb.mxu0 %v8126_v44 }
 0xff3   :  { %3100 = vmatpush.msrb.mxu0 %v8127_v57 }
 0xff5   :  { %3101 = vmatpush.msrb.mxu0 %v8128_v62 }
 0xff7   :  { %3102 = vmatpush.msrb.mxu0 %v8129_v48 }
 0xff9   :  { %3103 = vmatpush.msrb.mxu0 %v8130_v21 }
 0xffb   :  { %3104 = vmatpush.msrb.mxu0 %v8131_v14 }
 0xffd   :  { %3105 = vmatpush.msrb.mxu0 %v8132_v5 }
 0xfff   :  { %3106 = vmatpush.msrb.mxu0 %v8133_v46 }
0x1001   :  { %3107 = vmatpush.msrb.mxu0 %v8134_v10 }
0x1003   :  { %3108 = vmatpush.msrb.mxu0 %v8135_v59 }
0x1005   :  { %3173 = vmatpush.msra.mxu0 %v6796_v26 }
0x1007   :  { %3174 = vmatpush.msra.mxu0 %v6799_v9 }
0x1009   :  { %3175 = vmatpush.msra.mxu0 %v6802_v1 }
0x100b   :  { %3176 = vmatpush.msra.mxu0 %v6805_v18 }
0x100d   :  { %3177 = vmatpush.msra.mxu0 %v6808_v20 }
0x100f   :  { %3178 = vmatpush.msra.mxu0 %v6811_v30 }
0x1011   :  { %3179 = vmatpush.msra.mxu0 %v6814_v25 }
0x1013   :  { %3180 = vmatpush.msra.mxu0 %v6817_v56 }
0x1015   :  { %3181 = vmatpush.msra.mxu0 %v6820_v51 }
0x1017   :  { %3182 = vmatpush.msra.mxu0 %v8268_v0 }
0x1019   :  { %3183 = vmatpush.msra.mxu0 %v8269_v53 }
0x101b   :  { %3184 = vmatpush.msra.mxu0 %v8270_v16 }
0x101d   :  { %3185 = vmatpush.msra.mxu0 %v8271_v47 }
0x101f   :  { %3186 = vmatpush.msra.mxu0 %v8272_v45 }
0x1021   :  { %3187 = vmatpush.msra.mxu0 %v8273_v58 }
0x1023   :  { %3188 = vmatpush.msra.mxu0 %v8274_v22 }
0x1061   :  { %v2835_v27 = vpop.f32.mrf.mxu0 }
0x1062   :  { %v2836_v23 = vadd.f32 %v8275_v38, %v2835_v27  ;;  %v3911_v38 = vld [vmem:[%s7503_s1 + $0x18] sm:$0xff] }
0x1064   :  { %3909 = vst [vmem:[%s7517_s15 + $0x10] sm:$0xff] %v2836_v23  ;;  %2840 = vmax.xlane.f32.xlu2 %v2836_v23 }
0x10d7   :  { %v2841_v7 = vpop.xlane.xlu2 %2840 }
0x10d8   :  { %vm2842_vm12 = vcmp.eq.f32.partialorder %v2836_v23, %v2841_v7 }
0x10d9   :  { %v2843_v39 = vsel %vm2842_vm12, %v8043_v17, 128 }
0x10da   :  { %v2845_v37 = vshra.s32 %v2843_v39, 16  ;;  %v2844_v60 = vand.u32 65535, %v2843_v39 }
0x10dc   :  { %v2847_v43 = vcvt.s32.f32 %v2845_v37  ;;  %v2846_v52 = vcvt.s32.f32 %v2844_v60  ;;  %v8277_v37 = vld [vmem:[#allocation29_spill] sm:$0xff]  ;;  %v8280_v60 = vld [vmem:[#allocation52_spill] sm:$0xff] }
0x10de   :  { %2848 = vmin.xlane.f32.xlu0 %v2847_v43 }
0x1151   :  { %v2849_v54 = vpop.xlane.xlu0 %2848 }
0x1152   :  { %vm2850_vm2 = vcmp.eq.f32.partialorder %v2847_v43, %v2849_v54  ;;  %v2855_v28 = vcvt.f32.s32 %v2849_v54  ;;  %v8279_v43 = vld [vmem:[#allocation46_spill] sm:$0xff] }
0x1153   :  { %v2851_v35 = vsel %vm2850_vm2, %v2846_v52, inf  ;;  %v8282_v54 = vld [vmem:[#allocation58_spill] sm:$0xff]  ;;  %v8283_v52 = vld [vmem:[#allocation53_spill] sm:$0xff] }
0x1154   :  { %2852 = vmin.xlane.f32.xlu0 %v2851_v35  ;;  %v2856_v61 = vshll.u32 %v2855_v28, 16  ;;  %v8284_v35 = vld [vmem:[#allocation41_spill] sm:$0xff]  ;;  %v8285_v28 = vld [vmem:[#allocation42_spill] sm:$0xff] }
0x11c7   :  { %v2853_v15 = vpop.xlane.xlu0 %2852 }
0x11c8   :  { %v2854_v27 = vcvt.f32.s32 %v2853_v15  ;;  %v8287_v15 = vld [vmem:[#allocation40_spill] sm:$0xff] }
0x11ca   :  { %v2857_v23 = vadd.s32 %v2856_v61, %v2854_v27  ;;  %v8288_v61 = vld [vmem:[#allocation57_spill] sm:$0xff]  ;;  %v8289_v27 = vld [vmem:[#allocation34_spill] sm:$0xff] }
0x11cc   :  { %v2865_v7 = vsel %vm2864_vm3, %v3911_v38, %v2857_v23  ;;  %v8290_v38 = vld [vmem:[#allocation50_spill] sm:$0xff]  ;;  %v8291_v23 = vld [vmem:[#allocation39_spill] sm:$0xff] }
0x11cd   :  { %2867 = vperm.xlu0 %3956, %v2865_v7   ;;  %v8292_v7 = vld [vmem:[#allocation35_spill] sm:$0xff] }
0x123f   :  { %v2868_v39 = vpop.permute.xlu0 %2867 }
0x1240   :  { %vm2869_vm4 = vcmp.eq.s32.totalorder %v2868_v39, %v8043_v17  ;;  %v8293_v39 = vld [vmem:[#allocation55_spill] sm:$0xff] }
0x1241   :  { %3913 = vmatmul.msk.f32.vlgmr.msra.gmra.mxu1 %vm2869_vm4, %v8044_v34  ;;  %3914 = vmatmul.msk.f32.vlgmr.msra.gmra.mxu3 %vm2869_vm4, %v8044_v34 }
0x1242   :  { %3915 = vmatmul.msk.f32.vlgmr.msrb.gmra.mxu2 %vm2869_vm4, %v8044_v34  ;;  %3113 = vmatpush.msra.mxu1 %v8139_v3 }
0x1243   :  { %3133 = vmatpush.msra.mxu3 %v6335_v13  ;;  %3153 = vmatpush.msrb.mxu2 %v6657_v4  ;;  %v8276_v4 = vld [vmem:[#allocation12_spill] sm:$0xff] }
0x1244   :  { %3114 = vmatpush.msra.mxu1 %v8140_v24 }
0x1245   :  { %3134 = vmatpush.msra.mxu3 %v6323_v42  ;;  %3154 = vmatpush.msrb.mxu2 %v6662_v31  ;;  %v8278_v31 = vld [vmem:[#allocation43_spill] sm:$0xff] }
0x1246   :  { %3115 = vmatpush.msra.mxu1 %v8141_v40 }
0x1247   :  { %3135 = vmatpush.msra.mxu3 %v6311_v63  ;;  %3155 = vmatpush.msrb.mxu2 %v6667_v8  ;;  %v8281_v8 = vld [vmem:[#allocation56_spill] sm:$0xff] }
0x1248   :  { %3116 = vmatpush.msra.mxu1 %v8142_v33 }
0x1249   :  { %3136 = vmatpush.msra.mxu3 %v6299_v29  ;;  %2968 = vmatmul.f32.vlgmr.msrb.gmra.mxu1 %v6977_v50 }
0x124a   :  { %2988 = vmatmul.f32.vlgmr.msrb.gmra.mxu3 %v6977_v50  ;;  %3117 = vmatpush.msra.mxu1 %v8143_v32 }
0x124b   :  { %3137 = vmatpush.msra.mxu3 %v8276_v4  ;;  %3156 = vmatpush.msrb.mxu2 %v8277_v37  ;;  %v8294_v37 = vld [vmem:[#allocation36_spill] sm:$0xff] }
0x124c   :  { %3118 = vmatpush.msra.mxu1 %v8278_v31 }
0x124d   :  { %3138 = vmatpush.msra.mxu3 %v8279_v43  ;;  %3157 = vmatpush.msrb.mxu2 %v8280_v60  ;;  %v8295_v60 = vld [vmem:[#allocation32_spill] sm:$0xff] }
0x124e   :  { %3119 = vmatpush.msra.mxu1 %v8281_v8 }
0x124f   :  { %3139 = vmatpush.msra.mxu3 %v8282_v54  ;;  %3158 = vmatpush.msrb.mxu2 %v8283_v52  ;;  %v8296_v52 = vld [vmem:[#allocation51_spill] sm:$0xff] }
0x1250   :  { %3120 = vmatpush.msra.mxu1 %v8284_v35  ;;  %v8346_v35 = vld [vmem:[#allocation94_spill] sm:$0xff]  ;;  %v8347_v54 = vld [vmem:[#allocation95_spill] sm:$0xff] }
0x1251   :  { %3140 = vmatpush.msra.mxu3 %v8285_v28  ;;  %3159 = vmatpush.msrb.mxu2 %v8286_v41  ;;  %v8297_v41 = vld [vmem:[#allocation54_spill] sm:$0xff] }
0x1252   :  { %3121 = vmatpush.msra.mxu1 %v8287_v15  ;;  %v8298_v15 = vld [vmem:[#allocation33_spill] sm:$0xff] }
0x1253   :  { %3141 = vmatpush.msra.mxu3 %v8288_v61  ;;  %3160 = vmatpush.msrb.mxu2 %v8289_v27  ;;  %v8299_v61 = vld [vmem:[#allocation21_spill] sm:$0xff]  ;;  %v8300_v27 = vld [vmem:[#allocation60_spill] sm:$0xff] }
0x1254   :  { %3122 = vmatpush.msra.mxu1 %v8290_v38  ;;  %v8301_v38 = vld [vmem:[#allocation37_spill] sm:$0xff] }
0x1255   :  { %3142 = vmatpush.msra.mxu3 %v8291_v23  ;;  %3161 = vmatpush.msrb.mxu2 %v8292_v7  ;;  %v8302_v23 = vld [vmem:[#allocation18_spill] sm:$0xff]  ;;  %v8303_v7 = vld [vmem:[#allocation15_spill] sm:$0xff] }
0x1256   :  { %3123 = vmatpush.msra.mxu1 %v8293_v39  ;;  %v8304_v39 = vld [vmem:[#allocation38_spill] sm:$0xff] }
0x1257   :  { %3143 = vmatpush.msra.mxu3 %v8294_v37  ;;  %3162 = vmatpush.msrb.mxu2 %v8295_v60  ;;  %v8305_v37 = vld [vmem:[#allocation14_spill] sm:$0xff]  ;;  %v8306_v60 = vld [vmem:[#allocation20_spill] sm:$0xff] }
0x1258   :  { %3124 = vmatpush.msra.mxu1 %v8296_v52  ;;  %v8307_v52 = vld [vmem:[#allocation28_spill] sm:$0xff] }
0x1259   :  { %3144 = vmatpush.msra.mxu3 %v8297_v41  ;;  %3163 = vmatpush.msrb.mxu2 %v8298_v15  ;;  %v8308_v41 = vld [vmem:[#allocation16_spill] sm:$0xff]  ;;  %v8309_v15 = vld [vmem:[#allocation19_spill] sm:$0xff] }
0x125a   :  { %3125 = vmatpush.msra.mxu1 %v8299_v61  ;;  %v8310_v61 = vld [vmem:[#allocation27_spill] sm:$0xff] }
0x125b   :  { %3145 = vmatpush.msra.mxu3 %v8300_v27  ;;  %3164 = vmatpush.msrb.mxu2 %v8301_v38  ;;  %v8311_v27 = vld [vmem:[#allocation47_spill] sm:$0xff] }
0x125c   :  { %3126 = vmatpush.msra.mxu1 %v8302_v23  ;;  %v7078_v38 = vld [vmem:[%s7515_s13 + $0x78] sm:$0xff] }
0x125d   :  { %3146 = vmatpush.msra.mxu3 %v8303_v7  ;;  %3165 = vmatpush.msrb.mxu2 %v8304_v39  ;;  %8312 = vst [vmem:[#allocation76_spill] sm:$0xff] %v7078_v38  ;;  %v8313_v39 = vld [vmem:[#allocation26_spill] sm:$0xff] }
0x125e   :  { %3127 = vmatpush.msra.mxu1 %v8305_v37 }
0x125f   :  { %3147 = vmatpush.msra.mxu3 %v8306_v60  ;;  %3166 = vmatpush.msrb.mxu2 %v8307_v52  ;;  %v8314_v60 = vld [vmem:[#allocation45_spill] sm:$0xff]  ;;  %v7086_v52 = vld [vmem:[%s7515_s13 + $0x70] sm:$0xff] }
0x1260   :  { %3128 = vmatpush.msra.mxu1 %v8308_v41  ;;  %8315 = vst [vmem:[#allocation77_spill] sm:$0xff] %v7086_v52  ;;  %v8345_v41 = vld [vmem:[#allocation92_spill] sm:$0xff] }
0x1261   :  { %3148 = vmatpush.msra.mxu3 %v8309_v15  ;;  %3167 = vmatpush.msrb.mxu2 %v8310_v61  ;;  %v8316_v61 = vld [vmem:[#allocation48_spill] sm:$0xff]  ;;  %v8344_v15 = vld [vmem:[#allocation90_spill] sm:$0xff] }
0x1262   :  { %3193 = vmatpush.msrb.mxu1 %v8311_v27  ;;  %v7093_v27 = vld [vmem:[%s7515_s13 + $0x68] sm:$0xff] }
0x1263   :  { %3260 = vmatpush.msrb.mxu3 %v7078_v38  ;;  %3168 = vmatpush.msrb.mxu2 %v8313_v39  ;;  %8317 = vst [vmem:[#allocation78_spill] sm:$0xff] %v7093_v27  ;;  %v8318_v38 = vld [vmem:[#allocation63_spill] sm:$0xff]  ;;  %v7100_v39 = vld [vmem:[%s7515_s13 + $0x60] sm:$0xff] }
0x1264   :  { %3194 = vmatpush.msrb.mxu1 %v8314_v60  ;;  %8319 = vst [vmem:[#allocation79_spill] sm:$0xff] %v7100_v39  ;;  %v8320_v60 = vld [vmem:[#allocation64_spill] sm:$0xff] }
0x1265   :  { %3261 = vmatpush.msrb.mxu3 %v7086_v52  ;;  %v8322_v52 = vld [vmem:[#allocation65_spill] sm:$0xff] }
0x1266   :  { %3195 = vmatpush.msrb.mxu1 %v8316_v61  ;;  %v7107_v61 = vld [vmem:[%s7515_s13 + $0x58] sm:$0xff] }
0x1267   :  { %3262 = vmatpush.msrb.mxu3 %v7093_v27  ;;  %8321 = vst [vmem:[#allocation80_spill] sm:$0xff] %v7107_v61  ;;  %v8324_v27 = vld [vmem:[#allocation66_spill] sm:$0xff] }
0x1268   :  { %3196 = vmatpush.msrb.mxu1 %v8318_v38  ;;  %v7114_v38 = vld [vmem:[%s7515_s13 + $0x50] sm:$0xff] }
0x1269   :  { %3263 = vmatpush.msrb.mxu3 %v7100_v39  ;;  %8323 = vst [vmem:[#allocation81_spill] sm:$0xff] %v7114_v38  ;;  %v8326_v39 = vld [vmem:[#allocation67_spill] sm:$0xff] }
0x126a   :  { %3197 = vmatpush.msrb.mxu1 %v8320_v60  ;;  %v7121_v60 = vld [vmem:[%s7515_s13 + $0x48] sm:$0xff] }
0x126b   :  { %3264 = vmatpush.msrb.mxu3 %v7107_v61  ;;  %8325 = vst [vmem:[#allocation82_spill] sm:$0xff] %v7121_v60  ;;  %v8328_v61 = vld [vmem:[#allocation68_spill] sm:$0xff] }
0x126c   :  { %3198 = vmatpush.msrb.mxu1 %v8322_v52  ;;  %v7128_v52 = vld [vmem:[%s7515_s13 + $0x40] sm:$0xff] }
0x126d   :  { %3265 = vmatpush.msrb.mxu3 %v7114_v38  ;;  %8327 = vst [vmem:[#allocation83_spill] sm:$0xff] %v7128_v52  ;;  %v8330_v38 = vld [vmem:[#allocation69_spill] sm:$0xff] }
0x126e   :  { %3199 = vmatpush.msrb.mxu1 %v8324_v27  ;;  %v7135_v27 = vld [vmem:[%s7515_s13 + $0x38] sm:$0xff] }
0x126f   :  { %3266 = vmatpush.msrb.mxu3 %v7121_v60  ;;  %8329 = vst [vmem:[#allocation84_spill] sm:$0xff] %v7135_v27  ;;  %v8332_v60 = vld [vmem:[#allocation70_spill] sm:$0xff] }
0x1270   :  { %3200 = vmatpush.msrb.mxu1 %v8326_v39  ;;  %v7142_v39 = vld [vmem:[%s7515_s13 + $0x30] sm:$0xff] }
0x1271   :  { %3267 = vmatpush.msrb.mxu3 %v7128_v52  ;;  %8331 = vst [vmem:[#allocation85_spill] sm:$0xff] %v7142_v39  ;;  %v8334_v52 = vld [vmem:[#allocation71_spill] sm:$0xff] }
0x1272   :  { %3201 = vmatpush.msrb.mxu1 %v8328_v61  ;;  %v7149_v61 = vld [vmem:[%s7515_s13 + $0x28] sm:$0xff] }
0x1273   :  { %3268 = vmatpush.msrb.mxu3 %v7135_v27  ;;  %8333 = vst [vmem:[#allocation86_spill] sm:$0xff] %v7149_v61  ;;  %v8336_v27 = vld [vmem:[#allocation72_spill] sm:$0xff] }
0x1274   :  { %3202 = vmatpush.msrb.mxu1 %v8330_v38  ;;  %v7156_v38 = vld [vmem:[%s7515_s13 + $0x20] sm:$0xff] }
0x1275   :  { %3269 = vmatpush.msrb.mxu3 %v7142_v39  ;;  %8335 = vst [vmem:[#allocation87_spill] sm:$0xff] %v7156_v38  ;;  %v8338_v39 = vld [vmem:[#allocation73_spill] sm:$0xff] }
0x1276   :  { %3203 = vmatpush.msrb.mxu1 %v8332_v60  ;;  %v7163_v60 = vld [vmem:[%s7515_s13 + $0x18] sm:$0xff] }
0x1277   :  { %3270 = vmatpush.msrb.mxu3 %v7149_v61  ;;  %8337 = vst [vmem:[#allocation88_spill] sm:$0xff] %v7163_v60  ;;  %v8340_v61 = vld [vmem:[#allocation74_spill] sm:$0xff] }
0x1278   :  { %3204 = vmatpush.msrb.mxu1 %v8334_v52  ;;  %v7170_v52 = vld [vmem:[%s7515_s13 + $0x10] sm:$0xff] }
0x1279   :  { %3271 = vmatpush.msrb.mxu3 %v7156_v38  ;;  %8339 = vst [vmem:[#allocation89_spill] sm:$0xff] %v7170_v52  ;;  %v8342_v38 = vld [vmem:[#allocation75_spill] sm:$0xff] }
0x127a   :  { %3205 = vmatpush.msrb.mxu1 %v8336_v27  ;;  %v7177_v27 = vld [vmem:[%s7515_s13 + $0x8] sm:$0xff] }
0x127b   :  { %3272 = vmatpush.msrb.mxu3 %v7163_v60  ;;  %8341 = vst [vmem:[#allocation91_spill] sm:$0xff] %v7177_v27  ;;  %v2949_v60 = vpop.f32.mrf.mxu0 }
0x127c   :  { %3206 = vmatpush.msrb.mxu1 %v8338_v39  ;;  %v7184_v39 = vld [vmem:[%s7515_s13] sm:$0xff] }
0x127d   :  { %3273 = vmatpush.msrb.mxu3 %v7170_v52  ;;  %8343 = vst [vmem:[#allocation93_spill] sm:$0xff] %v7184_v39 }
0x127e   :  { %3207 = vmatpush.msrb.mxu1 %v8340_v61  ;;  %v2950_v61 = vadd.f32 %v2949_v60, %v8344_v15 }
0x127f   :  { %3274 = vmatpush.msrb.mxu3 %v7177_v27 }
0x1280   :  { %3208 = vmatpush.msrb.mxu1 %v8342_v38 }
0x1281   :  { %3275 = vmatpush.msrb.mxu3 %v7184_v39 }
0x12be   :  { %v2889_v52 = vpop.f32.mrf.mxu1 }
0x12bf   :  { %v2890_v37 = vadd.f32 %v2889_v52, %v8345_v41 }
0x12c1   :  { %v2992_v7 = vadd.f32 %v2950_v61, %v2890_v37 }
0x12c3   :  { %v3916_v23 = vmul.f32 -1.442695, %v2992_v7 }
0x12c4   :  { %v2909_v28 = vpop.f32.mrf.mxu3 }
0x12c5   :  { %4090 = vpow2.f32 %v3916_v23  ;;  %v2910_v38 = vadd.f32 %v2909_v28, %v8346_v35 }
0x12c6   :  { %v2969_v27 = vpop.f32.mrf.mxu1 }
0x12c7   :  { %v2970_v8 = vadd.f32 %v2969_v27, %v8347_v54 }
0x12c9   :  { %v3012_v43 = vadd.f32 %v2970_v8, %v2910_v38  ;;  %v2929_v8 = vpop.f32.mrf.mxu2 }
0x12ca   :  { %v2930_v54 = vadd.f32 %v2929_v8, %v6597_v55 }
0x12cb   :  { %v4091_v31 = vpop.eup %4090  ;;  %v3917_v4 = vmul.f32 -1.442695, %v3012_v43 }
0x12cc   :  { %v2996_v32 = vadd.f32 1.0, %v4091_v31 }
0x12cd   :  { %4092 = vpow2.f32 %v3917_v4  ;;  %v2989_v61 = vpop.f32.mrf.mxu3 }
0x12ce   :  { %4094 = vrcp.f32 %v2996_v32  ;;  %v3008_v7 = vand.u32 2147483648, %v2996_v32  ;;  %v3006_v23 = vand.u32 2147483647, %v2996_v32  ;;  %vm3002_vm6 = vweird.f32 %v2996_v32 }
0x12cf   :  { %v2990_v4 = vadd.f32 %v2989_v61, %v6594_v12 }
0x12d0   :  { %v3009_v43 = vor.u32 1.1754944e-38, %v3008_v7  ;;  %vm3007_vm11 = vcmp.eq.f32.partialorder %v3006_v23, 8.507059e+37 }
0x12d3   :  { %v4093_v39 = vpop.eup %4092 }
0x12d4   :  { %v4095_v29 = vpop.eup %4094  ;;  %v3016_v60 = vadd.f32 1.0, %v4093_v39 }
0x12d5   :  { %v2998_v15 = vmul.f32 %v4095_v29, %v2996_v32  ;;  %vm3003_vm5 = vweird.f32 %v4095_v29 }
0x12d6   :  { %4096 = vrcp.f32 %v3016_v60  ;;  %vm3004_vm7 = vmor %vm3002_vm6, %vm3003_vm5  ;;  %v3026_v33 = vand.u32 2147483647, %v3016_v60  ;;  %vm3022_vm13 = vweird.f32 %v3016_v60 }
0x12d7   :  { %v2999_v37 = vsub.f32 1.0, %v2998_v15 }
0x12d8   :  { %vm3027_vm9 = vcmp.eq.f32.partialorder %v3026_v33, 8.507059e+37  ;;  %v7233_v33 = vld [vmem:[%s7516_s14] ss:$0 sm:$0xff]  ;;  %s3919_s14 = sld [smem:[#allocation3 + $0x3]] }
0x12d9   :  { %v3000_v52 = vmul.f32 %v4095_v29, %v2999_v37  ;;  %v3028_v37 = vand.u32 2147483648, %v3016_v60 }
0x12db   :  { %v3001_v28 = vadd.f32 %v4095_v29, %v3000_v52  ;;  %v3029_v7 = vor.u32 1.1754944e-38, %v3028_v37  ;;  %v8353_v37 = vld [vmem:[#allocation43_spill] sm:$0xff] }
0x12dc   :  { %v4097_v27 = vpop.eup %4096 }
0x12dd   :  { %v3018_v31 = vmul.f32 %v4097_v27, %v3016_v60  ;;  %v3005_v38 = vsel %vm3004_vm7, %v4095_v29, %v3001_v28  ;;  %vm3023_vm0 = vweird.f32 %v4097_v27  ;;  %v8348_v60 = vld [vmem:[#allocation49_spill] sm:$0xff] }
0x12de   :  { %v3010_v39 = vsel %vm3007_vm11, %v3009_v43, %v3005_v38  ;;  %vm3024_vm8 = vmor %vm3022_vm13, %vm3023_vm0  ;;  %p3080_p3 = scmp.gt.s32.totalorder %s3919_s14, 0  ;;  %v8351_v38 = vld [vmem:[#allocation59_spill] sm:$0xff] }
0x12df   :  { %v3019_v15 = vsub.f32 1.0, %v3018_v31  ;;  %v3032_v35 = vmul.f32 %v3010_v39, %v2990_v4  ;;  %v8349_v31 = vld [vmem:[#allocation44_spill] sm:$0xff]  ;;  %v8350_v4 = vld [vmem:[#allocation61_spill] sm:$0xff] }
0x12e0   :  { %s3083_s16 = scalar_select %p3080_p3, 1, 0  ;;  %v8352_v39 = vld [vmem:[#allocation12_spill] sm:$0xff] }
0x12e1   :  { %v3020_v41 = vmul.f32 %v4097_v27, %v3019_v15  ;;  %v3033_v52 = vadd.f32 %v3032_v35, %v2930_v54  ;;  %v7249_v35 = vld [vmem:[#allocation7 + $0x168] sm:$0xff]  ;;  %v7268_v15 = vld [vmem:[#allocation7 + $0x120] sm:$0xff] }
0x12e3   :  { %v3021_v32 = vadd.f32 %v4097_v27, %v3020_v41  ;;  %4098 = vtanh.f32 %v3033_v52  ;;  %v7254_v41 = vld [vmem:[#allocation7 + $0x150] sm:$0xff] }
0x12e4   :  { %v8354_v52 = vld [vmem:[#allocation46_spill] sm:$0xff] }
0x12e5   :  { %v3025_v63 = vsel %vm3024_vm8, %v4097_v27, %v3021_v32  ;;  %v7259_v27 = vld [vmem:[#allocation7 + $0x138] sm:$0xff]  ;;  %v7273_v32 = vld [vmem:[#allocation7 + $0x108] sm:$0xff] }
0x12e6   :  { %v3030_v61 = vsel %vm3027_vm9, %v3029_v7, %v3025_v63  ;;  %v8355_v7 = vld [vmem:[#allocation56_spill] sm:$0xff] }
0x12e7   :  { %v3035_v29 = vsub.f32 1.0, %v3030_v61  ;;  %v3037_v8 = vmul.f32 %v3030_v61, %v6977_v50  ;;  %v8356_v61 = vld [vmem:[#allocation58_spill] sm:$0xff] }
0x12e9   :  { %v4099_v23 = vpop.eup %4098 }
0x12ea   :  { %v3036_v28 = vmul.f32 %v4099_v23, %v3035_v29  ;;  %v7278_v29 = vld [vmem:[#allocation7 + $0xf0] sm:$0xff]  ;;  %v8357_v23 = vld [vmem:[#allocation41_spill] sm:$0xff] }
0x12ec   :  { %v7194_v43 = vadd.f32 %v3037_v8, %v3036_v28  ;;  %v8358_v28 = vld [vmem:[#allocation42_spill] sm:$0xff]  ;;  %v7283_v8 = vld [vmem:[#allocation7 + $0xd8] sm:$0xff] }
0x12ed   :  { %8359 = vst [vmem:[#allocation25_spill] sm:$0xff] %v7283_v8 }
0x12ee   :  { %3055 = vmatmul.f32.vlgmr.msra.gmra.mxu2 %v7194_v43 }
0x12ef   :  { %3314 = vmatpush.msra.mxu2 %v8120_v49 }
0x12f1   :  { %3315 = vmatpush.msra.mxu2 %v8121_v36 }
0x12f3   :  { %3316 = vmatpush.msra.mxu2 %v8122_v11 }
0x12f5   :  { %3317 = vmatpush.msra.mxu2 %v8123_v2 }
0x12f6   :  { %3169 = vmatmul.f32.vlgmr.msrb.gmra.mxu2 %v7194_v43 }
0x12f7   :  { %3318 = vmatpush.msra.mxu2 %v8124_v19 }
0x12f9   :  { %3319 = vmatpush.msra.mxu2 %v8125_v6 }
0x12fb   :  { %3320 = vmatpush.msra.mxu2 %v8126_v44 }
0x12fd   :  { %3321 = vmatpush.msra.mxu2 %v8127_v57 }
0x12ff   :  { %3322 = vmatpush.msra.mxu2 %v8128_v62 }
0x1301   :  { %3323 = vmatpush.msra.mxu2 %v8129_v48 }
0x1303   :  { %3324 = vmatpush.msra.mxu2 %v8130_v21 }
0x1305   :  { %3325 = vmatpush.msra.mxu2 %v8131_v14 }
0x1307   :  { %3326 = vmatpush.msra.mxu2 %v8132_v5 }
0x1309   :  { %3327 = vmatpush.msra.mxu2 %v8133_v46 }
0x130b   :  { %3328 = vmatpush.msra.mxu2 %v8134_v10 }
0x130d   :  { %3329 = vmatpush.msra.mxu2 %v8135_v59 }
0x130f   :  { %3394 = vmatpush.msrb.mxu2 %v6796_v26 }
0x1311   :  { %3395 = vmatpush.msrb.mxu2 %v6799_v9 }
0x1313   :  { %3396 = vmatpush.msrb.mxu2 %v6802_v1 }
0x1315   :  { %3397 = vmatpush.msrb.mxu2 %v6805_v18 }
0x1317   :  { %3398 = vmatpush.msrb.mxu2 %v6808_v20 }
0x1319   :  { %3399 = vmatpush.msrb.mxu2 %v6811_v30 }
0x131b   :  { %3400 = vmatpush.msrb.mxu2 %v6814_v25 }
0x131d   :  { %3401 = vmatpush.msrb.mxu2 %v6817_v56 }
0x131f   :  { %3402 = vmatpush.msrb.mxu2 %v6820_v51 }
0x1321   :  { %3403 = vmatpush.msrb.mxu2 %v8268_v0  ;;  %v3084_v0 = vstv %s3083_s16 }
0x1322   :  { %vm3085_vm15 = vcmp.eq.s32.totalorder %v3084_v0, 1  ;;  %v7303_v0 = vld [vmem:[#allocation7 + $0x78] sm:$0xff] }
0x1323   :  { %3404 = vmatpush.msrb.mxu2 %v8269_v53  ;;  %8371 = vst [vmem:[#allocation13_spill] sm:$0xff] %v7303_v0 }
0x1325   :  { %3405 = vmatpush.msrb.mxu2 %v8270_v16 }
0x1327   :  { %3406 = vmatpush.msrb.mxu2 %v8271_v47 }
0x1329   :  { %3407 = vmatpush.msrb.mxu2 %v8272_v45  ;;  %v3920_v45 = vld [vmem:[%s7503_s1 + $0x20] sm:$0xff] }
0x132b   :  { %3408 = vmatpush.msrb.mxu2 %v8273_v58 }
0x132d   :  { %3409 = vmatpush.msrb.mxu2 %v8274_v22 }
0x1371   :  { %v3056_v63 = vpop.f32.mrf.mxu2 }
0x1372   :  { %v3057_v26 = vadd.f32 %v7233_v33, %v3056_v63  ;;  %v8360_v63 = vld [vmem:[#allocation40_spill] sm:$0xff] }
0x1374   :  { %3918 = vst [vmem:[%s7517_s15 + $0x18] sm:$0xff] %v3057_v26  ;;  %3061 = vmax.xlane.f32.xlu1 %v3057_v26 }
0x13e7   :  { %v3062_v9 = vpop.xlane.xlu1 %3061 }
0x13e8   :  { %vm3063_vm10 = vcmp.eq.f32.partialorder %v3057_v26, %v3062_v9  ;;  %v8361_v26 = vld [vmem:[#allocation57_spill] sm:$0xff]  ;;  %v7288_v9 = vld [vmem:[#allocation7 + $0xc0] sm:$0xff] }
0x13e9   :  { %v3064_v1 = vsel %vm3063_vm10, %v8043_v17, 128  ;;  %8362 = vst [vmem:[#allocation24_spill] sm:$0xff] %v7288_v9 }
0x13ea   :  { %v3066_v18 = vshra.s32 %v3064_v1, 16  ;;  %v3065_v30 = vand.u32 65535, %v3064_v1  ;;  %v8363_v1 = vld [vmem:[#allocation50_spill] sm:$0xff] }
0x13ec   :  { %v3068_v20 = vcvt.s32.f32 %v3066_v18  ;;  %v3067_v56 = vcvt.s32.f32 %v3065_v30  ;;  %v8364_v18 = vld [vmem:[#allocation39_spill] sm:$0xff] }
0x13ed   :  { %v8366_v30 = vld [vmem:[#allocation55_spill] sm:$0xff] }
0x13ee   :  { %3069 = vmin.xlane.f32.xlu0 %v3068_v20 }
0x1461   :  { %v3070_v25 = vpop.xlane.xlu0 %3069 }
0x1462   :  { %vm3071_vm14 = vcmp.eq.f32.partialorder %v3068_v20, %v3070_v25  ;;  %v3076_v50 = vcvt.f32.s32 %v3070_v25  ;;  %v7293_v20 = vld [vmem:[#allocation7 + $0xa8] sm:$0xff]  ;;  %v8367_v25 = vld [vmem:[#allocation36_spill] sm:$0xff] }
0x1463   :  { %v3072_v51 = vsel %vm3071_vm14, %v3067_v56, inf  ;;  %8365 = vst [vmem:[#allocation23_spill] sm:$0xff] %v7293_v20  ;;  %v7298_v56 = vld [vmem:[#allocation7 + $0x90] sm:$0xff] }
0x1464   :  { %3073 = vmin.xlane.f32.xlu2 %v3072_v51  ;;  %v3077_v16 = vshll.u32 %v3076_v50, 16  ;;  %8368 = vst [vmem:[#allocation22_spill] sm:$0xff] %v7298_v56  ;;  %v8369_v51 = vld [vmem:[#allocation51_spill] sm:$0xff]  ;;  %v8370_v50 = vld [vmem:[#allocation54_spill] sm:$0xff] }
0x14d7   :  { %v3074_v53 = vpop.xlane.xlu2 %3073 }
0x14d8   :  { %v3075_v47 = vcvt.f32.s32 %v3074_v53  ;;  %v8372_v53 = vld [vmem:[#allocation21_spill] sm:$0xff] }
0x14da   :  { %v3078_v58 = vadd.s32 %v3077_v16, %v3075_v47  ;;  %v8373_v16 = vld [vmem:[#allocation60_spill] sm:$0xff] }
0x14db   :  { %v7308_v47 = vld [vmem:[#allocation7 + $0x60] sm:$0xff] }
0x14dc   :  { %v3086_v22 = vsel %vm3085_vm15, %v3920_v45, %v3078_v58  ;;  %8374 = vst [vmem:[#allocation17_spill] sm:$0xff] %v7308_v47  ;;  %v8375_v45 = vld [vmem:[#allocation18_spill] sm:$0xff]  ;;  %v8376_v58 = vld [vmem:[#allocation15_spill] sm:$0xff] }
0x14dd   :  { %3088 = vperm.xlu2 %3958, %v3086_v22   ;;  %v7313_v22 = vld [vmem:[#allocation7 + $0x48] sm:$0xff] }
0x14de   :  { %8377 = vst [vmem:[#allocation62_spill] sm:$0xff] %v7313_v22 }
0x1537   :  { %v3089_v54 = vpop.permute.xlu2 %3088 }
0x1538   :  { %vm3090_vm1 = vcmp.eq.s32.totalorder %v3089_v54, %v8043_v17  ;;  %v8378_v54 = vld [vmem:[#allocation14_spill] sm:$0xff] }
0x1539   :  { %3922 = vmatmul.msk.f32.vlgmr.msrb.gmra.mxu0 %vm3090_vm1, %v8044_v34  ;;  %3923 = vmatmul.msk.f32.vlgmr.msra.gmra.mxu1 %vm3090_vm1, %v8044_v34 }
0x153a   :  { %3924 = vmatmul.msk.f32.vlgmr.msra.gmra.mxu3 %vm3090_vm1, %v8044_v34  ;;  %3334 = vmatpush.msrb.mxu0 %v8139_v3 }
0x153b   :  { %3354 = vmatpush.msra.mxu1 %v6335_v13  ;;  %3374 = vmatpush.msra.mxu3 %v7249_v35 }
0x153c   :  { %3335 = vmatpush.msrb.mxu0 %v8140_v24 }
0x153d   :  { %3355 = vmatpush.msra.mxu1 %v6323_v42  ;;  %3375 = vmatpush.msra.mxu3 %v7254_v41 }
0x153e   :  { %3336 = vmatpush.msrb.mxu0 %v8141_v40 }
0x153f   :  { %3356 = vmatpush.msra.mxu1 %v8348_v60  ;;  %3376 = vmatpush.msra.mxu3 %v7259_v27 }
0x1540   :  { %3337 = vmatpush.msrb.mxu0 %v8349_v31 }
0x1541   :  { %3357 = vmatpush.msra.mxu1 %v8350_v4  ;;  %3189 = vmatmul.f32.vlgmr.msra.gmra.mxu0 %v7194_v43 }
0x1542   :  { %3209 = vmatmul.f32.vlgmr.msrb.gmra.mxu1 %v7194_v43  ;;  %3338 = vmatpush.msrb.mxu0 %v8351_v38 }
0x1543   :  { %3358 = vmatpush.msra.mxu1 %v8352_v39  ;;  %3377 = vmatpush.msra.mxu3 %v7268_v15 }
0x1544   :  { %3339 = vmatpush.msrb.mxu0 %v8353_v37 }
0x1545   :  { %3359 = vmatpush.msra.mxu1 %v8354_v52  ;;  %3378 = vmatpush.msra.mxu3 %v7273_v32 }
0x1546   :  { %3340 = vmatpush.msrb.mxu0 %v8355_v7 }
0x1547   :  { %3360 = vmatpush.msra.mxu1 %v8356_v61  ;;  %3379 = vmatpush.msra.mxu3 %v7278_v29 }
0x1548   :  { %3341 = vmatpush.msrb.mxu0 %v8357_v23 }
0x1549   :  { %3361 = vmatpush.msra.mxu1 %v8358_v28  ;;  %3380 = vmatpush.msra.mxu3 %v7283_v8 }
0x154a   :  { %3342 = vmatpush.msrb.mxu0 %v8360_v63 }
0x154b   :  { %3362 = vmatpush.msra.mxu1 %v8361_v26  ;;  %3381 = vmatpush.msra.mxu3 %v7288_v9 }
0x154c   :  { %3343 = vmatpush.msrb.mxu0 %v8363_v1 }
0x154d   :  { %3363 = vmatpush.msra.mxu1 %v8364_v18  ;;  %3382 = vmatpush.msra.mxu3 %v7293_v20 }
0x154e   :  { %3344 = vmatpush.msrb.mxu0 %v8366_v30  ;;  %v8418_v30 = vld [vmem:[#allocation92_spill] sm:$0xff] }
0x154f   :  { %3364 = vmatpush.msra.mxu1 %v8367_v25  ;;  %3383 = vmatpush.msra.mxu3 %v7298_v56  ;;  %v8396_v56 = vld [vmem:[#allocation81_spill] sm:$0xff]  ;;  %v8417_v25 = vld [vmem:[#allocation90_spill] sm:$0xff] }
0x1550   :  { %3345 = vmatpush.msrb.mxu0 %v8369_v51  ;;  %v8392_v51 = vld [vmem:[#allocation79_spill] sm:$0xff] }
0x1551   :  { %3365 = vmatpush.msra.mxu1 %v8370_v50  ;;  %3384 = vmatpush.msra.mxu3 %v7303_v0  ;;  %v8379_v50 = vld [vmem:[#allocation20_spill] sm:$0xff]  ;;  %v7318_v0 = vld [vmem:[#allocation7 + $0x30] sm:$0xff] }
0x1552   :  { %3346 = vmatpush.msrb.mxu0 %v8372_v53  ;;  %8380 = vst [vmem:[#allocation30_spill] sm:$0xff] %v7318_v0  ;;  %v8382_v53 = vld [vmem:[#allocation19_spill] sm:$0xff] }
0x1553   :  { %3366 = vmatpush.msra.mxu1 %v8373_v16  ;;  %3385 = vmatpush.msra.mxu3 %v7308_v47  ;;  %v8381_v16 = vld [vmem:[#allocation16_spill] sm:$0xff]  ;;  %v7323_v47 = vld [vmem:[#allocation7 + $0x18] sm:$0xff] }
0x1554   :  { %3347 = vmatpush.msrb.mxu0 %v8375_v45  ;;  %8383 = vst [vmem:[#allocation29_spill] sm:$0xff] %v7323_v47  ;;  %v8385_v45 = vld [vmem:[#allocation76_spill] sm:$0xff] }
0x1555   :  { %3367 = vmatpush.msra.mxu1 %v8376_v58  ;;  %3386 = vmatpush.msra.mxu3 %v7313_v22  ;;  %v8384_v58 = vld [vmem:[#allocation47_spill] sm:$0xff]  ;;  %v7328_v22 = vld [vmem:[#allocation7] sm:$0xff] }
0x1556   :  { %3348 = vmatpush.msrb.mxu0 %v8378_v54  ;;  %8386 = vst [vmem:[#allocation52_spill] sm:$0xff] %v7328_v22  ;;  %v8388_v54 = vld [vmem:[#allocation77_spill] sm:$0xff] }
0x1557   :  { %3368 = vmatpush.msra.mxu1 %v8379_v50  ;;  %3387 = vmatpush.msra.mxu3 %v7318_v0  ;;  %v8387_v50 = vld [vmem:[#allocation45_spill] sm:$0xff]  ;;  %v8389_v0 = vld [vmem:[#allocation48_spill] sm:$0xff] }
0x1558   :  { %3349 = vmatpush.msrb.mxu0 %v8381_v16  ;;  %v8390_v16 = vld [vmem:[#allocation78_spill] sm:$0xff] }
0x1559   :  { %3369 = vmatpush.msra.mxu1 %v8382_v53  ;;  %3388 = vmatpush.msra.mxu3 %v7323_v47  ;;  %v8391_v53 = vld [vmem:[#allocation63_spill] sm:$0xff]  ;;  %v8393_v47 = vld [vmem:[#allocation64_spill] sm:$0xff] }
0x155a   :  { %3414 = vmatpush.msra.mxu0 %v8384_v58  ;;  %v8394_v58 = vld [vmem:[#allocation80_spill] sm:$0xff] }
0x155b   :  { %3481 = vmatpush.msrb.mxu1 %v8385_v45  ;;  %3389 = vmatpush.msra.mxu3 %v7328_v22  ;;  %v8395_v45 = vld [vmem:[#allocation65_spill] sm:$0xff]  ;;  %v8397_v22 = vld [vmem:[#allocation66_spill] sm:$0xff] }
0x155c   :  { %3415 = vmatpush.msra.mxu0 %v8387_v50  ;;  %v8398_v50 = vld [vmem:[#allocation82_spill] sm:$0xff] }
0x155d   :  { %3482 = vmatpush.msrb.mxu1 %v8388_v54  ;;  %v8399_v54 = vld [vmem:[#allocation67_spill] sm:$0xff] }
0x155e   :  { %3416 = vmatpush.msra.mxu0 %v8389_v0  ;;  %v8400_v0 = vld [vmem:[#allocation83_spill] sm:$0xff] }
0x155f   :  { %3483 = vmatpush.msrb.mxu1 %v8390_v16  ;;  %v8401_v16 = vld [vmem:[#allocation68_spill] sm:$0xff] }
0x1560   :  { %3417 = vmatpush.msra.mxu0 %v8391_v53  ;;  %v8402_v53 = vld [vmem:[#allocation84_spill] sm:$0xff] }
0x1561   :  { %3484 = vmatpush.msrb.mxu1 %v8392_v51  ;;  %v8403_v51 = vld [vmem:[#allocation69_spill] sm:$0xff] }
0x1562   :  { %3418 = vmatpush.msra.mxu0 %v8393_v47  ;;  %v8404_v47 = vld [vmem:[#allocation85_spill] sm:$0xff] }
0x1563   :  { %3485 = vmatpush.msrb.mxu1 %v8394_v58  ;;  %v8405_v58 = vld [vmem:[#allocation70_spill] sm:$0xff] }
0x1564   :  { %3419 = vmatpush.msra.mxu0 %v8395_v45  ;;  %v8406_v45 = vld [vmem:[#allocation86_spill] sm:$0xff] }
0x1565   :  { %3486 = vmatpush.msrb.mxu1 %v8396_v56  ;;  %v8407_v56 = vld [vmem:[#allocation71_spill] sm:$0xff] }
0x1566   :  { %3420 = vmatpush.msra.mxu0 %v8397_v22  ;;  %v8408_v22 = vld [vmem:[#allocation87_spill] sm:$0xff] }
0x1567   :  { %3487 = vmatpush.msrb.mxu1 %v8398_v50  ;;  %v8409_v50 = vld [vmem:[#allocation72_spill] sm:$0xff] }
0x1568   :  { %3421 = vmatpush.msra.mxu0 %v8399_v54  ;;  %v8410_v54 = vld [vmem:[#allocation88_spill] sm:$0xff] }
0x1569   :  { %3488 = vmatpush.msrb.mxu1 %v8400_v0  ;;  %v8411_v0 = vld [vmem:[#allocation73_spill] sm:$0xff] }
0x156a   :  { %3422 = vmatpush.msra.mxu0 %v8401_v16  ;;  %v8412_v16 = vld [vmem:[#allocation89_spill] sm:$0xff] }
0x156b   :  { %3489 = vmatpush.msrb.mxu1 %v8402_v53  ;;  %v8413_v53 = vld [vmem:[#allocation74_spill] sm:$0xff] }
0x156c   :  { %3423 = vmatpush.msra.mxu0 %v8403_v51  ;;  %v8414_v51 = vld [vmem:[#allocation91_spill] sm:$0xff] }
0x156d   :  { %3490 = vmatpush.msrb.mxu1 %v8404_v47  ;;  %v8415_v47 = vld [vmem:[#allocation75_spill] sm:$0xff] }
0x156e   :  { %3424 = vmatpush.msra.mxu0 %v8405_v58  ;;  %v8416_v58 = vld [vmem:[#allocation93_spill] sm:$0xff] }
0x156f   :  { %3491 = vmatpush.msrb.mxu1 %v8406_v45  ;;  %v3170_v45 = vpop.f32.mrf.mxu2 }
0x1570   :  { %3425 = vmatpush.msra.mxu0 %v8407_v56 }
0x1571   :  { %3492 = vmatpush.msrb.mxu1 %v8408_v22  ;;  %v3171_v22 = vadd.f32 %v3170_v45, %v8417_v25 }
0x1572   :  { %3426 = vmatpush.msra.mxu0 %v8409_v50 }
0x1573   :  { %3493 = vmatpush.msrb.mxu1 %v8410_v54 }
0x1574   :  { %3427 = vmatpush.msra.mxu0 %v8411_v0 }
0x1575   :  { %3494 = vmatpush.msrb.mxu1 %v8412_v16  ;;  %v8419_v16 = vld [vmem:[#allocation94_spill] sm:$0xff] }
0x1576   :  { %3428 = vmatpush.msra.mxu0 %v8413_v53  ;;  %v8420_v53 = vld [vmem:[#allocation95_spill] sm:$0xff] }
0x1577   :  { %3495 = vmatpush.msrb.mxu1 %v8414_v51 }
0x1578   :  { %3429 = vmatpush.msra.mxu0 %v8415_v47 }
0x1579   :  { %3496 = vmatpush.msrb.mxu1 %v8416_v58 }
0x15b6   :  { %v3110_v56 = vpop.f32.mrf.mxu0  ;;  %v3130_v18 = vpop.f32.mrf.mxu1 }
0x15b7   :  { %v3111_v50 = vadd.f32 %v3110_v56, %v8418_v30  ;;  %v3131_v1 = vadd.f32 %v3130_v18, %v8419_v16 }
0x15b9   :  { %v3213_v20 = vadd.f32 %v3171_v22, %v3111_v50 }
0x15bb   :  { %v3925_v54 = vmul.f32 -1.442695, %v3213_v20 }
0x15bd   :  { %4100 = vpow2.f32 %v3925_v54 }
0x15be   :  { %v3190_v0 = vpop.f32.mrf.mxu0 }
0x15bf   :  { %v3191_v9 = vadd.f32 %v3190_v0, %v8420_v53  ;;  %v3210_v50 = vpop.f32.mrf.mxu1 }
0x15c1   :  { %v3233_v51 = vadd.f32 %v3191_v9, %v3131_v1  ;;  %v3150_v9 = vpop.f32.mrf.mxu3 }
0x15c2   :  { %v3151_v53 = vadd.f32 %v3150_v9, %v6597_v55 }
0x15c3   :  { %v4101_v26 = vpop.eup %4100  ;;  %v3926_v47 = vmul.f32 -1.442695, %v3233_v51  ;;  %v3211_v51 = vadd.f32 %v3210_v50, %v6594_v12 }
0x15c4   :  { %v3217_v63 = vadd.f32 1.0, %v4101_v26 }
0x15c5   :  { %4102 = vpow2.f32 %v3926_v47 }
0x15c6   :  { %4104 = vrcp.f32 %v3217_v63  ;;  %v3229_v20 = vand.u32 2147483648, %v3217_v63  ;;  %v3227_v54 = vand.u32 2147483647, %v3217_v63  ;;  %vm3223_vm2 = vweird.f32 %v3217_v63 }
0x15c8   :  { %v3230_v1 = vor.u32 1.1754944e-38, %v3229_v20  ;;  %vm3228_vm4 = vcmp.eq.f32.partialorder %v3227_v54, 8.507059e+37 }
0x15cb   :  { %v4103_v58 = vpop.eup %4102 }
0x15cc   :  { %v4105_v8 = vpop.eup %4104  ;;  %v3237_v45 = vadd.f32 1.0, %v4103_v58 }
0x15cd   :  { %v3219_v25 = vmul.f32 %v4105_v8, %v3217_v63  ;;  %vm3224_vm12 = vweird.f32 %v4105_v8 }
0x15ce   :  { %4106 = vrcp.f32 %v3237_v45  ;;  %vm3225_vm3 = vmor %vm3223_vm2, %vm3224_vm12  ;;  %v3247_v28 = vand.u32 2147483647, %v3237_v45  ;;  %vm3243_vm6 = vweird.f32 %v3237_v45 }
0x15cf   :  { %v3220_v22 = vsub.f32 1.0, %v3219_v25 }
0x15d0   :  { %vm3248_vm11 = vcmp.eq.f32.partialorder %v3247_v28, 8.507059e+37 }
0x15d1   :  { %v3221_v56 = vmul.f32 %v4105_v8, %v3220_v22  ;;  %v3249_v22 = vand.u32 2147483648, %v3237_v45 }
0x15d3   :  { %v3222_v18 = vadd.f32 %v4105_v8, %v3221_v56  ;;  %v3250_v20 = vor.u32 1.1754944e-38, %v3249_v22 }
0x15d4   :  { %v4107_v0 = vpop.eup %4106 }
0x15d5   :  { %v3239_v26 = vmul.f32 %v4107_v0, %v3237_v45  ;;  %v3226_v47 = vsel %vm3225_vm3, %v4105_v8, %v3222_v18  ;;  %vm3244_vm5 = vweird.f32 %v4107_v0 }
0x15d6   :  { %v3231_v58 = vsel %vm3228_vm4, %v3230_v1, %v3226_v47  ;;  %vm3245_vm7 = vmor %vm3243_vm6, %vm3244_vm5 }
0x15d7   :  { %v3240_v25 = vsub.f32 1.0, %v3239_v26  ;;  %v3253_v16 = vmul.f32 %v3231_v58, %v3211_v51  ;;  %v3305_v58 = vstv %s3304_s5 }
0x15d8   :  { %vm3306_vm8 = vcmp.eq.s32.totalorder %v3305_v58, 1  ;;  %v4286_v58 = vld [vmem:[#allocation7 + $0x70] sm:$0xff] }
0x15d9   :  { %v3241_v30 = vmul.f32 %v4107_v0, %v3240_v25  ;;  %v3254_v56 = vadd.f32 %v3253_v16, %v3151_v53 }
0x15db   :  { %v3242_v63 = vadd.f32 %v4107_v0, %v3241_v30  ;;  %4108 = vtanh.f32 %v3254_v56 }
0x15dd   :  { %v3246_v23 = vsel %vm3245_vm7, %v4107_v0, %v3242_v63  ;;  %v3929_v63 = vld [vmem:[%s7503_s1 + $0x28] sm:$0xff] }
0x15de   :  { %v3251_v50 = vsel %vm3248_vm11, %v3250_v20, %v3246_v23 }
0x15df   :  { %v3256_v8 = vsub.f32 1.0, %v3251_v50  ;;  %v3258_v9 = vmul.f32 %v3251_v50, %v7194_v43 }
0x15e1   :  { %v4109_v54 = vpop.eup %4108 }
0x15e2   :  { %v3257_v18 = vmul.f32 %v4109_v54, %v3256_v8  ;;  %v8441_v54 = vld [vmem:[#allocation62_spill] sm:$0xff] }
0x15e4   :  { %v7368_v1 = vadd.f32 %v3258_v9, %v3257_v18  ;;  %v8442_v18 = vld [vmem:[#allocation14_spill] sm:$0xff]  ;;  %v8443_v9 = vld [vmem:[#allocation20_spill] sm:$0xff] }
0x15e6   :  { %3276 = vmatmul.f32.vlgmr.msrb.gmra.mxu3 %v7368_v1 }
0x15e7   :  { %3535 = vmatpush.msrb.mxu3 %v8120_v49  ;;  %v4259_v49 = vld [vmem:[#allocation7 + $0x170] sm:$0xff] }
0x15e9   :  { %3536 = vmatpush.msrb.mxu3 %v8121_v36  ;;  %v4260_v36 = vld [vmem:[#allocation7 + $0x158] sm:$0xff] }
0x15eb   :  { %3537 = vmatpush.msrb.mxu3 %v8122_v11  ;;  %v4261_v11 = vld [vmem:[#allocation7 + $0x140] sm:$0xff] }
0x15ed   :  { %3538 = vmatpush.msrb.mxu3 %v8123_v2  ;;  %v4262_v2 = vld [vmem:[#allocation7 + $0x128] sm:$0xff] }
0x15ee   :  { %3390 = vmatmul.f32.vlgmr.msra.gmra.mxu3 %v7368_v1 }
0x15ef   :  { %3539 = vmatpush.msrb.mxu3 %v8124_v19  ;;  %v4263_v19 = vld [vmem:[#allocation7 + $0x110] sm:$0xff] }
0x15f1   :  { %3540 = vmatpush.msrb.mxu3 %v8125_v6  ;;  %v4264_v6 = vld [vmem:[#allocation7 + $0xf8] sm:$0xff] }
0x15f3   :  { %3541 = vmatpush.msrb.mxu3 %v8126_v44  ;;  %v4265_v44 = vld [vmem:[#allocation7 + $0xe0] sm:$0xff] }
0x15f5   :  { %3542 = vmatpush.msrb.mxu3 %v8127_v57  ;;  %v4266_v57 = vld [vmem:[#allocation7 + $0xc8] sm:$0xff] }
0x15f7   :  { %3543 = vmatpush.msrb.mxu3 %v8128_v62  ;;  %v4267_v62 = vld [vmem:[#allocation7 + $0xb0] sm:$0xff] }
0x15f9   :  { %3544 = vmatpush.msrb.mxu3 %v8129_v48  ;;  %v4268_v48 = vld [vmem:[#allocation7 + $0x98] sm:$0xff] }
0x15fb   :  { %3545 = vmatpush.msrb.mxu3 %v8130_v21  ;;  %v4269_v21 = vld [vmem:[#allocation7 + $0x80] sm:$0xff] }
0x15fd   :  { %3546 = vmatpush.msrb.mxu3 %v8131_v14  ;;  %v4270_v14 = vld [vmem:[#allocation7 + $0x68] sm:$0xff] }
0x15ff   :  { %3547 = vmatpush.msrb.mxu3 %v8132_v5  ;;  %v4271_v5 = vld [vmem:[#allocation7 + $0x50] sm:$0xff] }
0x1601   :  { %3548 = vmatpush.msrb.mxu3 %v8133_v46  ;;  %v4272_v46 = vld [vmem:[#allocation7 + $0x38] sm:$0xff] }
0x1603   :  { %3549 = vmatpush.msrb.mxu3 %v8134_v10  ;;  %v4273_v10 = vld [vmem:[#allocation7 + $0x20] sm:$0xff] }
0x1605   :  { %3550 = vmatpush.msrb.mxu3 %v8135_v59  ;;  %v4274_v59 = vld [vmem:[#allocation7 + $0x8] sm:$0xff] }
0x1607   :  { %3615 = vmatpush.msra.mxu3 %v4259_v49  ;;  %v8444_v49 = vld [vmem:[#allocation30_spill] sm:$0xff] }
0x1609   :  { %3616 = vmatpush.msra.mxu3 %v4260_v36  ;;  %v8445_v36 = vld [vmem:[#allocation16_spill] sm:$0xff] }
0x160b   :  { %3617 = vmatpush.msra.mxu3 %v4261_v11  ;;  %v8446_v11 = vld [vmem:[#allocation19_spill] sm:$0xff] }
0x160d   :  { %3618 = vmatpush.msra.mxu3 %v4262_v2  ;;  %v8447_v2 = vld [vmem:[#allocation29_spill] sm:$0xff] }
0x160f   :  { %3619 = vmatpush.msra.mxu3 %v4263_v19  ;;  %v4275_v19 = vld [vmem:[#allocation7 + $0x178] sm:$0xff] }
0x1611   :  { %3620 = vmatpush.msra.mxu3 %v4264_v6  ;;  %v8448_v6 = vld [vmem:[#allocation76_spill] sm:$0xff] }
0x1613   :  { %3621 = vmatpush.msra.mxu3 %v4265_v44  ;;  %v8449_v44 = vld [vmem:[#allocation52_spill] sm:$0xff] }
0x1615   :  { %3622 = vmatpush.msra.mxu3 %v4266_v57  ;;  %v4276_v57 = vld [vmem:[#allocation7 + $0x160] sm:$0xff] }
0x1617   :  { %3623 = vmatpush.msra.mxu3 %v4267_v62  ;;  %v8450_v62 = vld [vmem:[#allocation77_spill] sm:$0xff] }
0x1619   :  { %3624 = vmatpush.msra.mxu3 %v4268_v48  ;;  %v4277_v48 = vld [vmem:[#allocation7 + $0x148] sm:$0xff] }
0x161b   :  { %3625 = vmatpush.msra.mxu3 %v4269_v21  ;;  %v8451_v21 = vld [vmem:[#allocation78_spill] sm:$0xff] }
0x161d   :  { %3626 = vmatpush.msra.mxu3 %v4270_v14  ;;  %v4278_v14 = vld [vmem:[#allocation7 + $0x130] sm:$0xff] }
0x161f   :  { %3627 = vmatpush.msra.mxu3 %v4271_v5  ;;  %v8452_v5 = vld [vmem:[#allocation79_spill] sm:$0xff] }
0x1621   :  { %3628 = vmatpush.msra.mxu3 %v4272_v46  ;;  %v4279_v46 = vld [vmem:[#allocation7 + $0x118] sm:$0xff] }
0x1623   :  { %3629 = vmatpush.msra.mxu3 %v4273_v10  ;;  %v8453_v10 = vld [vmem:[#allocation80_spill] sm:$0xff] }
0x1625   :  { %3630 = vmatpush.msra.mxu3 %v4274_v59  ;;  %v4280_v59 = vld [vmem:[#allocation7 + $0x100] sm:$0xff] }
0x1669   :  { %v3277_v43 = vpop.f32.mrf.mxu3 }
0x166a   :  { %v3278_v23 = vadd.f32 %v7233_v33, %v3277_v43  ;;  %v8454_v43 = vld [vmem:[#allocation81_spill] sm:$0xff] }
0x166c   :  { %3927 = vst [vmem:[%s7517_s15 + $0x20] sm:$0xff] %v3278_v23  ;;  %3282 = vmax.xlane.f32.xlu1 %v3278_v23 }
0x16df   :  { %v3283_v28 = vpop.xlane.xlu1 %3282 }
0x16e0   :  { %vm3284_vm0 = vcmp.eq.f32.partialorder %v3278_v23, %v3283_v28  ;;  %v4281_v23 = vld [vmem:[#allocation7 + $0xe8] sm:$0xff]  ;;  %v8455_v28 = vld [vmem:[#allocation82_spill] sm:$0xff] }
0x16e1   :  { %v3285_v30 = vsel %vm3284_vm0, %v8043_v17, 128 }
0x16e2   :  { %v3287_v16 = vshra.s32 %v3285_v30, 16  ;;  %v3286_v45 = vand.u32 65535, %v3285_v30  ;;  %v4282_v30 = vld [vmem:[#allocation7 + $0xd0] sm:$0xff] }
0x16e4   :  { %v3289_v53 = vcvt.s32.f32 %v3287_v16  ;;  %v3288_v26 = vcvt.s32.f32 %v3286_v45  ;;  %v8456_v16 = vld [vmem:[#allocation83_spill] sm:$0xff]  ;;  %v8457_v45 = vld [vmem:[#allocation84_spill] sm:$0xff] }
0x16e6   :  { %3290 = vmin.xlane.f32.xlu1 %v3289_v53 }
0x1759   :  { %v3291_v0 = vpop.xlane.xlu1 %3290 }
0x175a   :  { %vm3292_vm13 = vcmp.eq.f32.partialorder %v3289_v53, %v3291_v0  ;;  %v3297_v47 = vcvt.f32.s32 %v3291_v0  ;;  %v4283_v53 = vld [vmem:[#allocation7 + $0xb8] sm:$0xff]  ;;  %v4284_v0 = vld [vmem:[#allocation7 + $0xa0] sm:$0xff] }
0x175b   :  { %v3293_v51 = vsel %vm3292_vm13, %v3288_v26, inf  ;;  %v8458_v26 = vld [vmem:[#allocation85_spill] sm:$0xff] }
0x175c   :  { %3294 = vmin.xlane.f32.xlu2 %v3293_v51  ;;  %v3298_v22 = vshll.u32 %v3297_v47, 16  ;;  %v4285_v51 = vld [vmem:[#allocation7 + $0x88] sm:$0xff]  ;;  %v8459_v47 = vld [vmem:[#allocation86_spill] sm:$0xff] }
0x17cf   :  { %v3295_v25 = vpop.xlane.xlu2 %3294 }
0x17d0   :  { %v3296_v56 = vcvt.f32.s32 %v3295_v25  ;;  %v8460_v25 = vld [vmem:[#allocation87_spill] sm:$0xff] }
0x17d2   :  { %v3299_v20 = vadd.s32 %v3298_v22, %v3296_v56  ;;  %v4287_v22 = vld [vmem:[#allocation7 + $0x58] sm:$0xff]  ;;  %v8461_v56 = vld [vmem:[#allocation88_spill] sm:$0xff] }
0x17d4   :  { %v3307_v50 = vsel %vm3306_vm8, %v3929_v63, %v3299_v20  ;;  %v4288_v63 = vld [vmem:[#allocation7 + $0x40] sm:$0xff]  ;;  %v8462_v20 = vld [vmem:[#allocation89_spill] sm:$0xff] }
0x17d5   :  { %3309 = vperm.xlu1 %3957, %v3307_v50   ;;  %v4289_v50 = vld [vmem:[#allocation7 + $0x28] sm:$0xff] }
0x1847   :  { %v3310_v8 = vpop.permute.xlu1 %3309 }
0x1848   :  { %vm3311_vm9 = vcmp.eq.s32.totalorder %v3310_v8, %v8043_v17  ;;  %v8463_v8 = vld [vmem:[#allocation91_spill] sm:$0xff] }
0x1849   :  { %3931 = vmatmul.msk.f32.vlgmr.msra.gmra.mxu2 %vm3311_vm9, %v8044_v34  ;;  %3932 = vmatmul.msk.f32.vlgmr.msrb.gmra.mxu0 %vm3311_vm9, %v8044_v34 }
0x184a   :  { %3933 = vmatmul.msk.f32.vlgmr.msra.gmra.mxu1 %vm3311_vm9, %v8044_v34  ;;  %3555 = vmatpush.msra.mxu2 %v8139_v3  ;;  %v8423_v3 = vld [vmem:[#allocation25_spill] sm:$0xff] }
0x184b   :  { %3575 = vmatpush.msrb.mxu0 %v6335_v13  ;;  %3595 = vmatpush.msra.mxu1 %v7249_v35  ;;  %v8421_v13 = vld [vmem:[#allocation41_spill] sm:$0xff]  ;;  %v8426_v35 = vld [vmem:[#allocation24_spill] sm:$0xff] }
0x184c   :  { %3556 = vmatpush.msra.mxu2 %v8140_v24  ;;  %v8424_v24 = vld [vmem:[#allocation40_spill] sm:$0xff] }
0x184d   :  { %3576 = vmatpush.msrb.mxu0 %v6323_v42  ;;  %3596 = vmatpush.msra.mxu1 %v7254_v41  ;;  %v8422_v42 = vld [vmem:[#allocation42_spill] sm:$0xff] }
0x184e   :  { %3557 = vmatpush.msra.mxu2 %v8141_v40  ;;  %v8425_v40 = vld [vmem:[#allocation57_spill] sm:$0xff]  ;;  %v8427_v41 = vld [vmem:[#allocation50_spill] sm:$0xff] }
0x184f   :  { %3577 = vmatpush.msrb.mxu0 %v8348_v60  ;;  %3597 = vmatpush.msra.mxu1 %v7259_v27  ;;  %v8428_v60 = vld [vmem:[#allocation39_spill] sm:$0xff] }
0x1850   :  { %3558 = vmatpush.msra.mxu2 %v8349_v31  ;;  %v8429_v27 = vld [vmem:[#allocation23_spill] sm:$0xff] }
0x1851   :  { %3578 = vmatpush.msrb.mxu0 %v8350_v4  ;;  %3410 = vmatmul.f32.vlgmr.msrb.gmra.mxu2 %v7368_v1  ;;  %v8430_v31 = vld [vmem:[#allocation55_spill] sm:$0xff]  ;;  %v8431_v4 = vld [vmem:[#allocation36_spill] sm:$0xff] }
0x1852   :  { %3430 = vmatmul.f32.vlgmr.msra.gmra.mxu0 %v7368_v1  ;;  %3559 = vmatpush.msra.mxu2 %v8351_v38  ;;  %v8432_v38 = vld [vmem:[#allocation22_spill] sm:$0xff] }
0x1853   :  { %3579 = vmatpush.msrb.mxu0 %v8352_v39  ;;  %3598 = vmatpush.msra.mxu1 %v7268_v15  ;;  %v8433_v39 = vld [vmem:[#allocation51_spill] sm:$0xff]  ;;  %v8434_v15 = vld [vmem:[#allocation54_spill] sm:$0xff] }
0x1854   :  { %3560 = vmatpush.msra.mxu2 %v8353_v37  ;;  %v8435_v37 = vld [vmem:[#allocation13_spill] sm:$0xff] }
0x1855   :  { %3580 = vmatpush.msrb.mxu0 %v8354_v52  ;;  %3599 = vmatpush.msra.mxu1 %v7273_v32  ;;  %v8436_v52 = vld [vmem:[#allocation21_spill] sm:$0xff]  ;;  %v8437_v32 = vld [vmem:[#allocation60_spill] sm:$0xff] }
0x1856   :  { %3561 = vmatpush.msra.mxu2 %v8355_v7  ;;  %v8438_v7 = vld [vmem:[#allocation17_spill] sm:$0xff] }
0x1857   :  { %3581 = vmatpush.msrb.mxu0 %v8356_v61  ;;  %3600 = vmatpush.msra.mxu1 %v7278_v29  ;;  %v8439_v61 = vld [vmem:[#allocation18_spill] sm:$0xff]  ;;  %v8440_v29 = vld [vmem:[#allocation15_spill] sm:$0xff] }
0x1858   :  { %3562 = vmatpush.msra.mxu2 %v8421_v13  ;;  %v4290_v13 = vld [vmem:[#allocation7 + $0x10] sm:$0xff] }
0x1859   :  { %3582 = vmatpush.msrb.mxu0 %v8422_v42  ;;  %3601 = vmatpush.msra.mxu1 %v8423_v3  ;;  %v8464_v42 = vld [vmem:[#allocation93_spill] sm:$0xff]  ;;  %v3391_v3 = vpop.f32.mrf.mxu3 }
0x185a   :  { %3563 = vmatpush.msra.mxu2 %v8424_v24 }
0x185b   :  { %3583 = vmatpush.msrb.mxu0 %v8425_v40  ;;  %3602 = vmatpush.msra.mxu1 %v8426_v35  ;;  %v8465_v40 = vld [vmem:[#allocation90_spill] sm:$0xff] }
0x185c   :  { %3564 = vmatpush.msra.mxu2 %v8427_v41  ;;  %v3392_v35 = vadd.f32 %v3391_v3, %v8465_v40  ;;  %v8466_v41 = vld [vmem:[#allocation92_spill] sm:$0xff] }
0x185d   :  { %3584 = vmatpush.msrb.mxu0 %v8428_v60  ;;  %3603 = vmatpush.msra.mxu1 %v8429_v27 }
0x185e   :  { %3565 = vmatpush.msra.mxu2 %v8430_v31 }
0x185f   :  { %3585 = vmatpush.msrb.mxu0 %v8431_v4  ;;  %3604 = vmatpush.msra.mxu1 %v8432_v38 }
0x1860   :  { %3566 = vmatpush.msra.mxu2 %v8433_v39  ;;  %v8467_v39 = vld [vmem:[#allocation94_spill] sm:$0xff] }
0x1861   :  { %3586 = vmatpush.msrb.mxu0 %v8434_v15  ;;  %3605 = vmatpush.msra.mxu1 %v8435_v37  ;;  %v8468_v37 = vld [vmem:[#allocation95_spill] sm:$0xff] }
0x1862   :  { %3567 = vmatpush.msra.mxu2 %v8436_v52 }
0x1863   :  { %3587 = vmatpush.msrb.mxu0 %v8437_v32  ;;  %3606 = vmatpush.msra.mxu1 %v8438_v7 }
0x1864   :  { %3568 = vmatpush.msra.mxu2 %v8439_v61 }
0x1865   :  { %3588 = vmatpush.msrb.mxu0 %v8440_v29  ;;  %3607 = vmatpush.msra.mxu1 %v8441_v54 }
0x1866   :  { %3569 = vmatpush.msra.mxu2 %v8442_v18 }
0x1867   :  { %3589 = vmatpush.msrb.mxu0 %v8443_v9  ;;  %3608 = vmatpush.msra.mxu1 %v8444_v49 }
0x1868   :  { %3570 = vmatpush.msra.mxu2 %v8445_v36 }
0x1869   :  { %3590 = vmatpush.msrb.mxu0 %v8446_v11  ;;  %3609 = vmatpush.msra.mxu1 %v8447_v2 }
0x186a   :  { %3635 = vmatpush.msrb.mxu2 %v4275_v19 }
0x186b   :  { %3702 = vmatpush.msra.mxu0 %v8448_v6  ;;  %3610 = vmatpush.msra.mxu1 %v8449_v44 }
0x186c   :  { %3636 = vmatpush.msrb.mxu2 %v4276_v57 }
0x186d   :  { %3703 = vmatpush.msra.mxu0 %v8450_v62 }
0x186e   :  { %3637 = vmatpush.msrb.mxu2 %v4277_v48 }
0x186f   :  { %3704 = vmatpush.msra.mxu0 %v8451_v21 }
0x1870   :  { %3638 = vmatpush.msrb.mxu2 %v4278_v14 }
0x1871   :  { %3705 = vmatpush.msra.mxu0 %v8452_v5 }
0x1872   :  { %3639 = vmatpush.msrb.mxu2 %v4279_v46 }
0x1873   :  { %3706 = vmatpush.msra.mxu0 %v8453_v10 }
0x1874   :  { %3640 = vmatpush.msrb.mxu2 %v4280_v59 }
0x1875   :  { %3707 = vmatpush.msra.mxu0 %v8454_v43 }
0x1876   :  { %3641 = vmatpush.msrb.mxu2 %v4281_v23 }
0x1877   :  { %3708 = vmatpush.msra.mxu0 %v8455_v28 }
0x1878   :  { %3642 = vmatpush.msrb.mxu2 %v4282_v30 }
0x1879   :  { %3709 = vmatpush.msra.mxu0 %v8456_v16 }
0x187a   :  { %3643 = vmatpush.msrb.mxu2 %v4283_v53 }
0x187b   :  { %3710 = vmatpush.msra.mxu0 %v8457_v45 }
0x187c   :  { %3644 = vmatpush.msrb.mxu2 %v4284_v0 }
0x187d   :  { %3711 = vmatpush.msra.mxu0 %v8458_v26 }
0x187e   :  { %3645 = vmatpush.msrb.mxu2 %v4285_v51 }
0x187f   :  { %3712 = vmatpush.msra.mxu0 %v8459_v47 }
0x1880   :  { %3646 = vmatpush.msrb.mxu2 %v4286_v58 }
0x1881   :  { %3713 = vmatpush.msra.mxu0 %v8460_v25 }
0x1882   :  { %3647 = vmatpush.msrb.mxu2 %v4287_v22 }
0x1883   :  { %3714 = vmatpush.msra.mxu0 %v8461_v56 }
0x1884   :  { %3648 = vmatpush.msrb.mxu2 %v4288_v63 }
0x1885   :  { %3715 = vmatpush.msra.mxu0 %v8462_v20 }
0x1886   :  { %3649 = vmatpush.msrb.mxu2 %v4289_v50 }
0x1887   :  { %3716 = vmatpush.msra.mxu0 %v8463_v8 }
0x1888   :  { %3650 = vmatpush.msrb.mxu2 %v4290_v13 }
0x1889   :  { %3717 = vmatpush.msra.mxu0 %v8464_v42 }
0x18c6   :  { %v3351_v4 = vpop.f32.mrf.mxu0 }
0x18c7   :  { %v3352_v15 = vadd.f32 %v3351_v4, %v8467_v39  ;;  %v3371_v62 = vpop.f32.mrf.mxu1 }
0x18c8   :  { %v3372_v10 = vadd.f32 %v3371_v62, %v6597_v55 }
0x18cc   :  { %v3331_v24 = vpop.f32.mrf.mxu2 }
0x18cd   :  { %v3332_v60 = vadd.f32 %v3331_v24, %v8466_v41 }
0x18cf   :  { %v3434_v27 = vadd.f32 %v3392_v35, %v3332_v60  ;;  %v3431_v6 = vpop.f32.mrf.mxu0  ;;  %v3526_v60 = vstv %s3525_s22 }
0x18d0   :  { %v3432_v21 = vadd.f32 %v3431_v6, %v6594_v12  ;;  %vm3527_vm7 = vcmp.eq.s32.totalorder %v3526_v60, 1 }
0x18d1   :  { %v3934_v31 = vmul.f32 -1.442695, %v3434_v27 }
0x18d3   :  { %4110 = vpow2.f32 %v3934_v31 }
0x18d4   :  { %v3411_v38 = vpop.f32.mrf.mxu2 }
0x18d5   :  { %v3412_v52 = vadd.f32 %v3411_v38, %v8468_v37  ;;  %v3938_v38 = vld [vmem:[%s7503_s1 + $0x30] sm:$0xff] }
0x18d7   :  { %v3454_v32 = vadd.f32 %v3412_v52, %v3352_v15 }
0x18d9   :  { %v4111_v7 = vpop.eup %4110  ;;  %v3935_v61 = vmul.f32 -1.442695, %v3454_v32 }
0x18da   :  { %v3438_v29 = vadd.f32 1.0, %v4111_v7 }
0x18db   :  { %4112 = vpow2.f32 %v3935_v61 }
0x18dc   :  { %4114 = vrcp.f32 %v3438_v29  ;;  %v3450_v11 = vand.u32 2147483648, %v3438_v29  ;;  %v3448_v19 = vand.u32 2147483647, %v3438_v29  ;;  %vm3444_vm14 = vweird.f32 %v3438_v29 }
0x18de   :  { %v3451_v48 = vor.u32 1.1754944e-38, %v3450_v11  ;;  %vm3449_vm1 = vcmp.eq.f32.partialorder %v3448_v19, 8.507059e+37 }
0x18e1   :  { %v4113_v54 = vpop.eup %4112 }
0x18e2   :  { %v4115_v18 = vpop.eup %4114  ;;  %v3458_v9 = vadd.f32 1.0, %v4113_v54 }
0x18e3   :  { %v3440_v49 = vmul.f32 %v4115_v18, %v3438_v29  ;;  %vm3445_vm10 = vweird.f32 %v4115_v18 }
0x18e4   :  { %4116 = vrcp.f32 %v3458_v9  ;;  %vm3446_vm15 = vmor %vm3444_vm14, %vm3445_vm10  ;;  %v3470_v23 = vand.u32 2147483648, %v3458_v9  ;;  %v3468_v16 = vand.u32 2147483647, %v3458_v9  ;;  %vm3464_vm2 = vweird.f32 %v3458_v9 }
0x18e5   :  { %v3441_v36 = vsub.f32 1.0, %v3440_v49 }
0x18e6   :  { %v3471_v45 = vor.u32 1.1754944e-38, %v3470_v23  ;;  %vm3469_vm4 = vcmp.eq.f32.partialorder %v3468_v16, 8.507059e+37 }
0x18e7   :  { %v3442_v2 = vmul.f32 %v4115_v18, %v3441_v36 }
0x18e9   :  { %v3443_v44 = vadd.f32 %v4115_v18, %v3442_v2 }
0x18ea   :  { %v4117_v57 = vpop.eup %4116 }
0x18eb   :  { %v3447_v14 = vsel %vm3446_vm15, %v4115_v18, %v3443_v44  ;;  %v3460_v5 = vmul.f32 %v4117_v57, %v3458_v9  ;;  %vm3465_vm12 = vweird.f32 %v4117_v57 }
0x18ec   :  { %v3452_v46 = vsel %vm3449_vm1, %v3451_v48, %v3447_v14  ;;  %vm3466_vm3 = vmor %vm3464_vm2, %vm3465_vm12 }
0x18ed   :  { %v3474_v59 = vmul.f32 %v3452_v46, %v3432_v21  ;;  %v3461_v43 = vsub.f32 1.0, %v3460_v5 }
0x18ef   :  { %v3475_v28 = vadd.f32 %v3474_v59, %v3372_v10  ;;  %v3462_v30 = vmul.f32 %v4117_v57, %v3461_v43 }
0x18f1   :  { %4118 = vtanh.f32 %v3475_v28  ;;  %v3463_v53 = vadd.f32 %v4117_v57, %v3462_v30 }
0x18f3   :  { %v3467_v0 = vsel %vm3466_vm3, %v4117_v57, %v3463_v53 }
0x18f4   :  { %v3472_v26 = vsel %vm3469_vm4, %v3471_v45, %v3467_v0 }
0x18f5   :  { %v3477_v51 = vsub.f32 1.0, %v3472_v26  ;;  %v3479_v25 = vmul.f32 %v3472_v26, %v7368_v1 }
0x18f7   :  { %v4119_v47 = vpop.eup %4118 }
0x18f8   :  { %v3478_v58 = vmul.f32 %v4119_v47, %v3477_v51 }
0x18fa   :  { %v7473_v22 = vadd.f32 %v3479_v25, %v3478_v58 }
0x18fc   :  { %3497 = vmatmul.f32.vlgmr.msrb.gmra.mxu1 %v7473_v22 }
0x1904   :  { %3611 = vmatmul.f32.vlgmr.msra.gmra.mxu1 %v7473_v22 }
0x1979   :  { %v3498_v56 = vpop.f32.mrf.mxu1 }
0x197a   :  { %v3499_v63 = vadd.f32 %v7233_v33, %v3498_v56 }
0x197c   :  { %3936 = vst [vmem:[%s7517_s15 + $0x28] sm:$0xff] %v3499_v63  ;;  %3503 = vmax.xlane.f32.xlu0 %v3499_v63 }
0x1981   :  { %v3612_v7 = vpop.f32.mrf.mxu1 }
0x1982   :  { %v3613_v29 = vadd.f32 %v3612_v7, %v8465_v40 }
0x19ef   :  { %v3504_v20 = vpop.xlane.xlu0 %3503 }
0x19f0   :  { %vm3505_vm5 = vcmp.eq.f32.partialorder %v3499_v63, %v3504_v20 }
0x19f1   :  { %v3506_v50 = vsel %vm3505_vm5, %v8043_v17, 128 }
0x19f2   :  { %v3508_v8 = vshra.s32 %v3506_v50, 16  ;;  %v3507_v13 = vand.u32 65535, %v3506_v50 }
0x19f4   :  { %v3510_v1 = vcvt.s32.f32 %v3508_v8  ;;  %v3509_v3 = vcvt.s32.f32 %v3507_v13 }
0x19f6   :  { %3511 = vmin.xlane.f32.xlu0 %v3510_v1 }
0x1a69   :  { %v3512_v42 = vpop.xlane.xlu0 %3511 }
0x1a6a   :  { %vm3513_vm6 = vcmp.eq.f32.partialorder %v3510_v1, %v3512_v42  ;;  %v3518_v35 = vcvt.f32.s32 %v3512_v42 }
0x1a6b   :  { %v3514_v24 = vsel %vm3513_vm6, %v3509_v3, inf }
0x1a6c   :  { %3515 = vmin.xlane.f32.xlu0 %v3514_v24  ;;  %v3519_v31 = vshll.u32 %v3518_v35, 16 }
0x1adf   :  { %v3516_v27 = vpop.xlane.xlu0 %3515 }
0x1ae0   :  { %v3517_v4 = vcvt.f32.s32 %v3516_v27 }
0x1ae2   :  { %v3520_v15 = vadd.s32 %v3519_v31, %v3517_v4 }
0x1ae4   :  { %v3528_v52 = vsel %vm3527_vm7, %v3938_v38, %v3520_v15 }
0x1ae5   :  { %3530 = vperm.xlu1 %3957, %v3528_v52  }
0x1b57   :  { %v3531_v32 = vpop.permute.xlu1 %3530 }
0x1b58   :  { %vm3532_vm11 = vcmp.eq.s32.totalorder %v3531_v32, %v8043_v17 }
0x1b59   :  { %3940 = vmatmul.msk.f32.vlgmr.msrb.gmra.mxu3 %vm3532_vm11, %v8044_v34  ;;  %3941 = vmatmul.msk.f32.vlgmr.msra.gmra.mxu2 %vm3532_vm11, %v8044_v34 }
0x1b5a   :  { %3942 = vmatmul.msk.f32.vlgmr.msrb.gmra.mxu0 %vm3532_vm11, %v8044_v34 }
0x1b61   :  { %3631 = vmatmul.f32.vlgmr.msra.gmra.mxu3 %v7473_v22  ;;  %3651 = vmatmul.f32.vlgmr.msrb.gmra.mxu2 %v7473_v22 }
0x1bd7   :  { %v3592_v46 = vpop.f32.mrf.mxu0 }
0x1bd8   :  { %v3593_v30 = vadd.f32 %v3592_v46, %v6597_v55 }
0x1bdc   :  { %v3552_v61 = vpop.f32.mrf.mxu3  ;;  %v3572_v49 = vpop.f32.mrf.mxu2 }
0x1bdd   :  { %v3553_v54 = vadd.f32 %v3552_v61, %v8466_v41  ;;  %v3573_v36 = vadd.f32 %v3572_v49, %v8467_v39 }
0x1bdf   :  { %v3655_v18 = vadd.f32 %v3613_v29, %v3553_v54 }
0x1be1   :  { %v3943_v9 = vmul.f32 -1.442695, %v3655_v18 }
0x1be3   :  { %4120 = vpow2.f32 %v3943_v9 }
0x1be4   :  { %v3632_v17 = vpop.f32.mrf.mxu3  ;;  %v3652_v5 = vpop.f32.mrf.mxu2 }
0x1be5   :  { %v3633_v11 = vadd.f32 %v3632_v17, %v8468_v37  ;;  %v3653_v43 = vadd.f32 %v3652_v5, %v6594_v12 }
0x1be7   :  { %v3675_v34 = vadd.f32 %v3633_v11, %v3573_v36 }
0x1be9   :  { %v4121_v2 = vpop.eup %4120  ;;  %v3944_v19 = vmul.f32 -1.442695, %v3675_v34 }
0x1bea   :  { %v3659_v6 = vadd.f32 1.0, %v4121_v2 }
0x1beb   :  { %4122 = vpow2.f32 %v3944_v19 }
0x1bec   :  { %4124 = vrcp.f32 %v3659_v6  ;;  %v3671_v48 = vand.u32 2147483648, %v3659_v6  ;;  %v3669_v14 = vand.u32 2147483647, %v3659_v6  ;;  %vm3665_vm13 = vweird.f32 %v3659_v6 }
0x1bee   :  { %v3672_v10 = vor.u32 1.1754944e-38, %v3671_v48  ;;  %vm3670_vm9 = vcmp.eq.f32.partialorder %v3669_v14, 8.507059e+37 }
0x1bf1   :  { %v4123_v44 = vpop.eup %4122 }
0x1bf2   :  { %v4125_v57 = vpop.eup %4124  ;;  %v3679_v40 = vadd.f32 1.0, %v4123_v44 }
0x1bf3   :  { %v3661_v62 = vmul.f32 %v4125_v57, %v3659_v6  ;;  %vm3666_vm0 = vweird.f32 %v4125_v57 }
0x1bf4   :  { %4126 = vrcp.f32 %v3679_v40  ;;  %vm3667_vm8 = vmor %vm3665_vm13, %vm3666_vm0  ;;  %v3691_v45 = vand.u32 2147483648, %v3679_v40  ;;  %v3689_v26 = vand.u32 2147483647, %v3679_v40  ;;  %vm3685_vm14 = vweird.f32 %v3679_v40 }
0x1bf5   :  { %v3662_v41 = vsub.f32 1.0, %v3661_v62 }
0x1bf6   :  { %v3692_v58 = vor.u32 1.1754944e-38, %v3691_v45  ;;  %vm3690_vm1 = vcmp.eq.f32.partialorder %v3689_v26, 8.507059e+37 }
0x1bf7   :  { %v3663_v21 = vmul.f32 %v4125_v57, %v3662_v41 }
0x1bf9   :  { %v3664_v39 = vadd.f32 %v4125_v57, %v3663_v21 }
0x1bfa   :  { %v4127_v37 = vpop.eup %4126 }
0x1bfb   :  { %v3681_v59 = vmul.f32 %v4127_v37, %v3679_v40  ;;  %v3668_v23 = vsel %vm3667_vm8, %v4125_v57, %v3664_v39  ;;  %vm3686_vm10 = vweird.f32 %v4127_v37 }
0x1bfc   :  { %v3673_v28 = vsel %vm3670_vm9, %v3672_v10, %v3668_v23  ;;  %vm3687_vm15 = vmor %vm3685_vm14, %vm3686_vm10 }
0x1bfd   :  { %v3682_v16 = vsub.f32 1.0, %v3681_v59  ;;  %v3695_v53 = vmul.f32 %v3673_v28, %v3653_v43 }
0x1bff   :  { %v3683_v0 = vmul.f32 %v4127_v37, %v3682_v16  ;;  %v3696_v51 = vadd.f32 %v3695_v53, %v3593_v30 }
0x1c01   :  { %v3684_v47 = vadd.f32 %v4127_v37, %v3683_v0  ;;  %4128 = vtanh.f32 %v3696_v51 }
0x1c03   :  { %v3688_v25 = vsel %vm3687_vm15, %v4127_v37, %v3684_v47 }
0x1c04   :  { %v3693_v12 = vsel %vm3690_vm1, %v3692_v58, %v3688_v25 }
0x1c05   :  { %v3698_v56 = vsub.f32 1.0, %v3693_v12  ;;  %v3700_v55 = vmul.f32 %v3693_v12, %v7473_v22 }
0x1c07   :  { %v4129_v63 = vpop.eup %4128 }
0x1c08   :  { %v3699_v20 = vmul.f32 %v4129_v63, %v3698_v56 }
0x1c0a   :  { %v3701_v50 = vadd.f32 %v3700_v55, %v3699_v20 }
0x1c0c   :  { %3718 = vmatmul.f32.vlgmr.msra.gmra.mxu0 %v3701_v50 }
0x1c89   :  { %v3719_v8 = vpop.f32.mrf.mxu0 }
0x1c8a   :  { %v3720_v1 = vadd.f32 %v7233_v33, %v3719_v8 }
0x1c8c   :  { %3945 = vst [vmem:[%s7517_s15 + $0x30] sm:$0xff] %v3720_v1 }
0x1c8d   :  { %3728 = vsyncpa [#allocation4], 1 }
0x1c8e   :  { %3729 = vsyncpa [#allocation8], 1 }
0x1c8f   :  { %3730 = vsyncpa [#allocation5], 1 }

</bundles_post_ra>
